<compile_context>
chip_gen: v7x
topology: tpu7x:2x2x1
jax: 0.10.0
libtpu: 0.0.40
codegen_flags: <defaults>
</compile_context>

<pallas_src>
import functools

import jax
import jax.numpy as jnp
from jax.experimental import pallas as pl
from jax.experimental.pallas import tpu as pltpu


def _round_up(x, m):
    return (x + m - 1) // m * m


def _pick_tile(n_pad, target):
    """Largest multiple of 128 <= target that divides n_pad (n_pad % 128 == 0)."""
    t = min(target, n_pad)
    while n_pad % t:
        t -= 128
    return t


def _appnp_link_kernel(x0_ref, a_ref, w1_ref, b1_ref, w2_ref, b2_ref,
                       o_ref, z_buf, acc_ref, *, tm, tk, n_pad, alpha,
                       a_is_resident, epi_chunk):
    k = pl.program_id(0)          # propagation step            (outermost)
    i = pl.program_id(1)          # output-row tile
    j = pl.program_id(2)          # reduction (column) tile     (innermost)
    nj = pl.num_programs(2)
    last_k = pl.num_programs(0) - 1

    # One-time init: z^0 = x lives in slot 0 of the ping-pong scratch.
    @pl.when((k == 0) & (i == 0) & (j == 0))
    def _():
        z_buf[pl.ds(0, n_pad), :] = x0_ref[...]

    cur = jax.lax.rem(k, 2)       # slot holding z^k
    nxt = 1 - cur                 # slot receiving z^{k+1}
    row0 = pl.multiple_of(i * tm, tm)

    # Start of a row sweep: seed the accumulator with the teleport term
    # alpha * x, computed from the bf16 resident x (no separate f32 resident).
    @pl.when(j == 0)
    def _():
        acc_ref[...] = (jnp.float32(alpha)
                        * x0_ref[pl.ds(row0, tm), :].astype(jnp.float32))

    # acc += ((1 - alpha) * A_hat)[i, j] @ z^k[j]   (bf16 x bf16 -> f32 MXU)
    if a_is_resident:
        col0 = pl.multiple_of(j * tk, tk)
        a_tile = a_ref[pl.ds(row0, tm), pl.ds(col0, tk)]
    else:
        a_tile = a_ref[...]
    zcol0 = pl.multiple_of(cur * n_pad + j * tk, tk)
    z_j = z_buf[pl.ds(zcol0, tk), :]
    acc_ref[...] += jnp.dot(a_tile, z_j, preferred_element_type=jnp.float32)

    # End of a row sweep (not the last step): commit z^{k+1}[i].
    # The commit of z^K would be a dead write, so it is skipped.
    @pl.when((j == nj - 1) & (k != last_k))
    def _():
        zrow0 = pl.multiple_of(nxt * n_pad + i * tm, tm)
        z_buf[pl.ds(zrow0, tm), :] = acc_ref[...].astype(jnp.bfloat16)

    # Last propagation step: relu + lin1 + (dropout = identity, eval) + lin2.
    # Chunked over epi_chunk rows to bound vreg pressure when tm is large.
    @pl.when((k == last_k) & (j == nj - 1))
    def _():
        def chunk(c, carry):
            r0 = pl.multiple_of(c * epi_chunk, epi_chunk)
            h = jnp.maximum(acc_ref[pl.ds(r0, epi_chunk), :], 0.0)
            h = jnp.dot(h.astype(jnp.bfloat16), w1_ref[...],
                        preferred_element_type=jnp.float32) + b1_ref[...]
            # F.dropout is identity in eval mode.
            h = jnp.dot(h.astype(jnp.bfloat16), w2_ref[...],
                        preferred_element_type=jnp.float32) + b2_ref[...]
            o_ref[pl.ds(r0, epi_chunk), :] = h.astype(o_ref.dtype)
            return carry
        jax.lax.fori_loop(0, tm // epi_chunk, chunk, 0, unroll=True)
    # Note: for k < last_k the output block may be flushed with garbage before
    # being overwritten at k == last_k (minor extra writeback; final result ok).


def appnp_net_link_forward(x, edge_index, w1, b1, w2, b2, *, K=2, alpha=0.5,
                           edge_weight=None, force_stream_a=False):
    """x: (N, Cin) f32, edge_index: (2, E) int32, w1: (Cin, Cmid), w2: (Cmid, Cout)."""
    assert K >= 1, "APPNP propagation requires K >= 1"
    N, cin = x.shape
    cmid = w1.shape[1]
    cout = w2.shape[1]

    # ---- glue: gcn_norm (self loops + symmetric normalization) -> dense ----
    # TODO(synk): dense (N, N) A_hat is O(N^2); large graphs need CSR/segment
    # propagation, and A_hat should be built once (bf16) and cached across calls.
    if edge_weight is None:
        edge_weight = jnp.ones((edge_index.shape[1],), jnp.float32)
    edge_weight = edge_weight.astype(jnp.float32)
    self_loops = jnp.arange(N, dtype=edge_index.dtype)
    row = jnp.concatenate([edge_index[0], self_loops])
    col = jnp.concatenate([edge_index[1], self_loops])
    w = jnp.concatenate([edge_weight, jnp.ones((N,), jnp.float32)])
    deg = jnp.zeros((N,), jnp.float32).at[col].add(w)
    dinv = jnp.where(deg > 0, jax.lax.rsqrt(jnp.maximum(deg, 1e-12)), 0.0)
    # Fold the (1 - alpha) propagation weight into A_hat (saves a VPU mul / step).
    norm = (1.0 - float(alpha)) * dinv[row] * w * dinv[col]

    # ---- padded / tiled geometry (lane-dense channels, 512-quantum nodes) ----
    LANE = 128
    cin_p = _round_up(cin, LANE)
    cmid_p = _round_up(cmid, LANE)
    cout_p = _round_up(cout, LANE)
    n_pad = _round_up(N, 512)          # guarantees tm up to 512 and tk >= 512

    # message passing aggregates at target (col): out[i] = sum_j A[i, j] x[j]
    a_hat = (jnp.zeros((n_pad, n_pad), jnp.float32).at[col, row].add(norm)
             .astype(jnp.bfloat16))
    # TODO(synk): int8 (v5e/v6e) / fp8 (v7x) A_hat with per-row scales would
    # halve the dominant HBM stream when A_hat cannot stay VMEM-resident.

    x0_pad = jnp.zeros((n_pad, cin_p), jnp.bfloat16).at[:N, :cin].set(
        x.astype(jnp.bfloat16))
    w1_p = jnp.zeros((cin_p, cmid_p), jnp.bfloat16).at[:cin, :cmid].set(
        w1.astype(jnp.bfloat16))
    b1_p = jnp.zeros((1, cmid_p), jnp.float32).at[0, :cmid].set(b1)
    w2_p = jnp.zeros((cmid_p, cout_p), jnp.bfloat16).at[:cmid, :cout].set(
        w2.astype(jnp.bfloat16))
    b2_p = jnp.zeros((1, cout_p), jnp.float32).at[0, :cout].set(b2)

    # ---- VMEM budget (chip-aware) and A_hat residency decision ----
    vmem_cap = 64 * 1024 * 1024                   # assume smallest (v7x per-TC)
    try:
        vmem_cap = int(pltpu.get_tpu_info().vmem_capacity_bytes)
    except Exception:
        pass
    vmem_limit = min(int(vmem_cap * 0.84), 112 * 1024 * 1024)

    tm = _pick_tile(n_pad, 512)
    tk = _pick_tile(n_pad, 2048)
    epi_chunk = 256 if tm % 256 == 0 else 128

    a_bytes = n_pad * n_pad * 2
    fixed_bytes = (3 * n_pad * cin_p * 2                      # x0 + z ping-pong
                   + tm * cin_p * 4                           # f32 accumulator
                   + 2 * tm * cout_p * 4                      # output buffers
                   + 2 * (cin_p * cmid_p + cmid_p * cout_p)   # bf16 weights
                   + 4 * (cmid_p + cout_p))                   # biases
    a_resident = (not force_stream_a) and (a_bytes + fixed_bytes <= vmem_limit // 2)

    grid = (K, n_pad // tm, n_pad // tk)
    kernel = functools.partial(
        _appnp_link_kernel, tm=tm, tk=tk, n_pad=n_pad, alpha=float(alpha),
        a_is_resident=a_resident, epi_chunk=epi_chunk)

    flops = (2 * K * n_pad * n_pad * cin_p
             + 2 * n_pad * cin_p * cmid_p
             + 2 * n_pad * cmid_p * cout_p)
    a_reads = 1 if a_resident else K
    bytes_accessed = (a_reads * a_bytes                       # A_hat stream
                      + n_pad * cin_p * 2                     # x (bf16)
                      + 2 * (cin_p * cmid_p + cmid_p * cout_p)
                      + 4 * (cmid_p + cout_p)
                      + n_pad * cout_p * 4)                   # output

    def build_and_run(single_buffer_invariants):
        def inv_spec(shape):
            if single_buffer_invariants:
                return pl.BlockSpec(shape, lambda k_, i_, j_: (0, 0),
                                    pipeline_mode=pl.Buffered(1))
            return pl.BlockSpec(shape, lambda k_, i_, j_: (0, 0))

        if a_resident:
            # Whole A_hat resident in VMEM across all K steps (fetched once).
            a_spec = inv_spec((n_pad, n_pad))
        else:
            # Large bf16 tiles streamed from HBM (re-read once per k).
            a_spec = pl.BlockSpec((tm, tk), lambda k_, i_, j_: (i_, j_))

        return pl.pallas_call(
            kernel,
            out_shape=jax.ShapeDtypeStruct((n_pad, cout_p), jnp.float32),
            grid_spec=pltpu.PrefetchScalarGridSpec(
                num_scalar_prefetch=0,
                grid=grid,
                in_specs=[
                    inv_spec((n_pad, cin_p)),    # x (bf16): z^0 seed + teleport
                    a_spec,                      # A_hat (resident or streamed)
                    inv_spec((cin_p, cmid_p)),   # W1 (bf16)
                    inv_spec((1, cmid_p)),       # b1
                    inv_spec((cmid_p, cout_p)),  # W2 (bf16)
                    inv_spec((1, cout_p)),       # b2
                ],
                out_specs=pl.BlockSpec((tm, cout_p), lambda k_, i_, j_: (i_, 0)),
                scratch_shapes=[
                    pltpu.VMEM((2 * n_pad, cin_p), jnp.bfloat16),  # z ping-pong
                    pltpu.VMEM((tm, cin_p), jnp.float32),          # row accumulator
                ],
            ),
            compiler_params=pltpu.CompilerParams(
                # All "arbitrary": z^{k+1} depends on every row of z^k held in
                # per-core VMEM scratch, so no grid axis may be split across cores.
                # TODO(synk): v7x dual-TC via core_map + cross-core z exchange.
                dimension_semantics=("arbitrary", "arbitrary", "arbitrary"),
                vmem_limit_bytes=vmem_limit,
            ),
            cost_estimate=pl.CostEstimate(
                flops=flops, transcendentals=0, bytes_accessed=bytes_accessed),
        )(x0_pad, a_hat, w1_p, b1_p, w2_p, b2_p)

    try:
        out_pad = build_and_run(True)
    except Exception:
        # pl.Buffered(1) single-buffering is an optional optimization; fall
        # back to default double-buffered invariant inputs if unsupported.
        out_pad = build_and_run(False)

    return out_pad[:N, :cout]


def _reference(x, edge_index, w1, b1, w2, b2, *, K=2, alpha=0.5):
    N = x.shape[0]
    self_loops = jnp.arange(N, dtype=edge_index.dtype)
    row = jnp.concatenate([edge_index[0], self_loops])
    col = jnp.concatenate([edge_index[1], self_loops])
    w = jnp.ones((row.shape[0],), jnp.float32)
    deg = jnp.zeros((N,), jnp.float32).at[col].add(w)
    dinv = jnp.where(deg > 0, 1.0 / jnp.sqrt(deg), 0.0)
    norm = dinv[row] * w * dinv[col]
    a_hat = jnp.zeros((N, N), jnp.float32).at[col, row].add(norm)
    z = x
    for _ in range(K):
        z = (1 - alpha) * (a_hat @ z) + alpha * x
    z = jnp.maximum(z, 0.0)
    z = z @ w1 + b1
    z = z @ w2 + b2
    return z


if __name__ == "__main__":
    key = jax.random.PRNGKey(0)
    N = 16              # number of graph nodes
    in_channels = 8
    out_channels = 32
    K, alpha = 2, 0.5

    k_x, k_w1, k_b1, k_w2, k_b2 = jax.random.split(key, 5)

    x = jax.random.normal(k_x, (N, in_channels), jnp.float32)

    # deterministic synthetic graph: bidirectional ring
    src = jnp.arange(N, dtype=jnp.int32)
    dst = (src + 1) % N
    edge_index = jnp.concatenate(
        [jnp.stack([src, dst]), jnp.stack([dst, src])], axis=1)  # (2, 2N)

    # deterministic Linear params (uniform, roughly PyTorch-style scale)
    lim1 = 1.0 / (in_channels ** 0.5)
    lim2 = 1.0 / (out_channels ** 0.5)
    w1 = jax.random.uniform(k_w1, (in_channels, out_channels), jnp.float32,
                            -lim1, lim1)
    b1 = jax.random.uniform(k_b1, (out_channels,), jnp.float32, -lim1, lim1)
    w2 = jax.random.uniform(k_w2, (out_channels, out_channels), jnp.float32,
                            -lim2, lim2)
    b2 = jax.random.uniform(k_b2, (out_channels,), jnp.float32, -lim2, lim2)

    ref = _reference(x, edge_index, w1, b1, w2, b2, K=K, alpha=alpha)

    # Path 1 (auto): A_hat VMEM-resident across the K propagation steps.
    out = jax.block_until_ready(
        appnp_net_link_forward(x, edge_index, w1, b1, w2, b2, K=K, alpha=alpha))
    assert out.shape == (N, out_channels)
    # Propagation + epilogue run with bf16 operands (f32 MXU accumulation), so
    # use a slightly looser tolerance than the pure-f32 reference.
    assert jnp.allclose(out, ref, atol=5e-2, rtol=5e-2)

    # Path 2 (forced): HBM-streamed A_hat tiling (the large-graph code path).
    out_s = jax.block_until_ready(
        appnp_net_link_forward(x, edge_index, w1, b1, w2, b2, K=K, alpha=alpha,
                               force_stream_a=True))
    assert jnp.allclose(out_s, ref, atol=5e-2, rtol=5e-2)

    print("KERNEL_OK")
</pallas_src>

<mosaic_0001>
module attributes {stable_mosaic.version = 11 : i64} {
  func.func @_appnp_link_kernel(%arg0: i32, %arg1: i32, %arg2: i32, %arg3: memref<512x128xbf16, #tpu.memory_space<vmem>>, %arg4: memref<512x512xbf16, #tpu.memory_space<vmem>>, %arg5: memref<128x128xbf16, #tpu.memory_space<vmem>>, %arg6: memref<1x128xf32, #tpu.memory_space<vmem>>, %arg7: memref<128x128xbf16, #tpu.memory_space<vmem>>, %arg8: memref<1x128xf32, #tpu.memory_space<vmem>>, %arg9: memref<512x128xf32, #tpu.memory_space<vmem>>, %arg10: memref<1024x128xbf16, #tpu.memory_space<vmem>>, %arg11: memref<512x128xf32, #tpu.memory_space<vmem>>) attributes {dimension_semantics = [#tpu.dimension_semantics<arbitrary>, #tpu.dimension_semantics<arbitrary>, #tpu.dimension_semantics<arbitrary>], iteration_bounds = array<i64: 2, 1, 1>, scalar_prefetch = 0 : i64, scratch_operands = 2 : i64, tpu.core_type = #tpu.core_type<tc>, window_params = [{pipeline_mode = #tpu.pipeline_mode<synchronous>, transform_indices = @transform_0, window_bounds = array<i64: 512, 128>}, {pipeline_mode = #tpu.pipeline_mode<synchronous>, transform_indices = @transform_1, window_bounds = array<i64: 512, 512>}, {pipeline_mode = #tpu.pipeline_mode<synchronous>, transform_indices = @transform_2, window_bounds = array<i64: 128, 128>}, {pipeline_mode = #tpu.pipeline_mode<synchronous>, transform_indices = @transform_3, window_bounds = array<i64: 1, 128>}, {pipeline_mode = #tpu.pipeline_mode<synchronous>, transform_indices = @transform_4, window_bounds = array<i64: 128, 128>}, {pipeline_mode = #tpu.pipeline_mode<synchronous>, transform_indices = @transform_5, window_bounds = array<i64: 1, 128>}, {transform_indices = @transform_6, window_bounds = array<i64: 512, 128>}]} {
    %c0_i32 = arith.constant 0 : i32
    %0 = arith.cmpi eq, %arg0, %c0_i32 : i32
    %c0_i32_0 = arith.constant 0 : i32
    %1 = arith.cmpi eq, %arg1, %c0_i32_0 : i32
    %2 = arith.andi %0, %1 : i1
    %c0_i32_1 = arith.constant 0 : i32
    %3 = arith.cmpi eq, %arg2, %c0_i32_1 : i32
    %4 = arith.andi %2, %3 : i1
    %5 = arith.extui %4 : i1 to i32
    %c0_i32_2 = arith.constant 0 : i32
    %6 = arith.cmpi ne, %5, %c0_i32_2 : i32
    scf.if %6 {
      %c0_18 = arith.constant 0 : index
      %c0_19 = arith.constant 0 : index
      %39 = vector.load %arg3[%c0_18, %c0_19] : memref<512x128xbf16, #tpu.memory_space<vmem>>, vector<512x128xbf16>
      %c0_20 = arith.constant 0 : index
      %c0_21 = arith.constant 0 : index
      %40 = vector.load %arg10[%c0_20, %c0_21] : memref<1024x128xbf16, #tpu.memory_space<vmem>>, vector<512x128xbf16>
      tpu.vector_store %arg10[%c0_20, %c0_21], %39 {strides = array<i32>} : memref<1024x128xbf16, #tpu.memory_space<vmem>>, vector<512x128xbf16>,
    } else {
    }
    %c2_i32 = arith.constant 2 : i32
    %7 = arith.remsi %arg0, %c2_i32 : i32
    %c1_i32 = arith.constant 1 : i32
    %8 = arith.subi %c1_i32, %7 : i32
    %c512_i32 = arith.constant 512 : i32
    %9 = arith.muli %arg1, %c512_i32 : i32
    %10 = tpu.assume_multiple %9, 512 : i32
    %c0_i32_3 = arith.constant 0 : i32
    %11 = arith.cmpi eq, %arg2, %c0_i32_3 : i32
    %12 = arith.extui %11 : i1 to i32
    %c0_i32_4 = arith.constant 0 : i32
    %13 = arith.cmpi ne, %12, %c0_i32_4 : i32
    scf.if %13 {
      %39 = arith.index_cast %10 : i32 to index
      %c0_18 = arith.constant 0 : index
      %40 = vector.load %arg3[%39, %c0_18] : memref<512x128xbf16, #tpu.memory_space<vmem>>, vector<512x128xbf16>
      %41 = arith.extf %40 : vector<512x128xbf16> to vector<512x128xf32>
      %cst_19 = arith.constant 5.000000e-01 : f32
      %42 = vector.broadcast %cst_19 : f32 to vector<512x128xf32>
      %43 = arith.mulf %42, %41 : vector<512x128xf32>
      %c0_20 = arith.constant 0 : index
      %c0_21 = arith.constant 0 : index
      %44 = vector.load %arg11[%c0_20, %c0_21] : memref<512x128xf32, #tpu.memory_space<vmem>>, vector<512x128xf32>
      tpu.vector_store %arg11[%c0_20, %c0_21], %43 {strides = array<i32>} : memref<512x128xf32, #tpu.memory_space<vmem>>, vector<512x128xf32>,
    } else {
    }
    %c512_i32_5 = arith.constant 512 : i32
    %14 = arith.muli %arg2, %c512_i32_5 : i32
    %15 = tpu.assume_multiple %14, 512 : i32
    %16 = arith.index_cast %10 : i32 to index
    %17 = arith.index_cast %15 : i32 to index
    %18 = vector.load %arg4[%16, %17] : memref<512x512xbf16, #tpu.memory_space<vmem>>, vector<512x512xbf16>
    %c512_i32_6 = arith.constant 512 : i32
    %19 = arith.muli %7, %c512_i32_6 : i32
    %c512_i32_7 = arith.constant 512 : i32
    %20 = arith.muli %arg2, %c512_i32_7 : i32
    %21 = arith.addi %19, %20 : i32
    %22 = tpu.assume_multiple %21, 512 : i32
    %23 = arith.index_cast %22 : i32 to index
    %c0 = arith.constant 0 : index
    %24 = vector.load %arg10[%23, %c0] : memref<1024x128xbf16, #tpu.memory_space<vmem>>, vector<512x128xbf16>
    %c0_8 = arith.constant 0 : index
    %c0_9 = arith.constant 0 : index
    %25 = vector.load %arg11[%c0_8, %c0_9] : memref<512x128xf32, #tpu.memory_space<vmem>>, vector<512x128xf32>
    %cst = arith.constant dense<0.000000e+00> : vector<512x128xf32>
    %26 = tpu.matmul %18, %24, %cst {dimension_numbers = #tpu.dot_dimension_numbers<[1], [0], [0], [1], [0, 0, 1, 1], [], []>} : vector<512x512xbf16>, vector<512x128xbf16>, vector<512x128xf32> -> vector<512x128xf32>
    %27 = arith.addf %25, %26 : vector<512x128xf32>
    %c0_10 = arith.constant 0 : index
    %c0_11 = arith.constant 0 : index
    %28 = vector.load %arg11[%c0_10, %c0_11] : memref<512x128xf32, #tpu.memory_space<vmem>>, vector<512x128xf32>
    tpu.vector_store %arg11[%c0_10, %c0_11], %27 {strides = array<i32>} : memref<512x128xf32, #tpu.memory_space<vmem>>, vector<512x128xf32>,
    %c0_i32_12 = arith.constant 0 : i32
    %29 = arith.cmpi eq, %arg2, %c0_i32_12 : i32
    %c1_i32_13 = arith.constant 1 : i32
    %30 = arith.cmpi ne, %arg0, %c1_i32_13 : i32
    %31 = arith.andi %29, %30 : i1
    %32 = arith.extui %31 : i1 to i32
    %c0_i32_14 = arith.constant 0 : i32
    %33 = arith.cmpi ne, %32, %c0_i32_14 : i32
    scf.if %33 {
      %c512_i32_18 = arith.constant 512 : i32
      %39 = arith.muli %8, %c512_i32_18 : i32
      %c512_i32_19 = arith.constant 512 : i32
      %40 = arith.muli %arg1, %c512_i32_19 : i32
      %41 = arith.addi %39, %40 : i32
      %42 = tpu.assume_multiple %41, 512 : i32
      %c0_20 = arith.constant 0 : index
      %c0_21 = arith.constant 0 : index
      %43 = vector.load %arg11[%c0_20, %c0_21] : memref<512x128xf32, #tpu.memory_space<vmem>>, vector<512x128xf32>
      %44 = arith.truncf %43 : vector<512x128xf32> to vector<512x128xbf16>
      %45 = arith.index_cast %42 : i32 to index
      %c0_22 = arith.constant 0 : index
      %46 = vector.load %arg10[%45, %c0_22] : memref<1024x128xbf16, #tpu.memory_space<vmem>>, vector<512x128xbf16>
      tpu.vector_store %arg10[%45, %c0_22], %44 {strides = array<i32>} : memref<1024x128xbf16, #tpu.memory_space<vmem>>, vector<512x128xbf16>,
    } else {
    }
    %c1_i32_15 = arith.constant 1 : i32
    %34 = arith.cmpi eq, %arg0, %c1_i32_15 : i32
    %c0_i32_16 = arith.constant 0 : i32
    %35 = arith.cmpi eq, %arg2, %c0_i32_16 : i32
    %36 = arith.andi %34, %35 : i1
    %37 = arith.extui %36 : i1 to i32
    %c0_i32_17 = arith.constant 0 : i32
    %38 = arith.cmpi ne, %37, %c0_i32_17 : i32
    scf.if %38 {
      %c0_i32_18 = arith.constant 0 : i32
      %c256_i32 = arith.constant 256 : i32
      %39 = arith.muli %c0_i32_18, %c256_i32 : i32
      %40 = tpu.assume_multiple %39, 256 : i32
      %41 = arith.index_cast %40 : i32 to index
      %c0_19 = arith.constant 0 : index
      %42 = vector.load %arg11[%41, %c0_19] : memref<512x128xf32, #tpu.memory_space<vmem>>, vector<256x128xf32>
      %cst_20 = arith.constant 0.000000e+00 : f32
      %43 = vector.broadcast %cst_20 : f32 to vector<256x128xf32>
      %44 = arith.maximumf %42, %43 : vector<256x128xf32>
      %45 = arith.truncf %44 : vector<256x128xf32> to vector<256x128xbf16>
      %c0_21 = arith.constant 0 : index
      %c0_22 = arith.constant 0 : index
      %46 = vector.load %arg5[%c0_21, %c0_22] : memref<128x128xbf16, #tpu.memory_space<vmem>>, vector<128x128xbf16>
      %cst_23 = arith.constant dense<0.000000e+00> : vector<256x128xf32>
      %47 = tpu.matmul %45, %46, %cst_23 {dimension_numbers = #tpu.dot_dimension_numbers<[1], [0], [0], [1], [0, 0, 1, 1], [], []>} : vector<256x128xbf16>, vector<128x128xbf16>, vector<256x128xf32> -> vector<256x128xf32>
      %c0_24 = arith.constant 0 : index
      %c0_25 = arith.constant 0 : index
      %48 = vector.load %arg6[%c0_24, %c0_25] : memref<1x128xf32, #tpu.memory_space<vmem>>, vector<1x128xf32>
      %49 = vector.broadcast %48 : vector<1x128xf32> to vector<256x128xf32>
      %50 = arith.addf %47, %49 : vector<256x128xf32>
      %51 = arith.truncf %50 : vector<256x128xf32> to vector<256x128xbf16>
      %c0_26 = arith.constant 0 : index
      %c0_27 = arith.constant 0 : index
      %52 = vector.load %arg7[%c0_26, %c0_27] : memref<128x128xbf16, #tpu.memory_space<vmem>>, vector<128x128xbf16>
      %cst_28 = arith.constant dense<0.000000e+00> : vector<256x128xf32>
      %53 = tpu.matmul %51, %52, %cst_28 {dimension_numbers = #tpu.dot_dimension_numbers<[1], [0], [0], [1], [0, 0, 1, 1], [], []>} : vector<256x128xbf16>, vector<128x128xbf16>, vector<256x128xf32> -> vector<256x128xf32>
      %c0_29 = arith.constant 0 : index
      %c0_30 = arith.constant 0 : index
      %54 = vector.load %arg8[%c0_29, %c0_30] : memref<1x128xf32, #tpu.memory_space<vmem>>, vector<1x128xf32>
      %55 = vector.broadcast %54 : vector<1x128xf32> to vector<256x128xf32>
      %56 = arith.addf %53, %55 : vector<256x128xf32>
      %57 = arith.index_cast %40 : i32 to index
      %c0_31 = arith.constant 0 : index
      %58 = vector.load %arg9[%57, %c0_31] : memref<512x128xf32, #tpu.memory_space<vmem>>, vector<256x128xf32>
      tpu.vector_store %arg9[%57, %c0_31], %56 {strides = array<i32>} : memref<512x128xf32, #tpu.memory_space<vmem>>, vector<256x128xf32>,
      %c1_i32_32 = arith.constant 1 : i32
      %c256_i32_33 = arith.constant 256 : i32
      %59 = arith.muli %c1_i32_32, %c256_i32_33 : i32
      %60 = tpu.assume_multiple %59, 256 : i32
      %61 = arith.index_cast %60 : i32 to index
      %c0_34 = arith.constant 0 : index
      %62 = vector.load %arg11[%61, %c0_34] : memref<512x128xf32, #tpu.memory_space<vmem>>, vector<256x128xf32>
      %cst_35 = arith.constant 0.000000e+00 : f32
      %63 = vector.broadcast %cst_35 : f32 to vector<256x128xf32>
      %64 = arith.maximumf %62, %63 : vector<256x128xf32>
      %65 = arith.truncf %64 : vector<256x128xf32> to vector<256x128xbf16>
      %c0_36 = arith.constant 0 : index
      %c0_37 = arith.constant 0 : index
      %66 = vector.load %arg5[%c0_36, %c0_37] : memref<128x128xbf16, #tpu.memory_space<vmem>>, vector<128x128xbf16>
      %cst_38 = arith.constant dense<0.000000e+00> : vector<256x128xf32>
      %67 = tpu.matmul %65, %66, %cst_38 {dimension_numbers = #tpu.dot_dimension_numbers<[1], [0], [0], [1], [0, 0, 1, 1], [], []>} : vector<256x128xbf16>, vector<128x128xbf16>, vector<256x128xf32> -> vector<256x128xf32>
      %c0_39 = arith.constant 0 : index
      %c0_40 = arith.constant 0 : index
      %68 = vector.load %arg6[%c0_39, %c0_40] : memref<1x128xf32, #tpu.memory_space<vmem>>, vector<1x128xf32>
      %69 = vector.broadcast %68 : vector<1x128xf32> to vector<256x128xf32>
      %70 = arith.addf %67, %69 : vector<256x128xf32>
      %71 = arith.truncf %70 : vector<256x128xf32> to vector<256x128xbf16>
      %c0_41 = arith.constant 0 : index
      %c0_42 = arith.constant 0 : index
      %72 = vector.load %arg7[%c0_41, %c0_42] : memref<128x128xbf16, #tpu.memory_space<vmem>>, vector<128x128xbf16>
      %cst_43 = arith.constant dense<0.000000e+00> : vector<256x128xf32>
      %73 = tpu.matmul %71, %72, %cst_43 {dimension_numbers = #tpu.dot_dimension_numbers<[1], [0], [0], [1], [0, 0, 1, 1], [], []>} : vector<256x128xbf16>, vector<128x128xbf16>, vector<256x128xf32> -> vector<256x128xf32>
      %c0_44 = arith.constant 0 : index
      %c0_45 = arith.constant 0 : index
      %74 = vector.load %arg8[%c0_44, %c0_45] : memref<1x128xf32, #tpu.memory_space<vmem>>, vector<1x128xf32>
      %75 = vector.broadcast %74 : vector<1x128xf32> to vector<256x128xf32>
      %76 = arith.addf %73, %75 : vector<256x128xf32>
      %77 = arith.index_cast %60 : i32 to index
      %c0_46 = arith.constant 0 : index
      %78 = vector.load %arg9[%77, %c0_46] : memref<512x128xf32, #tpu.memory_space<vmem>>, vector<256x128xf32>
      tpu.vector_store %arg9[%77, %c0_46], %76 {strides = array<i32>} : memref<512x128xf32, #tpu.memory_space<vmem>>, vector<256x128xf32>,
      %c2_i32_47 = arith.constant 2 : i32
    } else {
    }
    return
  }
  func.func @transform_0(%arg0: i32, %arg1: i32, %arg2: i32) -> (i32, i32) {
    %c0_i32 = arith.constant 0 : i32
    %c0_i32_0 = arith.constant 0 : i32
    %c0_i32_1 = arith.constant 0 : i32
    return %c0_i32, %c0_i32_0 : i32, i32
  }
  func.func @transform_1(%arg0: i32, %arg1: i32, %arg2: i32) -> (i32, i32) {
    %c0_i32 = arith.constant 0 : i32
    %c0_i32_0 = arith.constant 0 : i32
    %c0_i32_1 = arith.constant 0 : i32
    return %c0_i32, %c0_i32_0 : i32, i32
  }
  func.func @transform_2(%arg0: i32, %arg1: i32, %arg2: i32) -> (i32, i32) {
    %c0_i32 = arith.constant 0 : i32
    %c0_i32_0 = arith.constant 0 : i32
    %c0_i32_1 = arith.constant 0 : i32
    return %c0_i32, %c0_i32_0 : i32, i32
  }
  func.func @transform_3(%arg0: i32, %arg1: i32, %arg2: i32) -> (i32, i32) {
    %c0_i32 = arith.constant 0 : i32
    %c0_i32_0 = arith.constant 0 : i32
    %c0_i32_1 = arith.constant 0 : i32
    return %c0_i32, %c0_i32_0 : i32, i32
  }
  func.func @transform_4(%arg0: i32, %arg1: i32, %arg2: i32) -> (i32, i32) {
    %c0_i32 = arith.constant 0 : i32
    %c0_i32_0 = arith.constant 0 : i32
    %c0_i32_1 = arith.constant 0 : i32
    return %c0_i32, %c0_i32_0 : i32, i32
  }
  func.func @transform_5(%arg0: i32, %arg1: i32, %arg2: i32) -> (i32, i32) {
    %c0_i32 = arith.constant 0 : i32
    %c0_i32_0 = arith.constant 0 : i32
    %c0_i32_1 = arith.constant 0 : i32
    return %c0_i32, %c0_i32_0 : i32, i32
  }
  func.func @transform_6(%arg0: i32, %arg1: i32, %arg2: i32) -> (i32, i32) {
    %c0_i32 = arith.constant 0 : i32
    %c0_i32_0 = arith.constant 0 : i32
    return %arg1, %c0_i32 : i32, i32
  }
}

module attributes {stable_mosaic.version = 11 : i64} {
  func.func @_appnp_link_kernel(%arg0: i32, %arg1: i32, %arg2: i32, %arg3: memref<512x128xbf16, #tpu.memory_space<vmem>>, %arg4: memref<512x512xbf16, #tpu.memory_space<vmem>>, %arg5: memref<128x128xbf16, #tpu.memory_space<vmem>>, %arg6: memref<1x128xf32, #tpu.memory_space<vmem>>, %arg7: memref<128x128xbf16, #tpu.memory_space<vmem>>, %arg8: memref<1x128xf32, #tpu.memory_space<vmem>>, %arg9: memref<512x128xf32, #tpu.memory_space<vmem>>, %arg10: memref<1024x128xbf16, #tpu.memory_space<vmem>>, %arg11: memref<512x128xf32, #tpu.memory_space<vmem>>) attributes {dimension_semantics = [#tpu.dimension_semantics<arbitrary>, #tpu.dimension_semantics<arbitrary>, #tpu.dimension_semantics<arbitrary>], iteration_bounds = array<i64: 2, 1, 1>, scalar_prefetch = 0 : i64, scratch_operands = 2 : i64, tpu.core_type = #tpu.core_type<tc>, window_params = [{pipeline_mode = #tpu.pipeline_mode<synchronous>, transform_indices = @transform_0, window_bounds = array<i64: 512, 128>}, {pipeline_mode = #tpu.pipeline_mode<synchronous>, transform_indices = @transform_1, window_bounds = array<i64: 512, 512>}, {pipeline_mode = #tpu.pipeline_mode<synchronous>, transform_indices = @transform_2, window_bounds = array<i64: 128, 128>}, {pipeline_mode = #tpu.pipeline_mode<synchronous>, transform_indices = @transform_3, window_bounds = array<i64: 1, 128>}, {pipeline_mode = #tpu.pipeline_mode<synchronous>, transform_indices = @transform_4, window_bounds = array<i64: 128, 128>}, {pipeline_mode = #tpu.pipeline_mode<synchronous>, transform_indices = @transform_5, window_bounds = array<i64: 1, 128>}, {transform_indices = @transform_6, window_bounds = array<i64: 512, 128>}]} {
    %c0_i32 = arith.constant 0 : i32
    %0 = arith.cmpi eq, %arg0, %c0_i32 : i32
    %c0_i32_0 = arith.constant 0 : i32
    %1 = arith.cmpi eq, %arg1, %c0_i32_0 : i32
    %2 = arith.andi %0, %1 : i1
    %c0_i32_1 = arith.constant 0 : i32
    %3 = arith.cmpi eq, %arg2, %c0_i32_1 : i32
    %4 = arith.andi %2, %3 : i1
    %5 = arith.extui %4 : i1 to i32
    %c0_i32_2 = arith.constant 0 : i32
    %6 = arith.cmpi ne, %5, %c0_i32_2 : i32
    scf.if %6 {
      %c0_18 = arith.constant 0 : index
      %c0_19 = arith.constant 0 : index
      %39 = vector.load %arg3[%c0_18, %c0_19] : memref<512x128xbf16, #tpu.memory_space<vmem>>, vector<512x128xbf16>
      %c0_20 = arith.constant 0 : index
      %c0_21 = arith.constant 0 : index
      %40 = vector.load %arg10[%c0_20, %c0_21] : memref<1024x128xbf16, #tpu.memory_space<vmem>>, vector<512x128xbf16>
      tpu.vector_store %arg10[%c0_20, %c0_21], %39 {strides = array<i32>} : memref<1024x128xbf16, #tpu.memory_space<vmem>>, vector<512x128xbf16>,
    } else {
    }
    %c2_i32 = arith.constant 2 : i32
    %7 = arith.remsi %arg0, %c2_i32 : i32
    %c1_i32 = arith.constant 1 : i32
    %8 = arith.subi %c1_i32, %7 : i32
    %c512_i32 = arith.constant 512 : i32
    %9 = arith.muli %arg1, %c512_i32 : i32
    %10 = tpu.assume_multiple %9, 512 : i32
    %c0_i32_3 = arith.constant 0 : i32
    %11 = arith.cmpi eq, %arg2, %c0_i32_3 : i32
    %12 = arith.extui %11 : i1 to i32
    %c0_i32_4 = arith.constant 0 : i32
    %13 = arith.cmpi ne, %12, %c0_i32_4 : i32
    scf.if %13 {
      %39 = arith.index_cast %10 : i32 to index
      %c0_18 = arith.constant 0 : index
      %40 = vector.load %arg3[%39, %c0_18] : memref<512x128xbf16, #tpu.memory_space<vmem>>, vector<512x128xbf16>
      %41 = arith.extf %40 : vector<512x128xbf16> to vector<512x128xf32>
      %cst_19 = arith.constant 5.000000e-01 : f32
      %42 = vector.broadcast %cst_19 : f32 to vector<512x128xf32>
      %43 = arith.mulf %42, %41 : vector<512x128xf32>
      %c0_20 = arith.constant 0 : index
      %c0_21 = arith.constant 0 : index
      %44 = vector.load %arg11[%c0_20, %c0_21] : memref<512x128xf32, #tpu.memory_space<vmem>>, vector<512x128xf32>
      tpu.vector_store %arg11[%c0_20, %c0_21], %43 {strides = array<i32>} : memref<512x128xf32, #tpu.memory_space<vmem>>, vector<512x128xf32>,
    } else {
    }
    %c512_i32_5 = arith.constant 512 : i32
    %14 = arith.muli %arg2, %c512_i32_5 : i32
    %15 = tpu.assume_multiple %14, 512 : i32
    %16 = arith.index_cast %10 : i32 to index
    %17 = arith.index_cast %15 : i32 to index
    %18 = vector.load %arg4[%16, %17] : memref<512x512xbf16, #tpu.memory_space<vmem>>, vector<512x512xbf16>
    %c512_i32_6 = arith.constant 512 : i32
    %19 = arith.muli %7, %c512_i32_6 : i32
    %c512_i32_7 = arith.constant 512 : i32
    %20 = arith.muli %arg2, %c512_i32_7 : i32
    %21 = arith.addi %19, %20 : i32
    %22 = tpu.assume_multiple %21, 512 : i32
    %23 = arith.index_cast %22 : i32 to index
    %c0 = arith.constant 0 : index
    %24 = vector.load %arg10[%23, %c0] : memref<1024x128xbf16, #tpu.memory_space<vmem>>, vector<512x128xbf16>
    %c0_8 = arith.constant 0 : index
    %c0_9 = arith.constant 0 : index
    %25 = vector.load %arg11[%c0_8, %c0_9] : memref<512x128xf32, #tpu.memory_space<vmem>>, vector<512x128xf32>
    %cst = arith.constant dense<0.000000e+00> : vector<512x128xf32>
    %26 = tpu.matmul %18, %24, %cst {dimension_numbers = #tpu.dot_dimension_numbers<[1], [0], [0], [1], [0, 0, 1, 1], [], []>} : vector<512x512xbf16>, vector<512x128xbf16>, vector<512x128xf32> -> vector<512x128xf32>
    %27 = arith.addf %25, %26 : vector<512x128xf32>
    %c0_10 = arith.constant 0 : index
    %c0_11 = arith.constant 0 : index
    %28 = vector.load %arg11[%c0_10, %c0_11] : memref<512x128xf32, #tpu.memory_space<vmem>>, vector<512x128xf32>
    tpu.vector_store %arg11[%c0_10, %c0_11], %27 {strides = array<i32>} : memref<512x128xf32, #tpu.memory_space<vmem>>, vector<512x128xf32>,
    %c0_i32_12 = arith.constant 0 : i32
    %29 = arith.cmpi eq, %arg2, %c0_i32_12 : i32
    %c1_i32_13 = arith.constant 1 : i32
    %30 = arith.cmpi ne, %arg0, %c1_i32_13 : i32
    %31 = arith.andi %29, %30 : i1
    %32 = arith.extui %31 : i1 to i32
    %c0_i32_14 = arith.constant 0 : i32
    %33 = arith.cmpi ne, %32, %c0_i32_14 : i32
    scf.if %33 {
      %c512_i32_18 = arith.constant 512 : i32
      %39 = arith.muli %8, %c512_i32_18 : i32
      %c512_i32_19 = arith.constant 512 : i32
      %40 = arith.muli %arg1, %c512_i32_19 : i32
      %41 = arith.addi %39, %40 : i32
      %42 = tpu.assume_multiple %41, 512 : i32
      %c0_20 = arith.constant 0 : index
      %c0_21 = arith.constant 0 : index
      %43 = vector.load %arg11[%c0_20, %c0_21] : memref<512x128xf32, #tpu.memory_space<vmem>>, vector<512x128xf32>
      %44 = arith.truncf %43 : vector<512x128xf32> to vector<512x128xbf16>
      %45 = arith.index_cast %42 : i32 to index
      %c0_22 = arith.constant 0 : index
      %46 = vector.load %arg10[%45, %c0_22] : memref<1024x128xbf16, #tpu.memory_space<vmem>>, vector<512x128xbf16>
      tpu.vector_store %arg10[%45, %c0_22], %44 {strides = array<i32>} : memref<1024x128xbf16, #tpu.memory_space<vmem>>, vector<512x128xbf16>,
    } else {
    }
    %c1_i32_15 = arith.constant 1 : i32
    %34 = arith.cmpi eq, %arg0, %c1_i32_15 : i32
    %c0_i32_16 = arith.constant 0 : i32
    %35 = arith.cmpi eq, %arg2, %c0_i32_16 : i32
    %36 = arith.andi %34, %35 : i1
    %37 = arith.extui %36 : i1 to i32
    %c0_i32_17 = arith.constant 0 : i32
    %38 = arith.cmpi ne, %37, %c0_i32_17 : i32
    scf.if %38 {
      %c0_i32_18 = arith.constant 0 : i32
      %c256_i32 = arith.constant 256 : i32
      %39 = arith.muli %c0_i32_18, %c256_i32 : i32
      %40 = tpu.assume_multiple %39, 256 : i32
      %41 = arith.index_cast %40 : i32 to index
      %c0_19 = arith.constant 0 : index
      %42 = vector.load %arg11[%41, %c0_19] : memref<512x128xf32, #tpu.memory_space<vmem>>, vector<256x128xf32>
      %cst_20 = arith.constant 0.000000e+00 : f32
      %43 = vector.broadcast %cst_20 : f32 to vector<256x128xf32>
      %44 = arith.maximumf %42, %43 : vector<256x128xf32>
      %45 = arith.truncf %44 : vector<256x128xf32> to vector<256x128xbf16>
      %c0_21 = arith.constant 0 : index
      %c0_22 = arith.constant 0 : index
      %46 = vector.load %arg5[%c0_21, %c0_22] : memref<128x128xbf16, #tpu.memory_space<vmem>>, vector<128x128xbf16>
      %cst_23 = arith.constant dense<0.000000e+00> : vector<256x128xf32>
      %47 = tpu.matmul %45, %46, %cst_23 {dimension_numbers = #tpu.dot_dimension_numbers<[1], [0], [0], [1], [0, 0, 1, 1], [], []>} : vector<256x128xbf16>, vector<128x128xbf16>, vector<256x128xf32> -> vector<256x128xf32>
      %c0_24 = arith.constant 0 : index
      %c0_25 = arith.constant 0 : index
      %48 = vector.load %arg6[%c0_24, %c0_25] : memref<1x128xf32, #tpu.memory_space<vmem>>, vector<1x128xf32>
      %49 = vector.broadcast %48 : vector<1x128xf32> to vector<256x128xf32>
      %50 = arith.addf %47, %49 : vector<256x128xf32>
      %51 = arith.truncf %50 : vector<256x128xf32> to vector<256x128xbf16>
      %c0_26 = arith.constant 0 : index
      %c0_27 = arith.constant 0 : index
      %52 = vector.load %arg7[%c0_26, %c0_27] : memref<128x128xbf16, #tpu.memory_space<vmem>>, vector<128x128xbf16>
      %cst_28 = arith.constant dense<0.000000e+00> : vector<256x128xf32>
      %53 = tpu.matmul %51, %52, %cst_28 {dimension_numbers = #tpu.dot_dimension_numbers<[1], [0], [0], [1], [0, 0, 1, 1], [], []>} : vector<256x128xbf16>, vector<128x128xbf16>, vector<256x128xf32> -> vector<256x128xf32>
      %c0_29 = arith.constant 0 : index
      %c0_30 = arith.constant 0 : index
      %54 = vector.load %arg8[%c0_29, %c0_30] : memref<1x128xf32, #tpu.memory_space<vmem>>, vector<1x128xf32>
      %55 = vector.broadcast %54 : vector<1x128xf32> to vector<256x128xf32>
      %56 = arith.addf %53, %55 : vector<256x128xf32>
      %57 = arith.index_cast %40 : i32 to index
      %c0_31 = arith.constant 0 : index
      %58 = vector.load %arg9[%57, %c0_31] : memref<512x128xf32, #tpu.memory_space<vmem>>, vector<256x128xf32>
      tpu.vector_store %arg9[%57, %c0_31], %56 {strides = array<i32>} : memref<512x128xf32, #tpu.memory_space<vmem>>, vector<256x128xf32>,
      %c1_i32_32 = arith.constant 1 : i32
      %c256_i32_33 = arith.constant 256 : i32
      %59 = arith.muli %c1_i32_32, %c256_i32_33 : i32
      %60 = tpu.assume_multiple %59, 256 : i32
      %61 = arith.index_cast %60 : i32 to index
      %c0_34 = arith.constant 0 : index
      %62 = vector.load %arg11[%61, %c0_34] : memref<512x128xf32, #tpu.memory_space<vmem>>, vector<256x128xf32>
      %cst_35 = arith.constant 0.000000e+00 : f32
      %63 = vector.broadcast %cst_35 : f32 to vector<256x128xf32>
      %64 = arith.maximumf %62, %63 : vector<256x128xf32>
      %65 = arith.truncf %64 : vector<256x128xf32> to vector<256x128xbf16>
      %c0_36 = arith.constant 0 : index
      %c0_37 = arith.constant 0 : index
      %66 = vector.load %arg5[%c0_36, %c0_37] : memref<128x128xbf16, #tpu.memory_space<vmem>>, vector<128x128xbf16>
      %cst_38 = arith.constant dense<0.000000e+00> : vector<256x128xf32>
      %67 = tpu.matmul %65, %66, %cst_38 {dimension_numbers = #tpu.dot_dimension_numbers<[1], [0], [0], [1], [0, 0, 1, 1], [], []>} : vector<256x128xbf16>, vector<128x128xbf16>, vector<256x128xf32> -> vector<256x128xf32>
      %c0_39 = arith.constant 0 : index
      %c0_40 = arith.constant 0 : index
      %68 = vector.load %arg6[%c0_39, %c0_40] : memref<1x128xf32, #tpu.memory_space<vmem>>, vector<1x128xf32>
      %69 = vector.broadcast %68 : vector<1x128xf32> to vector<256x128xf32>
      %70 = arith.addf %67, %69 : vector<256x128xf32>
      %71 = arith.truncf %70 : vector<256x128xf32> to vector<256x128xbf16>
      %c0_41 = arith.constant 0 : index
      %c0_42 = arith.constant 0 : index
      %72 = vector.load %arg7[%c0_41, %c0_42] : memref<128x128xbf16, #tpu.memory_space<vmem>>, vector<128x128xbf16>
      %cst_43 = arith.constant dense<0.000000e+00> : vector<256x128xf32>
      %73 = tpu.matmul %71, %72, %cst_43 {dimension_numbers = #tpu.dot_dimension_numbers<[1], [0], [0], [1], [0, 0, 1, 1], [], []>} : vector<256x128xbf16>, vector<128x128xbf16>, vector<256x128xf32> -> vector<256x128xf32>
      %c0_44 = arith.constant 0 : index
      %c0_45 = arith.constant 0 : index
      %74 = vector.load %arg8[%c0_44, %c0_45] : memref<1x128xf32, #tpu.memory_space<vmem>>, vector<1x128xf32>
      %75 = vector.broadcast %74 : vector<1x128xf32> to vector<256x128xf32>
      %76 = arith.addf %73, %75 : vector<256x128xf32>
      %77 = arith.index_cast %60 : i32 to index
      %c0_46 = arith.constant 0 : index
      %78 = vector.load %arg9[%77, %c0_46] : memref<512x128xf32, #tpu.memory_space<vmem>>, vector<256x128xf32>
      tpu.vector_store %arg9[%77, %c0_46], %76 {strides = array<i32>} : memref<512x128xf32, #tpu.memory_space<vmem>>, vector<256x128xf32>,
      %c2_i32_47 = arith.constant 2 : i32
    } else {
    }
    return
  }
  func.func @transform_0(%arg0: i32, %arg1: i32, %arg2: i32) -> (i32, i32) {
    %c0_i32 = arith.constant 0 : i32
    %c0_i32_0 = arith.constant 0 : i32
    %c0_i32_1 = arith.constant 0 : i32
    return %c0_i32, %c0_i32_0 : i32, i32
  }
  func.func @transform_1(%arg0: i32, %arg1: i32, %arg2: i32) -> (i32, i32) {
    %c0_i32 = arith.constant 0 : i32
    %c0_i32_0 = arith.constant 0 : i32
    %c0_i32_1 = arith.constant 0 : i32
    return %c0_i32, %c0_i32_0 : i32, i32
  }
  func.func @transform_2(%arg0: i32, %arg1: i32, %arg2: i32) -> (i32, i32) {
    %c0_i32 = arith.constant 0 : i32
    %c0_i32_0 = arith.constant 0 : i32
    %c0_i32_1 = arith.constant 0 : i32
    return %c0_i32, %c0_i32_0 : i32, i32
  }
  func.func @transform_3(%arg0: i32, %arg1: i32, %arg2: i32) -> (i32, i32) {
    %c0_i32 = arith.constant 0 : i32
    %c0_i32_0 = arith.constant 0 : i32
    %c0_i32_1 = arith.constant 0 : i32
    return %c0_i32, %c0_i32_0 : i32, i32
  }
  func.func @transform_4(%arg0: i32, %arg1: i32, %arg2: i32) -> (i32, i32) {
    %c0_i32 = arith.constant 0 : i32
    %c0_i32_0 = arith.constant 0 : i32
    %c0_i32_1 = arith.constant 0 : i32
    return %c0_i32, %c0_i32_0 : i32, i32
  }
  func.func @transform_5(%arg0: i32, %arg1: i32, %arg2: i32) -> (i32, i32) {
    %c0_i32 = arith.constant 0 : i32
    %c0_i32_0 = arith.constant 0 : i32
    %c0_i32_1 = arith.constant 0 : i32
    return %c0_i32, %c0_i32_0 : i32, i32
  }
  func.func @transform_6(%arg0: i32, %arg1: i32, %arg2: i32) -> (i32, i32) {
    %c0_i32 = arith.constant 0 : i32
    %c0_i32_0 = arith.constant 0 : i32
    return %arg1, %c0_i32 : i32, i32
  }
}

</mosaic_0001>

<bundles_post_ra>
// kernel: tpu_custom_call.1
= control target key start
LH: loop header
LB: loop body
LE: loop exit
PB: predicated region body
PF: predicated region fallthrough
CT: control target
= control target key end

     0   :  { %11 = vsyncpa [#allocation5], 0  ;;  %s5563_s0 = inlined_call_operand.hbm [shape: bf16[512,128], index: 0, kind: input, shape index: {}]   ;;  %s5564_s1 = inlined_call_operand.hbm [shape: bf16[512,512], index: 1, kind: input, shape index: {}]   ;;  %s5565_s2 = inlined_call_operand.hbm [shape: bf16[128,128], index: 2, kind: input, shape index: {}]   ;;  %s5566_s3 = inlined_call_operand.vmem [shape: f32[1,128], index: 3, kind: input, shape index: {}]   ;;  %s5567_s4 = inlined_call_operand.hbm [shape: bf16[128,128], index: 4, kind: input, shape index: {}]   ;;  %s5568_s5 = inlined_call_operand.vmem [shape: f32[1,128], index: 5, kind: input, shape index: {}]   ;;  %s5569_s6 = inlined_call_operand.hbm [shape: f32[512,128], index: 6, kind: output, shape index: {}]  }
   0x1   :  { %12 = vsyncpa [#allocation8], 0 }
   0x2   :  { %13 = vsyncpa [#allocation11], 0 }
   0x3   :  { %14 = vsyncpa [#allocation6], 0  ;;  %s5121_s21 = smov 0   ;;  %s5123_s22 = smov 0  }
   0x4   :  { %s5125_s23 = smov 0  }
   0x5 LB: > { %s5074_s24 = smov [#allocation7]   ;;  %s5573_s26 = sadd.s32 4294967295, %s5072_s23   ;;  %s5072_s23 = sphi %s5125_s23, %s20_s23   ;;  %s5068_s22 = sphi %s5123_s22, %s5584_s22   ;;  %s5064_s21 = sphi %s5121_s21, %s5583_s21  }
   0x6   : > { %s221_s25 = sshll.u32 %s5074_s24, 4  ;;  %p3891_p0 = scmp.ge.s32.totalorder %s5072_s23, 1  ;;  %s5145_s25 = int_to_ptr.vmem [resolvable:$true] %s221_s25 }
   0x7   : > { %p196_p1 = scmp.lt.s32.totalorder %s5072_s23, 3  ;;  %p5141_p2 = scmp.eq.s32.totalorder %s5573_s26, 0 }
   0x8   : > { %s39_s30 = sadd.s32 1, %s5068_s22  ;;  %s5075_s8 = smov [#allocation4]  }
   0x9   : > { %s5574_s27 = scalar_select %p5141_p2, 1, 0 }
   0xa   : > { %p5147_p3 = pnand %p3891_p0, %p196_p1  ;;  %p5160_p6 = scmp.ge.s32.totalorder %s39_s30, 2 }
   0xb   : > { %s208_s9 = sshll.u32 %s5075_s8, 4  ;;  %s4896_s12 = scalar_lea.hbm %s5564_s1, 16384  ;;  %s209_s9 = int_to_ptr.vmem [resolvable:$true] %s208_s9 }
   0xc   : > { %s5575_s28 = scalar_select %p5147_p3, 1, 0 }
   0xd   : > { %p4581_p4 = pneg %p5147_p3  ;;  %p4897_p7 = scmp.ne.s32.totalorder %s5564_s1, %s4896_s12 }
   0xe   : > { %p4903_p11 = scmp.lt.u32.totalorder %s4896_s12, %s5564_s1 }
   0xf   : > { %p5155_p5 = pnand %p5141_p2, %p4581_p4 }
  0x11   : > { %p5172_p8 = pneg %p5155_p5 }
  0x13   : > { %p4899_p9 = pnand %p5172_p8, %p4897_p7 }
  0x15   : > { %p4900_p10 = pneg %p4899_p9 }
  0x17   : > { %p4905_p12 = pnand %p4903_p11, %p4900_p10 }
  0x19   : > { %4908 = shalt.err (!%p4905_p12)
}
  0x1a   : > { %s4909_s18 = scalar_lea.vmem %s5145_s25, 16384  ;;  %p4917_p4 = scmp.lt.s32.totalorder %s5145_s25, %s5145_s25 }
  0x1b   : > { %p4910_p13 = scmp.ne.s32.totalorder %s5145_s25, %s4909_s18  ;;  %p4918_p2 = scmp.lt.s32.totalorder %s4909_s18, %s4909_s18 }
  0x1d   : > { %p4912_p0 = pnand %p4910_p13, %p5172_p8  ;;  %p4919_p7 = por %p4918_p2, %p4917_p4 }
  0x1f   : > { %p4913_p1 = pneg %p4912_p0 }
  0x21   : > { %p4920_p9 = pnand %p4919_p7, %p4913_p1 }
  0x23   : > { %4923 = shalt.err (!%p4920_p9)
}
  0x24   : > { %s5076_s19 = smov 256   ;;  %s5077_s20 = smov 16  }
  0x25   : > { %4587 = dma.hbm_to_vmem [thread:$0]  (!%p5155_p5), %s5564_s1, 16384, %s5145_s25, [#allocation8], %s5076_s19, %s5076_s19, %s5077_s20  }
  0x26   : > { %s5586_s30 = smov (%p5160_p6, %s39_s30), 0  ;;  %s4924_s12 = scalar_lea.hbm %s5563_s0, 4096 }
  0x27   : > { %p4925_p2 = scmp.ne.s32.totalorder %s5563_s0, %s4924_s12  ;;  %p4931_p12 = scmp.lt.u32.totalorder %s4924_s12, %s5563_s0 }
  0x29   : > { %p4927_p10 = pnand %p4925_p2, %p5172_p8 }
  0x2b   : > { %p4928_p11 = pneg %p4927_p10 }
  0x2d   : > { %p4933_p13 = pnand %p4931_p12, %p4928_p11 }
  0x2f   : > { %4936 = shalt.err (!%p4933_p13)
}
  0x30   : > { %s4937_s25 = scalar_lea.vmem %s209_s9, 4096  ;;  %p4945_p4 = scmp.lt.s32.totalorder %s209_s9, %s209_s9 }
  0x31   : > { %p4938_p6 = scmp.ne.s32.totalorder %s209_s9, %s4937_s25  ;;  %p4946_p7 = scmp.lt.s32.totalorder %s4937_s25, %s4937_s25 }
  0x33   : > { %p4940_p0 = pnand %p4938_p6, %p5172_p8  ;;  %p4947_p9 = por %p4946_p7, %p4945_p4 }
  0x35   : > { %p4941_p1 = pneg %p4940_p0 }
  0x37   : > { %p4948_p3 = pnand %p4947_p9, %p4941_p1 }
  0x39   : > { %4951 = shalt.err (!%p4948_p3)
}
  0x3a   : > { %s5078_s7 = smov 64   ;;  %s5079_s18 = smov 4  }
  0x3b   : > { %4584 = dma.hbm_to_vmem [thread:$0]  (!%p5155_p5), %s5563_s0, 4096, %s209_s9, [#allocation5], %s5078_s7, %s5078_s7, %s5079_s18  }
  0x3c   : > { %s5080_s24 = smov [#allocation9]   ;;  %s5081_s10 = smov [#allocation10]  }
  0x3d   : > { %s234_s8 = sshll.u32 %s5080_s24, 4  ;;  %s250_s11 = sshll.u32 %s5081_s10, 4  ;;  %s235_s8 = int_to_ptr.vmem [resolvable:$true] %s234_s8  ;;  %s251_s11 = int_to_ptr.vmem [resolvable:$true] %s250_s11 }
  0x3e   : > { %s4952_s14 = scalar_lea.hbm %s5565_s2, 1024 }
  0x3f   : > { %p4953_p3 = scmp.ne.s32.totalorder %s5565_s2, %s4952_s14  ;;  %p4959_p11 = scmp.lt.u32.totalorder %s4952_s14, %s5565_s2 }
  0x41   : > { %p4955_p2 = pnand %p4953_p3, %p5172_p8 }
  0x43   : > { %p4956_p10 = pneg %p4955_p2 }
  0x45   : > { %p4961_p12 = pnand %p4959_p11, %p4956_p10 }
  0x47   : > { %4964 = shalt.err (!%p4961_p12)
}
  0x48   : > { %s4965_s9 = scalar_lea.vmem %s235_s8, 1024  ;;  %p4973_p1 = scmp.lt.s32.totalorder %s235_s8, %s235_s8 }
  0x49   : > { %p4966_p13 = scmp.ne.s32.totalorder %s235_s8, %s4965_s9  ;;  %p4974_p4 = scmp.lt.s32.totalorder %s4965_s9, %s4965_s9 }
  0x4b   : > { %p4968_p6 = pnand %p4966_p13, %p5172_p8  ;;  %p4975_p7 = por %p4974_p4, %p4973_p1 }
  0x4d   : > { %p4969_p0 = pneg %p4968_p6 }
  0x4f   : > { %p4976_p9 = pnand %p4975_p7, %p4969_p0 }
  0x51   : > { %4979 = shalt.err (!%p4976_p9)
}
  0x52   : > { %4590 = dma.hbm_to_vmem [thread:$0]  (!%p5155_p5), %s5565_s2, 1024, %s235_s8, [#allocation8], %s5078_s7, %s5078_s7, %s5079_s18  }
  0x53   : > { %s4980_s10 = scalar_lea.hbm %s5567_s4, 1024 }
  0x54   : > { %p4981_p3 = scmp.ne.s32.totalorder %s5567_s4, %s4980_s10  ;;  %p4987_p11 = scmp.lt.u32.totalorder %s4980_s10, %s5567_s4 }
  0x56   : > { %p4983_p2 = pnand %p4981_p3, %p5172_p8 }
  0x58   : > { %p4984_p10 = pneg %p4983_p2 }
  0x5a   : > { %p4989_p12 = pnand %p4987_p11, %p4984_p10 }
  0x5c   : > { %4992 = shalt.err (!%p4989_p12)
}
  0x5d   : > { %s4993_s17 = scalar_lea.vmem %s251_s11, 1024  ;;  %p5001_p1 = scmp.lt.s32.totalorder %s251_s11, %s251_s11 }
  0x5e   : > { %p4994_p13 = scmp.ne.s32.totalorder %s251_s11, %s4993_s17  ;;  %p5002_p4 = scmp.lt.s32.totalorder %s4993_s17, %s4993_s17 }
  0x60   : > { %p4996_p6 = pnand %p4994_p13, %p5172_p8  ;;  %p5003_p7 = por %p5002_p4, %p5001_p1 }
  0x62   : > { %p4997_p0 = pneg %p4996_p6 }
  0x64   : > { %p5004_p9 = pnand %p5003_p7, %p4997_p0 }
  0x66   : > { %5007 = shalt.err (!%p5004_p9)
}
  0x67   : > { %4593 = dma.hbm_to_vmem [thread:$0]  (!%p5155_p5), %s5567_s4, 1024, %s251_s11, [#allocation11], %s5078_s7, %s5078_s7, %s5079_s18  }
  0x68   : > { %p5579_p3 = scmp.ne.s32.totalorder %s5575_s28, 0 }
  0x69   : > { %p5580_p8 = scmp.ne.s32.totalorder (!%p5579_p3), %s5574_s27, 0 }
  0x6a   : > { %269 = sbr.rel (%p5579_p3) target bundleno = 1305 (0x519), region = 44 }
  0x71   : > { %5047 = dma.done.wait (%p5580_p8), [#allocation5], 4096  }
  0x72   : > { %5049 = vsyncadd (%p5580_p8), [#allocation5], 4294963200 }
  0x73   : > { %5051 = dma.done.wait (%p5580_p8), [#allocation8], 17408  }
  0x74   : > { %5053 = vsyncadd (%p5580_p8), [#allocation8], 4294949888 }
  0x75   : > { %5055 = dma.done.wait (%p5580_p8), [#allocation11], 1024  }
  0x76   : > { %5057 = vsyncadd (%p5580_p8), [#allocation11], 4294966272  ;;  %p303_p5 = scmp.eq.s32.totalorder %s5064_s21, 0 }
  0x77   : > { %v4640_v0 = vld [vmem:[#allocation4] sm:$0xff] (%p303_p5)   ;;  %v4641_v1 = vld [vmem:[#allocation4 + $0x8] sm:$0xff] (%p303_p5)   ;;  %v4642_v2 = vld [vmem:[#allocation4 + $0x10] sm:$0xff] (%p303_p5)  }
  0x78   : > { %311 = sbr.rel (!%p303_p5) target bundleno = 136 (0x88), region = 64  ;;  %568 = vst [vmem:[#allocation2] sm:$0xff] (%p303_p5), %v4640_v0  ;;  %569 = vst [vmem:[#allocation2 + $0x8] sm:$0xff] (%p303_p5), %v4641_v1  ;;  %v4643_v3 = vld [vmem:[#allocation4 + $0x18] sm:$0xff] (%p303_p5)   ;;  %v4644_v4 = vld [vmem:[#allocation4 + $0x20] sm:$0xff] (%p303_p5)  }
  0x79   : > { %570 = vst [vmem:[#allocation2 + $0x10] sm:$0xff] (%p303_p5), %v4642_v2  ;;  %571 = vst [vmem:[#allocation2 + $0x18] sm:$0xff] (%p303_p5), %v4643_v3  ;;  %v4645_v5 = vld [vmem:[#allocation4 + $0x28] sm:$0xff] (%p303_p5)   ;;  %v4646_v6 = vld [vmem:[#allocation4 + $0x30] sm:$0xff] (%p303_p5)  }
  0x7a   : > { %572 = vst [vmem:[#allocation2 + $0x20] sm:$0xff] (%p303_p5), %v4644_v4  ;;  %573 = vst [vmem:[#allocation2 + $0x28] sm:$0xff] (%p303_p5), %v4645_v5  ;;  %v4647_v7 = vld [vmem:[#allocation4 + $0x38] sm:$0xff] (%p303_p5)   ;;  %v4648_v8 = vld [vmem:[#allocation4 + $0x40] sm:$0xff] (%p303_p5)  }
  0x7b   : > { %574 = vst [vmem:[#allocation2 + $0x30] sm:$0xff] (%p303_p5), %v4646_v6  ;;  %575 = vst [vmem:[#allocation2 + $0x38] sm:$0xff] (%p303_p5), %v4647_v7  ;;  %v4649_v9 = vld [vmem:[#allocation4 + $0x48] sm:$0xff] (%p303_p5)   ;;  %v4650_v10 = vld [vmem:[#allocation4 + $0x50] sm:$0xff] (%p303_p5)  }
  0x7c   : > { %576 = vst [vmem:[#allocation2 + $0x40] sm:$0xff] (%p303_p5), %v4648_v8  ;;  %577 = vst [vmem:[#allocation2 + $0x48] sm:$0xff] (%p303_p5), %v4649_v9  ;;  %v4651_v11 = vld [vmem:[#allocation4 + $0x58] sm:$0xff] (%p303_p5)   ;;  %v4652_v12 = vld [vmem:[#allocation4 + $0x60] sm:$0xff] (%p303_p5)  }
  0x7d   : > { %578 = vst [vmem:[#allocation2 + $0x50] sm:$0xff] (%p303_p5), %v4650_v10  ;;  %579 = vst [vmem:[#allocation2 + $0x58] sm:$0xff] (%p303_p5), %v4651_v11  ;;  %v4653_v13 = vld [vmem:[#allocation4 + $0x68] sm:$0xff] (%p303_p5)   ;;  %v4654_v14 = vld [vmem:[#allocation4 + $0x70] sm:$0xff] (%p303_p5)  }
  0x7e   : > { %580 = vst [vmem:[#allocation2 + $0x60] sm:$0xff] (%p303_p5), %v4652_v12  ;;  %581 = vst [vmem:[#allocation2 + $0x68] sm:$0xff] (%p303_p5), %v4653_v13  ;;  %v4655_v15 = vld [vmem:[#allocation4 + $0x78] sm:$0xff] (%p303_p5)   ;;  %v4656_v16 = vld [vmem:[#allocation4 + $0x80] sm:$0xff] (%p303_p5)  }
  0x7f   : > { %582 = vst [vmem:[#allocation2 + $0x70] sm:$0xff] %v4654_v14  ;;  %583 = vst [vmem:[#allocation2 + $0x78] sm:$0xff] %v4655_v15  ;;  %v4657_v17 = vld [vmem:[#allocation4 + $0x88] sm:$0xff]   ;;  %v4658_v18 = vld [vmem:[#allocation4 + $0x90] sm:$0xff]  }
  0x80   : > { %584 = vst [vmem:[#allocation2 + $0x80] sm:$0xff] %v4656_v16  ;;  %585 = vst [vmem:[#allocation2 + $0x88] sm:$0xff] %v4657_v17  ;;  %v4659_v19 = vld [vmem:[#allocation4 + $0x98] sm:$0xff]   ;;  %v4660_v20 = vld [vmem:[#allocation4 + $0xa0] sm:$0xff]  }
  0x81   : > { %586 = vst [vmem:[#allocation2 + $0x90] sm:$0xff] %v4658_v18  ;;  %587 = vst [vmem:[#allocation2 + $0x98] sm:$0xff] %v4659_v19  ;;  %v4661_v21 = vld [vmem:[#allocation4 + $0xa8] sm:$0xff]   ;;  %v4662_v22 = vld [vmem:[#allocation4 + $0xb0] sm:$0xff]  }
  0x82   : > { %588 = vst [vmem:[#allocation2 + $0xa0] sm:$0xff] %v4660_v20  ;;  %589 = vst [vmem:[#allocation2 + $0xa8] sm:$0xff] %v4661_v21  ;;  %v4663_v23 = vld [vmem:[#allocation4 + $0xb8] sm:$0xff]   ;;  %v4664_v24 = vld [vmem:[#allocation4 + $0xc0] sm:$0xff]  }
  0x83   : > { %590 = vst [vmem:[#allocation2 + $0xb0] sm:$0xff] %v4662_v22  ;;  %591 = vst [vmem:[#allocation2 + $0xb8] sm:$0xff] %v4663_v23  ;;  %v4665_v25 = vld [vmem:[#allocation4 + $0xc8] sm:$0xff]   ;;  %v4666_v26 = vld [vmem:[#allocation4 + $0xd0] sm:$0xff]  }
  0x84   : > { %592 = vst [vmem:[#allocation2 + $0xc0] sm:$0xff] %v4664_v24  ;;  %593 = vst [vmem:[#allocation2 + $0xc8] sm:$0xff] %v4665_v25  ;;  %v4667_v27 = vld [vmem:[#allocation4 + $0xd8] sm:$0xff]   ;;  %v4668_v28 = vld [vmem:[#allocation4 + $0xe0] sm:$0xff]  }
  0x85   : > { %594 = vst [vmem:[#allocation2 + $0xd0] sm:$0xff] %v4666_v26  ;;  %595 = vst [vmem:[#allocation2 + $0xd8] sm:$0xff] %v4667_v27  ;;  %v4669_v29 = vld [vmem:[#allocation4 + $0xe8] sm:$0xff]   ;;  %v4670_v30 = vld [vmem:[#allocation4 + $0xf0] sm:$0xff]  }
  0x86   : > { %596 = vst [vmem:[#allocation2 + $0xe0] sm:$0xff] %v4668_v28  ;;  %597 = vst [vmem:[#allocation2 + $0xe8] sm:$0xff] %v4669_v29  ;;  %v4671_v31 = vld [vmem:[#allocation4 + $0xf8] sm:$0xff]  }
  0x87   : > { %598 = vst [vmem:[#allocation2 + $0xf0] sm:$0xff] %v4670_v30  ;;  %599 = vst [vmem:[#allocation2 + $0xf8] sm:$0xff] %v4671_v31 }
  0x88 PF: > { %p600_p2 = scmp.lt.s32.totalorder %s5064_s21, 0  ;;  %s601_s27 = ssub.s32 0, %s5064_s21  ;;  %v5082_v32 = vmov 0   ;;  %v4674_v33 = vld [vmem:[#allocation7 + $0x4] ss:$16 sps:$4 sm:$0xff]  }
  0x89   : > { %1750 = vmatprep.subr.bf16.mxu0 %v5082_v32  ;;  %2039 = vmatprep.subr.bf16.mxu1 %v5082_v32  ;;  %s3935_s28 = smin.u32 %s5064_s21, %s601_s27  ;;  %v4677_v34 = vld [vmem:[#allocation7 + $0xc] ss:$16 sps:$4 sm:$0xff]   ;;  %v4672_v3 = vld [vmem:[#allocation7] ss:$16 sps:$4 sm:$0xff]   ;;  %v4675_v4 = vld [vmem:[#allocation7 + $0x8] ss:$16 sps:$4 sm:$0xff]  }
  0x8a   : > { %s603_s29 = sand.u32 1, %s3935_s28   ;;  %1782 = vmatprep.mubr.bf16.mxu0 %v4674_v33  ;;  %2071 = vmatprep.mubr.bf16.mxu1 %v4677_v34  ;;  %v4678_v5 = vld [vmem:[#allocation7 + $0x24] ss:$16 sps:$4 sm:$0xff]   ;;  %v4680_v6 = vld [vmem:[#allocation7 + $0x2c] ss:$16 sps:$4 sm:$0xff]   ;;  %p2456_p10 = scmp.ne.s32.totalorder %s5064_s21, 1 }
  0x8b   : > { %s604_s15 = ssub.s32 0, %s603_s29  ;;  %v4682_v7 = vld [vmem:[#allocation7 + $0x20] ss:$16 sps:$4 sm:$0xff]   ;;  %v4683_v8 = vld [vmem:[#allocation7 + $0x28] ss:$16 sps:$4 sm:$0xff]  }
  0x8c   : > { %s5588_s15 = smov (!%p600_p2, %s604_s15), %s603_s29  ;;  %v4684_v9 = vld [vmem:[#allocation7 + $0x44] ss:$16 sps:$4 sm:$0xff]   ;;  %v4686_v10 = vld [vmem:[#allocation7 + $0x4c] ss:$16 sps:$4 sm:$0xff]   ;;  %v4688_v11 = vld [vmem:[#allocation7 + $0x40] ss:$16 sps:$4 sm:$0xff]  }
  0x8d   : > { %s606_s7 = ssub.s32 1, %s5588_s15  ;;  %s3936_s18 = sshll.u32 %s5588_s15, 9  ;;  %v4689_v12 = vld [vmem:[#allocation7 + $0x48] ss:$16 sps:$4 sm:$0xff]   ;;  %v4690_v13 = vld [vmem:[#allocation7 + $0x64] ss:$16 sps:$4 sm:$0xff]  }
  0x8e   : > { %s1010_s11 = sshra.s32 %s3936_s18, 4  ;;  %v4692_v14 = vld [vmem:[#allocation7 + $0x6c] ss:$16 sps:$4 sm:$0xff]   ;;  %v4694_v15 = vld [vmem:[#allocation7 + $0x60] ss:$16 sps:$4 sm:$0xff]   ;;  %s4067_s19 = sshll.u32 (%p2456_p10), %s606_s7, 9 }
  0x8f   : > { %s3937_s9 = sshll.u32 %s1010_s11, 3  ;;  %v4695_v16 = vld [vmem:[#allocation7 + $0x68] ss:$16 sps:$4 sm:$0xff]   ;;  %v4696_v17 = vld [vmem:[#allocation7 + $0x84] ss:$16 sps:$4 sm:$0xff]   ;;  %s2559_s20 = sshra.s32 (%p2456_p10), %s4067_s19, 4 }
  0x90   : > { %s5284_s26 = scalar_lea.vmem [#allocation2], %s3937_s9  ;;  %v4698_v18 = vld [vmem:[#allocation7 + $0x8c] ss:$16 sps:$4 sm:$0xff]   ;;  %v4700_v19 = vld [vmem:[#allocation7 + $0x80] ss:$16 sps:$4 sm:$0xff]   ;;  %s4068_s24 = sshll.u32 (%p2456_p10), %s2559_s20, 3 }
  0x91   : > { %v1014_v35 = vld [vmem:[%s5284_s26] sm:$0xff]  ;;  %v1015_v37 = vld [vmem:[%s5284_s26 + $0x8] sm:$0xff]  ;;  %v1016_v39 = vld [vmem:[%s5284_s26 + $0x10] sm:$0xff]  ;;  %s5353_s10 = scalar_lea.vmem (%p2456_p10), [#allocation2], %s4068_s24 }
  0x92   : > { %v1030_v36 = vld [vmem:[%s5284_s26 + $0x80] sm:$0xff]  ;;  %1751 = vmatpush1.bf16.msra.mxu0 %v1014_v35  ;;  %v1031_v38 = vld [vmem:[%s5284_s26 + $0x88] sm:$0xff]  ;;  %v1032_v40 = vld [vmem:[%s5284_s26 + $0x90] sm:$0xff] }
  0x93   : > { %2040 = vmatpush1.bf16.msra.mxu1 %v1030_v36  ;;  %1752 = vmatprep.subr.bf16.mxu0 %v5082_v32  ;;  %v1017_v41 = vld [vmem:[%s5284_s26 + $0x18] sm:$0xff]  ;;  %v1018_v43 = vld [vmem:[%s5284_s26 + $0x20] sm:$0xff]  ;;  %v1019_v45 = vld [vmem:[%s5284_s26 + $0x28] sm:$0xff] }
  0x94   : > { %2041 = vmatprep.subr.bf16.mxu1 %v5082_v32  ;;  %v1033_v42 = vld [vmem:[%s5284_s26 + $0x98] sm:$0xff]  ;;  %v1034_v44 = vld [vmem:[%s5284_s26 + $0xa0] sm:$0xff]  ;;  %v1035_v46 = vld [vmem:[%s5284_s26 + $0xa8] sm:$0xff] }
  0x95   : > { %v1020_v47 = vld [vmem:[%s5284_s26 + $0x30] sm:$0xff]  ;;  %v1021_v49 = vld [vmem:[%s5284_s26 + $0x38] sm:$0xff]  ;;  %v1022_v51 = vld [vmem:[%s5284_s26 + $0x40] sm:$0xff] }
  0x96   : > { %1753 = vmatpush1.bf16.msra.mxu0 %v1015_v37  ;;  %v1036_v48 = vld [vmem:[%s5284_s26 + $0xb0] sm:$0xff]  ;;  %v1037_v50 = vld [vmem:[%s5284_s26 + $0xb8] sm:$0xff]  ;;  %v1038_v52 = vld [vmem:[%s5284_s26 + $0xc0] sm:$0xff] }
  0x97   : > { %2042 = vmatpush1.bf16.msra.mxu1 %v1031_v38  ;;  %1754 = vmatprep.subr.bf16.mxu0 %v5082_v32  ;;  %v1023_v53 = vld [vmem:[%s5284_s26 + $0x48] sm:$0xff]  ;;  %v1024_v55 = vld [vmem:[%s5284_s26 + $0x50] sm:$0xff]  ;;  %v1025_v57 = vld [vmem:[%s5284_s26 + $0x58] sm:$0xff] }
  0x98   : > { %2043 = vmatprep.subr.bf16.mxu1 %v5082_v32  ;;  %v1039_v54 = vld [vmem:[%s5284_s26 + $0xc8] sm:$0xff]  ;;  %v1040_v56 = vld [vmem:[%s5284_s26 + $0xd0] sm:$0xff]  ;;  %v1041_v58 = vld [vmem:[%s5284_s26 + $0xd8] sm:$0xff] }
  0x99   : > { %v1026_v59 = vld [vmem:[%s5284_s26 + $0x60] sm:$0xff]  ;;  %v1027_v61 = vld [vmem:[%s5284_s26 + $0x68] sm:$0xff]  ;;  %v1028_v63 = vld [vmem:[%s5284_s26 + $0x70] sm:$0xff] }
  0x9a   : > { %1755 = vmatpush1.bf16.msra.mxu0 %v1016_v39  ;;  %v1042_v60 = vld [vmem:[%s5284_s26 + $0xe0] sm:$0xff]  ;;  %v1043_v62 = vld [vmem:[%s5284_s26 + $0xe8] sm:$0xff]  ;;  %v1044_v0 = vld [vmem:[%s5284_s26 + $0xf0] sm:$0xff] }
  0x9b   : > { %2044 = vmatpush1.bf16.msra.mxu1 %v1032_v40  ;;  %1756 = vmatprep.subr.bf16.mxu0 %v5082_v32  ;;  %v1029_v1 = vld [vmem:[%s5284_s26 + $0x78] sm:$0xff]  ;;  %v4702_v21 = vld [vmem:[#allocation7 + $0xa4] ss:$16 sps:$4 sm:$0xff]   ;;  %v4706_v23 = vld [vmem:[#allocation7 + $0xa0] ss:$16 sps:$4 sm:$0xff]  }
  0x9c   : > { %2045 = vmatprep.subr.bf16.mxu1 %v5082_v32  ;;  %v1045_v2 = vld [vmem:[%s5284_s26 + $0xf8] sm:$0xff]  ;;  %v4708_v25 = vld [vmem:[#allocation7 + $0xc4] ss:$16 sps:$4 sm:$0xff]   ;;  %v4712_v27 = vld [vmem:[#allocation7 + $0xc0] ss:$16 sps:$4 sm:$0xff]  }
  0x9d   : > { %v4701_v20 = vld [vmem:[#allocation7 + $0x88] ss:$16 sps:$4 sm:$0xff]   ;;  %v4704_v22 = vld [vmem:[#allocation7 + $0xac] ss:$16 sps:$4 sm:$0xff]   ;;  %v4714_v29 = vld [vmem:[#allocation7 + $0xe4] ss:$16 sps:$4 sm:$0xff]  }
  0x9e   : > { %1757 = vmatpush1.bf16.msra.mxu0 %v1017_v41  ;;  %v4707_v24 = vld [vmem:[#allocation7 + $0xa8] ss:$16 sps:$4 sm:$0xff]   ;;  %v4710_v26 = vld [vmem:[#allocation7 + $0xcc] ss:$16 sps:$4 sm:$0xff]   ;;  %v4718_v31 = vld [vmem:[#allocation7 + $0xe0] ss:$16 sps:$4 sm:$0xff]  }
  0x9f   : > { %2046 = vmatpush1.bf16.msra.mxu1 %v1033_v42  ;;  %1758 = vmatprep.subr.bf16.mxu0 %v5082_v32  ;;  %v4713_v28 = vld [vmem:[#allocation7 + $0xc8] ss:$16 sps:$4 sm:$0xff]   ;;  %v4716_v30 = vld [vmem:[#allocation7 + $0xec] ss:$16 sps:$4 sm:$0xff]   ;;  %v4720_v33 = vld [vmem:[#allocation7 + $0x104] ss:$16 sps:$4 sm:$0xff]  }
  0xa0   : > { %2047 = vmatprep.subr.bf16.mxu1 %v5082_v32  ;;  %v4722_v34 = vld [vmem:[#allocation7 + $0x10c] ss:$16 sps:$4 sm:$0xff]   ;;  %v4724_v35 = vld [vmem:[#allocation7 + $0x100] ss:$16 sps:$4 sm:$0xff]   ;;  %v4725_v36 = vld [vmem:[#allocation7 + $0x108] ss:$16 sps:$4 sm:$0xff]  }
  0xa1   : > { %v4726_v37 = vld [vmem:[#allocation7 + $0x124] ss:$16 sps:$4 sm:$0xff]   ;;  %v4728_v38 = vld [vmem:[#allocation7 + $0x12c] ss:$16 sps:$4 sm:$0xff]   ;;  %v4730_v39 = vld [vmem:[#allocation7 + $0x120] ss:$16 sps:$4 sm:$0xff]  }
  0xa2   : > { %1759 = vmatpush1.bf16.msra.mxu0 %v1018_v43  ;;  %v4731_v40 = vld [vmem:[#allocation7 + $0x128] ss:$16 sps:$4 sm:$0xff]   ;;  %v4732_v41 = vld [vmem:[#allocation7 + $0x144] ss:$16 sps:$4 sm:$0xff]   ;;  %v4734_v42 = vld [vmem:[#allocation7 + $0x14c] ss:$16 sps:$4 sm:$0xff]  }
  0xa3   : > { %2048 = vmatpush1.bf16.msra.mxu1 %v1034_v44  ;;  %1760 = vmatprep.subr.bf16.mxu0 %v5082_v32  ;;  %v4736_v43 = vld [vmem:[#allocation7 + $0x140] ss:$16 sps:$4 sm:$0xff]   ;;  %v4737_v44 = vld [vmem:[#allocation7 + $0x148] ss:$16 sps:$4 sm:$0xff]  }
  0xa4   : > { %2049 = vmatprep.subr.bf16.mxu1 %v5082_v32 }
  0xa6   : > { %1761 = vmatpush1.bf16.msra.mxu0 %v1019_v45  ;;  %v4738_v45 = vld [vmem:[#allocation7 + $0x164] ss:$16 sps:$4 sm:$0xff]  }
  0xa7   : > { %2050 = vmatpush1.bf16.msra.mxu1 %v1035_v46  ;;  %1762 = vmatprep.subr.bf16.mxu0 %v5082_v32  ;;  %v4740_v46 = vld [vmem:[#allocation7 + $0x16c] ss:$16 sps:$4 sm:$0xff]  }
  0xa8   : > { %2051 = vmatprep.subr.bf16.mxu1 %v5082_v32 }
  0xaa   : > { %1763 = vmatpush1.bf16.msra.mxu0 %v1020_v47  ;;  %v4742_v47 = vld [vmem:[#allocation7 + $0x160] ss:$16 sps:$4 sm:$0xff]  }
  0xab   : > { %2052 = vmatpush1.bf16.msra.mxu1 %v1036_v48  ;;  %1764 = vmatprep.subr.bf16.mxu0 %v5082_v32  ;;  %v4743_v48 = vld [vmem:[#allocation7 + $0x168] ss:$16 sps:$4 sm:$0xff]  }
  0xac   : > { %2053 = vmatprep.subr.bf16.mxu1 %v5082_v32 }
  0xae   : > { %1765 = vmatpush1.bf16.msra.mxu0 %v1021_v49  ;;  %v4744_v49 = vld [vmem:[#allocation7 + $0x184] ss:$16 sps:$4 sm:$0xff]  }
  0xaf   : > { %2054 = vmatpush1.bf16.msra.mxu1 %v1037_v50  ;;  %1766 = vmatprep.subr.bf16.mxu0 %v5082_v32  ;;  %v4746_v50 = vld [vmem:[#allocation7 + $0x18c] ss:$16 sps:$4 sm:$0xff]  }
  0xb0   : > { %2055 = vmatprep.subr.bf16.mxu1 %v5082_v32 }
  0xb2   : > { %1767 = vmatpush1.bf16.msra.mxu0 %v1022_v51  ;;  %v4748_v51 = vld [vmem:[#allocation7 + $0x180] ss:$16 sps:$4 sm:$0xff]  }
  0xb3   : > { %2056 = vmatpush1.bf16.msra.mxu1 %v1038_v52  ;;  %1768 = vmatprep.subr.bf16.mxu0 %v5082_v32  ;;  %v4749_v52 = vld [vmem:[#allocation7 + $0x188] ss:$16 sps:$4 sm:$0xff]  }
  0xb4   : > { %2057 = vmatprep.subr.bf16.mxu1 %v5082_v32 }
  0xb6   : > { %1769 = vmatpush1.bf16.msra.mxu0 %v1023_v53  ;;  %v4750_v53 = vld [vmem:[#allocation7 + $0x1a4] ss:$16 sps:$4 sm:$0xff]  }
  0xb7   : > { %2058 = vmatpush1.bf16.msra.mxu1 %v1039_v54  ;;  %1770 = vmatprep.subr.bf16.mxu0 %v5082_v32  ;;  %v4752_v54 = vld [vmem:[#allocation7 + $0x1ac] ss:$16 sps:$4 sm:$0xff]  }
  0xb8   : > { %2059 = vmatprep.subr.bf16.mxu1 %v5082_v32 }
  0xba   : > { %1771 = vmatpush1.bf16.msra.mxu0 %v1024_v55  ;;  %v4754_v55 = vld [vmem:[#allocation7 + $0x1a0] ss:$16 sps:$4 sm:$0xff]  }
  0xbb   : > { %2060 = vmatpush1.bf16.msra.mxu1 %v1040_v56  ;;  %1772 = vmatprep.subr.bf16.mxu0 %v5082_v32  ;;  %v4755_v56 = vld [vmem:[#allocation7 + $0x1a8] ss:$16 sps:$4 sm:$0xff]  }
  0xbc   : > { %2061 = vmatprep.subr.bf16.mxu1 %v5082_v32 }
  0xbe   : > { %1773 = vmatpush1.bf16.msra.mxu0 %v1025_v57  ;;  %v4756_v57 = vld [vmem:[#allocation7 + $0x1c4] ss:$16 sps:$4 sm:$0xff]  }
  0xbf   : > { %2062 = vmatpush1.bf16.msra.mxu1 %v1041_v58  ;;  %1774 = vmatprep.subr.bf16.mxu0 %v5082_v32  ;;  %v4758_v58 = vld [vmem:[#allocation7 + $0x1cc] ss:$16 sps:$4 sm:$0xff]  }
  0xc0   : > { %2063 = vmatprep.subr.bf16.mxu1 %v5082_v32 }
  0xc2   : > { %1775 = vmatpush1.bf16.msra.mxu0 %v1026_v59  ;;  %v4760_v59 = vld [vmem:[#allocation7 + $0x1c0] ss:$16 sps:$4 sm:$0xff]  }
  0xc3   : > { %2064 = vmatpush1.bf16.msra.mxu1 %v1042_v60  ;;  %1776 = vmatprep.subr.bf16.mxu0 %v5082_v32  ;;  %v4761_v60 = vld [vmem:[#allocation7 + $0x1c8] ss:$16 sps:$4 sm:$0xff]  }
  0xc4   : > { %2065 = vmatprep.subr.bf16.mxu1 %v5082_v32 }
  0xc6   : > { %1777 = vmatpush1.bf16.msra.mxu0 %v1027_v61  ;;  %v4762_v61 = vld [vmem:[#allocation7 + $0x1e4] ss:$16 sps:$4 sm:$0xff]  }
  0xc7   : > { %2066 = vmatpush1.bf16.msra.mxu1 %v1043_v62  ;;  %1778 = vmatprep.subr.bf16.mxu0 %v5082_v32  ;;  %v4764_v62 = vld [vmem:[#allocation7 + $0x1ec] ss:$16 sps:$4 sm:$0xff]  }
  0xc8   : > { %2067 = vmatprep.subr.bf16.mxu1 %v5082_v32 }
  0xca   : > { %1779 = vmatpush1.bf16.msra.mxu0 %v1028_v63  ;;  %v4766_v63 = vld [vmem:[#allocation7 + $0x1e0] ss:$16 sps:$4 sm:$0xff]  }
  0xcb   : > { %2068 = vmatpush1.bf16.msra.mxu1 %v1044_v0  ;;  %1780 = vmatprep.subr.bf16.mxu0 %v5082_v32  ;;  %v4767_v0 = vld [vmem:[#allocation7 + $0x1e8] ss:$16 sps:$4 sm:$0xff]  }
  0xcc   : > { %2069 = vmatprep.subr.bf16.mxu1 %v5082_v32  ;;  %v4719_v32 = vld [vmem:[#allocation7 + $0xe8] ss:$16 sps:$4 sm:$0xff]  }
  0xce   : > { %1781 = vmatpush1.bf16.msra.mxu0 %v1029_v1  ;;  %v4768_v1 = vld [vmem:[#allocation7 + $0x204] ss:$16 sps:$4 sm:$0xff]  }
  0xcf   : > { %2070 = vmatpush1.bf16.msra.mxu1 %v1045_v2  ;;  %v4770_v2 = vld [vmem:[#allocation7 + $0x20c] ss:$16 sps:$4 sm:$0xff]  }
  0xd1   : > { %1783 = vmatmul.mubr.bf16.vlgmr.msra.gmra.mrb[0].mxu0 %v4672_v3  ;;  %v4772_v3 = vld [vmem:[#allocation7 + $0x200] ss:$16 sps:$4 sm:$0xff]  }
  0xd2   : > { %2072 = vmatmul.mubr.bf16.vlgmr.msra.gmra.mrb[0].mxu1 %v4675_v4  ;;  %1790 = vmatprep.mubr.bf16.mxu0 %v4678_v5  ;;  %v4773_v4 = vld [vmem:[#allocation7 + $0x208] ss:$16 sps:$4 sm:$0xff]   ;;  %v4774_v5 = vld [vmem:[#allocation7 + $0x224] ss:$16 sps:$4 sm:$0xff]  }
  0xd3   : > { %2079 = vmatprep.mubr.bf16.mxu1 %v4680_v6  ;;  %v4776_v6 = vld [vmem:[#allocation7 + $0x22c] ss:$16 sps:$4 sm:$0xff]  }
  0xd9   : > { %1791 = vmatmul.mubr.bf16.gmra.mrb[4].mxu0 %v4682_v7  ;;  %v4778_v7 = vld [vmem:[#allocation7 + $0x220] ss:$16 sps:$4 sm:$0xff]  }
  0xda   : > { %2080 = vmatmul.mubr.bf16.gmra.mrb[4].mxu1 %v4683_v8  ;;  %1798 = vmatprep.mubr.bf16.mxu0 %v4684_v9  ;;  %v4779_v8 = vld [vmem:[#allocation7 + $0x228] ss:$16 sps:$4 sm:$0xff]   ;;  %v4780_v9 = vld [vmem:[#allocation7 + $0x244] ss:$16 sps:$4 sm:$0xff]  }
  0xdb   : > { %2087 = vmatprep.mubr.bf16.mxu1 %v4686_v10  ;;  %v4782_v10 = vld [vmem:[#allocation7 + $0x24c] ss:$16 sps:$4 sm:$0xff]  }
  0xe1   : > { %1799 = vmatmul.mubr.bf16.gmra.mrb[8].mxu0 %v4688_v11  ;;  %v4784_v11 = vld [vmem:[#allocation7 + $0x240] ss:$16 sps:$4 sm:$0xff]  }
  0xe2   : > { %2088 = vmatmul.mubr.bf16.gmra.mrb[8].mxu1 %v4689_v12  ;;  %1806 = vmatprep.mubr.bf16.mxu0 %v4690_v13  ;;  %v4785_v12 = vld [vmem:[#allocation7 + $0x248] ss:$16 sps:$4 sm:$0xff]   ;;  %v4786_v13 = vld [vmem:[#allocation7 + $0x264] ss:$16 sps:$4 sm:$0xff]  }
  0xe3   : > { %2095 = vmatprep.mubr.bf16.mxu1 %v4692_v14  ;;  %v4788_v14 = vld [vmem:[#allocation7 + $0x26c] ss:$16 sps:$4 sm:$0xff]  }
  0xe9   : > { %1807 = vmatmul.mubr.bf16.gmra.mrb[12].mxu0 %v4694_v15  ;;  %v4790_v15 = vld [vmem:[#allocation7 + $0x260] ss:$16 sps:$4 sm:$0xff]  }
  0xea   : > { %2096 = vmatmul.mubr.bf16.gmra.mrb[12].mxu1 %v4695_v16  ;;  %1814 = vmatprep.mubr.bf16.mxu0 %v4696_v17  ;;  %v4791_v16 = vld [vmem:[#allocation7 + $0x268] ss:$16 sps:$4 sm:$0xff]   ;;  %v4792_v17 = vld [vmem:[#allocation7 + $0x284] ss:$16 sps:$4 sm:$0xff]  }
  0xeb   : > { %2103 = vmatprep.mubr.bf16.mxu1 %v4698_v18  ;;  %v4794_v18 = vld [vmem:[#allocation7 + $0x28c] ss:$16 sps:$4 sm:$0xff]  }
  0xf1   : > { %1815 = vmatmul.mubr.bf16.gmra.mrb[16].mxu0 %v4700_v19  ;;  %v4796_v19 = vld [vmem:[#allocation7 + $0x280] ss:$16 sps:$4 sm:$0xff]  }
  0xf2   : > { %2104 = vmatmul.mubr.bf16.gmra.mrb[16].mxu1 %v4701_v20  ;;  %1822 = vmatprep.mubr.bf16.mxu0 %v4702_v21  ;;  %v4797_v20 = vld [vmem:[#allocation7 + $0x288] ss:$16 sps:$4 sm:$0xff]   ;;  %v4798_v21 = vld [vmem:[#allocation7 + $0x2a4] ss:$16 sps:$4 sm:$0xff]  }
  0xf3   : > { %2111 = vmatprep.mubr.bf16.mxu1 %v4704_v22  ;;  %v4800_v22 = vld [vmem:[#allocation7 + $0x2ac] ss:$16 sps:$4 sm:$0xff]  }
  0xf9   : > { %1823 = vmatmul.mubr.bf16.gmra.mrb[20].mxu0 %v4706_v23  ;;  %v4802_v23 = vld [vmem:[#allocation7 + $0x2a0] ss:$16 sps:$4 sm:$0xff]  }
  0xfa   : > { %2112 = vmatmul.mubr.bf16.gmra.mrb[20].mxu1 %v4707_v24  ;;  %1830 = vmatprep.mubr.bf16.mxu0 %v4708_v25  ;;  %v4803_v24 = vld [vmem:[#allocation7 + $0x2a8] ss:$16 sps:$4 sm:$0xff]   ;;  %v4804_v25 = vld [vmem:[#allocation7 + $0x2c4] ss:$16 sps:$4 sm:$0xff]  }
  0xfb   : > { %2119 = vmatprep.mubr.bf16.mxu1 %v4710_v26  ;;  %v4806_v26 = vld [vmem:[#allocation7 + $0x2cc] ss:$16 sps:$4 sm:$0xff]  }
 0x101   : > { %1831 = vmatmul.mubr.bf16.gmra.mrb[24].mxu0 %v4712_v27  ;;  %v4808_v27 = vld [vmem:[#allocation7 + $0x2c0] ss:$16 sps:$4 sm:$0xff]  }
 0x102   : > { %2120 = vmatmul.mubr.bf16.gmra.mrb[24].mxu1 %v4713_v28  ;;  %1838 = vmatprep.mubr.bf16.mxu0 %v4714_v29  ;;  %v4809_v28 = vld [vmem:[#allocation7 + $0x2c8] ss:$16 sps:$4 sm:$0xff]   ;;  %v4810_v29 = vld [vmem:[#allocation7 + $0x2e4] ss:$16 sps:$4 sm:$0xff]  }
 0x103   : > { %2127 = vmatprep.mubr.bf16.mxu1 %v4716_v30  ;;  %v4812_v30 = vld [vmem:[#allocation7 + $0x2ec] ss:$16 sps:$4 sm:$0xff]  }
 0x109   : > { %1839 = vmatmul.mubr.bf16.gmra.mrb[28].mxu0 %v4718_v31  ;;  %v4814_v31 = vld [vmem:[#allocation7 + $0x2e0] ss:$16 sps:$4 sm:$0xff]  }
 0x10a   : > { %2128 = vmatmul.mubr.bf16.gmra.mrb[28].mxu1 %v4719_v32  ;;  %1846 = vmatprep.mubr.bf16.mxu0 %v4720_v33  ;;  %v4815_v32 = vld [vmem:[#allocation7 + $0x2e8] ss:$16 sps:$4 sm:$0xff]   ;;  %v4816_v33 = vld [vmem:[#allocation7 + $0x304] ss:$16 sps:$4 sm:$0xff]  }
 0x10b   : > { %2135 = vmatprep.mubr.bf16.mxu1 %v4722_v34  ;;  %v4818_v34 = vld [vmem:[#allocation7 + $0x30c] ss:$16 sps:$4 sm:$0xff]  }
 0x111   : > { %1847 = vmatmul.mubr.bf16.gmra.mrb[32].mxu0 %v4724_v35  ;;  %v4820_v35 = vld [vmem:[#allocation7 + $0x300] ss:$16 sps:$4 sm:$0xff]  }
 0x112   : > { %2136 = vmatmul.mubr.bf16.gmra.mrb[32].mxu1 %v4725_v36  ;;  %1854 = vmatprep.mubr.bf16.mxu0 %v4726_v37  ;;  %v4821_v36 = vld [vmem:[#allocation7 + $0x308] ss:$16 sps:$4 sm:$0xff]   ;;  %v4822_v37 = vld [vmem:[#allocation7 + $0x324] ss:$16 sps:$4 sm:$0xff]  }
 0x113   : > { %2143 = vmatprep.mubr.bf16.mxu1 %v4728_v38  ;;  %v4824_v38 = vld [vmem:[#allocation7 + $0x32c] ss:$16 sps:$4 sm:$0xff]  }
 0x119   : > { %1855 = vmatmul.mubr.bf16.gmra.mrb[36].mxu0 %v4730_v39  ;;  %v4826_v39 = vld [vmem:[#allocation7 + $0x320] ss:$16 sps:$4 sm:$0xff]  }
 0x11a   : > { %2144 = vmatmul.mubr.bf16.gmra.mrb[36].mxu1 %v4731_v40  ;;  %1862 = vmatprep.mubr.bf16.mxu0 %v4732_v41  ;;  %v4827_v40 = vld [vmem:[#allocation7 + $0x328] ss:$16 sps:$4 sm:$0xff]   ;;  %v4828_v41 = vld [vmem:[#allocation7 + $0x344] ss:$16 sps:$4 sm:$0xff]  }
 0x11b   : > { %2151 = vmatprep.mubr.bf16.mxu1 %v4734_v42  ;;  %v4830_v42 = vld [vmem:[#allocation7 + $0x34c] ss:$16 sps:$4 sm:$0xff]  }
 0x121   : > { %1863 = vmatmul.mubr.bf16.gmra.mrb[40].mxu0 %v4736_v43  ;;  %v4115_v43 = vld [vmem:[#allocation4] sm:$0xff]  }
 0x122   : > { %2152 = vmatmul.mubr.bf16.gmra.mrb[40].mxu1 %v4737_v44  ;;  %1870 = vmatprep.mubr.bf16.mxu0 %v4738_v45  ;;  %v4832_v44 = vld [vmem:[#allocation7 + $0x340] ss:$16 sps:$4 sm:$0xff]   ;;  %v4833_v45 = vld [vmem:[#allocation7 + $0x348] ss:$16 sps:$4 sm:$0xff]  }
 0x123   : > { %2159 = vmatprep.mubr.bf16.mxu1 %v4740_v46  ;;  %v4834_v46 = vld [vmem:[#allocation7 + $0x364] ss:$16 sps:$4 sm:$0xff]  }
 0x129   : > { %1871 = vmatmul.mubr.bf16.gmra.mrb[44].mxu0 %v4742_v47  ;;  %v4836_v47 = vld [vmem:[#allocation7 + $0x36c] ss:$16 sps:$4 sm:$0xff]  }
 0x12a   : > { %2160 = vmatmul.mubr.bf16.gmra.mrb[44].mxu1 %v4743_v48  ;;  %1878 = vmatprep.mubr.bf16.mxu0 %v4744_v49  ;;  %v4116_v48 = vunpack.c.l.bf16 %v4115_v43  ;;  %v4117_v49 = vunpack.c.h.bf16 %v4115_v43 }
 0x12b   : > { %2167 = vmatprep.mubr.bf16.mxu1 %v4746_v50 }
 0x12c   : > { %v743_v50 = vmul.f32 0.5, %v4116_v48 }
 0x131   : > { %1879 = vmatmul.mubr.bf16.gmra.mrb[48].mxu0 %v4748_v51 }
 0x132   : > { %2168 = vmatmul.mubr.bf16.gmra.mrb[48].mxu1 %v4749_v52  ;;  %1886 = vmatprep.mubr.bf16.mxu0 %v4750_v53  ;;  %v744_v53 = vmul.f32 0.5, %v4117_v49 }
 0x133   : > { %2175 = vmatprep.mubr.bf16.mxu1 %v4752_v54  ;;  %v4242_v54 = vld [vmem:[#allocation4 + $0x8] sm:$0xff]  }
 0x139   : > { %1887 = vmatmul.mubr.bf16.gmra.mrb[52].mxu0 %v4754_v55 }
 0x13a   : > { %2176 = vmatmul.mubr.bf16.gmra.mrb[52].mxu1 %v4755_v56  ;;  %1894 = vmatprep.mubr.bf16.mxu0 %v4756_v57 }
 0x13b   : > { %2183 = vmatprep.mubr.bf16.mxu1 %v4758_v58  ;;  %v4838_v58 = vld [vmem:[#allocation7 + $0x360] ss:$16 sps:$4 sm:$0xff]  }
 0x141   : > { %1895 = vmatmul.mubr.bf16.gmra.mrb[56].mxu0 %v4760_v59  ;;  %v4839_v59 = vld [vmem:[#allocation7 + $0x368] ss:$16 sps:$4 sm:$0xff]  }
 0x142   : > { %2184 = vmatmul.mubr.bf16.gmra.mrb[56].mxu1 %v4761_v60  ;;  %1902 = vmatprep.mubr.bf16.mxu0 %v4762_v61 }
 0x143   : > { %2191 = vmatprep.mubr.bf16.mxu1 %v4764_v62  ;;  %v4840_v62 = vld [vmem:[#allocation7 + $0x384] ss:$16 sps:$4 sm:$0xff]  }
 0x149   : > { %1903 = vmatmul.mubr.bf16.gmra.mrb[60].mxu0 %v4766_v63  ;;  %v4842_v63 = vld [vmem:[#allocation7 + $0x38c] ss:$16 sps:$4 sm:$0xff]  }
 0x14a   : > { %2192 = vmatmul.mubr.bf16.gmra.mrb[60].mxu1 %v4767_v0  ;;  %1910 = vmatprep.mubr.bf16.mxu0 %v4768_v1 }
 0x14b   : > { %2199 = vmatprep.mubr.bf16.mxu1 %v4770_v2 }
 0x151   : > { %1911 = vmatmul.mubr.bf16.gmra.mrb[64].mxu0 %v4772_v3 }
 0x152   : > { %2200 = vmatmul.mubr.bf16.gmra.mrb[64].mxu1 %v4773_v4  ;;  %1918 = vmatprep.mubr.bf16.mxu0 %v4774_v5  ;;  %v4120_v4 = vunpack.c.l.bf16 %v4242_v54  ;;  %v4121_v5 = vunpack.c.h.bf16 %v4242_v54 }
 0x153   : > { %2207 = vmatprep.mubr.bf16.mxu1 %v4776_v6 }
 0x159   : > { %1919 = vmatmul.mubr.bf16.gmra.mrb[68].mxu0 %v4778_v7  ;;  %v745_v7 = vmul.f32 0.5, %v4120_v4 }
 0x15a   : > { %2208 = vmatmul.mubr.bf16.gmra.mrb[68].mxu1 %v4779_v8  ;;  %1926 = vmatprep.mubr.bf16.mxu0 %v4780_v9 }
 0x15b   : > { %2215 = vmatprep.mubr.bf16.mxu1 %v4782_v10  ;;  %v746_v10 = vmul.f32 0.5, %v4121_v5 }
 0x161   : > { %1927 = vmatmul.mubr.bf16.gmra.mrb[72].mxu0 %v4784_v11  ;;  %v4243_v11 = vld [vmem:[#allocation4 + $0x10] sm:$0xff]  }
 0x162   : > { %2216 = vmatmul.mubr.bf16.gmra.mrb[72].mxu1 %v4785_v12  ;;  %1934 = vmatprep.mubr.bf16.mxu0 %v4786_v13 }
 0x163   : > { %2223 = vmatprep.mubr.bf16.mxu1 %v4788_v14 }
 0x169   : > { %1935 = vmatmul.mubr.bf16.gmra.mrb[76].mxu0 %v4790_v15  ;;  %v4844_v15 = vld [vmem:[#allocation7 + $0x380] ss:$16 sps:$4 sm:$0xff]  }
 0x16a   : > { %2224 = vmatmul.mubr.bf16.gmra.mrb[76].mxu1 %v4791_v16  ;;  %1942 = vmatprep.mubr.bf16.mxu0 %v4792_v17  ;;  %v4845_v16 = vld [vmem:[#allocation7 + $0x388] ss:$16 sps:$4 sm:$0xff]  }
 0x16b   : > { %2231 = vmatprep.mubr.bf16.mxu1 %v4794_v18 }
 0x171   : > { %1943 = vmatmul.mubr.bf16.gmra.mrb[80].mxu0 %v4796_v19  ;;  %v4846_v19 = vld [vmem:[#allocation7 + $0x3a4] ss:$16 sps:$4 sm:$0xff]  }
 0x172   : > { %2232 = vmatmul.mubr.bf16.gmra.mrb[80].mxu1 %v4797_v20  ;;  %1950 = vmatprep.mubr.bf16.mxu0 %v4798_v21  ;;  %v4848_v20 = vld [vmem:[#allocation7 + $0x3ac] ss:$16 sps:$4 sm:$0xff]  }
 0x173   : > { %2239 = vmatprep.mubr.bf16.mxu1 %v4800_v22 }
 0x179   : > { %1951 = vmatmul.mubr.bf16.gmra.mrb[84].mxu0 %v4802_v23 }
 0x17a   : > { %2240 = vmatmul.mubr.bf16.gmra.mrb[84].mxu1 %v4803_v24  ;;  %1958 = vmatprep.mubr.bf16.mxu0 %v4804_v25  ;;  %v4124_v25 = vunpack.c.l.bf16 %v4243_v11 }
 0x17b   : > { %2247 = vmatprep.mubr.bf16.mxu1 %v4806_v26  ;;  %v4125_v26 = vunpack.c.h.bf16 %v4243_v11 }
 0x181   : > { %1959 = vmatmul.mubr.bf16.gmra.mrb[88].mxu0 %v4808_v27 }
 0x182   : > { %2248 = vmatmul.mubr.bf16.gmra.mrb[88].mxu1 %v4809_v28  ;;  %1966 = vmatprep.mubr.bf16.mxu0 %v4810_v29  ;;  %v747_v28 = vmul.f32 0.5, %v4124_v25 }
 0x183   : > { %2255 = vmatprep.mubr.bf16.mxu1 %v4812_v30 }
 0x189   : > { %1967 = vmatmul.mubr.bf16.gmra.mrb[92].mxu0 %v4814_v31  ;;  %v748_v31 = vmul.f32 0.5, %v4125_v26 }
 0x18a   : > { %2256 = vmatmul.mubr.bf16.gmra.mrb[92].mxu1 %v4815_v32  ;;  %1974 = vmatprep.mubr.bf16.mxu0 %v4816_v33  ;;  %v4244_v32 = vld [vmem:[#allocation4 + $0x18] sm:$0xff]  }
 0x18b   : > { %2263 = vmatprep.mubr.bf16.mxu1 %v4818_v34 }
 0x191   : > { %1975 = vmatmul.mubr.bf16.gmra.mrb[96].mxu0 %v4820_v35 }
 0x192   : > { %2264 = vmatmul.mubr.bf16.gmra.mrb[96].mxu1 %v4821_v36  ;;  %1982 = vmatprep.mubr.bf16.mxu0 %v4822_v37  ;;  %v4850_v36 = vld [vmem:[#allocation7 + $0x3a0] ss:$16 sps:$4 sm:$0xff]   ;;  %v4851_v37 = vld [vmem:[#allocation7 + $0x3a8] ss:$16 sps:$4 sm:$0xff]  }
 0x193   : > { %2271 = vmatprep.mubr.bf16.mxu1 %v4824_v38 }
 0x199   : > { %1983 = vmatmul.mubr.bf16.gmra.mrb[100].mxu0 %v4826_v39 }
 0x19a   : > { %2272 = vmatmul.mubr.bf16.gmra.mrb[100].mxu1 %v4827_v40  ;;  %1990 = vmatprep.mubr.bf16.mxu0 %v4828_v41  ;;  %v4852_v40 = vld [vmem:[#allocation7 + $0x3c4] ss:$16 sps:$4 sm:$0xff]   ;;  %v4854_v41 = vld [vmem:[#allocation7 + $0x3cc] ss:$16 sps:$4 sm:$0xff]  }
 0x19b   : > { %2279 = vmatprep.mubr.bf16.mxu1 %v4830_v42 }
 0x1a1   : > { %1991 = vmatmul.mubr.bf16.gmra.mrb[104].mxu0 %v4832_v44 }
 0x1a2   : > { %2280 = vmatmul.mubr.bf16.gmra.mrb[104].mxu1 %v4833_v45  ;;  %1998 = vmatprep.mubr.bf16.mxu0 %v4834_v46  ;;  %v4128_v46 = vunpack.c.l.bf16 %v4244_v32 }
 0x1a3   : > { %2287 = vmatprep.mubr.bf16.mxu1 %v4836_v47  ;;  %v4129_v47 = vunpack.c.h.bf16 %v4244_v32 }
 0x1a4   : > { %v1784_v51 = vpop.f32.mrb[0].mxu0  ;;  %v749_v49 = vmul.f32 0.5, %v4128_v46 }
 0x1a5   : > { %v2073_v52 = vpop.f32.mrb[0].mxu1  ;;  %v1786_v56 = vpop.f32.mrb[1].mxu0 }
 0x1a6   : > { %v2074_v55 = vadd.f32 %v2073_v52, %v1784_v51  ;;  %v2075_v57 = vpop.f32.mrb[1].mxu1  ;;  %v1787_v60 = vpop.f32.mrb[2].mxu0  ;;  %v750_v52 = vmul.f32 0.5, %v4129_v47 }
 0x1a7   : > { %v2076_v61 = vpop.f32.mrb[2].mxu1  ;;  %v1789_v2 = vpop.f32.mrb[3].mxu0  ;;  %v4856_v57 = vld [vmem:[#allocation7 + $0x3c0] ss:$16 sps:$4 sm:$0xff]  }
 0x1a8   : > { %v2328_v0 = vadd.f32 %v2074_v55, %v743_v50  ;;  %v2077_v1 = vadd.f32 %v2076_v61, %v1787_v60  ;;  %v2078_v3 = vpop.f32.mrb[3].mxu1  ;;  %v4858_v61 = vld [vmem:[#allocation7 + $0x3e4] ss:$16 sps:$4 sm:$0xff]  }
 0x1a9   : > { %1999 = vmatmul.mubr.bf16.gmra.mrb[108].mxu0 %v4838_v58  ;;  %v4857_v58 = vld [vmem:[#allocation7 + $0x3c8] ss:$16 sps:$4 sm:$0xff]  }
 0x1aa   : > { %2392 = vst [vmem:[#allocation3] sm:$0xff] %v2328_v0  ;;  %v2329_v6 = vadd.f32 %v2077_v1, %v744_v53  ;;  %2288 = vmatmul.mubr.bf16.gmra.mrb[108].mxu1 %v4839_v59  ;;  %2006 = vmatprep.mubr.bf16.mxu0 %v4840_v62  ;;  %v4245_v53 = vld [vmem:[#allocation4 + $0x20] sm:$0xff]   ;;  %v4860_v62 = vld [vmem:[#allocation7 + $0x3ec] ss:$16 sps:$4 sm:$0xff]  }
 0x1ab   : > { %2295 = vmatprep.mubr.bf16.mxu1 %v4842_v63  ;;  %v4132_v3 = vunpack.c.l.bf16 %v4245_v53  ;;  %v4133_v4 = vunpack.c.h.bf16 %v4245_v53 }
 0x1ac   : > { %2393 = vst [vmem:[#allocation3 + $0x8] sm:$0xff] %v2329_v6  ;;  %v1792_v8 = vpop.f32.mrb[4].mxu0 }
 0x1ad   : > { %v2081_v9 = vpop.f32.mrb[4].mxu1  ;;  %v1794_v13 = vpop.f32.mrb[5].mxu0  ;;  %v751_v6 = vmul.f32 0.5, %v4132_v3 }
 0x1ae   : > { %v2082_v12 = vadd.f32 %v2081_v9, %v1792_v8  ;;  %v2083_v14 = vpop.f32.mrb[5].mxu1  ;;  %v1795_v17 = vpop.f32.mrb[6].mxu0  ;;  %v752_v9 = vmul.f32 0.5, %v4133_v4 }
 0x1af   : > { %v2084_v18 = vpop.f32.mrb[6].mxu1  ;;  %v1797_v23 = vpop.f32.mrb[7].mxu0  ;;  %v4862_v14 = vld [vmem:[#allocation7 + $0x3e0] ss:$16 sps:$4 sm:$0xff]  }
 0x1b0   : > { %v2330_v21 = vadd.f32 %v2082_v12, %v745_v7  ;;  %v2085_v22 = vadd.f32 %v2084_v18, %v1795_v17  ;;  %v2086_v24 = vpop.f32.mrb[7].mxu1 }
 0x1b1   : > { %2007 = vmatmul.mubr.bf16.gmra.mrb[112].mxu0 %v4844_v15  ;;  %v4863_v15 = vld [vmem:[#allocation7 + $0x3e8] ss:$16 sps:$4 sm:$0xff]  }
 0x1b2   : > { %2394 = vst [vmem:[#allocation3 + $0x10] sm:$0xff] %v2330_v21  ;;  %v2331_v27 = vadd.f32 %v2085_v22, %v746_v10  ;;  %2296 = vmatmul.mubr.bf16.gmra.mrb[112].mxu1 %v4845_v16  ;;  %2014 = vmatprep.mubr.bf16.mxu0 %v4846_v19  ;;  %v4246_v10 = vld [vmem:[#allocation4 + $0x28] sm:$0xff]  }
 0x1b3   : > { %2303 = vmatprep.mubr.bf16.mxu1 %v4848_v20  ;;  %v4136_v22 = vunpack.c.l.bf16 %v4246_v10  ;;  %v4137_v24 = vunpack.c.h.bf16 %v4246_v10 }
 0x1b4   : > { %2395 = vst [vmem:[#allocation3 + $0x18] sm:$0xff] %v2331_v27  ;;  %v1800_v29 = vpop.f32.mrb[8].mxu0 }
 0x1b5   : > { %v2089_v30 = vpop.f32.mrb[8].mxu1  ;;  %v1802_v34 = vpop.f32.mrb[9].mxu0  ;;  %v753_v25 = vmul.f32 0.5, %v4136_v22  ;;  %v754_v32 = vmul.f32 0.5, %v4137_v24 }
 0x1b6   : > { %v2090_v33 = vadd.f32 %v2089_v30, %v1800_v29  ;;  %v2091_v35 = vpop.f32.mrb[9].mxu1  ;;  %v1803_v38 = vpop.f32.mrb[10].mxu0 }
 0x1b7   : > { %v2092_v39 = vpop.f32.mrb[10].mxu1  ;;  %v1805_v44 = vpop.f32.mrb[11].mxu0 }
 0x1b8   : > { %v2332_v42 = vadd.f32 %v2090_v33, %v747_v28  ;;  %v2093_v43 = vadd.f32 %v2092_v39, %v1803_v38  ;;  %v2094_v45 = vpop.f32.mrb[11].mxu1  ;;  %v4247_v28 = vld [vmem:[#allocation4 + $0x30] sm:$0xff]  }
 0x1b9   : > { %2015 = vmatmul.mubr.bf16.gmra.mrb[116].mxu0 %v4850_v36  ;;  %v4140_v39 = vunpack.c.l.bf16 %v4247_v28  ;;  %v4248_v45 = vld [vmem:[#allocation4 + $0x38] sm:$0xff]  }
 0x1ba   : > { %2396 = vst [vmem:[#allocation3 + $0x20] sm:$0xff] %v2332_v42  ;;  %v2333_v48 = vadd.f32 %v2093_v43, %v748_v31  ;;  %2304 = vmatmul.mubr.bf16.gmra.mrb[116].mxu1 %v4851_v37  ;;  %2022 = vmatprep.mubr.bf16.mxu0 %v4852_v40 }
 0x1bb   : > { %2311 = vmatprep.mubr.bf16.mxu1 %v4854_v41  ;;  %v4141_v41 = vunpack.c.h.bf16 %v4247_v28  ;;  %v755_v42 = vmul.f32 0.5, %v4140_v39 }
 0x1bc   : > { %2397 = vst [vmem:[#allocation3 + $0x28] sm:$0xff] %v2333_v48  ;;  %v1808_v50 = vpop.f32.mrb[12].mxu0 }
 0x1bd   : > { %v2097_v51 = vpop.f32.mrb[12].mxu1  ;;  %v1810_v55 = vpop.f32.mrb[13].mxu0 }
 0x1be   : > { %v2098_v54 = vadd.f32 %v2097_v51, %v1808_v50  ;;  %v2099_v56 = vpop.f32.mrb[13].mxu1  ;;  %v1811_v59 = vpop.f32.mrb[14].mxu0 }
 0x1bf   : > { %v2100_v60 = vpop.f32.mrb[14].mxu1  ;;  %v1813_v1 = vpop.f32.mrb[15].mxu0  ;;  %v4144_v56 = vunpack.c.l.bf16 %v4248_v45 }
 0x1c0   : > { %v2334_v63 = vadd.f32 %v2098_v54, %v749_v49  ;;  %v2101_v0 = vadd.f32 %v2100_v60, %v1811_v59  ;;  %v2102_v2 = vpop.f32.mrb[15].mxu1  ;;  %v756_v49 = vmul.f32 0.5, %v4141_v41 }
 0x1c1   : > { %2023 = vmatmul.mubr.bf16.gmra.mrb[120].mxu0 %v4856_v57  ;;  %v757_v59 = vmul.f32 0.5, %v4144_v56 }
 0x1c2   : > { %2398 = vst [vmem:[#allocation3 + $0x30] sm:$0xff] %v2334_v63  ;;  %v2335_v5 = vadd.f32 %v2101_v0, %v750_v52  ;;  %2312 = vmatmul.mubr.bf16.gmra.mrb[120].mxu1 %v4857_v58  ;;  %2030 = vmatprep.mubr.bf16.mxu0 %v4858_v61  ;;  %v4145_v58 = vunpack.c.h.bf16 %v4248_v45 }
 0x1c3   : > { %2319 = vmatprep.mubr.bf16.mxu1 %v4860_v62  ;;  %v4249_v62 = vld [vmem:[#allocation4 + $0x40] sm:$0xff]  }
 0x1c4   : > { %2399 = vst [vmem:[#allocation3 + $0x38] sm:$0xff] %v2335_v5  ;;  %v1816_v7 = vpop.f32.mrb[16].mxu0  ;;  %v758_v2 = vmul.f32 0.5, %v4145_v58 }
 0x1c5   : > { %v2105_v8 = vpop.f32.mrb[16].mxu1  ;;  %v1818_v12 = vpop.f32.mrb[17].mxu0 }
 0x1c6   : > { %v2106_v11 = vadd.f32 %v2105_v8, %v1816_v7  ;;  %v2107_v13 = vpop.f32.mrb[17].mxu1  ;;  %v1819_v16 = vpop.f32.mrb[18].mxu0 }
 0x1c7   : > { %v2108_v17 = vpop.f32.mrb[18].mxu1  ;;  %v1821_v20 = vpop.f32.mrb[19].mxu0 }
 0x1c8   : > { %v2336_v18 = vadd.f32 %v2106_v11, %v751_v6  ;;  %v2109_v19 = vadd.f32 %v2108_v17, %v1819_v16  ;;  %v2110_v21 = vpop.f32.mrb[19].mxu1  ;;  %v4149_v11 = vunpack.c.h.bf16 %v4249_v62 }
 0x1c9   : > { %2031 = vmatmul.mubr.bf16.gmra.mrb[124].mxu0 %v4862_v14 }
 0x1ca   : > { %2400 = vst [vmem:[#allocation3 + $0x40] sm:$0xff] %v2336_v18  ;;  %v2337_v23 = vadd.f32 %v2109_v19, %v752_v9  ;;  %2320 = vmatmul.mubr.bf16.gmra.mrb[124].mxu1 %v4863_v15  ;;  %v4148_v9 = vunpack.c.l.bf16 %v4249_v62  ;;  %v4250_v15 = vld [vmem:[#allocation4 + $0x48] sm:$0xff]   ;;  %v760_v19 = vmul.f32 0.5, %v4149_v11 }
 0x1cb   : > { %v4153_v28 = vunpack.c.h.bf16 %v4250_v15 }
 0x1cc   : > { %2401 = vst [vmem:[#allocation3 + $0x48] sm:$0xff] %v2337_v23  ;;  %v1824_v26 = vpop.f32.mrb[20].mxu0  ;;  %v759_v12 = vmul.f32 0.5, %v4148_v9 }
 0x1cd   : > { %v2113_v27 = vpop.f32.mrb[20].mxu1  ;;  %v1826_v30 = vpop.f32.mrb[21].mxu0 }
 0x1ce   : > { %v2114_v29 = vadd.f32 %v2113_v27, %v1824_v26  ;;  %v2115_v31 = vpop.f32.mrb[21].mxu1  ;;  %v1827_v33 = vpop.f32.mrb[22].mxu0  ;;  %v4152_v26 = vunpack.c.l.bf16 %v4250_v15 }
 0x1cf   : > { %v2116_v34 = vpop.f32.mrb[22].mxu1  ;;  %v1829_v37 = vpop.f32.mrb[23].mxu0 }
 0x1d0   : > { %v2338_v35 = vadd.f32 %v2114_v29, %v753_v25  ;;  %v2117_v36 = vadd.f32 %v2116_v34, %v1827_v33  ;;  %v2118_v38 = vpop.f32.mrb[23].mxu1  ;;  %v761_v29 = vmul.f32 0.5, %v4152_v26 }
 0x1d2   : > { %2402 = vst [vmem:[#allocation3 + $0x50] sm:$0xff] %v2338_v35  ;;  %v2339_v40 = vadd.f32 %v2117_v36, %v754_v32  ;;  %v4251_v32 = vld [vmem:[#allocation4 + $0x50] sm:$0xff]   ;;  %v762_v36 = vmul.f32 0.5, %v4153_v28 }
 0x1d3   : > { %v4157_v45 = vunpack.c.h.bf16 %v4251_v32 }
 0x1d4   : > { %2403 = vst [vmem:[#allocation3 + $0x58] sm:$0xff] %v2339_v40  ;;  %v1832_v43 = vpop.f32.mrb[24].mxu0 }
 0x1d5   : > { %v2121_v44 = vpop.f32.mrb[24].mxu1  ;;  %v1834_v47 = vpop.f32.mrb[25].mxu0 }
 0x1d6   : > { %v2122_v46 = vadd.f32 %v2121_v44, %v1832_v43  ;;  %v2123_v48 = vpop.f32.mrb[25].mxu1  ;;  %v1835_v50 = vpop.f32.mrb[26].mxu0  ;;  %v4156_v43 = vunpack.c.l.bf16 %v4251_v32 }
 0x1d7   : > { %v2124_v51 = vpop.f32.mrb[26].mxu1  ;;  %v1837_v54 = vpop.f32.mrb[27].mxu0 }
 0x1d8   : > { %v2340_v52 = vadd.f32 %v2122_v46, %v755_v42  ;;  %v2125_v53 = vadd.f32 %v2124_v51, %v1835_v50  ;;  %v2126_v55 = vpop.f32.mrb[27].mxu1  ;;  %v763_v46 = vmul.f32 0.5, %v4156_v43 }
 0x1da   : > { %2404 = vst [vmem:[#allocation3 + $0x60] sm:$0xff] %v2340_v52  ;;  %v2341_v57 = vadd.f32 %v2125_v53, %v756_v49  ;;  %v4252_v49 = vld [vmem:[#allocation4 + $0x58] sm:$0xff]   ;;  %v764_v53 = vmul.f32 0.5, %v4157_v45 }
 0x1db   : > { %v4161_v62 = vunpack.c.h.bf16 %v4252_v49 }
 0x1dc   : > { %2405 = vst [vmem:[#allocation3 + $0x68] sm:$0xff] %v2341_v57  ;;  %v1840_v60 = vpop.f32.mrb[28].mxu0 }
 0x1dd   : > { %v2129_v61 = vpop.f32.mrb[28].mxu1  ;;  %v1842_v0 = vpop.f32.mrb[29].mxu0 }
 0x1de   : > { %v2130_v63 = vadd.f32 %v2129_v61, %v1840_v60  ;;  %v2131_v1 = vpop.f32.mrb[29].mxu1  ;;  %v1843_v3 = vpop.f32.mrb[30].mxu0  ;;  %v4160_v60 = vunpack.c.l.bf16 %v4252_v49 }
 0x1df   : > { %v2132_v4 = vpop.f32.mrb[30].mxu1  ;;  %v1845_v7 = vpop.f32.mrb[31].mxu0 }
 0x1e0   : > { %v2342_v5 = vadd.f32 %v2130_v63, %v757_v59  ;;  %v2133_v6 = vadd.f32 %v2132_v4, %v1843_v3  ;;  %v2134_v8 = vpop.f32.mrb[31].mxu1  ;;  %v765_v63 = vmul.f32 0.5, %v4160_v60 }
 0x1e2   : > { %2406 = vst [vmem:[#allocation3 + $0x70] sm:$0xff] %v2342_v5  ;;  %v2343_v10 = vadd.f32 %v2133_v6, %v758_v2  ;;  %v4253_v2 = vld [vmem:[#allocation4 + $0x60] sm:$0xff]   ;;  %v766_v6 = vmul.f32 0.5, %v4161_v62 }
 0x1e3   : > { %v4165_v15 = vunpack.c.h.bf16 %v4253_v2 }
 0x1e4   : > { %2407 = vst [vmem:[#allocation3 + $0x78] sm:$0xff] %v2343_v10  ;;  %v1848_v13 = vpop.f32.mrb[32].mxu0 }
 0x1e5   : > { %v2137_v14 = vpop.f32.mrb[32].mxu1  ;;  %v1850_v17 = vpop.f32.mrb[33].mxu0 }
 0x1e6   : > { %v2138_v16 = vadd.f32 %v2137_v14, %v1848_v13  ;;  %v2139_v18 = vpop.f32.mrb[33].mxu1  ;;  %v1851_v20 = vpop.f32.mrb[34].mxu0  ;;  %v4164_v13 = vunpack.c.l.bf16 %v4253_v2 }
 0x1e7   : > { %v2140_v21 = vpop.f32.mrb[34].mxu1  ;;  %v1853_v24 = vpop.f32.mrb[35].mxu0 }
 0x1e8   : > { %v2344_v22 = vadd.f32 %v2138_v16, %v759_v12  ;;  %v2141_v23 = vadd.f32 %v2140_v21, %v1851_v20  ;;  %v2142_v25 = vpop.f32.mrb[35].mxu1  ;;  %v767_v16 = vmul.f32 0.5, %v4164_v13 }
 0x1ea   : > { %2408 = vst [vmem:[#allocation3 + $0x80] sm:$0xff] %v2344_v22  ;;  %v2345_v27 = vadd.f32 %v2141_v23, %v760_v19  ;;  %v4254_v19 = vld [vmem:[#allocation4 + $0x68] sm:$0xff]   ;;  %v768_v23 = vmul.f32 0.5, %v4165_v15 }
 0x1eb   : > { %v4169_v32 = vunpack.c.h.bf16 %v4254_v19 }
 0x1ec   : > { %2409 = vst [vmem:[#allocation3 + $0x88] sm:$0xff] %v2345_v27  ;;  %v1856_v30 = vpop.f32.mrb[36].mxu0 }
 0x1ed   : > { %v2145_v31 = vpop.f32.mrb[36].mxu1  ;;  %v1858_v34 = vpop.f32.mrb[37].mxu0 }
 0x1ee   : > { %v2146_v33 = vadd.f32 %v2145_v31, %v1856_v30  ;;  %v2147_v35 = vpop.f32.mrb[37].mxu1  ;;  %v1859_v37 = vpop.f32.mrb[38].mxu0  ;;  %v4168_v30 = vunpack.c.l.bf16 %v4254_v19 }
 0x1ef   : > { %v2148_v38 = vpop.f32.mrb[38].mxu1  ;;  %v1861_v41 = vpop.f32.mrb[39].mxu0 }
 0x1f0   : > { %v2346_v39 = vadd.f32 %v2146_v33, %v761_v29  ;;  %v2149_v40 = vadd.f32 %v2148_v38, %v1859_v37  ;;  %v2150_v42 = vpop.f32.mrb[39].mxu1  ;;  %v769_v33 = vmul.f32 0.5, %v4168_v30 }
 0x1f2   : > { %2410 = vst [vmem:[#allocation3 + $0x90] sm:$0xff] %v2346_v39  ;;  %v2347_v44 = vadd.f32 %v2149_v40, %v762_v36  ;;  %v4255_v36 = vld [vmem:[#allocation4 + $0x70] sm:$0xff]   ;;  %v770_v40 = vmul.f32 0.5, %v4169_v32 }
 0x1f3   : > { %v4173_v49 = vunpack.c.h.bf16 %v4255_v36 }
 0x1f4   : > { %2411 = vst [vmem:[#allocation3 + $0x98] sm:$0xff] %v2347_v44  ;;  %v1864_v47 = vpop.f32.mrb[40].mxu0 }
 0x1f5   : > { %v2153_v48 = vpop.f32.mrb[40].mxu1  ;;  %v1866_v51 = vpop.f32.mrb[41].mxu0 }
 0x1f6   : > { %v2154_v50 = vadd.f32 %v2153_v48, %v1864_v47  ;;  %v2155_v52 = vpop.f32.mrb[41].mxu1  ;;  %v1867_v54 = vpop.f32.mrb[42].mxu0  ;;  %v4172_v47 = vunpack.c.l.bf16 %v4255_v36 }
 0x1f7   : > { %v2156_v55 = vpop.f32.mrb[42].mxu1  ;;  %v1869_v58 = vpop.f32.mrb[43].mxu0 }
 0x1f8   : > { %v2348_v56 = vadd.f32 %v2154_v50, %v763_v46  ;;  %v2157_v57 = vadd.f32 %v2156_v55, %v1867_v54  ;;  %v2158_v59 = vpop.f32.mrb[43].mxu1  ;;  %v771_v50 = vmul.f32 0.5, %v4172_v47 }
 0x1fa   : > { %2412 = vst [vmem:[#allocation3 + $0xa0] sm:$0xff] %v2348_v56  ;;  %v2349_v61 = vadd.f32 %v2157_v57, %v764_v53  ;;  %v4256_v53 = vld [vmem:[#allocation4 + $0x78] sm:$0xff]   ;;  %v772_v57 = vmul.f32 0.5, %v4173_v49 }
 0x1fb   : > { %v4177_v2 = vunpack.c.h.bf16 %v4256_v53 }
 0x1fc   : > { %2413 = vst [vmem:[#allocation3 + $0xa8] sm:$0xff] %v2349_v61  ;;  %v1872_v0 = vpop.f32.mrb[44].mxu0 }
 0x1fd   : > { %v2161_v1 = vpop.f32.mrb[44].mxu1  ;;  %v1874_v4 = vpop.f32.mrb[45].mxu0 }
 0x1fe   : > { %v2162_v3 = vadd.f32 %v2161_v1, %v1872_v0  ;;  %v2163_v5 = vpop.f32.mrb[45].mxu1  ;;  %v1875_v7 = vpop.f32.mrb[46].mxu0  ;;  %v4176_v0 = vunpack.c.l.bf16 %v4256_v53 }
 0x1ff   : > { %v2164_v8 = vpop.f32.mrb[46].mxu1  ;;  %v1877_v11 = vpop.f32.mrb[47].mxu0 }
 0x200   : > { %v2350_v9 = vadd.f32 %v2162_v3, %v765_v63  ;;  %v2165_v10 = vadd.f32 %v2164_v8, %v1875_v7  ;;  %v2166_v12 = vpop.f32.mrb[47].mxu1  ;;  %v773_v3 = vmul.f32 0.5, %v4176_v0 }
 0x202   : > { %2414 = vst [vmem:[#allocation3 + $0xb0] sm:$0xff] %v2350_v9  ;;  %v2351_v14 = vadd.f32 %v2165_v10, %v766_v6  ;;  %v4257_v6 = vld [vmem:[#allocation4 + $0x80] sm:$0xff]   ;;  %v774_v10 = vmul.f32 0.5, %v4177_v2 }
 0x203   : > { %v4181_v19 = vunpack.c.h.bf16 %v4257_v6 }
 0x204   : > { %2415 = vst [vmem:[#allocation3 + $0xb8] sm:$0xff] %v2351_v14  ;;  %v1880_v17 = vpop.f32.mrb[48].mxu0 }
 0x205   : > { %v2169_v18 = vpop.f32.mrb[48].mxu1  ;;  %v1882_v21 = vpop.f32.mrb[49].mxu0 }
 0x206   : > { %v2170_v20 = vadd.f32 %v2169_v18, %v1880_v17  ;;  %v2171_v22 = vpop.f32.mrb[49].mxu1  ;;  %v1883_v24 = vpop.f32.mrb[50].mxu0  ;;  %v4180_v17 = vunpack.c.l.bf16 %v4257_v6 }
 0x207   : > { %v2172_v25 = vpop.f32.mrb[50].mxu1  ;;  %v1885_v28 = vpop.f32.mrb[51].mxu0 }
 0x208   : > { %v2352_v26 = vadd.f32 %v2170_v20, %v767_v16  ;;  %v2173_v27 = vadd.f32 %v2172_v25, %v1883_v24  ;;  %v2174_v29 = vpop.f32.mrb[51].mxu1  ;;  %v775_v20 = vmul.f32 0.5, %v4180_v17 }
 0x20a   : > { %2416 = vst [vmem:[#allocation3 + $0xc0] sm:$0xff] %v2352_v26  ;;  %v2353_v31 = vadd.f32 %v2173_v27, %v768_v23  ;;  %v4258_v23 = vld [vmem:[#allocation4 + $0x88] sm:$0xff]   ;;  %v776_v27 = vmul.f32 0.5, %v4181_v19 }
 0x20b   : > { %v4185_v36 = vunpack.c.h.bf16 %v4258_v23 }
 0x20c   : > { %2417 = vst [vmem:[#allocation3 + $0xc8] sm:$0xff] %v2353_v31  ;;  %v1888_v34 = vpop.f32.mrb[52].mxu0 }
 0x20d   : > { %v2177_v35 = vpop.f32.mrb[52].mxu1  ;;  %v1890_v38 = vpop.f32.mrb[53].mxu0 }
 0x20e   : > { %v2178_v37 = vadd.f32 %v2177_v35, %v1888_v34  ;;  %v2179_v39 = vpop.f32.mrb[53].mxu1  ;;  %v1891_v41 = vpop.f32.mrb[54].mxu0  ;;  %v4184_v34 = vunpack.c.l.bf16 %v4258_v23 }
 0x20f   : > { %v2180_v42 = vpop.f32.mrb[54].mxu1  ;;  %v1893_v45 = vpop.f32.mrb[55].mxu0 }
 0x210   : > { %v2354_v43 = vadd.f32 %v2178_v37, %v769_v33  ;;  %v2181_v44 = vadd.f32 %v2180_v42, %v1891_v41  ;;  %v2182_v46 = vpop.f32.mrb[55].mxu1  ;;  %v777_v37 = vmul.f32 0.5, %v4184_v34 }
 0x212   : > { %2418 = vst [vmem:[#allocation3 + $0xd0] sm:$0xff] %v2354_v43  ;;  %v2355_v48 = vadd.f32 %v2181_v44, %v770_v40  ;;  %v4259_v40 = vld [vmem:[#allocation4 + $0x90] sm:$0xff]   ;;  %v778_v44 = vmul.f32 0.5, %v4185_v36 }
 0x213   : > { %v4189_v53 = vunpack.c.h.bf16 %v4259_v40 }
 0x214   : > { %2419 = vst [vmem:[#allocation3 + $0xd8] sm:$0xff] %v2355_v48  ;;  %v1896_v51 = vpop.f32.mrb[56].mxu0 }
 0x215   : > { %v2185_v52 = vpop.f32.mrb[56].mxu1  ;;  %v1898_v55 = vpop.f32.mrb[57].mxu0 }
 0x216   : > { %v2186_v54 = vadd.f32 %v2185_v52, %v1896_v51  ;;  %v2187_v56 = vpop.f32.mrb[57].mxu1  ;;  %v1899_v58 = vpop.f32.mrb[58].mxu0  ;;  %v4188_v51 = vunpack.c.l.bf16 %v4259_v40 }
 0x217   : > { %v2188_v59 = vpop.f32.mrb[58].mxu1  ;;  %v1901_v62 = vpop.f32.mrb[59].mxu0 }
 0x218   : > { %v2356_v60 = vadd.f32 %v2186_v54, %v771_v50  ;;  %v2189_v61 = vadd.f32 %v2188_v59, %v1899_v58  ;;  %v2190_v63 = vpop.f32.mrb[59].mxu1  ;;  %v779_v54 = vmul.f32 0.5, %v4188_v51 }
 0x21a   : > { %2420 = vst [vmem:[#allocation3 + $0xe0] sm:$0xff] %v2356_v60  ;;  %v2357_v1 = vadd.f32 %v2189_v61, %v772_v57  ;;  %v4260_v57 = vld [vmem:[#allocation4 + $0x98] sm:$0xff]   ;;  %v780_v61 = vmul.f32 0.5, %v4189_v53 }
 0x21b   : > { %v4193_v6 = vunpack.c.h.bf16 %v4260_v57 }
 0x21c   : > { %2421 = vst [vmem:[#allocation3 + $0xe8] sm:$0xff] %v2357_v1  ;;  %v1904_v4 = vpop.f32.mrb[60].mxu0 }
 0x21d   : > { %v2193_v5 = vpop.f32.mrb[60].mxu1  ;;  %v1906_v8 = vpop.f32.mrb[61].mxu0 }
 0x21e   : > { %v2194_v7 = vadd.f32 %v2193_v5, %v1904_v4  ;;  %v2195_v9 = vpop.f32.mrb[61].mxu1  ;;  %v1907_v11 = vpop.f32.mrb[62].mxu0  ;;  %v4192_v4 = vunpack.c.l.bf16 %v4260_v57 }
 0x21f   : > { %v2196_v12 = vpop.f32.mrb[62].mxu1  ;;  %v1909_v15 = vpop.f32.mrb[63].mxu0 }
 0x220   : > { %v2358_v13 = vadd.f32 %v2194_v7, %v773_v3  ;;  %v2197_v14 = vadd.f32 %v2196_v12, %v1907_v11  ;;  %v2198_v16 = vpop.f32.mrb[63].mxu1  ;;  %v781_v7 = vmul.f32 0.5, %v4192_v4 }
 0x222   : > { %2422 = vst [vmem:[#allocation3 + $0xf0] sm:$0xff] %v2358_v13  ;;  %v2359_v18 = vadd.f32 %v2197_v14, %v774_v10  ;;  %v4261_v10 = vld [vmem:[#allocation4 + $0xa0] sm:$0xff]   ;;  %v782_v14 = vmul.f32 0.5, %v4193_v6 }
 0x223   : > { %v4197_v23 = vunpack.c.h.bf16 %v4261_v10 }
 0x224   : > { %2423 = vst [vmem:[#allocation3 + $0xf8] sm:$0xff] %v2359_v18  ;;  %v1912_v21 = vpop.f32.mrb[64].mxu0 }
 0x225   : > { %v2201_v22 = vpop.f32.mrb[64].mxu1  ;;  %v1914_v25 = vpop.f32.mrb[65].mxu0 }
 0x226   : > { %v2202_v24 = vadd.f32 %v2201_v22, %v1912_v21  ;;  %v2203_v26 = vpop.f32.mrb[65].mxu1  ;;  %v1915_v28 = vpop.f32.mrb[66].mxu0  ;;  %v4196_v21 = vunpack.c.l.bf16 %v4261_v10 }
 0x227   : > { %v2204_v29 = vpop.f32.mrb[66].mxu1  ;;  %v1917_v32 = vpop.f32.mrb[67].mxu0 }
 0x228   : > { %v2360_v30 = vadd.f32 %v2202_v24, %v775_v20  ;;  %v2205_v31 = vadd.f32 %v2204_v29, %v1915_v28  ;;  %v2206_v33 = vpop.f32.mrb[67].mxu1  ;;  %v783_v24 = vmul.f32 0.5, %v4196_v21 }
 0x22a   : > { %2424 = vst [vmem:[#allocation3 + $0x100] sm:$0xff] %v2360_v30  ;;  %v2361_v35 = vadd.f32 %v2205_v31, %v776_v27  ;;  %v4262_v27 = vld [vmem:[#allocation4 + $0xa8] sm:$0xff]   ;;  %v784_v31 = vmul.f32 0.5, %v4197_v23 }
 0x22b   : > { %v4201_v40 = vunpack.c.h.bf16 %v4262_v27 }
 0x22c   : > { %2425 = vst [vmem:[#allocation3 + $0x108] sm:$0xff] %v2361_v35  ;;  %v1920_v38 = vpop.f32.mrb[68].mxu0 }
 0x22d   : > { %v2209_v39 = vpop.f32.mrb[68].mxu1  ;;  %v1922_v42 = vpop.f32.mrb[69].mxu0 }
 0x22e   : > { %v2210_v41 = vadd.f32 %v2209_v39, %v1920_v38  ;;  %v2211_v43 = vpop.f32.mrb[69].mxu1  ;;  %v1923_v45 = vpop.f32.mrb[70].mxu0  ;;  %v4200_v38 = vunpack.c.l.bf16 %v4262_v27 }
 0x22f   : > { %v2212_v46 = vpop.f32.mrb[70].mxu1  ;;  %v1925_v49 = vpop.f32.mrb[71].mxu0 }
 0x230   : > { %v2362_v47 = vadd.f32 %v2210_v41, %v777_v37  ;;  %v2213_v48 = vadd.f32 %v2212_v46, %v1923_v45  ;;  %v2214_v50 = vpop.f32.mrb[71].mxu1  ;;  %v785_v41 = vmul.f32 0.5, %v4200_v38 }
 0x232   : > { %2426 = vst [vmem:[#allocation3 + $0x110] sm:$0xff] %v2362_v47  ;;  %v2363_v52 = vadd.f32 %v2213_v48, %v778_v44  ;;  %v4263_v44 = vld [vmem:[#allocation4 + $0xb0] sm:$0xff]   ;;  %v786_v48 = vmul.f32 0.5, %v4201_v40 }
 0x233   : > { %v4205_v57 = vunpack.c.h.bf16 %v4263_v44 }
 0x234   : > { %2427 = vst [vmem:[#allocation3 + $0x118] sm:$0xff] %v2363_v52  ;;  %v1928_v55 = vpop.f32.mrb[72].mxu0 }
 0x235   : > { %v2217_v56 = vpop.f32.mrb[72].mxu1  ;;  %v1930_v59 = vpop.f32.mrb[73].mxu0 }
 0x236   : > { %v2218_v58 = vadd.f32 %v2217_v56, %v1928_v55  ;;  %v2219_v60 = vpop.f32.mrb[73].mxu1  ;;  %v1931_v62 = vpop.f32.mrb[74].mxu0  ;;  %v4204_v55 = vunpack.c.l.bf16 %v4263_v44 }
 0x237   : > { %v2220_v63 = vpop.f32.mrb[74].mxu1  ;;  %v1933_v2 = vpop.f32.mrb[75].mxu0 }
 0x238   : > { %v2364_v0 = vadd.f32 %v2218_v58, %v779_v54  ;;  %v2221_v1 = vadd.f32 %v2220_v63, %v1931_v62  ;;  %v2222_v3 = vpop.f32.mrb[75].mxu1  ;;  %v787_v58 = vmul.f32 0.5, %v4204_v55 }
 0x23a   : > { %2428 = vst [vmem:[#allocation3 + $0x120] sm:$0xff] %v2364_v0  ;;  %v2365_v5 = vadd.f32 %v2221_v1, %v780_v61  ;;  %v4264_v61 = vld [vmem:[#allocation4 + $0xb8] sm:$0xff]   ;;  %v788_v1 = vmul.f32 0.5, %v4205_v57 }
 0x23b   : > { %v4209_v10 = vunpack.c.h.bf16 %v4264_v61 }
 0x23c   : > { %2429 = vst [vmem:[#allocation3 + $0x128] sm:$0xff] %v2365_v5  ;;  %v1936_v8 = vpop.f32.mrb[76].mxu0 }
 0x23d   : > { %v2225_v9 = vpop.f32.mrb[76].mxu1  ;;  %v1938_v12 = vpop.f32.mrb[77].mxu0 }
 0x23e   : > { %v2226_v11 = vadd.f32 %v2225_v9, %v1936_v8  ;;  %v2227_v13 = vpop.f32.mrb[77].mxu1  ;;  %v1939_v15 = vpop.f32.mrb[78].mxu0  ;;  %v4208_v8 = vunpack.c.l.bf16 %v4264_v61 }
 0x23f   : > { %v2228_v16 = vpop.f32.mrb[78].mxu1  ;;  %v1941_v19 = vpop.f32.mrb[79].mxu0 }
 0x240   : > { %v2366_v17 = vadd.f32 %v2226_v11, %v781_v7  ;;  %v2229_v18 = vadd.f32 %v2228_v16, %v1939_v15  ;;  %v2230_v20 = vpop.f32.mrb[79].mxu1  ;;  %v789_v11 = vmul.f32 0.5, %v4208_v8 }
 0x242   : > { %2430 = vst [vmem:[#allocation3 + $0x130] sm:$0xff] %v2366_v17  ;;  %v2367_v22 = vadd.f32 %v2229_v18, %v782_v14  ;;  %v4265_v14 = vld [vmem:[#allocation4 + $0xc0] sm:$0xff]   ;;  %v790_v18 = vmul.f32 0.5, %v4209_v10 }
 0x243   : > { %v4213_v27 = vunpack.c.h.bf16 %v4265_v14 }
 0x244   : > { %2431 = vst [vmem:[#allocation3 + $0x138] sm:$0xff] %v2367_v22  ;;  %v1944_v25 = vpop.f32.mrb[80].mxu0 }
 0x245   : > { %v2233_v26 = vpop.f32.mrb[80].mxu1  ;;  %v1946_v29 = vpop.f32.mrb[81].mxu0 }
 0x246   : > { %v2234_v28 = vadd.f32 %v2233_v26, %v1944_v25  ;;  %v2235_v30 = vpop.f32.mrb[81].mxu1  ;;  %v1947_v32 = vpop.f32.mrb[82].mxu0  ;;  %v4212_v25 = vunpack.c.l.bf16 %v4265_v14 }
 0x247   : > { %v2236_v33 = vpop.f32.mrb[82].mxu1  ;;  %v1949_v36 = vpop.f32.mrb[83].mxu0 }
 0x248   : > { %v2368_v34 = vadd.f32 %v2234_v28, %v783_v24  ;;  %v2237_v35 = vadd.f32 %v2236_v33, %v1947_v32  ;;  %v2238_v37 = vpop.f32.mrb[83].mxu1  ;;  %v791_v28 = vmul.f32 0.5, %v4212_v25 }
 0x24a   : > { %2432 = vst [vmem:[#allocation3 + $0x140] sm:$0xff] %v2368_v34  ;;  %v2369_v39 = vadd.f32 %v2237_v35, %v784_v31  ;;  %v4266_v31 = vld [vmem:[#allocation4 + $0xc8] sm:$0xff]   ;;  %v792_v35 = vmul.f32 0.5, %v4213_v27 }
 0x24b   : > { %v4217_v44 = vunpack.c.h.bf16 %v4266_v31 }
 0x24c   : > { %2433 = vst [vmem:[#allocation3 + $0x148] sm:$0xff] %v2369_v39  ;;  %v1952_v42 = vpop.f32.mrb[84].mxu0 }
 0x24d   : > { %v2241_v43 = vpop.f32.mrb[84].mxu1  ;;  %v1954_v46 = vpop.f32.mrb[85].mxu0 }
 0x24e   : > { %v2242_v45 = vadd.f32 %v2241_v43, %v1952_v42  ;;  %v2243_v47 = vpop.f32.mrb[85].mxu1  ;;  %v1955_v49 = vpop.f32.mrb[86].mxu0  ;;  %v4216_v42 = vunpack.c.l.bf16 %v4266_v31 }
 0x24f   : > { %v2244_v50 = vpop.f32.mrb[86].mxu1  ;;  %v1957_v53 = vpop.f32.mrb[87].mxu0 }
 0x250   : > { %v2370_v51 = vadd.f32 %v2242_v45, %v785_v41  ;;  %v2245_v52 = vadd.f32 %v2244_v50, %v1955_v49  ;;  %v2246_v54 = vpop.f32.mrb[87].mxu1  ;;  %v793_v45 = vmul.f32 0.5, %v4216_v42 }
 0x252   : > { %2434 = vst [vmem:[#allocation3 + $0x150] sm:$0xff] %v2370_v51  ;;  %v2371_v56 = vadd.f32 %v2245_v52, %v786_v48  ;;  %v4267_v48 = vld [vmem:[#allocation4 + $0xd0] sm:$0xff]   ;;  %v794_v52 = vmul.f32 0.5, %v4217_v44 }
 0x253   : > { %v4221_v61 = vunpack.c.h.bf16 %v4267_v48 }
 0x254   : > { %2435 = vst [vmem:[#allocation3 + $0x158] sm:$0xff] %v2371_v56  ;;  %v1960_v59 = vpop.f32.mrb[88].mxu0 }
 0x255   : > { %v2249_v60 = vpop.f32.mrb[88].mxu1  ;;  %v1962_v63 = vpop.f32.mrb[89].mxu0 }
 0x256   : > { %v2250_v62 = vadd.f32 %v2249_v60, %v1960_v59  ;;  %v2251_v0 = vpop.f32.mrb[89].mxu1  ;;  %v1963_v2 = vpop.f32.mrb[90].mxu0  ;;  %v4220_v59 = vunpack.c.l.bf16 %v4267_v48 }
 0x257   : > { %v2252_v3 = vpop.f32.mrb[90].mxu1  ;;  %v1965_v6 = vpop.f32.mrb[91].mxu0 }
 0x258   : > { %v2372_v4 = vadd.f32 %v2250_v62, %v787_v58  ;;  %v2253_v5 = vadd.f32 %v2252_v3, %v1963_v2  ;;  %v2254_v7 = vpop.f32.mrb[91].mxu1  ;;  %v795_v62 = vmul.f32 0.5, %v4220_v59 }
 0x25a   : > { %2436 = vst [vmem:[#allocation3 + $0x160] sm:$0xff] %v2372_v4  ;;  %v2373_v9 = vadd.f32 %v2253_v5, %v788_v1  ;;  %v4268_v1 = vld [vmem:[#allocation4 + $0xd8] sm:$0xff]   ;;  %v796_v5 = vmul.f32 0.5, %v4221_v61 }
 0x25b   : > { %v4225_v14 = vunpack.c.h.bf16 %v4268_v1 }
 0x25c   : > { %2437 = vst [vmem:[#allocation3 + $0x168] sm:$0xff] %v2373_v9  ;;  %v1968_v12 = vpop.f32.mrb[92].mxu0 }
 0x25d   : > { %v2257_v13 = vpop.f32.mrb[92].mxu1  ;;  %v1970_v16 = vpop.f32.mrb[93].mxu0 }
 0x25e   : > { %v2258_v15 = vadd.f32 %v2257_v13, %v1968_v12  ;;  %v2259_v17 = vpop.f32.mrb[93].mxu1  ;;  %v1971_v19 = vpop.f32.mrb[94].mxu0  ;;  %v4224_v12 = vunpack.c.l.bf16 %v4268_v1 }
 0x25f   : > { %v2260_v20 = vpop.f32.mrb[94].mxu1  ;;  %v1973_v23 = vpop.f32.mrb[95].mxu0 }
 0x260   : > { %v2374_v21 = vadd.f32 %v2258_v15, %v789_v11  ;;  %v2261_v22 = vadd.f32 %v2260_v20, %v1971_v19  ;;  %v2262_v24 = vpop.f32.mrb[95].mxu1  ;;  %v797_v15 = vmul.f32 0.5, %v4224_v12 }
 0x262   : > { %2438 = vst [vmem:[#allocation3 + $0x170] sm:$0xff] %v2374_v21  ;;  %v2375_v26 = vadd.f32 %v2261_v22, %v790_v18  ;;  %v4269_v18 = vld [vmem:[#allocation4 + $0xe0] sm:$0xff]   ;;  %v798_v22 = vmul.f32 0.5, %v4225_v14 }
 0x263   : > { %v4229_v31 = vunpack.c.h.bf16 %v4269_v18 }
 0x264   : > { %2439 = vst [vmem:[#allocation3 + $0x178] sm:$0xff] %v2375_v26  ;;  %v1976_v29 = vpop.f32.mrb[96].mxu0 }
 0x265   : > { %v2265_v30 = vpop.f32.mrb[96].mxu1  ;;  %v1978_v33 = vpop.f32.mrb[97].mxu0 }
 0x266   : > { %v2266_v32 = vadd.f32 %v2265_v30, %v1976_v29  ;;  %v2267_v34 = vpop.f32.mrb[97].mxu1  ;;  %v1979_v36 = vpop.f32.mrb[98].mxu0  ;;  %v4228_v29 = vunpack.c.l.bf16 %v4269_v18 }
 0x267   : > { %v2268_v37 = vpop.f32.mrb[98].mxu1  ;;  %v1981_v40 = vpop.f32.mrb[99].mxu0 }
 0x268   : > { %v2376_v38 = vadd.f32 %v2266_v32, %v791_v28  ;;  %v2269_v39 = vadd.f32 %v2268_v37, %v1979_v36  ;;  %v2270_v41 = vpop.f32.mrb[99].mxu1  ;;  %v799_v32 = vmul.f32 0.5, %v4228_v29 }
 0x26a   : > { %2440 = vst [vmem:[#allocation3 + $0x180] sm:$0xff] %v2376_v38  ;;  %v2377_v43 = vadd.f32 %v2269_v39, %v792_v35  ;;  %v4270_v35 = vld [vmem:[#allocation4 + $0xe8] sm:$0xff]   ;;  %v800_v39 = vmul.f32 0.5, %v4229_v31 }
 0x26b   : > { %v4233_v48 = vunpack.c.h.bf16 %v4270_v35 }
 0x26c   : > { %2441 = vst [vmem:[#allocation3 + $0x188] sm:$0xff] %v2377_v43  ;;  %v1984_v46 = vpop.f32.mrb[100].mxu0 }
 0x26d   : > { %v2273_v47 = vpop.f32.mrb[100].mxu1  ;;  %v1986_v50 = vpop.f32.mrb[101].mxu0 }
 0x26e   : > { %v2274_v49 = vadd.f32 %v2273_v47, %v1984_v46  ;;  %v2275_v51 = vpop.f32.mrb[101].mxu1  ;;  %v1987_v53 = vpop.f32.mrb[102].mxu0  ;;  %v4232_v46 = vunpack.c.l.bf16 %v4270_v35  ;;  %v2465_v35 = vld [vmem:[#allocation3 + $0x10] sm:$0xff] (%p2456_p10) }
 0x26f   : > { %v2276_v54 = vpop.f32.mrb[102].mxu1  ;;  %v1989_v57 = vpop.f32.mrb[103].mxu0 }
 0x270   : > { %v2378_v55 = vadd.f32 %v2274_v49, %v793_v45  ;;  %v2277_v56 = vadd.f32 %v2276_v54, %v1987_v53  ;;  %v2278_v58 = vpop.f32.mrb[103].mxu1  ;;  %v801_v49 = vmul.f32 0.5, %v4232_v46  ;;  %v2472_v46 = vld [vmem:[#allocation3 + $0x48] sm:$0xff] (%p2456_p10) }
 0x272   : > { %2442 = vst [vmem:[#allocation3 + $0x190] sm:$0xff] %v2378_v55  ;;  %v2379_v60 = vadd.f32 %v2277_v56, %v794_v52  ;;  %v4271_v52 = vld [vmem:[#allocation4 + $0xf0] sm:$0xff]   ;;  %v802_v56 = vmul.f32 0.5, %v4233_v48  ;;  %v2474_v48 = vld [vmem:[#allocation3 + $0x58] sm:$0xff] (%p2456_p10) }
 0x273   : > { %v4237_v1 = vunpack.c.h.bf16 %v4271_v52 }
 0x274   : > { %2443 = vst [vmem:[#allocation3 + $0x198] sm:$0xff] %v2379_v60  ;;  %v1992_v63 = vpop.f32.mrb[104].mxu0 }
 0x275   : > { %v2281_v0 = vpop.f32.mrb[104].mxu1  ;;  %v1994_v3 = vpop.f32.mrb[105].mxu0 }
 0x276   : > { %v2282_v2 = vadd.f32 %v2281_v0, %v1992_v63  ;;  %v2283_v4 = vpop.f32.mrb[105].mxu1  ;;  %v1995_v6 = vpop.f32.mrb[106].mxu0  ;;  %v4236_v63 = vunpack.c.l.bf16 %v4271_v52  ;;  %v2476_v52 = vld [vmem:[#allocation3 + $0x68] sm:$0xff] (%p2456_p10) }
 0x277   : > { %v2284_v7 = vpop.f32.mrb[106].mxu1  ;;  %v1997_v10 = vpop.f32.mrb[107].mxu0 }
 0x278   : > { %v2380_v8 = vadd.f32 %v2282_v2, %v795_v62  ;;  %v2285_v9 = vadd.f32 %v2284_v7, %v1995_v6  ;;  %v2286_v11 = vpop.f32.mrb[107].mxu1  ;;  %v803_v2 = vmul.f32 0.5, %v4236_v63 }
 0x27a   : > { %2444 = vst [vmem:[#allocation3 + $0x1a0] sm:$0xff] %v2380_v8  ;;  %v2381_v13 = vadd.f32 %v2285_v9, %v796_v5  ;;  %v4272_v5 = vld [vmem:[#allocation4 + $0xf8] sm:$0xff]   ;;  %v804_v9 = vmul.f32 0.5, %v4237_v1  ;;  %v2485_v1 = vld [vmem:[#allocation3 + $0xb0] sm:$0xff] (%p2456_p10) }
 0x27b   : > { %v4241_v18 = vunpack.c.h.bf16 %v4272_v5 }
 0x27c   : > { %2445 = vst [vmem:[#allocation3 + $0x1a8] sm:$0xff] %v2381_v13  ;;  %v2000_v16 = vpop.f32.mrb[108].mxu0 }
 0x27d   : > { %v2289_v17 = vpop.f32.mrb[108].mxu1  ;;  %v2002_v20 = vpop.f32.mrb[109].mxu0 }
 0x27e   : > { %v2290_v19 = vadd.f32 %v2289_v17, %v2000_v16  ;;  %v2291_v21 = vpop.f32.mrb[109].mxu1  ;;  %v2003_v23 = vpop.f32.mrb[110].mxu0  ;;  %v4240_v16 = vunpack.c.l.bf16 %v4272_v5  ;;  %v2487_v5 = vld [vmem:[#allocation3 + $0xc0] sm:$0xff] (%p2456_p10) }
 0x27f   : > { %v2292_v24 = vpop.f32.mrb[110].mxu1  ;;  %v2005_v27 = vpop.f32.mrb[111].mxu0 }
 0x280   : > { %v2382_v25 = vadd.f32 %v2290_v19, %v797_v15  ;;  %v2293_v26 = vadd.f32 %v2292_v24, %v2003_v23  ;;  %v2294_v28 = vpop.f32.mrb[111].mxu1  ;;  %v805_v19 = vmul.f32 0.5, %v4240_v16  ;;  %v2495_v16 = vld [vmem:[#allocation3 + $0x100] sm:$0xff] (%p2456_p10) }
 0x282   : > { %2446 = vst [vmem:[#allocation3 + $0x1b0] sm:$0xff] %v2382_v25  ;;  %v2383_v30 = vadd.f32 %v2293_v26, %v798_v22  ;;  %v806_v25 = vmul.f32 0.5, %v4241_v18  ;;  %v2496_v18 = vld [vmem:[#allocation3 + $0x108] sm:$0xff] (%p2456_p10) }
 0x284   : > { %2447 = vst [vmem:[#allocation3 + $0x1b8] sm:$0xff] %v2383_v30  ;;  %v2008_v33 = vpop.f32.mrb[112].mxu0 }
 0x285   : > { %v2297_v34 = vpop.f32.mrb[112].mxu1  ;;  %v2010_v37 = vpop.f32.mrb[113].mxu0 }
 0x286   : > { %v2298_v36 = vadd.f32 %v2297_v34, %v2008_v33  ;;  %v2299_v38 = vpop.f32.mrb[113].mxu1  ;;  %v2011_v40 = vpop.f32.mrb[114].mxu0  ;;  %v2463_v33 = vld [vmem:[#allocation3] sm:$0xff] (%p2456_p10)  ;;  %v2464_v34 = vld [vmem:[#allocation3 + $0x8] sm:$0xff] (%p2456_p10)  ;;  %v2466_v37 = vld [vmem:[#allocation3 + $0x18] sm:$0xff] (%p2456_p10) }
 0x287   : > { %v2300_v41 = vpop.f32.mrb[114].mxu1  ;;  %v2013_v44 = vpop.f32.mrb[115].mxu0  ;;  %v2467_v38 = vld [vmem:[#allocation3 + $0x20] sm:$0xff] (%p2456_p10) }
 0x288   : > { %v2384_v42 = vadd.f32 %v2298_v36, %v799_v32  ;;  %v2301_v43 = vadd.f32 %v2300_v41, %v2011_v40  ;;  %v2302_v45 = vpop.f32.mrb[115].mxu1  ;;  %v2527_v36 = vpack.c.bf16 (%p2456_p10), %v2464_v34, %v2463_v33  ;;  %v2528_v40 = vpack.c.bf16 (%p2456_p10), %v2466_v37, %v2465_v35  ;;  %v2471_v44 = vld [vmem:[#allocation3 + $0x40] sm:$0xff] (%p2456_p10)  ;;  %v2506_v33 = vld [vmem:[#allocation3 + $0x158] sm:$0xff] (%p2456_p10)  ;;  %v2509_v37 = vld [vmem:[#allocation3 + $0x170] sm:$0xff] (%p2456_p10) }
 0x289   : > { %v2507_v34 = vld [vmem:[#allocation3 + $0x160] sm:$0xff] (%p2456_p10) }
 0x28a   : > { %2448 = vst [vmem:[#allocation3 + $0x1c0] sm:$0xff] %v2384_v42  ;;  %v2385_v47 = vadd.f32 %v2301_v43, %v800_v39  ;;  %v2468_v39 = vld [vmem:[#allocation3 + $0x28] sm:$0xff] (%p2456_p10)  ;;  %v2469_v42 = vld [vmem:[#allocation3 + $0x30] sm:$0xff] (%p2456_p10)  ;;  %v2470_v43 = vld [vmem:[#allocation3 + $0x38] sm:$0xff] (%p2456_p10) }
 0x28b   : > { %v2529_v41 = vpack.c.bf16 (%p2456_p10), %v2468_v39, %v2467_v38  ;;  %v2530_v45 = vpack.c.bf16 (%p2456_p10), %v2470_v43, %v2469_v42  ;;  %2563 = vst [vmem:[%s5353_s10] sm:$0xff] (%p2456_p10), %v2527_v36  ;;  %2564 = vst [vmem:[%s5353_s10 + $0x8] sm:$0xff] (%p2456_p10), %v2528_v40  ;;  %v2508_v36 = vld [vmem:[#allocation3 + $0x168] sm:$0xff] (%p2456_p10)  ;;  %v2510_v38 = vld [vmem:[#allocation3 + $0x178] sm:$0xff] (%p2456_p10) }
 0x28c   : > { %2449 = vst [vmem:[#allocation3 + $0x1c8] sm:$0xff] %v2385_v47  ;;  %v2016_v50 = vpop.f32.mrb[116].mxu0  ;;  %v2473_v47 = vld [vmem:[#allocation3 + $0x50] sm:$0xff] (%p2456_p10)  ;;  %v2549_v39 = vpack.c.bf16 (%p2456_p10), %v2508_v36, %v2507_v34  ;;  %v2550_v40 = vpack.c.bf16 (%p2456_p10), %v2510_v38, %v2509_v37  ;;  %v2512_v42 = vld [vmem:[#allocation3 + $0x188] sm:$0xff] (%p2456_p10) }
 0x28d   : > { %v2305_v51 = vpop.f32.mrb[116].mxu1  ;;  %v2018_v54 = vpop.f32.mrb[117].mxu0  ;;  %2565 = vst [vmem:[%s5353_s10 + $0x10] sm:$0xff] (%p2456_p10), %v2529_v41  ;;  %2566 = vst [vmem:[%s5353_s10 + $0x18] sm:$0xff] (%p2456_p10), %v2530_v45  ;;  %v2511_v41 = vld [vmem:[#allocation3 + $0x180] sm:$0xff] (%p2456_p10)  ;;  %v2513_v43 = vld [vmem:[#allocation3 + $0x190] sm:$0xff] (%p2456_p10) }
 0x28e   : > { %v2306_v53 = vadd.f32 %v2305_v51, %v2016_v50  ;;  %v2307_v55 = vpop.f32.mrb[117].mxu1  ;;  %v2019_v57 = vpop.f32.mrb[118].mxu0  ;;  %v2532_v50 = vpack.c.bf16 (%p2456_p10), %v2474_v48, %v2473_v47  ;;  %v2475_v51 = vld [vmem:[#allocation3 + $0x60] sm:$0xff] (%p2456_p10)  ;;  %v2514_v45 = vld [vmem:[#allocation3 + $0x198] sm:$0xff] (%p2456_p10)  ;;  %v2516_v47 = vld [vmem:[#allocation3 + $0x1a8] sm:$0xff] (%p2456_p10)  ;;  %2585 = vst [vmem:[%s5353_s10 + $0xb0] sm:$0xff] (%p2456_p10), %v2549_v39 }
 0x28f   : > { %v2308_v58 = vpop.f32.mrb[118].mxu1  ;;  %v2021_v61 = vpop.f32.mrb[119].mxu0  ;;  %v2533_v54 = vpack.c.bf16 (%p2456_p10), %v2476_v52, %v2475_v51  ;;  %v2478_v55 = vld [vmem:[#allocation3 + $0x78] sm:$0xff] (%p2456_p10)  ;;  %2586 = vst [vmem:[%s5353_s10 + $0xb8] sm:$0xff] (%p2456_p10), %v2550_v40  ;;  %v2552_v48 = vpack.c.bf16 (%p2456_p10), %v2514_v45, %v2513_v43 }
 0x290   : > { %v2386_v59 = vadd.f32 %v2306_v53, %v801_v49  ;;  %v2309_v60 = vadd.f32 %v2308_v58, %v2019_v57  ;;  %v2310_v62 = vpop.f32.mrb[119].mxu1  ;;  %v2531_v49 = vpack.c.bf16 (%p2456_p10), %v2472_v46, %v2471_v44  ;;  %v2477_v53 = vld [vmem:[#allocation3 + $0x70] sm:$0xff] (%p2456_p10)  ;;  %v2480_v57 = vld [vmem:[#allocation3 + $0x88] sm:$0xff] (%p2456_p10)  ;;  %2568 = vst [vmem:[%s5353_s10 + $0x28] sm:$0xff] (%p2456_p10), %v2532_v50  ;;  %v2482_v61 = vld [vmem:[#allocation3 + $0x98] sm:$0xff] (%p2456_p10)  ;;  %v2551_v44 = vpack.c.bf16 (%p2456_p10), %v2512_v42, %v2511_v41 }
 0x291   : > { %v2534_v58 = vpack.c.bf16 (%p2456_p10), %v2478_v55, %v2477_v53  ;;  %v2483_v62 = vld [vmem:[#allocation3 + $0xa0] sm:$0xff] (%p2456_p10)  ;;  %2569 = vst [vmem:[%s5353_s10 + $0x30] sm:$0xff] (%p2456_p10), %v2533_v54  ;;  %v2517_v50 = vld [vmem:[#allocation3 + $0x1b0] sm:$0xff] (%p2456_p10)  ;;  %v2518_v51 = vld [vmem:[#allocation3 + $0x1b8] sm:$0xff] (%p2456_p10) }
 0x292   : > { %2450 = vst [vmem:[#allocation3 + $0x1d0] sm:$0xff] %v2386_v59  ;;  %v2387_v0 = vadd.f32 %v2309_v60, %v802_v56  ;;  %v2479_v56 = vld [vmem:[#allocation3 + $0x80] sm:$0xff] (%p2456_p10)  ;;  %2567 = vst [vmem:[%s5353_s10 + $0x20] sm:$0xff] (%p2456_p10), %v2531_v49  ;;  %v2481_v60 = vld [vmem:[#allocation3 + $0x90] sm:$0xff] (%p2456_p10)  ;;  %v2554_v53 = vpack.c.bf16 (%p2456_p10), %v2518_v51, %v2517_v50 }
 0x293   : > { %v2535_v59 = vpack.c.bf16 (%p2456_p10), %v2480_v57, %v2479_v56  ;;  %v2536_v63 = vpack.c.bf16 (%p2456_p10), %v2482_v61, %v2481_v60  ;;  %2570 = vst [vmem:[%s5353_s10 + $0x38] sm:$0xff] (%p2456_p10), %v2534_v58  ;;  %v2515_v46 = vld [vmem:[#allocation3 + $0x1a0] sm:$0xff] (%p2456_p10)  ;;  %2587 = vst [vmem:[%s5353_s10 + $0xc0] sm:$0xff] (%p2456_p10), %v2551_v44  ;;  %v2520_v54 = vld [vmem:[#allocation3 + $0x1c8] sm:$0xff] (%p2456_p10) }
 0x294   : > { %2451 = vst [vmem:[#allocation3 + $0x1d8] sm:$0xff] %v2387_v0  ;;  %v2024_v3 = vpop.f32.mrb[120].mxu0  ;;  %v2484_v0 = vld [vmem:[#allocation3 + $0xa8] sm:$0xff] (%p2456_p10)  ;;  %v2553_v49 = vpack.c.bf16 (%p2456_p10), %v2516_v47, %v2515_v46  ;;  %v2519_v52 = vld [vmem:[#allocation3 + $0x1c0] sm:$0xff] (%p2456_p10)  ;;  %2588 = vst [vmem:[%s5353_s10 + $0xc8] sm:$0xff] (%p2456_p10), %v2552_v48 }
 0x295   : > { %v2313_v4 = vpop.f32.mrb[120].mxu1  ;;  %v2026_v7 = vpop.f32.mrb[121].mxu0  ;;  %2571 = vst [vmem:[%s5353_s10 + $0x40] sm:$0xff] (%p2456_p10), %v2535_v59  ;;  %2572 = vst [vmem:[%s5353_s10 + $0x48] sm:$0xff] (%p2456_p10), %v2536_v63  ;;  %v2555_v57 = vpack.c.bf16 (%p2456_p10), %v2520_v54, %v2519_v52 }
 0x296   : > { %v2314_v6 = vadd.f32 %v2313_v4, %v2024_v3  ;;  %v2315_v8 = vpop.f32.mrb[121].mxu1  ;;  %v2027_v10 = vpop.f32.mrb[122].mxu0  ;;  %v2537_v3 = vpack.c.bf16 (%p2456_p10), %v2484_v0, %v2483_v62  ;;  %v2489_v7 = vld [vmem:[#allocation3 + $0xd0] sm:$0xff] (%p2456_p10)  ;;  %2589 = vst [vmem:[%s5353_s10 + $0xd0] sm:$0xff] (%p2456_p10), %v2553_v49  ;;  %2590 = vst [vmem:[%s5353_s10 + $0xd8] sm:$0xff] (%p2456_p10), %v2554_v53 }
 0x297   : > { %v2316_v11 = vpop.f32.mrb[122].mxu1  ;;  %v2029_v14 = vpop.f32.mrb[123].mxu0  ;;  %2591 = vst [vmem:[%s5353_s10 + $0xe0] sm:$0xff] (%p2456_p10), %v2555_v57 }
 0x298   : > { %v2388_v12 = vadd.f32 %v2314_v6, %v803_v2  ;;  %v2317_v13 = vadd.f32 %v2316_v11, %v2027_v10  ;;  %v2318_v15 = vpop.f32.mrb[123].mxu1  ;;  %v2486_v2 = vld [vmem:[#allocation3 + $0xb8] sm:$0xff] (%p2456_p10)  ;;  %v2488_v6 = vld [vmem:[#allocation3 + $0xc8] sm:$0xff] (%p2456_p10)  ;;  %v2491_v10 = vld [vmem:[#allocation3 + $0xe0] sm:$0xff] (%p2456_p10)  ;;  %2573 = vst [vmem:[%s5353_s10 + $0x50] sm:$0xff] (%p2456_p10), %v2537_v3 }
 0x299   : > { %v2538_v4 = vpack.c.bf16 (%p2456_p10), %v2486_v2, %v2485_v1  ;;  %v2539_v8 = vpack.c.bf16 (%p2456_p10), %v2488_v6, %v2487_v5  ;;  %v2492_v11 = vld [vmem:[#allocation3 + $0xe8] sm:$0xff] (%p2456_p10)  ;;  %v2493_v14 = vld [vmem:[#allocation3 + $0xf0] sm:$0xff] (%p2456_p10)  ;;  %v2494_v15 = vld [vmem:[#allocation3 + $0xf8] sm:$0xff] (%p2456_p10) }
 0x29a   : > { %2452 = vst [vmem:[#allocation3 + $0x1e0] sm:$0xff] %v2388_v12  ;;  %v2389_v17 = vadd.f32 %v2317_v13, %v804_v9  ;;  %v2490_v9 = vld [vmem:[#allocation3 + $0xd8] sm:$0xff] (%p2456_p10)  ;;  %v2541_v13 = vpack.c.bf16 (%p2456_p10), %v2492_v11, %v2491_v10  ;;  %v2521_v55 = vld [vmem:[#allocation3 + $0x1d0] sm:$0xff] (%p2456_p10) }
 0x29b   : > { %2574 = vst [vmem:[%s5353_s10 + $0x58] sm:$0xff] (%p2456_p10), %v2538_v4  ;;  %v2540_v12 = vpack.c.bf16 (%p2456_p10), %v2490_v9, %v2489_v7  ;;  %2575 = vst [vmem:[%s5353_s10 + $0x60] sm:$0xff] (%p2456_p10), %v2539_v8  ;;  %v2522_v56 = vld [vmem:[#allocation3 + $0x1d8] sm:$0xff] (%p2456_p10) }
 0x29c   : > { %2453 = vst [vmem:[#allocation3 + $0x1e8] sm:$0xff] %v2389_v17  ;;  %v2032_v20 = vpop.f32.mrb[124].mxu0  ;;  %v2542_v17 = vpack.c.bf16 (%p2456_p10), %v2494_v15, %v2493_v14  ;;  %2577 = vst [vmem:[%s5353_s10 + $0x70] sm:$0xff] (%p2456_p10), %v2541_v13  ;;  %v2556_v58 = vpack.c.bf16 (%p2456_p10), %v2522_v56, %v2521_v55 }
 0x29d   : > { %v2321_v21 = vpop.f32.mrb[124].mxu1  ;;  %v2034_v23 = vpop.f32.mrb[125].mxu0  ;;  %2576 = vst [vmem:[%s5353_s10 + $0x68] sm:$0xff] (%p2456_p10), %v2540_v12 }
 0x29e   : > { %v2322_v22 = vadd.f32 %v2321_v21, %v2032_v20  ;;  %v2323_v24 = vpop.f32.mrb[125].mxu1  ;;  %v2035_v26 = vpop.f32.mrb[126].mxu0  ;;  %2460 = sbr.rel (!%p2456_p10) target bundleno = 687 (0x2af), region = 72  ;;  %v2498_v20 = vld [vmem:[#allocation3 + $0x118] sm:$0xff] (%p2456_p10)  ;;  %v2543_v21 = vpack.c.bf16 (%p2456_p10), %v2496_v18, %v2495_v16  ;;  %v2499_v23 = vld [vmem:[#allocation3 + $0x120] sm:$0xff] (%p2456_p10)  ;;  %2578 = vst [vmem:[%s5353_s10 + $0x78] sm:$0xff] (%p2456_p10), %v2542_v17 }
 0x29f   : > { %v2324_v27 = vpop.f32.mrb[126].mxu1  ;;  %v2037_v30 = vpop.f32.mrb[127].mxu0  ;;  %v2500_v24 = vld [vmem:[#allocation3 + $0x128] sm:$0xff] (%p2456_p10)  ;;  %2592 = vst [vmem:[%s5353_s10 + $0xe8] sm:$0xff] (%p2456_p10), %v2556_v58 }
 0x2a0   : > { %v2390_v28 = vadd.f32 %v2322_v22, %v805_v19  ;;  %v2325_v29 = vadd.f32 %v2324_v27, %v2035_v26  ;;  %v2326_v31 = vpop.f32.mrb[127].mxu1  ;;  %v2497_v19 = vld [vmem:[#allocation3 + $0x110] sm:$0xff] (%p2456_p10)  ;;  %v2545_v26 = vpack.c.bf16 (%p2456_p10), %v2500_v24, %v2499_v23  ;;  %v2502_v27 = vld [vmem:[#allocation3 + $0x138] sm:$0xff] (%p2456_p10)  ;;  %2579 = vst [vmem:[%s5353_s10 + $0x80] sm:$0xff] (%p2456_p10), %v2543_v21 }
 0x2a1   : > { %v2544_v22 = vpack.c.bf16 (%p2456_p10), %v2498_v20, %v2497_v19  ;;  %v2523_v59 = vld [vmem:[#allocation3 + $0x1e0] sm:$0xff] (%p2456_p10) }
 0x2a2   : > { %2454 = vst [vmem:[#allocation3 + $0x1f0] sm:$0xff] %v2390_v28  ;;  %v2391_v32 = vadd.f32 %v2325_v29, %v806_v25  ;;  %v2501_v25 = vld [vmem:[#allocation3 + $0x130] sm:$0xff] (%p2456_p10)  ;;  %v2503_v28 = vld [vmem:[#allocation3 + $0x140] sm:$0xff] (%p2456_p10)  ;;  %v2504_v29 = vld [vmem:[#allocation3 + $0x148] sm:$0xff] (%p2456_p10) }
 0x2a3   : > { %2580 = vst [vmem:[%s5353_s10 + $0x88] sm:$0xff] (%p2456_p10), %v2544_v22  ;;  %v2546_v30 = vpack.c.bf16 (%p2456_p10), %v2502_v27, %v2501_v25  ;;  %v2547_v31 = vpack.c.bf16 (%p2456_p10), %v2504_v29, %v2503_v28  ;;  %2581 = vst [vmem:[%s5353_s10 + $0x90] sm:$0xff] (%p2456_p10), %v2545_v26  ;;  %v2524_v60 = vld [vmem:[#allocation3 + $0x1e8] sm:$0xff] (%p2456_p10) }
 0x2a4   : > { %2455 = vst [vmem:[#allocation3 + $0x1f8] sm:$0xff] %v2391_v32  ;;  %v2505_v32 = vld [vmem:[#allocation3 + $0x150] sm:$0xff] (%p2456_p10)  ;;  %v2557_v62 = vpack.c.bf16 (%p2456_p10), %v2524_v60, %v2523_v59 }
 0x2a5   : > { %v2548_v35 = vpack.c.bf16 %v2506_v33, %v2505_v32  ;;  %2582 = vst [vmem:[%s5353_s10 + $0x98] sm:$0xff] %v2546_v30  ;;  %2583 = vst [vmem:[%s5353_s10 + $0xa0] sm:$0xff] %v2547_v31 }
 0x2a6   : > { %2593 = vst [vmem:[%s5353_s10 + $0xf0] sm:$0xff] %v2557_v62 }
 0x2a7   : > { %2584 = vst [vmem:[%s5353_s10 + $0xa8] sm:$0xff] %v2548_v35 }
 0x2a9   : > { %v2525_v61 = vld [vmem:[#allocation3 + $0x1f0] sm:$0xff] }
 0x2ab   : > { %v2526_v63 = vld [vmem:[#allocation3 + $0x1f8] sm:$0xff] }
 0x2ac   : > { %v2558_v0 = vpack.c.bf16 %v2526_v63, %v2525_v61 }
 0x2ae   : > { %2594 = vst [vmem:[%s5353_s10 + $0xf8] sm:$0xff] %v2558_v0 }
 0x2af PF: > { %p2595_p11 = scmp.eq.s32.totalorder %s5064_s21, 1 }
 0x2b0   : > { %v4864_v1 = vld [vmem:[#allocation9] sm:$0xff] (%p2595_p11)   ;;  %v4865_v2 = vld [vmem:[#allocation9 + $0x8] sm:$0xff] (%p2595_p11)   ;;  %v4866_v3 = vld [vmem:[#allocation9 + $0x10] sm:$0xff] (%p2595_p11)  }
 0x2b1   : > { %2599 = sbr.rel (!%p2595_p11) target bundleno = 1279 (0x4ff), region = 76  ;;  %4369 = vmatprep.subr.bf16.mxu0 (%p2595_p11), %v4864_v1  ;;  %v4867_v4 = vld [vmem:[#allocation9 + $0x18] sm:$0xff] (%p2595_p11)   ;;  %v2600_v5 = vld [vmem:[#allocation3] sm:$0xff] (%p2595_p11)  ;;  %v2601_v6 = vld [vmem:[#allocation3 + $0x8] sm:$0xff] (%p2595_p11) }
 0x2b2   : > { %4370 = vmatpush3.bf16.msra.mxu0 (%p2595_p11), %v4864_v1  ;;  %v2632_v7 = vmax.f32 (%p2595_p11), %v2600_v5, 0.0  ;;  %v2633_v8 = vmax.f32 (%p2595_p11), %v2601_v6, 0.0  ;;  %v4868_v10 = vld [vmem:[#allocation9 + $0x20] sm:$0xff] (%p2595_p11)   ;;  %v4869_v11 = vld [vmem:[#allocation9 + $0x28] sm:$0xff] (%p2595_p11)   ;;  %v4870_v12 = vld [vmem:[#allocation9 + $0x30] sm:$0xff] (%p2595_p11)  }
 0x2b3   : > { %4371 = vmatprep.subr.bf16.mxu0 (%p2595_p11), %v4865_v2  ;;  %v4871_v13 = vld [vmem:[#allocation9 + $0x38] sm:$0xff] (%p2595_p11)   ;;  %v2602_v14 = vld [vmem:[#allocation3 + $0x10] sm:$0xff] (%p2595_p11)  ;;  %v2604_v16 = vld [vmem:[#allocation3 + $0x20] sm:$0xff] (%p2595_p11) }
 0x2b4   : > { %v2664_v9 = vpack.c.bf16 (%p2595_p11), %v2633_v8, %v2632_v7  ;;  %v2603_v15 = vld [vmem:[#allocation3 + $0x18] sm:$0xff] (%p2595_p11)  ;;  %v2605_v17 = vld [vmem:[#allocation3 + $0x28] sm:$0xff] (%p2595_p11)  ;;  %v2634_v18 = vmax.f32 (%p2595_p11), %v2602_v14, 0.0  ;;  %v2636_v20 = vmax.f32 (%p2595_p11), %v2604_v16, 0.0  ;;  %v4872_v22 = vld [vmem:[#allocation9] sm:$0xff] (%p2595_p11)  }
 0x2b5   : > { %v2635_v19 = vmax.f32 (%p2595_p11), %v2603_v15, 0.0  ;;  %v2637_v21 = vmax.f32 (%p2595_p11), %v2605_v17, 0.0  ;;  %v2606_v25 = vld [vmem:[#allocation3 + $0x30] sm:$0xff] (%p2595_p11)  ;;  %v2607_v26 = vld [vmem:[#allocation3 + $0x38] sm:$0xff] (%p2595_p11)  ;;  %v4873_v27 = vld [vmem:[#allocation9 + $0x8] sm:$0xff] (%p2595_p11)  }
 0x2b6   : > { %4372 = vmatpush3.bf16.msra.mxu0 (%p2595_p11), %v4865_v2  ;;  %4385 = vmatprep.mubr.bf16.mxu0 (%p2595_p11), %v2664_v9  ;;  %v2608_v28 = vld [vmem:[#allocation3 + $0x40] sm:$0xff] (%p2595_p11)  ;;  %v2609_v29 = vld [vmem:[#allocation3 + $0x48] sm:$0xff] (%p2595_p11)  ;;  %v2638_v30 = vmax.f32 (%p2595_p11), %v2606_v25, 0.0  ;;  %v2639_v31 = vmax.f32 (%p2595_p11), %v2607_v26, 0.0  ;;  %v4874_v34 = vld [vmem:[#allocation9 + $0x10] sm:$0xff] (%p2595_p11)  }
 0x2b7   : > { %4373 = vmatprep.subr.bf16.mxu0 (%p2595_p11), %v4866_v3  ;;  %v2665_v23 = vpack.c.bf16 (%p2595_p11), %v2635_v19, %v2634_v18  ;;  %v2666_v24 = vpack.c.bf16 (%p2595_p11), %v2637_v21, %v2636_v20  ;;  %v2640_v32 = vmax.f32 (%p2595_p11), %v2608_v28, 0.0  ;;  %v2641_v33 = vmax.f32 (%p2595_p11), %v2609_v29, 0.0  ;;  %v2610_v35 = vld [vmem:[#allocation3 + $0x50] sm:$0xff] (%p2595_p11)  ;;  %v2611_v36 = vld [vmem:[#allocation3 + $0x58] sm:$0xff] (%p2595_p11)  ;;  %v2612_v37 = vld [vmem:[#allocation3 + $0x60] sm:$0xff] (%p2595_p11) }
 0x2b8   : > { %v2667_v38 = vpack.c.bf16 %v2639_v31, %v2638_v30  ;;  %v2613_v39 = vld [vmem:[#allocation3 + $0x68] sm:$0xff]  ;;  %v2614_v40 = vld [vmem:[#allocation3 + $0x70] sm:$0xff]  ;;  %v2615_v41 = vld [vmem:[#allocation3 + $0x78] sm:$0xff]  ;;  %v2642_v44 = vmax.f32 %v2610_v35, 0.0  ;;  %v2643_v45 = vmax.f32 %v2611_v36, 0.0  ;;  %v2644_v48 = vmax.f32 %v2612_v37, 0.0 }
 0x2b9   : > { %v2668_v42 = vpack.c.bf16 %v2641_v33, %v2640_v32  ;;  %v4875_v43 = vld [vmem:[#allocation9 + $0x18] sm:$0xff]   ;;  %v2616_v46 = vld [vmem:[#allocation3 + $0x80] sm:$0xff]  ;;  %v4881_v49 = vld [vmem:[#allocation10 + $0x8] sm:$0xff]   ;;  %v2645_v50 = vmax.f32 %v2613_v39, 0.0  ;;  %v2646_v52 = vmax.f32 %v2614_v40, 0.0  ;;  %v2647_v53 = vmax.f32 %v2615_v41, 0.0 }
 0x2ba   : > { %4374 = vmatpush3.bf16.msra.mxu0 %v4866_v3  ;;  %v4880_v47 = vld [vmem:[#allocation10] sm:$0xff]   ;;  %v2617_v51 = vld [vmem:[#allocation3 + $0x88] sm:$0xff]  ;;  %v2648_v54 = vmax.f32 %v2616_v46, 0.0  ;;  %v4882_v57 = vld [vmem:[#allocation10 + $0x10] sm:$0xff]   ;;  %v2669_v58 = vpack.c.bf16 %v2643_v45, %v2642_v44 }
 0x2bb   : > { %4375 = vmatprep.subr.bf16.mxu0 %v4867_v4  ;;  %4417 = vmatprep.subr.bf16.mxu1 %v4880_v47  ;;  %v4876_v55 = vld [vmem:[#allocation9 + $0x20] sm:$0xff]   ;;  %v2649_v56 = vmax.f32 %v2617_v51, 0.0  ;;  %v4877_v59 = vld [vmem:[#allocation9 + $0x28] sm:$0xff]   ;;  %v2670_v60 = vpack.c.bf16 %v2645_v50, %v2644_v48  ;;  %v4883_v61 = vld [vmem:[#allocation10 + $0x18] sm:$0xff]   ;;  %v2671_v0 = vpack.c.bf16 %v2647_v53, %v2646_v52 }
 0x2bc   : > { %4418 = vmatpush3.bf16.msra.mxu1 %v4880_v47  ;;  %v4878_v62 = vld [vmem:[#allocation9 + $0x30] sm:$0xff]   ;;  %v4884_v63 = vld [vmem:[#allocation10 + $0x20] sm:$0xff]   ;;  %v2619_v3 = vld [vmem:[#allocation3 + $0x98] sm:$0xff] }
 0x2bd   : > { %4419 = vmatprep.subr.bf16.mxu1 %v4881_v49  ;;  %v2672_v1 = vpack.c.bf16 %v2649_v56, %v2648_v54  ;;  %v2618_v2 = vld [vmem:[#allocation3 + $0x90] sm:$0xff]  ;;  %v2621_v5 = vld [vmem:[#allocation3 + $0xa8] sm:$0xff]  ;;  %v4879_v6 = vld [vmem:[#allocation9 + $0x38] sm:$0xff]   ;;  %v2651_v9 = vmax.f32 %v2619_v3, 0.0 }
 0x2be   : > { %4376 = vmatpush3.bf16.msra.mxu0 %v4867_v4  ;;  %v2620_v4 = vld [vmem:[#allocation3 + $0xa0] sm:$0xff]  ;;  %v4885_v7 = vld [vmem:[#allocation10 + $0x28] sm:$0xff]   ;;  %v2650_v8 = vmax.f32 %v2618_v2, 0.0  ;;  %v2622_v14 = vld [vmem:[#allocation3 + $0xb0] sm:$0xff] }
 0x2bf   : > { %4377 = vmatprep.subr.bf16.mxu0 %v4868_v10  ;;  %v2623_v15 = vld [vmem:[#allocation3 + $0xb8] sm:$0xff]  ;;  %v2624_v16 = vld [vmem:[#allocation3 + $0xc0] sm:$0xff]  ;;  %v2625_v17 = vld [vmem:[#allocation3 + $0xc8] sm:$0xff]  ;;  %v2654_v18 = vmax.f32 %v2622_v14, 0.0 }
 0x2c0   : > { %4420 = vmatpush3.bf16.msra.mxu1 %v4881_v49  ;;  %v2655_v19 = vmax.f32 %v2623_v15, 0.0  ;;  %v2656_v20 = vmax.f32 %v2624_v16, 0.0  ;;  %v2657_v21 = vmax.f32 %v2625_v17, 0.0  ;;  %v2627_v25 = vld [vmem:[#allocation3 + $0xd8] sm:$0xff]  ;;  %v2628_v26 = vld [vmem:[#allocation3 + $0xe0] sm:$0xff]  ;;  %v3194_v37 = vld [vmem:[#allocation3 + $0x108] sm:$0xff] }
 0x2c1   : > { %4421 = vmatprep.subr.bf16.mxu1 %v4882_v57  ;;  %v2659_v29 = vmax.f32 %v2627_v25, 0.0  ;;  %v2660_v30 = vmax.f32 %v2628_v26, 0.0  ;;  %v2631_v35 = vld [vmem:[#allocation3 + $0xf8] sm:$0xff]  ;;  %v3193_v36 = vld [vmem:[#allocation3 + $0x100] sm:$0xff]  ;;  %v3226_v41 = vmax.f32 %v3194_v37, 0.0  ;;  %v3195_v44 = vld [vmem:[#allocation3 + $0x110] sm:$0xff] }
 0x2c2   : > { %4378 = vmatpush3.bf16.msra.mxu0 %v4868_v10  ;;  %v2652_v10 = vmax.f32 %v2620_v4, 0.0  ;;  %v2663_v39 = vmax.f32 %v2631_v35, 0.0  ;;  %v3225_v40 = vmax.f32 %v3193_v36, 0.0  ;;  %v3196_v45 = vld [vmem:[#allocation3 + $0x118] sm:$0xff]  ;;  %v3197_v46 = vld [vmem:[#allocation3 + $0x120] sm:$0xff]  ;;  %v3198_v47 = vld [vmem:[#allocation3 + $0x128] sm:$0xff] }
 0x2c3   : > { %4379 = vmatprep.subr.bf16.mxu0 %v4869_v11  ;;  %v3227_v48 = vmax.f32 %v3195_v44, 0.0  ;;  %v3228_v49 = vmax.f32 %v3196_v45, 0.0  ;;  %v3229_v50 = vmax.f32 %v3197_v46, 0.0  ;;  %v3230_v51 = vmax.f32 %v3198_v47, 0.0  ;;  %v3199_v54 = vld [vmem:[#allocation3 + $0x130] sm:$0xff]  ;;  %v3201_v56 = vld [vmem:[#allocation3 + $0x140] sm:$0xff] }
 0x2c4   : > { %4422 = vmatpush3.bf16.msra.mxu1 %v4882_v57  ;;  %v3202_v57 = vld [vmem:[#allocation3 + $0x148] sm:$0xff]  ;;  %v3205_v2 = vld [vmem:[#allocation3 + $0x160] sm:$0xff]  ;;  %v4887_v25 = vld [vmem:[#allocation10 + $0x38] sm:$0xff]  }
 0x2c5   : > { %4423 = vmatprep.subr.bf16.mxu1 %v4883_v61  ;;  %v3258_v52 = vpack.c.bf16 %v3228_v49, %v3227_v48  ;;  %v3259_v53 = vpack.c.bf16 %v3230_v51, %v3229_v50  ;;  %v3206_v3 = vld [vmem:[#allocation3 + $0x168] sm:$0xff]  ;;  %v3217_v35 = vld [vmem:[#allocation3 + $0x1c0] sm:$0xff]  ;;  %v3220_v44 = vld [vmem:[#allocation3 + $0x1d8] sm:$0xff] }
 0x2c6   : > { %4380 = vmatpush3.bf16.msra.mxu0 %v4869_v11  ;;  %v2653_v11 = vmax.f32 %v2621_v5, 0.0  ;;  %v3218_v36 = vld [vmem:[#allocation3 + $0x1c8] sm:$0xff]  ;;  %v3221_v45 = vld [vmem:[#allocation3 + $0x1e0] sm:$0xff]  ;;  %v3252_v48 = vmax.f32 %v3220_v44, 0.0 }
 0x2c7   : > { %4381 = vmatprep.subr.bf16.mxu0 %v4870_v12  ;;  %v3222_v46 = vld [vmem:[#allocation3 + $0x1e8] sm:$0xff]  ;;  %v3253_v49 = vmax.f32 %v3221_v45, 0.0 }
 0x2c8   : > { %4424 = vmatpush3.bf16.msra.mxu1 %v4883_v61  ;;  %v3234_v61 = vmax.f32 %v3202_v57, 0.0  ;;  %v3254_v50 = vmax.f32 %v3222_v46, 0.0 }
 0x2c9   : > { %4425 = vmatprep.subr.bf16.mxu1 %v4884_v63 }
 0x2ca   : > { %4382 = vmatpush3.bf16.msra.mxu0 %v4870_v12  ;;  %v2673_v12 = vpack.c.bf16 %v2651_v9, %v2650_v8 }
 0x2cb   : > { %4383 = vmatprep.subr.bf16.mxu0 %v4871_v13 }
 0x2cc   : > { %4426 = vmatpush3.bf16.msra.mxu1 %v4884_v63 }
 0x2cd   : > { %4427 = vmatprep.subr.bf16.mxu1 %v4885_v7 }
 0x2ce   : > { %4384 = vmatpush3.bf16.msra.mxu0 %v4871_v13  ;;  %v2674_v13 = vpack.c.bf16 %v2653_v11, %v2652_v10  ;;  %v3207_v10 = vld [vmem:[#allocation3 + $0x170] sm:$0xff]  ;;  %v3208_v11 = vld [vmem:[#allocation3 + $0x178] sm:$0xff] }
 0x2cf   : > { %4465 = vmatprep.subr.bf16.mxu0 %v4872_v22  ;;  %v3239_v14 = vmax.f32 %v3207_v10, 0.0  ;;  %v3240_v15 = vmax.f32 %v3208_v11, 0.0 }
 0x2d0   : > { %4428 = vmatpush3.bf16.msra.mxu1 %v4885_v7  ;;  %v3238_v7 = vmax.f32 %v3206_v3, 0.0 }
 0x2d1   : > { %4386 = vmatmul.mubr.bf16.vlgmr.msra.gmra.mrb[0].mxu0 %v2665_v23  ;;  %v2676_v23 = vpack.c.bf16 %v2657_v21, %v2656_v20  ;;  %v3211_v21 = vld [vmem:[#allocation3 + $0x190] sm:$0xff] }
 0x2d2   : > { %4466 = vmatpush3.bf16.msra.mxu0 %v4872_v22  ;;  %4389 = vmatprep.mubr.bf16.mxu0 %v2666_v24  ;;  %v2675_v22 = vpack.c.bf16 %v2655_v19, %v2654_v18  ;;  %v2626_v24 = vld [vmem:[#allocation3 + $0xd0] sm:$0xff]  ;;  %v3264_v19 = vpack.c.bf16 %v3240_v15, %v3239_v14  ;;  %v3243_v26 = vmax.f32 %v3211_v21, 0.0 }
 0x2d3   : > { %4467 = vmatprep.subr.bf16.mxu0 %v4873_v27  ;;  %v2658_v28 = vmax.f32 %v2626_v24, 0.0  ;;  %v4886_v18 = vld [vmem:[#allocation10 + $0x30] sm:$0xff]   ;;  %v3214_v24 = vld [vmem:[#allocation3 + $0x1a8] sm:$0xff] }
 0x2d4   : > { %4429 = vmatprep.subr.bf16.mxu1 %v4886_v18 }
 0x2d5   : > { %v2677_v32 = vpack.c.bf16 %v2659_v29, %v2658_v28  ;;  %4430 = vmatpush3.bf16.msra.mxu1 %v4886_v18  ;;  %v3246_v29 = vmax.f32 %v3214_v24, 0.0  ;;  %v4892_v24 = vld [vmem:[#allocation10 + $0x20] sm:$0xff]  }
 0x2d6   : > { %4468 = vmatpush3.bf16.msra.mxu0 %v4873_v27  ;;  %v2629_v27 = vld [vmem:[#allocation3 + $0xe8] sm:$0xff]  ;;  %4431 = vmatprep.subr.bf16.mxu1 %v4887_v25 }
 0x2d7   : > { %4469 = vmatprep.subr.bf16.mxu0 %v4874_v34  ;;  %v2661_v31 = vmax.f32 %v2629_v27, 0.0 }
 0x2d9   : > { %4390 = vmatmul.mubr.bf16.gmra.mrb[4].mxu0 %v2667_v38  ;;  %v2678_v33 = vpack.c.bf16 %v2661_v31, %v2660_v30  ;;  %4432 = vmatpush3.bf16.msra.mxu1 %v4887_v25 }
 0x2da   : > { %4393 = vmatprep.mubr.bf16.mxu0 %v2668_v42  ;;  %4470 = vmatpush3.bf16.msra.mxu0 %v4874_v34  ;;  %v2630_v34 = vld [vmem:[#allocation3 + $0xf0] sm:$0xff] }
 0x2db   : > { %4471 = vmatprep.subr.bf16.mxu0 %v4875_v43  ;;  %v2662_v38 = vmax.f32 %v2630_v34, 0.0  ;;  %v4888_v34 = vld [vmem:[#allocation10] sm:$0xff]  }
 0x2dc   : > { %4513 = vmatprep.subr.bf16.mxu1 %v4888_v34 }
 0x2dd   : > { %v2679_v42 = vpack.c.bf16 %v2663_v39, %v2662_v38  ;;  %v3249_v39 = vmax.f32 %v3217_v35, 0.0 }
 0x2de   : > { %4472 = vmatpush3.bf16.msra.mxu0 %v4875_v43  ;;  %v3257_v43 = vpack.c.bf16 %v3226_v41, %v3225_v40  ;;  %v3250_v40 = vmax.f32 %v3218_v36, 0.0  ;;  %v4894_v36 = vld [vmem:[#allocation10 + $0x30] sm:$0xff]  }
 0x2df   : > { %4473 = vmatprep.subr.bf16.mxu0 %v4876_v55 }
 0x2e1   : > { %4394 = vmatmul.mubr.bf16.gmra.mrb[8].mxu0 %v2669_v58  ;;  %v3231_v58 = vmax.f32 %v3199_v54, 0.0  ;;  %v3224_v54 = vld [vmem:[#allocation3 + $0x1f8] sm:$0xff] }
 0x2e2   : > { %4397 = vmatprep.mubr.bf16.mxu0 %v2670_v60  ;;  %4474 = vmatpush3.bf16.msra.mxu0 %v4876_v55  ;;  %v3200_v55 = vld [vmem:[#allocation3 + $0x138] sm:$0xff]  ;;  %v3233_v60 = vmax.f32 %v3201_v56, 0.0  ;;  %v3256_v56 = vmax.f32 %v3224_v54, 0.0 }
 0x2e3   : > { %4475 = vmatprep.subr.bf16.mxu0 %v4877_v59 }
 0x2e4   : > { %v3261_v63 = vpack.c.bf16 %v3234_v61, %v3233_v60 }
 0x2e6   : > { %4476 = vmatpush3.bf16.msra.mxu0 %v4877_v59  ;;  %v3232_v59 = vmax.f32 %v3200_v55, 0.0 }
 0x2e7   : > { %4477 = vmatprep.subr.bf16.mxu0 %v4878_v62 }
 0x2e9   : > { %4398 = vmatmul.mubr.bf16.gmra.mrb[12].mxu0 %v2671_v0  ;;  %v3203_v0 = vld [vmem:[#allocation3 + $0x150] sm:$0xff] }
 0x2ea   : > { %4401 = vmatprep.mubr.bf16.mxu0 %v2672_v1  ;;  %4478 = vmatpush3.bf16.msra.mxu0 %v4878_v62  ;;  %v3260_v62 = vpack.c.bf16 %v3232_v59, %v3231_v58  ;;  %v3204_v1 = vld [vmem:[#allocation3 + $0x158] sm:$0xff]  ;;  %v3235_v4 = vmax.f32 %v3203_v0, 0.0  ;;  %v5391_v59 = vld [vmem:[%s5566_s3] ss:$0 sm:$0xff] }
 0x2eb   : > { %4479 = vmatprep.subr.bf16.mxu0 %v4879_v6  ;;  %v3236_v5 = vmax.f32 %v3204_v1, 0.0 }
 0x2ed   : > { %v3262_v8 = vpack.c.bf16 %v3236_v5, %v3235_v4  ;;  %v4889_v5 = vld [vmem:[#allocation10 + $0x8] sm:$0xff]  }
 0x2ee   : > { %4480 = vmatpush3.bf16.msra.mxu0 %v4879_v6  ;;  %v3237_v6 = vmax.f32 %v3205_v2, 0.0 }
 0x2f0   : > { %v3263_v9 = vpack.c.bf16 %v3238_v7, %v3237_v6 }
 0x2f1   : > { %4402 = vmatmul.mubr.bf16.gmra.mrb[16].mxu0 %v2673_v12  ;;  %v3209_v12 = vld [vmem:[#allocation3 + $0x180] sm:$0xff] }
 0x2f2   : > { %4405 = vmatprep.mubr.bf16.mxu0 %v2674_v13  ;;  %v3210_v13 = vld [vmem:[#allocation3 + $0x188] sm:$0xff]  ;;  %v3241_v16 = vmax.f32 %v3209_v12, 0.0  ;;  %v4890_v12 = vld [vmem:[#allocation10 + $0x10] sm:$0xff]  }
 0x2f3   : > { %v3242_v17 = vmax.f32 %v3210_v13, 0.0 }
 0x2f5   : > { %v3265_v20 = vpack.c.bf16 %v3242_v17, %v3241_v16  ;;  %v4891_v17 = vld [vmem:[#allocation10 + $0x18] sm:$0xff]  }
 0x2f9   : > { %4406 = vmatmul.mubr.bf16.gmra.mrb[20].mxu0 %v2675_v22  ;;  %v3212_v22 = vld [vmem:[#allocation3 + $0x198] sm:$0xff] }
 0x2fa   : > { %4409 = vmatprep.mubr.bf16.mxu0 %v2676_v23  ;;  %v3213_v23 = vld [vmem:[#allocation3 + $0x1a0] sm:$0xff]  ;;  %v3244_v27 = vmax.f32 %v3212_v22, 0.0 }
 0x2fb   : > { %v3245_v28 = vmax.f32 %v3213_v23, 0.0 }
 0x2fc   : > { %v3266_v30 = vpack.c.bf16 %v3244_v27, %v3243_v26 }
 0x2fd   : > { %v3267_v31 = vpack.c.bf16 %v3246_v29, %v3245_v28  ;;  %v4893_v29 = vld [vmem:[#allocation10 + $0x28] sm:$0xff]  }
 0x301   : > { %4410 = vmatmul.mubr.bf16.gmra.mrb[24].mxu0 %v2677_v32  ;;  %v3215_v32 = vld [vmem:[#allocation3 + $0x1b0] sm:$0xff] }
 0x302   : > { %4413 = vmatprep.mubr.bf16.mxu0 %v2678_v33  ;;  %v3216_v33 = vld [vmem:[#allocation3 + $0x1b8] sm:$0xff]  ;;  %v3247_v37 = vmax.f32 %v3215_v32, 0.0 }
 0x303   : > { %v3248_v38 = vmax.f32 %v3216_v33, 0.0 }
 0x305   : > { %v3268_v41 = vpack.c.bf16 %v3248_v38, %v3247_v37 }
 0x309   : > { %4414 = vmatmul.mubr.bf16.gmra.mrb[28].mxu0 %v2679_v42  ;;  %v3269_v42 = vpack.c.bf16 %v3250_v40, %v3249_v39 }
 0x30a   : > { %4481 = vmatprep.mubr.bf16.mxu0 %v3257_v43  ;;  %v3219_v43 = vld [vmem:[#allocation3 + $0x1d0] sm:$0xff] }
 0x30b   : > { %v3251_v47 = vmax.f32 %v3219_v43, 0.0 }
 0x30d   : > { %v3270_v51 = vpack.c.bf16 %v3252_v48, %v3251_v47 }
 0x311   : > { %4482 = vmatmul.mubr.bf16.vlgmr.msra.gmra.mrb[32].mxu0 %v3258_v52  ;;  %v3271_v52 = vpack.c.bf16 %v3254_v50, %v3253_v49 }
 0x312   : > { %4485 = vmatprep.mubr.bf16.mxu0 %v3259_v53  ;;  %v3223_v53 = vld [vmem:[#allocation3 + $0x1f0] sm:$0xff] }
 0x313   : > { %v3255_v55 = vmax.f32 %v3223_v53, 0.0 }
 0x315   : > { %v3272_v57 = vpack.c.bf16 %v3256_v56, %v3255_v55 }
 0x319   : > { %4486 = vmatmul.mubr.bf16.gmra.mrb[36].mxu0 %v3260_v62 }
 0x31a   : > { %4489 = vmatprep.mubr.bf16.mxu0 %v3261_v63 }
 0x321   : > { %4490 = vmatmul.mubr.bf16.gmra.mrb[40].mxu0 %v3262_v8 }
 0x322   : > { %4493 = vmatprep.mubr.bf16.mxu0 %v3263_v9 }
 0x329   : > { %4494 = vmatmul.mubr.bf16.gmra.mrb[44].mxu0 %v3264_v19 }
 0x32a   : > { %4497 = vmatprep.mubr.bf16.mxu0 %v3265_v20 }
 0x331   : > { %4498 = vmatmul.mubr.bf16.gmra.mrb[48].mxu0 %v3266_v30 }
 0x332   : > { %4501 = vmatprep.mubr.bf16.mxu0 %v3267_v31 }
 0x339   : > { %4502 = vmatmul.mubr.bf16.gmra.mrb[52].mxu0 %v3268_v41  ;;  %v4895_v41 = vld [vmem:[#allocation10 + $0x38] sm:$0xff]  }
 0x33a   : > { %4505 = vmatprep.mubr.bf16.mxu0 %v3269_v42 }
 0x341   : > { %4506 = vmatmul.mubr.bf16.gmra.mrb[56].mxu0 %v3270_v51 }
 0x342   : > { %4509 = vmatprep.mubr.bf16.mxu0 %v3271_v52 }
 0x349   : > { %4510 = vmatmul.mubr.bf16.gmra.mrb[60].mxu0 %v3272_v57 }
 0x3a4   : > { %v4387_v58 = vpop.f32.mrb[0].mxu0 }
 0x3a5   : > { %v2785_v60 = vpop.f32.mrb[1].mxu0  ;;  %v2794_v62 = vadd.f32 %v4387_v58, %v5391_v59 }
 0x3a6   : > { %v4388_v61 = vpop.f32.mrb[2].mxu0  ;;  %v2786_v1 = vadd.f32 %v5391_v59, %v2785_v60 }
 0x3a7   : > { %v2797_v63 = vadd.f32 %v4388_v61, %v5391_v59  ;;  %v2788_v0 = vpop.f32.mrb[3].mxu0 }
 0x3a8   : > { %v2789_v2 = vadd.f32 %v5391_v59, %v2788_v0 }
 0x3a9   : > { %v2913_v3 = vpack.c.bf16 %v2797_v63, %v2794_v62 }
 0x3aa   : > { %v2912_v4 = vpack.c.bf16 %v2789_v2, %v2786_v1 }
 0x3ac   : > { %v4391_v6 = vpop.f32.mrb[4].mxu0  ;;  %4433 = vmatprep.mubr.bf16.mxu1 %v2912_v4 }
 0x3ad   : > { %v2801_v7 = vpop.f32.mrb[5].mxu0  ;;  %4434 = vmatmul.mubr.bf16.vlgmr.msra.gmra.mrb[0].mxu1 %v2913_v3  ;;  %v2810_v9 = vadd.f32 %v4391_v6, %v5391_v59 }
 0x3ae   : > { %v4392_v8 = vpop.f32.mrb[6].mxu0  ;;  %4514 = vmatpush3.bf16.msra.mxu1 %v4888_v34  ;;  %v2802_v13 = vadd.f32 %v5391_v59, %v2801_v7 }
 0x3af   : > { %v2813_v10 = vadd.f32 %v4392_v8, %v5391_v59  ;;  %v2804_v11 = vpop.f32.mrb[7].mxu0  ;;  %4515 = vmatprep.subr.bf16.mxu1 %v4889_v5 }
 0x3b0   : > { %v2805_v14 = vadd.f32 %v5391_v59, %v2804_v11 }
 0x3b1   : > { %v2915_v15 = vpack.c.bf16 %v2813_v10, %v2810_v9 }
 0x3b2   : > { %v2914_v16 = vpack.c.bf16 %v2805_v14, %v2802_v13  ;;  %4516 = vmatpush3.bf16.msra.mxu1 %v4889_v5 }
 0x3b3   : > { %4517 = vmatprep.subr.bf16.mxu1 %v4890_v12 }
 0x3b4   : > { %v4395_v18 = vpop.f32.mrb[8].mxu0  ;;  %4437 = vmatprep.mubr.bf16.mxu1 %v2914_v16 }
 0x3b5   : > { %v2817_v19 = vpop.f32.mrb[9].mxu0  ;;  %4438 = vmatmul.mubr.bf16.gmra.mrb[4].mxu1 %v2915_v15  ;;  %v2826_v21 = vadd.f32 %v4395_v18, %v5391_v59 }
 0x3b6   : > { %v4396_v20 = vpop.f32.mrb[10].mxu0  ;;  %4518 = vmatpush3.bf16.msra.mxu1 %v4890_v12  ;;  %v2818_v25 = vadd.f32 %v5391_v59, %v2817_v19 }
 0x3b7   : > { %v2829_v22 = vadd.f32 %v4396_v20, %v5391_v59  ;;  %v2820_v23 = vpop.f32.mrb[11].mxu0  ;;  %4519 = vmatprep.subr.bf16.mxu1 %v4891_v17 }
 0x3b8   : > { %v2821_v26 = vadd.f32 %v5391_v59, %v2820_v23 }
 0x3b9   : > { %v2917_v27 = vpack.c.bf16 %v2829_v22, %v2826_v21 }
 0x3ba   : > { %v2916_v28 = vpack.c.bf16 %v2821_v26, %v2818_v25  ;;  %4520 = vmatpush3.bf16.msra.mxu1 %v4891_v17 }
 0x3bb   : > { %4521 = vmatprep.subr.bf16.mxu1 %v4892_v24 }
 0x3bc   : > { %v4399_v30 = vpop.f32.mrb[12].mxu0  ;;  %4441 = vmatprep.mubr.bf16.mxu1 %v2916_v28 }
 0x3bd   : > { %v2833_v31 = vpop.f32.mrb[13].mxu0  ;;  %4442 = vmatmul.mubr.bf16.gmra.mrb[8].mxu1 %v2917_v27  ;;  %v2842_v33 = vadd.f32 %v4399_v30, %v5391_v59 }
 0x3be   : > { %v4400_v32 = vpop.f32.mrb[14].mxu0  ;;  %4522 = vmatpush3.bf16.msra.mxu1 %v4892_v24  ;;  %v2834_v37 = vadd.f32 %v5391_v59, %v2833_v31 }
 0x3bf   : > { %v2845_v34 = vadd.f32 %v4400_v32, %v5391_v59  ;;  %v2836_v35 = vpop.f32.mrb[15].mxu0  ;;  %4523 = vmatprep.subr.bf16.mxu1 %v4893_v29 }
 0x3c0   : > { %v2837_v38 = vadd.f32 %v5391_v59, %v2836_v35 }
 0x3c1   : > { %v2919_v39 = vpack.c.bf16 %v2845_v34, %v2842_v33 }
 0x3c2   : > { %v2918_v40 = vpack.c.bf16 %v2837_v38, %v2834_v37  ;;  %4524 = vmatpush3.bf16.msra.mxu1 %v4893_v29 }
 0x3c3   : > { %4525 = vmatprep.subr.bf16.mxu1 %v4894_v36 }
 0x3c4   : > { %v4403_v42 = vpop.f32.mrb[16].mxu0  ;;  %4445 = vmatprep.mubr.bf16.mxu1 %v2918_v40 }
 0x3c5   : > { %v2849_v43 = vpop.f32.mrb[17].mxu0  ;;  %4446 = vmatmul.mubr.bf16.gmra.mrb[12].mxu1 %v2919_v39  ;;  %v2858_v45 = vadd.f32 %v4403_v42, %v5391_v59 }
 0x3c6   : > { %v4404_v44 = vpop.f32.mrb[18].mxu0  ;;  %4526 = vmatpush3.bf16.msra.mxu1 %v4894_v36  ;;  %v2850_v48 = vadd.f32 %v5391_v59, %v2849_v43 }
 0x3c7   : > { %v2861_v46 = vadd.f32 %v4404_v44, %v5391_v59  ;;  %v2852_v47 = vpop.f32.mrb[19].mxu0  ;;  %4527 = vmatprep.subr.bf16.mxu1 %v4895_v41 }
 0x3c8   : > { %v2853_v49 = vadd.f32 %v5391_v59, %v2852_v47 }
 0x3c9   : > { %v2921_v50 = vpack.c.bf16 %v2861_v46, %v2858_v45 }
 0x3ca   : > { %v2920_v51 = vpack.c.bf16 %v2853_v49, %v2850_v48  ;;  %4528 = vmatpush3.bf16.msra.mxu1 %v4895_v41 }
 0x3cc   : > { %v4407_v52 = vpop.f32.mrb[20].mxu0  ;;  %4449 = vmatprep.mubr.bf16.mxu1 %v2920_v51 }
 0x3cd   : > { %v2865_v53 = vpop.f32.mrb[21].mxu0  ;;  %4450 = vmatmul.mubr.bf16.gmra.mrb[16].mxu1 %v2921_v50  ;;  %v2874_v55 = vadd.f32 %v4407_v52, %v5391_v59 }
 0x3ce   : > { %v4408_v54 = vpop.f32.mrb[22].mxu0  ;;  %v2866_v58 = vadd.f32 %v5391_v59, %v2865_v53 }
 0x3cf   : > { %v2877_v56 = vadd.f32 %v4408_v54, %v5391_v59  ;;  %v2868_v57 = vpop.f32.mrb[23].mxu0 }
 0x3d0   : > { %v2869_v60 = vadd.f32 %v5391_v59, %v2868_v57 }
 0x3d1   : > { %v2923_v61 = vpack.c.bf16 %v2877_v56, %v2874_v55 }
 0x3d2   : > { %v2922_v62 = vpack.c.bf16 %v2869_v60, %v2866_v58 }
 0x3d4   : > { %v4411_v63 = vpop.f32.mrb[24].mxu0  ;;  %4453 = vmatprep.mubr.bf16.mxu1 %v2922_v62 }
 0x3d5   : > { %v2881_v0 = vpop.f32.mrb[25].mxu0  ;;  %4454 = vmatmul.mubr.bf16.gmra.mrb[20].mxu1 %v2923_v61  ;;  %v2890_v2 = vadd.f32 %v4411_v63, %v5391_v59 }
 0x3d6   : > { %v4412_v1 = vpop.f32.mrb[26].mxu0  ;;  %v2882_v5 = vadd.f32 %v5391_v59, %v2881_v0 }
 0x3d7   : > { %v2893_v3 = vadd.f32 %v4412_v1, %v5391_v59  ;;  %v2884_v4 = vpop.f32.mrb[27].mxu0 }
 0x3d8   : > { %v2885_v6 = vadd.f32 %v5391_v59, %v2884_v4 }
 0x3d9   : > { %v2925_v7 = vpack.c.bf16 %v2893_v3, %v2890_v2 }
 0x3da   : > { %v2924_v8 = vpack.c.bf16 %v2885_v6, %v2882_v5 }
 0x3dc   : > { %v4415_v9 = vpop.f32.mrb[28].mxu0  ;;  %4457 = vmatprep.mubr.bf16.mxu1 %v2924_v8 }
 0x3dd   : > { %v2897_v10 = vpop.f32.mrb[29].mxu0  ;;  %4458 = vmatmul.mubr.bf16.gmra.mrb[24].mxu1 %v2925_v7  ;;  %v2906_v12 = vadd.f32 %v4415_v9, %v5391_v59 }
 0x3de   : > { %v4416_v11 = vpop.f32.mrb[30].mxu0  ;;  %v2898_v15 = vadd.f32 %v5391_v59, %v2897_v10 }
 0x3df   : > { %v2909_v13 = vadd.f32 %v4416_v11, %v5391_v59  ;;  %v2900_v14 = vpop.f32.mrb[31].mxu0 }
 0x3e0   : > { %v2901_v16 = vadd.f32 %v5391_v59, %v2900_v14 }
 0x3e1   : > { %v2927_v17 = vpack.c.bf16 %v2909_v13, %v2906_v12 }
 0x3e2   : > { %v2926_v18 = vpack.c.bf16 %v2901_v16, %v2898_v15 }
 0x3e4   : > { %4461 = vmatprep.mubr.bf16.mxu1 %v2926_v18  ;;  %v4483_v19 = vpop.f32.mrb[32].mxu0 }
 0x3e5   : > { %4462 = vmatmul.mubr.bf16.gmra.mrb[28].mxu1 %v2927_v17  ;;  %v3378_v20 = vpop.f32.mrb[33].mxu0  ;;  %v3387_v22 = vadd.f32 %v4483_v19, %v5391_v59 }
 0x3e6   : > { %v4484_v21 = vpop.f32.mrb[34].mxu0  ;;  %v3379_v25 = vadd.f32 %v5391_v59, %v3378_v20 }
 0x3e7   : > { %v3390_v23 = vadd.f32 %v4484_v21, %v5391_v59  ;;  %v3381_v24 = vpop.f32.mrb[35].mxu0 }
 0x3e8   : > { %v3382_v26 = vadd.f32 %v5391_v59, %v3381_v24 }
 0x3e9   : > { %v3506_v27 = vpack.c.bf16 %v3390_v23, %v3387_v22 }
 0x3ea   : > { %v3505_v28 = vpack.c.bf16 %v3382_v26, %v3379_v25 }
 0x3ec   : > { %v4487_v29 = vpop.f32.mrb[36].mxu0  ;;  %4529 = vmatprep.mubr.bf16.mxu1 %v3505_v28 }
 0x3ed   : > { %v3394_v30 = vpop.f32.mrb[37].mxu0  ;;  %4530 = vmatmul.mubr.bf16.vlgmr.msra.gmra.mrb[32].mxu1 %v3506_v27  ;;  %v3403_v32 = vadd.f32 %v4487_v29, %v5391_v59 }
 0x3ee   : > { %v4488_v31 = vpop.f32.mrb[38].mxu0  ;;  %v3395_v35 = vadd.f32 %v5391_v59, %v3394_v30 }
 0x3ef   : > { %v3406_v33 = vadd.f32 %v4488_v31, %v5391_v59  ;;  %v3397_v34 = vpop.f32.mrb[39].mxu0 }
 0x3f0   : > { %v3398_v36 = vadd.f32 %v5391_v59, %v3397_v34 }
 0x3f1   : > { %v3508_v37 = vpack.c.bf16 %v3406_v33, %v3403_v32 }
 0x3f2   : > { %v3507_v38 = vpack.c.bf16 %v3398_v36, %v3395_v35  ;;  %v5460_v36 = vld [vmem:[%s5568_s5] ss:$0 sm:$0xff] }
 0x3f4   : > { %v4491_v39 = vpop.f32.mrb[40].mxu0  ;;  %4533 = vmatprep.mubr.bf16.mxu1 %v3507_v38 }
 0x3f5   : > { %v3410_v40 = vpop.f32.mrb[41].mxu0  ;;  %4534 = vmatmul.mubr.bf16.gmra.mrb[36].mxu1 %v3508_v37  ;;  %v3419_v42 = vadd.f32 %v4491_v39, %v5391_v59 }
 0x3f6   : > { %v4492_v41 = vpop.f32.mrb[42].mxu0  ;;  %v3411_v45 = vadd.f32 %v5391_v59, %v3410_v40 }
 0x3f7   : > { %v3422_v43 = vadd.f32 %v4492_v41, %v5391_v59  ;;  %v3413_v44 = vpop.f32.mrb[43].mxu0 }
 0x3f8   : > { %v3414_v46 = vadd.f32 %v5391_v59, %v3413_v44 }
 0x3f9   : > { %v3510_v47 = vpack.c.bf16 %v3422_v43, %v3419_v42 }
 0x3fa   : > { %v3509_v48 = vpack.c.bf16 %v3414_v46, %v3411_v45 }
 0x3fc   : > { %v4495_v49 = vpop.f32.mrb[44].mxu0  ;;  %4537 = vmatprep.mubr.bf16.mxu1 %v3509_v48 }
 0x3fd   : > { %v3426_v50 = vpop.f32.mrb[45].mxu0  ;;  %4538 = vmatmul.mubr.bf16.gmra.mrb[40].mxu1 %v3510_v47  ;;  %v3435_v52 = vadd.f32 %v4495_v49, %v5391_v59 }
 0x3fe   : > { %v4496_v51 = vpop.f32.mrb[46].mxu0  ;;  %v3427_v55 = vadd.f32 %v5391_v59, %v3426_v50 }
 0x3ff   : > { %v3438_v53 = vadd.f32 %v4496_v51, %v5391_v59  ;;  %v3429_v54 = vpop.f32.mrb[47].mxu0 }
 0x400   : > { %v3430_v56 = vadd.f32 %v5391_v59, %v3429_v54 }
 0x401   : > { %v3512_v57 = vpack.c.bf16 %v3438_v53, %v3435_v52 }
 0x402   : > { %v3511_v58 = vpack.c.bf16 %v3430_v56, %v3427_v55 }
 0x404   : > { %v4499_v60 = vpop.f32.mrb[48].mxu0  ;;  %4541 = vmatprep.mubr.bf16.mxu1 %v3511_v58 }
 0x405   : > { %v3442_v61 = vpop.f32.mrb[49].mxu0  ;;  %4542 = vmatmul.mubr.bf16.gmra.mrb[44].mxu1 %v3512_v57  ;;  %v3451_v63 = vadd.f32 %v4499_v60, %v5391_v59 }
 0x406   : > { %v4500_v62 = vpop.f32.mrb[50].mxu0  ;;  %v3443_v2 = vadd.f32 %v5391_v59, %v3442_v61 }
 0x407   : > { %v3454_v0 = vadd.f32 %v4500_v62, %v5391_v59  ;;  %v3445_v1 = vpop.f32.mrb[51].mxu0 }
 0x408   : > { %v3446_v3 = vadd.f32 %v5391_v59, %v3445_v1 }
 0x409   : > { %v3514_v4 = vpack.c.bf16 %v3454_v0, %v3451_v63 }
 0x40a   : > { %v3513_v5 = vpack.c.bf16 %v3446_v3, %v3443_v2 }
 0x40c   : > { %v4503_v6 = vpop.f32.mrb[52].mxu0  ;;  %4545 = vmatprep.mubr.bf16.mxu1 %v3513_v5 }
 0x40d   : > { %v3458_v7 = vpop.f32.mrb[53].mxu0  ;;  %4546 = vmatmul.mubr.bf16.gmra.mrb[48].mxu1 %v3514_v4  ;;  %v3467_v9 = vadd.f32 %v4503_v6, %v5391_v59 }
 0x40e   : > { %v4504_v8 = vpop.f32.mrb[54].mxu0  ;;  %v3459_v12 = vadd.f32 %v5391_v59, %v3458_v7 }
 0x40f   : > { %v3470_v10 = vadd.f32 %v4504_v8, %v5391_v59  ;;  %v3461_v11 = vpop.f32.mrb[55].mxu0 }
 0x410   : > { %v3462_v13 = vadd.f32 %v5391_v59, %v3461_v11 }
 0x411   : > { %v3516_v14 = vpack.c.bf16 %v3470_v10, %v3467_v9 }
 0x412   : > { %v3515_v15 = vpack.c.bf16 %v3462_v13, %v3459_v12 }
 0x414   : > { %v4507_v16 = vpop.f32.mrb[56].mxu0  ;;  %4549 = vmatprep.mubr.bf16.mxu1 %v3515_v15 }
 0x415   : > { %v3474_v17 = vpop.f32.mrb[57].mxu0  ;;  %4550 = vmatmul.mubr.bf16.gmra.mrb[52].mxu1 %v3516_v14  ;;  %v3483_v19 = vadd.f32 %v4507_v16, %v5391_v59 }
 0x416   : > { %v4508_v18 = vpop.f32.mrb[58].mxu0  ;;  %v3475_v22 = vadd.f32 %v5391_v59, %v3474_v17 }
 0x417   : > { %v3486_v20 = vadd.f32 %v4508_v18, %v5391_v59  ;;  %v3477_v21 = vpop.f32.mrb[59].mxu0 }
 0x418   : > { %v3478_v23 = vadd.f32 %v5391_v59, %v3477_v21 }
 0x419   : > { %v3518_v24 = vpack.c.bf16 %v3486_v20, %v3483_v19 }
 0x41a   : > { %v3517_v25 = vpack.c.bf16 %v3478_v23, %v3475_v22 }
 0x41c   : > { %v4511_v26 = vpop.f32.mrb[60].mxu0  ;;  %4553 = vmatprep.mubr.bf16.mxu1 %v3517_v25 }
 0x41d   : > { %v3490_v27 = vpop.f32.mrb[61].mxu0  ;;  %4554 = vmatmul.mubr.bf16.gmra.mrb[56].mxu1 %v3518_v24  ;;  %v3499_v29 = vadd.f32 %v4511_v26, %v5391_v59 }
 0x41e   : > { %v4512_v28 = vpop.f32.mrb[62].mxu0  ;;  %v3491_v32 = vadd.f32 %v5391_v59, %v3490_v27 }
 0x41f   : > { %v3502_v30 = vadd.f32 %v4512_v28, %v5391_v59  ;;  %v3493_v31 = vpop.f32.mrb[63].mxu0 }
 0x420   : > { %v3494_v33 = vadd.f32 %v5391_v59, %v3493_v31 }
 0x421   : > { %v3520_v34 = vpack.c.bf16 %v3502_v30, %v3499_v29 }
 0x422   : > { %v3519_v35 = vpack.c.bf16 %v3494_v33, %v3491_v32 }
 0x424   : > { %4557 = vmatprep.mubr.bf16.mxu1 %v3519_v35 }
 0x425   : > { %4558 = vmatmul.mubr.bf16.gmra.mrb[60].mxu1 %v3520_v34 }
 0x480   : > { %v4435_v37 = vpop.f32.mrb[0].mxu1 }
 0x481   : > { %v3042_v38 = vadd.f32 %v4435_v37, %v5460_v36  ;;  %v3033_v39 = vpop.f32.mrb[1].mxu1 }
 0x482   : > { %v3034_v40 = vadd.f32 %v5460_v36, %v3033_v39  ;;  %v4436_v41 = vpop.f32.mrb[2].mxu1 }
 0x483   : > { %3162 = vst [vmem:[#allocation12 + $0x10] sm:$0xff] %v3042_v38  ;;  %v3045_v42 = vadd.f32 %v4436_v41, %v5460_v36  ;;  %v3036_v59 = vpop.f32.mrb[3].mxu1 }
 0x484   : > { %3160 = vst [vmem:[#allocation12] sm:$0xff] %v3034_v40  ;;  %v3037_v43 = vadd.f32 %v5460_v36, %v3036_v59 }
 0x485   : > { %3163 = vst [vmem:[#allocation12 + $0x18] sm:$0xff] %v3045_v42 }
 0x486   : > { %3161 = vst [vmem:[#allocation12 + $0x8] sm:$0xff] %v3037_v43 }
 0x488   : > { %v4439_v44 = vpop.f32.mrb[4].mxu1 }
 0x489   : > { %v3058_v45 = vadd.f32 %v4439_v44, %v5460_v36  ;;  %v3049_v46 = vpop.f32.mrb[5].mxu1 }
 0x48a   : > { %v3050_v47 = vadd.f32 %v5460_v36, %v3049_v46  ;;  %v4440_v48 = vpop.f32.mrb[6].mxu1 }
 0x48b   : > { %3166 = vst [vmem:[#allocation12 + $0x30] sm:$0xff] %v3058_v45  ;;  %v3061_v49 = vadd.f32 %v4440_v48, %v5460_v36  ;;  %v3052_v50 = vpop.f32.mrb[7].mxu1 }
 0x48c   : > { %3164 = vst [vmem:[#allocation12 + $0x20] sm:$0xff] %v3050_v47  ;;  %v3053_v51 = vadd.f32 %v5460_v36, %v3052_v50 }
 0x48d   : > { %3167 = vst [vmem:[#allocation12 + $0x38] sm:$0xff] %v3061_v49 }
 0x48e   : > { %3165 = vst [vmem:[#allocation12 + $0x28] sm:$0xff] %v3053_v51 }
 0x490   : > { %v4443_v52 = vpop.f32.mrb[8].mxu1 }
 0x491   : > { %v3074_v53 = vadd.f32 %v4443_v52, %v5460_v36  ;;  %v3065_v54 = vpop.f32.mrb[9].mxu1 }
 0x492   : > { %v3066_v55 = vadd.f32 %v5460_v36, %v3065_v54  ;;  %v4444_v56 = vpop.f32.mrb[10].mxu1 }
 0x493   : > { %3170 = vst [vmem:[#allocation12 + $0x50] sm:$0xff] %v3074_v53  ;;  %v3077_v57 = vadd.f32 %v4444_v56, %v5460_v36  ;;  %v3068_v58 = vpop.f32.mrb[11].mxu1 }
 0x494   : > { %3168 = vst [vmem:[#allocation12 + $0x40] sm:$0xff] %v3066_v55  ;;  %v3069_v60 = vadd.f32 %v5460_v36, %v3068_v58 }
 0x495   : > { %3171 = vst [vmem:[#allocation12 + $0x58] sm:$0xff] %v3077_v57 }
 0x496   : > { %3169 = vst [vmem:[#allocation12 + $0x48] sm:$0xff] %v3069_v60 }
 0x498   : > { %v4447_v61 = vpop.f32.mrb[12].mxu1 }
 0x499   : > { %v3090_v62 = vadd.f32 %v4447_v61, %v5460_v36  ;;  %v3081_v63 = vpop.f32.mrb[13].mxu1 }
 0x49a   : > { %v3082_v0 = vadd.f32 %v5460_v36, %v3081_v63  ;;  %v4448_v1 = vpop.f32.mrb[14].mxu1 }
 0x49b   : > { %3174 = vst [vmem:[#allocation12 + $0x70] sm:$0xff] %v3090_v62  ;;  %v3093_v2 = vadd.f32 %v4448_v1, %v5460_v36  ;;  %v3084_v3 = vpop.f32.mrb[15].mxu1 }
 0x49c   : > { %3172 = vst [vmem:[#allocation12 + $0x60] sm:$0xff] %v3082_v0  ;;  %v3085_v4 = vadd.f32 %v5460_v36, %v3084_v3 }
 0x49d   : > { %3175 = vst [vmem:[#allocation12 + $0x78] sm:$0xff] %v3093_v2 }
 0x49e   : > { %3173 = vst [vmem:[#allocation12 + $0x68] sm:$0xff] %v3085_v4 }
 0x4a0   : > { %v4451_v5 = vpop.f32.mrb[16].mxu1 }
 0x4a1   : > { %v3106_v6 = vadd.f32 %v4451_v5, %v5460_v36  ;;  %v3097_v7 = vpop.f32.mrb[17].mxu1 }
 0x4a2   : > { %v3098_v8 = vadd.f32 %v5460_v36, %v3097_v7  ;;  %v4452_v9 = vpop.f32.mrb[18].mxu1 }
 0x4a3   : > { %3178 = vst [vmem:[#allocation12 + $0x90] sm:$0xff] %v3106_v6  ;;  %v3109_v10 = vadd.f32 %v4452_v9, %v5460_v36  ;;  %v3100_v11 = vpop.f32.mrb[19].mxu1 }
 0x4a4   : > { %3176 = vst [vmem:[#allocation12 + $0x80] sm:$0xff] %v3098_v8  ;;  %v3101_v12 = vadd.f32 %v5460_v36, %v3100_v11 }
 0x4a5   : > { %3179 = vst [vmem:[#allocation12 + $0x98] sm:$0xff] %v3109_v10 }
 0x4a6   : > { %3177 = vst [vmem:[#allocation12 + $0x88] sm:$0xff] %v3101_v12 }
 0x4a8   : > { %v4455_v13 = vpop.f32.mrb[20].mxu1 }
 0x4a9   : > { %v3122_v14 = vadd.f32 %v4455_v13, %v5460_v36  ;;  %v3113_v15 = vpop.f32.mrb[21].mxu1 }
 0x4aa   : > { %v3114_v16 = vadd.f32 %v5460_v36, %v3113_v15  ;;  %v4456_v17 = vpop.f32.mrb[22].mxu1 }
 0x4ab   : > { %3182 = vst [vmem:[#allocation12 + $0xb0] sm:$0xff] %v3122_v14  ;;  %v3125_v18 = vadd.f32 %v4456_v17, %v5460_v36  ;;  %v3116_v19 = vpop.f32.mrb[23].mxu1 }
 0x4ac   : > { %3180 = vst [vmem:[#allocation12 + $0xa0] sm:$0xff] %v3114_v16  ;;  %v3117_v20 = vadd.f32 %v5460_v36, %v3116_v19 }
 0x4ad   : > { %3183 = vst [vmem:[#allocation12 + $0xb8] sm:$0xff] %v3125_v18 }
 0x4ae   : > { %3181 = vst [vmem:[#allocation12 + $0xa8] sm:$0xff] %v3117_v20 }
 0x4b0   : > { %v4459_v21 = vpop.f32.mrb[24].mxu1 }
 0x4b1   : > { %v3138_v22 = vadd.f32 %v4459_v21, %v5460_v36  ;;  %v3129_v23 = vpop.f32.mrb[25].mxu1 }
 0x4b2   : > { %v3130_v24 = vadd.f32 %v5460_v36, %v3129_v23  ;;  %v4460_v25 = vpop.f32.mrb[26].mxu1 }
 0x4b3   : > { %3186 = vst [vmem:[#allocation12 + $0xd0] sm:$0xff] %v3138_v22  ;;  %v3141_v26 = vadd.f32 %v4460_v25, %v5460_v36  ;;  %v3132_v27 = vpop.f32.mrb[27].mxu1 }
 0x4b4   : > { %3184 = vst [vmem:[#allocation12 + $0xc0] sm:$0xff] %v3130_v24  ;;  %v3133_v28 = vadd.f32 %v5460_v36, %v3132_v27 }
 0x4b5   : > { %3187 = vst [vmem:[#allocation12 + $0xd8] sm:$0xff] %v3141_v26 }
 0x4b6   : > { %3185 = vst [vmem:[#allocation12 + $0xc8] sm:$0xff] %v3133_v28 }
 0x4b8   : > { %v4463_v29 = vpop.f32.mrb[28].mxu1 }
 0x4b9   : > { %v3154_v30 = vadd.f32 %v4463_v29, %v5460_v36  ;;  %v3145_v31 = vpop.f32.mrb[29].mxu1 }
 0x4ba   : > { %v3146_v32 = vadd.f32 %v5460_v36, %v3145_v31  ;;  %v4464_v33 = vpop.f32.mrb[30].mxu1 }
 0x4bb   : > { %3190 = vst [vmem:[#allocation12 + $0xf0] sm:$0xff] %v3154_v30  ;;  %v3157_v34 = vadd.f32 %v4464_v33, %v5460_v36  ;;  %v3148_v35 = vpop.f32.mrb[31].mxu1 }
 0x4bc   : > { %3188 = vst [vmem:[#allocation12 + $0xe0] sm:$0xff] %v3146_v32  ;;  %v3149_v37 = vadd.f32 %v5460_v36, %v3148_v35 }
 0x4bd   : > { %3191 = vst [vmem:[#allocation12 + $0xf8] sm:$0xff] %v3157_v34 }
 0x4be   : > { %3189 = vst [vmem:[#allocation12 + $0xe8] sm:$0xff] %v3149_v37 }
 0x4c0   : > { %v4531_v38 = vpop.f32.mrb[32].mxu1 }
 0x4c1   : > { %v3635_v39 = vadd.f32 %v4531_v38, %v5460_v36  ;;  %v3626_v40 = vpop.f32.mrb[33].mxu1 }
 0x4c2   : > { %v3627_v41 = vadd.f32 %v5460_v36, %v3626_v40  ;;  %v4532_v42 = vpop.f32.mrb[34].mxu1 }
 0x4c3   : > { %3756 = vst [vmem:[#allocation12 + $0x110] sm:$0xff] %v3635_v39  ;;  %v3638_v59 = vadd.f32 %v4532_v42, %v5460_v36  ;;  %v3629_v43 = vpop.f32.mrb[35].mxu1 }
 0x4c4   : > { %3754 = vst [vmem:[#allocation12 + $0x100] sm:$0xff] %v3627_v41  ;;  %v3630_v44 = vadd.f32 %v5460_v36, %v3629_v43 }
 0x4c5   : > { %3757 = vst [vmem:[#allocation12 + $0x118] sm:$0xff] %v3638_v59 }
 0x4c6   : > { %3755 = vst [vmem:[#allocation12 + $0x108] sm:$0xff] %v3630_v44 }
 0x4c8   : > { %v4535_v45 = vpop.f32.mrb[36].mxu1 }
 0x4c9   : > { %v3651_v46 = vadd.f32 %v4535_v45, %v5460_v36  ;;  %v3642_v47 = vpop.f32.mrb[37].mxu1 }
 0x4ca   : > { %v3643_v48 = vadd.f32 %v5460_v36, %v3642_v47  ;;  %v4536_v49 = vpop.f32.mrb[38].mxu1 }
 0x4cb   : > { %3760 = vst [vmem:[#allocation12 + $0x130] sm:$0xff] %v3651_v46  ;;  %v3654_v50 = vadd.f32 %v4536_v49, %v5460_v36  ;;  %v3645_v51 = vpop.f32.mrb[39].mxu1 }
 0x4cc   : > { %3758 = vst [vmem:[#allocation12 + $0x120] sm:$0xff] %v3643_v48  ;;  %v3646_v52 = vadd.f32 %v5460_v36, %v3645_v51 }
 0x4cd   : > { %3761 = vst [vmem:[#allocation12 + $0x138] sm:$0xff] %v3654_v50 }
 0x4ce   : > { %3759 = vst [vmem:[#allocation12 + $0x128] sm:$0xff] %v3646_v52 }
 0x4d0   : > { %v4539_v53 = vpop.f32.mrb[40].mxu1 }
 0x4d1   : > { %v3667_v54 = vadd.f32 %v4539_v53, %v5460_v36  ;;  %v3658_v55 = vpop.f32.mrb[41].mxu1 }
 0x4d2   : > { %v3659_v56 = vadd.f32 %v5460_v36, %v3658_v55  ;;  %v4540_v57 = vpop.f32.mrb[42].mxu1 }
 0x4d3   : > { %3764 = vst [vmem:[#allocation12 + $0x150] sm:$0xff] %v3667_v54  ;;  %v3670_v58 = vadd.f32 %v4540_v57, %v5460_v36  ;;  %v3661_v60 = vpop.f32.mrb[43].mxu1 }
 0x4d4   : > { %3762 = vst [vmem:[#allocation12 + $0x140] sm:$0xff] %v3659_v56  ;;  %v3662_v61 = vadd.f32 %v5460_v36, %v3661_v60 }
 0x4d5   : > { %3765 = vst [vmem:[#allocation12 + $0x158] sm:$0xff] %v3670_v58 }
 0x4d6   : > { %3763 = vst [vmem:[#allocation12 + $0x148] sm:$0xff] %v3662_v61 }
 0x4d8   : > { %v4543_v62 = vpop.f32.mrb[44].mxu1 }
 0x4d9   : > { %v3683_v63 = vadd.f32 %v4543_v62, %v5460_v36  ;;  %v3674_v0 = vpop.f32.mrb[45].mxu1 }
 0x4da   : > { %v3675_v1 = vadd.f32 %v5460_v36, %v3674_v0  ;;  %v4544_v2 = vpop.f32.mrb[46].mxu1 }
 0x4db   : > { %3768 = vst [vmem:[#allocation12 + $0x170] sm:$0xff] %v3683_v63  ;;  %v3686_v3 = vadd.f32 %v4544_v2, %v5460_v36  ;;  %v3677_v4 = vpop.f32.mrb[47].mxu1 }
 0x4dc   : > { %3766 = vst [vmem:[#allocation12 + $0x160] sm:$0xff] %v3675_v1  ;;  %v3678_v5 = vadd.f32 %v5460_v36, %v3677_v4 }
 0x4dd   : > { %3769 = vst [vmem:[#allocation12 + $0x178] sm:$0xff] %v3686_v3 }
 0x4de   : > { %3767 = vst [vmem:[#allocation12 + $0x168] sm:$0xff] %v3678_v5 }
 0x4e0   : > { %v4547_v6 = vpop.f32.mrb[48].mxu1 }
 0x4e1   : > { %v3699_v7 = vadd.f32 %v4547_v6, %v5460_v36  ;;  %v3690_v8 = vpop.f32.mrb[49].mxu1 }
 0x4e2   : > { %v3691_v9 = vadd.f32 %v5460_v36, %v3690_v8  ;;  %v4548_v10 = vpop.f32.mrb[50].mxu1 }
 0x4e3   : > { %3772 = vst [vmem:[#allocation12 + $0x190] sm:$0xff] %v3699_v7  ;;  %v3702_v11 = vadd.f32 %v4548_v10, %v5460_v36  ;;  %v3693_v12 = vpop.f32.mrb[51].mxu1 }
 0x4e4   : > { %3770 = vst [vmem:[#allocation12 + $0x180] sm:$0xff] %v3691_v9  ;;  %v3694_v13 = vadd.f32 %v5460_v36, %v3693_v12 }
 0x4e5   : > { %3773 = vst [vmem:[#allocation12 + $0x198] sm:$0xff] %v3702_v11 }
 0x4e6   : > { %3771 = vst [vmem:[#allocation12 + $0x188] sm:$0xff] %v3694_v13 }
 0x4e8   : > { %v4551_v14 = vpop.f32.mrb[52].mxu1 }
 0x4e9   : > { %v3715_v15 = vadd.f32 %v4551_v14, %v5460_v36  ;;  %v3706_v16 = vpop.f32.mrb[53].mxu1 }
 0x4ea   : > { %v3707_v17 = vadd.f32 %v5460_v36, %v3706_v16  ;;  %v4552_v18 = vpop.f32.mrb[54].mxu1 }
 0x4eb   : > { %3776 = vst [vmem:[#allocation12 + $0x1b0] sm:$0xff] %v3715_v15  ;;  %v3718_v19 = vadd.f32 %v4552_v18, %v5460_v36  ;;  %v3709_v20 = vpop.f32.mrb[55].mxu1 }
 0x4ec   : > { %3774 = vst [vmem:[#allocation12 + $0x1a0] sm:$0xff] %v3707_v17  ;;  %v3710_v21 = vadd.f32 %v5460_v36, %v3709_v20 }
 0x4ed   : > { %3777 = vst [vmem:[#allocation12 + $0x1b8] sm:$0xff] %v3718_v19 }
 0x4ee   : > { %3775 = vst [vmem:[#allocation12 + $0x1a8] sm:$0xff] %v3710_v21 }
 0x4f0   : > { %v4555_v22 = vpop.f32.mrb[56].mxu1 }
 0x4f1   : > { %v3731_v23 = vadd.f32 %v4555_v22, %v5460_v36  ;;  %v3722_v24 = vpop.f32.mrb[57].mxu1 }
 0x4f2   : > { %v3723_v25 = vadd.f32 %v5460_v36, %v3722_v24  ;;  %v4556_v26 = vpop.f32.mrb[58].mxu1 }
 0x4f3   : > { %3780 = vst [vmem:[#allocation12 + $0x1d0] sm:$0xff] %v3731_v23  ;;  %v3734_v27 = vadd.f32 %v4556_v26, %v5460_v36  ;;  %v3725_v28 = vpop.f32.mrb[59].mxu1 }
 0x4f4   : > { %3778 = vst [vmem:[#allocation12 + $0x1c0] sm:$0xff] %v3723_v25  ;;  %v3726_v29 = vadd.f32 %v5460_v36, %v3725_v28 }
 0x4f5   : > { %3781 = vst [vmem:[#allocation12 + $0x1d8] sm:$0xff] %v3734_v27 }
 0x4f6   : > { %3779 = vst [vmem:[#allocation12 + $0x1c8] sm:$0xff] %v3726_v29 }
 0x4f8   : > { %v4559_v30 = vpop.f32.mrb[60].mxu1 }
 0x4f9   : > { %v3747_v31 = vadd.f32 %v4559_v30, %v5460_v36  ;;  %v3738_v32 = vpop.f32.mrb[61].mxu1 }
 0x4fa   : > { %v3739_v33 = vadd.f32 %v5460_v36, %v3738_v32  ;;  %v4560_v34 = vpop.f32.mrb[62].mxu1 }
 0x4fb   : > { %3784 = vst [vmem:[#allocation12 + $0x1f0] sm:$0xff] %v3747_v31  ;;  %v3750_v35 = vadd.f32 %v4560_v34, %v5460_v36  ;;  %v3741_v37 = vpop.f32.mrb[63].mxu1 }
 0x4fc   : > { %3782 = vst [vmem:[#allocation12 + $0x1e0] sm:$0xff] %v3739_v33  ;;  %v3742_v38 = vadd.f32 %v5460_v36, %v3741_v37 }
 0x4fd   : > { %3785 = vst [vmem:[#allocation12 + $0x1f8] sm:$0xff] %v3750_v35 }
 0x4fe   : > { %3783 = vst [vmem:[#allocation12 + $0x1e8] sm:$0xff] %v3742_v38 }
 0x4ff PF: > { %s5581_s16 = sadd.s32 4294967295, %s5072_s23   ;;  %s5083_s8 = smov [#allocation12]  }
 0x500   : > { %p5528_p12 = scmp.eq.s32.totalorder %s5581_s16, 1  ;;  %s3795_s25 = sshll.u32 %s5083_s8, 4  ;;  %s3796_s25 = int_to_ptr.vmem [resolvable:$true] %s3795_s25 }
 0x501   : > { %s5008_s27 = scalar_lea.vmem %s3796_s25, 8192  ;;  %p5015_p1 = scmp.lt.s32.totalorder %s3796_s25, %s3796_s25 }
 0x502   : > { %p5009_p13 = scmp.ne.s32.totalorder %s3796_s25, %s5008_s27  ;;  %p5016_p4 = scmp.lt.s32.totalorder %s5008_s27, %s5008_s27 }
 0x504   : > { %p5010_p6 = pnand %p5009_p13, %p5528_p12  ;;  %p5017_p7 = por %p5016_p4, %p5015_p1 }
 0x506   : > { %p5011_p0 = pneg %p5010_p6 }
 0x508   : > { %p5018_p9 = pnand %p5017_p7, %p5011_p0 }
 0x50a   : > { %5021 = shalt.err (!%p5018_p9)
}
 0x50b   : > { %s5022_s15 = scalar_lea.hbm %s5569_s6, 8192 }
 0x50c   : > { %p5023_p3 = scmp.ne.s32.totalorder %s5569_s6, %s5022_s15  ;;  %p5028_p2 = scmp.lt.u32.totalorder %s5022_s15, %s5569_s6 }
 0x50e   : > { %p5024_p8 = pnand %p5023_p3, %p5528_p12 }
 0x510   : > { %p5025_p5 = pneg %p5024_p8 }
 0x512   : > { %p5030_p10 = pnand %p5028_p2, %p5025_p5 }
 0x514   : > { %5033 = shalt.err (!%p5030_p10)
}
 0x515   : > { %s5084_s26 = smov 128   ;;  %s5085_s19 = smov 8  }
 0x516   : > { %4578 = dma.vmem_to_hbm [thread:$0]  (%p5528_p12), %s3796_s25, 8192, %s5569_s6, [#allocation6], %s5084_s26, %s5084_s26, %s5085_s19  }
 0x517   : > { %5059 = dma.done.wait (%p5528_p12), [#allocation6], 8192  }
 0x518   : > { %5061 = vsyncadd (%p5528_p12), [#allocation6], 4294959104 }
 0x519 PF: > { %s20_s23 = sadd.s32 1, %s5072_s23   ;;  %s5583_s21 = smov %s5068_s22 }
 0x51a   : > { %p17_p11 = scmp.ge.s32.totalorder %s20_s23, 4   ;;  %s5584_s22 = smov %s5586_s30 }
 0x51c   :  { %19 = sbr.rel (!%p17_p11) target bundleno = 5 (0x5), region = 108 }
 0x523   :  { %3811 = vsyncpa [#allocation5], 1 }
 0x524   :  { %3813 = vsyncpa [#allocation5 + $0x1], 1 }
 0x525   :  { %3814 = vsyncpa [#allocation8], 1 }
 0x526   :  { %3815 = vsyncpa [#allocation11], 1 }
 0x527   :  { %3816 = vsyncpa [#allocation6], 1 }
 0x528   :  { %3818 = vsyncpa [#allocation6 + $0x1], 1 }

// kernel: tpu_custom_call.1
= control target key start
LH: loop header
LB: loop body
LE: loop exit
PB: predicated region body
PF: predicated region fallthrough
CT: control target
= control target key end

     0   :  { %11 = vsyncpa [#allocation5], 0  ;;  %s5563_s0 = inlined_call_operand.hbm [shape: bf16[512,128], index: 0, kind: input, shape index: {}]   ;;  %s5564_s1 = inlined_call_operand.hbm [shape: bf16[512,512], index: 1, kind: input, shape index: {}]   ;;  %s5565_s2 = inlined_call_operand.hbm [shape: bf16[128,128], index: 2, kind: input, shape index: {}]   ;;  %s5566_s3 = inlined_call_operand.vmem [shape: f32[1,128], index: 3, kind: input, shape index: {}]   ;;  %s5567_s4 = inlined_call_operand.hbm [shape: bf16[128,128], index: 4, kind: input, shape index: {}]   ;;  %s5568_s5 = inlined_call_operand.vmem [shape: f32[1,128], index: 5, kind: input, shape index: {}]   ;;  %s5569_s6 = inlined_call_operand.hbm [shape: f32[512,128], index: 6, kind: output, shape index: {}]  }
   0x1   :  { %12 = vsyncpa [#allocation8], 0 }
   0x2   :  { %13 = vsyncpa [#allocation11], 0 }
   0x3   :  { %14 = vsyncpa [#allocation6], 0  ;;  %s5121_s21 = smov 0   ;;  %s5123_s22 = smov 0  }
   0x4   :  { %s5125_s23 = smov 0  }
   0x5 LB: > { %s5074_s24 = smov [#allocation7]   ;;  %s5573_s26 = sadd.s32 4294967295, %s5072_s23   ;;  %s5072_s23 = sphi %s5125_s23, %s20_s23   ;;  %s5068_s22 = sphi %s5123_s22, %s5584_s22   ;;  %s5064_s21 = sphi %s5121_s21, %s5583_s21  }
   0x6   : > { %s221_s25 = sshll.u32 %s5074_s24, 4  ;;  %p3891_p0 = scmp.ge.s32.totalorder %s5072_s23, 1  ;;  %s5145_s25 = int_to_ptr.vmem [resolvable:$true] %s221_s25 }
   0x7   : > { %p196_p1 = scmp.lt.s32.totalorder %s5072_s23, 3  ;;  %p5141_p2 = scmp.eq.s32.totalorder %s5573_s26, 0 }
   0x8   : > { %s39_s30 = sadd.s32 1, %s5068_s22  ;;  %s5075_s8 = smov [#allocation4]  }
   0x9   : > { %s5574_s27 = scalar_select %p5141_p2, 1, 0 }
   0xa   : > { %p5147_p3 = pnand %p3891_p0, %p196_p1  ;;  %p5160_p6 = scmp.ge.s32.totalorder %s39_s30, 2 }
   0xb   : > { %s208_s9 = sshll.u32 %s5075_s8, 4  ;;  %s4896_s12 = scalar_lea.hbm %s5564_s1, 16384  ;;  %s209_s9 = int_to_ptr.vmem [resolvable:$true] %s208_s9 }
   0xc   : > { %s5575_s28 = scalar_select %p5147_p3, 1, 0 }
   0xd   : > { %p4581_p4 = pneg %p5147_p3  ;;  %p4897_p7 = scmp.ne.s32.totalorder %s5564_s1, %s4896_s12 }
   0xe   : > { %p4903_p11 = scmp.lt.u32.totalorder %s4896_s12, %s5564_s1 }
   0xf   : > { %p5155_p5 = pnand %p5141_p2, %p4581_p4 }
  0x11   : > { %p5172_p8 = pneg %p5155_p5 }
  0x13   : > { %p4899_p9 = pnand %p5172_p8, %p4897_p7 }
  0x15   : > { %p4900_p10 = pneg %p4899_p9 }
  0x17   : > { %p4905_p12 = pnand %p4903_p11, %p4900_p10 }
  0x19   : > { %4908 = shalt.err (!%p4905_p12)
}
  0x1a   : > { %s4909_s18 = scalar_lea.vmem %s5145_s25, 16384  ;;  %p4917_p4 = scmp.lt.s32.totalorder %s5145_s25, %s5145_s25 }
  0x1b   : > { %p4910_p13 = scmp.ne.s32.totalorder %s5145_s25, %s4909_s18  ;;  %p4918_p2 = scmp.lt.s32.totalorder %s4909_s18, %s4909_s18 }
  0x1d   : > { %p4912_p0 = pnand %p4910_p13, %p5172_p8  ;;  %p4919_p7 = por %p4918_p2, %p4917_p4 }
  0x1f   : > { %p4913_p1 = pneg %p4912_p0 }
  0x21   : > { %p4920_p9 = pnand %p4919_p7, %p4913_p1 }
  0x23   : > { %4923 = shalt.err (!%p4920_p9)
}
  0x24   : > { %s5076_s19 = smov 256   ;;  %s5077_s20 = smov 16  }
  0x25   : > { %4587 = dma.hbm_to_vmem [thread:$0]  (!%p5155_p5), %s5564_s1, 16384, %s5145_s25, [#allocation8], %s5076_s19, %s5076_s19, %s5077_s20  }
  0x26   : > { %s5586_s30 = smov (%p5160_p6, %s39_s30), 0  ;;  %s4924_s12 = scalar_lea.hbm %s5563_s0, 4096 }
  0x27   : > { %p4925_p2 = scmp.ne.s32.totalorder %s5563_s0, %s4924_s12  ;;  %p4931_p12 = scmp.lt.u32.totalorder %s4924_s12, %s5563_s0 }
  0x29   : > { %p4927_p10 = pnand %p4925_p2, %p5172_p8 }
  0x2b   : > { %p4928_p11 = pneg %p4927_p10 }
  0x2d   : > { %p4933_p13 = pnand %p4931_p12, %p4928_p11 }
  0x2f   : > { %4936 = shalt.err (!%p4933_p13)
}
  0x30   : > { %s4937_s25 = scalar_lea.vmem %s209_s9, 4096  ;;  %p4945_p4 = scmp.lt.s32.totalorder %s209_s9, %s209_s9 }
  0x31   : > { %p4938_p6 = scmp.ne.s32.totalorder %s209_s9, %s4937_s25  ;;  %p4946_p7 = scmp.lt.s32.totalorder %s4937_s25, %s4937_s25 }
  0x33   : > { %p4940_p0 = pnand %p4938_p6, %p5172_p8  ;;  %p4947_p9 = por %p4946_p7, %p4945_p4 }
  0x35   : > { %p4941_p1 = pneg %p4940_p0 }
  0x37   : > { %p4948_p3 = pnand %p4947_p9, %p4941_p1 }
  0x39   : > { %4951 = shalt.err (!%p4948_p3)
}
  0x3a   : > { %s5078_s7 = smov 64   ;;  %s5079_s18 = smov 4  }
  0x3b   : > { %4584 = dma.hbm_to_vmem [thread:$0]  (!%p5155_p5), %s5563_s0, 4096, %s209_s9, [#allocation5], %s5078_s7, %s5078_s7, %s5079_s18  }
  0x3c   : > { %s5080_s24 = smov [#allocation9]   ;;  %s5081_s10 = smov [#allocation10]  }
  0x3d   : > { %s234_s8 = sshll.u32 %s5080_s24, 4  ;;  %s250_s11 = sshll.u32 %s5081_s10, 4  ;;  %s235_s8 = int_to_ptr.vmem [resolvable:$true] %s234_s8  ;;  %s251_s11 = int_to_ptr.vmem [resolvable:$true] %s250_s11 }
  0x3e   : > { %s4952_s14 = scalar_lea.hbm %s5565_s2, 1024 }
  0x3f   : > { %p4953_p3 = scmp.ne.s32.totalorder %s5565_s2, %s4952_s14  ;;  %p4959_p11 = scmp.lt.u32.totalorder %s4952_s14, %s5565_s2 }
  0x41   : > { %p4955_p2 = pnand %p4953_p3, %p5172_p8 }
  0x43   : > { %p4956_p10 = pneg %p4955_p2 }
  0x45   : > { %p4961_p12 = pnand %p4959_p11, %p4956_p10 }
  0x47   : > { %4964 = shalt.err (!%p4961_p12)
}
  0x48   : > { %s4965_s9 = scalar_lea.vmem %s235_s8, 1024  ;;  %p4973_p1 = scmp.lt.s32.totalorder %s235_s8, %s235_s8 }
  0x49   : > { %p4966_p13 = scmp.ne.s32.totalorder %s235_s8, %s4965_s9  ;;  %p4974_p4 = scmp.lt.s32.totalorder %s4965_s9, %s4965_s9 }
  0x4b   : > { %p4968_p6 = pnand %p4966_p13, %p5172_p8  ;;  %p4975_p7 = por %p4974_p4, %p4973_p1 }
  0x4d   : > { %p4969_p0 = pneg %p4968_p6 }
  0x4f   : > { %p4976_p9 = pnand %p4975_p7, %p4969_p0 }
  0x51   : > { %4979 = shalt.err (!%p4976_p9)
}
  0x52   : > { %4590 = dma.hbm_to_vmem [thread:$0]  (!%p5155_p5), %s5565_s2, 1024, %s235_s8, [#allocation8], %s5078_s7, %s5078_s7, %s5079_s18  }
  0x53   : > { %s4980_s10 = scalar_lea.hbm %s5567_s4, 1024 }
  0x54   : > { %p4981_p3 = scmp.ne.s32.totalorder %s5567_s4, %s4980_s10  ;;  %p4987_p11 = scmp.lt.u32.totalorder %s4980_s10, %s5567_s4 }
  0x56   : > { %p4983_p2 = pnand %p4981_p3, %p5172_p8 }
  0x58   : > { %p4984_p10 = pneg %p4983_p2 }
  0x5a   : > { %p4989_p12 = pnand %p4987_p11, %p4984_p10 }
  0x5c   : > { %4992 = shalt.err (!%p4989_p12)
}
  0x5d   : > { %s4993_s17 = scalar_lea.vmem %s251_s11, 1024  ;;  %p5001_p1 = scmp.lt.s32.totalorder %s251_s11, %s251_s11 }
  0x5e   : > { %p4994_p13 = scmp.ne.s32.totalorder %s251_s11, %s4993_s17  ;;  %p5002_p4 = scmp.lt.s32.totalorder %s4993_s17, %s4993_s17 }
  0x60   : > { %p4996_p6 = pnand %p4994_p13, %p5172_p8  ;;  %p5003_p7 = por %p5002_p4, %p5001_p1 }
  0x62   : > { %p4997_p0 = pneg %p4996_p6 }
  0x64   : > { %p5004_p9 = pnand %p5003_p7, %p4997_p0 }
  0x66   : > { %5007 = shalt.err (!%p5004_p9)
}
  0x67   : > { %4593 = dma.hbm_to_vmem [thread:$0]  (!%p5155_p5), %s5567_s4, 1024, %s251_s11, [#allocation11], %s5078_s7, %s5078_s7, %s5079_s18  }
  0x68   : > { %p5579_p3 = scmp.ne.s32.totalorder %s5575_s28, 0 }
  0x69   : > { %p5580_p8 = scmp.ne.s32.totalorder (!%p5579_p3), %s5574_s27, 0 }
  0x6a   : > { %269 = sbr.rel (%p5579_p3) target bundleno = 1305 (0x519), region = 44 }
  0x71   : > { %5047 = dma.done.wait (%p5580_p8), [#allocation5], 4096  }
  0x72   : > { %5049 = vsyncadd (%p5580_p8), [#allocation5], 4294963200 }
  0x73   : > { %5051 = dma.done.wait (%p5580_p8), [#allocation8], 17408  }
  0x74   : > { %5053 = vsyncadd (%p5580_p8), [#allocation8], 4294949888 }
  0x75   : > { %5055 = dma.done.wait (%p5580_p8), [#allocation11], 1024  }
  0x76   : > { %5057 = vsyncadd (%p5580_p8), [#allocation11], 4294966272  ;;  %p303_p5 = scmp.eq.s32.totalorder %s5064_s21, 0 }
  0x77   : > { %v4640_v0 = vld [vmem:[#allocation4] sm:$0xff] (%p303_p5)   ;;  %v4641_v1 = vld [vmem:[#allocation4 + $0x8] sm:$0xff] (%p303_p5)   ;;  %v4642_v2 = vld [vmem:[#allocation4 + $0x10] sm:$0xff] (%p303_p5)  }
  0x78   : > { %311 = sbr.rel (!%p303_p5) target bundleno = 136 (0x88), region = 64  ;;  %568 = vst [vmem:[#allocation2] sm:$0xff] (%p303_p5), %v4640_v0  ;;  %569 = vst [vmem:[#allocation2 + $0x8] sm:$0xff] (%p303_p5), %v4641_v1  ;;  %v4643_v3 = vld [vmem:[#allocation4 + $0x18] sm:$0xff] (%p303_p5)   ;;  %v4644_v4 = vld [vmem:[#allocation4 + $0x20] sm:$0xff] (%p303_p5)  }
  0x79   : > { %570 = vst [vmem:[#allocation2 + $0x10] sm:$0xff] (%p303_p5), %v4642_v2  ;;  %571 = vst [vmem:[#allocation2 + $0x18] sm:$0xff] (%p303_p5), %v4643_v3  ;;  %v4645_v5 = vld [vmem:[#allocation4 + $0x28] sm:$0xff] (%p303_p5)   ;;  %v4646_v6 = vld [vmem:[#allocation4 + $0x30] sm:$0xff] (%p303_p5)  }
  0x7a   : > { %572 = vst [vmem:[#allocation2 + $0x20] sm:$0xff] (%p303_p5), %v4644_v4  ;;  %573 = vst [vmem:[#allocation2 + $0x28] sm:$0xff] (%p303_p5), %v4645_v5  ;;  %v4647_v7 = vld [vmem:[#allocation4 + $0x38] sm:$0xff] (%p303_p5)   ;;  %v4648_v8 = vld [vmem:[#allocation4 + $0x40] sm:$0xff] (%p303_p5)  }
  0x7b   : > { %574 = vst [vmem:[#allocation2 + $0x30] sm:$0xff] (%p303_p5), %v4646_v6  ;;  %575 = vst [vmem:[#allocation2 + $0x38] sm:$0xff] (%p303_p5), %v4647_v7  ;;  %v4649_v9 = vld [vmem:[#allocation4 + $0x48] sm:$0xff] (%p303_p5)   ;;  %v4650_v10 = vld [vmem:[#allocation4 + $0x50] sm:$0xff] (%p303_p5)  }
  0x7c   : > { %576 = vst [vmem:[#allocation2 + $0x40] sm:$0xff] (%p303_p5), %v4648_v8  ;;  %577 = vst [vmem:[#allocation2 + $0x48] sm:$0xff] (%p303_p5), %v4649_v9  ;;  %v4651_v11 = vld [vmem:[#allocation4 + $0x58] sm:$0xff] (%p303_p5)   ;;  %v4652_v12 = vld [vmem:[#allocation4 + $0x60] sm:$0xff] (%p303_p5)  }
  0x7d   : > { %578 = vst [vmem:[#allocation2 + $0x50] sm:$0xff] (%p303_p5), %v4650_v10  ;;  %579 = vst [vmem:[#allocation2 + $0x58] sm:$0xff] (%p303_p5), %v4651_v11  ;;  %v4653_v13 = vld [vmem:[#allocation4 + $0x68] sm:$0xff] (%p303_p5)   ;;  %v4654_v14 = vld [vmem:[#allocation4 + $0x70] sm:$0xff] (%p303_p5)  }
  0x7e   : > { %580 = vst [vmem:[#allocation2 + $0x60] sm:$0xff] (%p303_p5), %v4652_v12  ;;  %581 = vst [vmem:[#allocation2 + $0x68] sm:$0xff] (%p303_p5), %v4653_v13  ;;  %v4655_v15 = vld [vmem:[#allocation4 + $0x78] sm:$0xff] (%p303_p5)   ;;  %v4656_v16 = vld [vmem:[#allocation4 + $0x80] sm:$0xff] (%p303_p5)  }
  0x7f   : > { %582 = vst [vmem:[#allocation2 + $0x70] sm:$0xff] %v4654_v14  ;;  %583 = vst [vmem:[#allocation2 + $0x78] sm:$0xff] %v4655_v15  ;;  %v4657_v17 = vld [vmem:[#allocation4 + $0x88] sm:$0xff]   ;;  %v4658_v18 = vld [vmem:[#allocation4 + $0x90] sm:$0xff]  }
  0x80   : > { %584 = vst [vmem:[#allocation2 + $0x80] sm:$0xff] %v4656_v16  ;;  %585 = vst [vmem:[#allocation2 + $0x88] sm:$0xff] %v4657_v17  ;;  %v4659_v19 = vld [vmem:[#allocation4 + $0x98] sm:$0xff]   ;;  %v4660_v20 = vld [vmem:[#allocation4 + $0xa0] sm:$0xff]  }
  0x81   : > { %586 = vst [vmem:[#allocation2 + $0x90] sm:$0xff] %v4658_v18  ;;  %587 = vst [vmem:[#allocation2 + $0x98] sm:$0xff] %v4659_v19  ;;  %v4661_v21 = vld [vmem:[#allocation4 + $0xa8] sm:$0xff]   ;;  %v4662_v22 = vld [vmem:[#allocation4 + $0xb0] sm:$0xff]  }
  0x82   : > { %588 = vst [vmem:[#allocation2 + $0xa0] sm:$0xff] %v4660_v20  ;;  %589 = vst [vmem:[#allocation2 + $0xa8] sm:$0xff] %v4661_v21  ;;  %v4663_v23 = vld [vmem:[#allocation4 + $0xb8] sm:$0xff]   ;;  %v4664_v24 = vld [vmem:[#allocation4 + $0xc0] sm:$0xff]  }
  0x83   : > { %590 = vst [vmem:[#allocation2 + $0xb0] sm:$0xff] %v4662_v22  ;;  %591 = vst [vmem:[#allocation2 + $0xb8] sm:$0xff] %v4663_v23  ;;  %v4665_v25 = vld [vmem:[#allocation4 + $0xc8] sm:$0xff]   ;;  %v4666_v26 = vld [vmem:[#allocation4 + $0xd0] sm:$0xff]  }
  0x84   : > { %592 = vst [vmem:[#allocation2 + $0xc0] sm:$0xff] %v4664_v24  ;;  %593 = vst [vmem:[#allocation2 + $0xc8] sm:$0xff] %v4665_v25  ;;  %v4667_v27 = vld [vmem:[#allocation4 + $0xd8] sm:$0xff]   ;;  %v4668_v28 = vld [vmem:[#allocation4 + $0xe0] sm:$0xff]  }
  0x85   : > { %594 = vst [vmem:[#allocation2 + $0xd0] sm:$0xff] %v4666_v26  ;;  %595 = vst [vmem:[#allocation2 + $0xd8] sm:$0xff] %v4667_v27  ;;  %v4669_v29 = vld [vmem:[#allocation4 + $0xe8] sm:$0xff]   ;;  %v4670_v30 = vld [vmem:[#allocation4 + $0xf0] sm:$0xff]  }
  0x86   : > { %596 = vst [vmem:[#allocation2 + $0xe0] sm:$0xff] %v4668_v28  ;;  %597 = vst [vmem:[#allocation2 + $0xe8] sm:$0xff] %v4669_v29  ;;  %v4671_v31 = vld [vmem:[#allocation4 + $0xf8] sm:$0xff]  }
  0x87   : > { %598 = vst [vmem:[#allocation2 + $0xf0] sm:$0xff] %v4670_v30  ;;  %599 = vst [vmem:[#allocation2 + $0xf8] sm:$0xff] %v4671_v31 }
  0x88 PF: > { %p600_p2 = scmp.lt.s32.totalorder %s5064_s21, 0  ;;  %s601_s27 = ssub.s32 0, %s5064_s21  ;;  %v5082_v32 = vmov 0   ;;  %v4674_v33 = vld [vmem:[#allocation7 + $0x4] ss:$16 sps:$4 sm:$0xff]  }
  0x89   : > { %1750 = vmatprep.subr.bf16.mxu0 %v5082_v32  ;;  %2039 = vmatprep.subr.bf16.mxu1 %v5082_v32  ;;  %s3935_s28 = smin.u32 %s5064_s21, %s601_s27  ;;  %v4677_v34 = vld [vmem:[#allocation7 + $0xc] ss:$16 sps:$4 sm:$0xff]   ;;  %v4672_v3 = vld [vmem:[#allocation7] ss:$16 sps:$4 sm:$0xff]   ;;  %v4675_v4 = vld [vmem:[#allocation7 + $0x8] ss:$16 sps:$4 sm:$0xff]  }
  0x8a   : > { %s603_s29 = sand.u32 1, %s3935_s28   ;;  %1782 = vmatprep.mubr.bf16.mxu0 %v4674_v33  ;;  %2071 = vmatprep.mubr.bf16.mxu1 %v4677_v34  ;;  %v4678_v5 = vld [vmem:[#allocation7 + $0x24] ss:$16 sps:$4 sm:$0xff]   ;;  %v4680_v6 = vld [vmem:[#allocation7 + $0x2c] ss:$16 sps:$4 sm:$0xff]   ;;  %p2456_p10 = scmp.ne.s32.totalorder %s5064_s21, 1 }
  0x8b   : > { %s604_s15 = ssub.s32 0, %s603_s29  ;;  %v4682_v7 = vld [vmem:[#allocation7 + $0x20] ss:$16 sps:$4 sm:$0xff]   ;;  %v4683_v8 = vld [vmem:[#allocation7 + $0x28] ss:$16 sps:$4 sm:$0xff]  }
  0x8c   : > { %s5588_s15 = smov (!%p600_p2, %s604_s15), %s603_s29  ;;  %v4684_v9 = vld [vmem:[#allocation7 + $0x44] ss:$16 sps:$4 sm:$0xff]   ;;  %v4686_v10 = vld [vmem:[#allocation7 + $0x4c] ss:$16 sps:$4 sm:$0xff]   ;;  %v4688_v11 = vld [vmem:[#allocation7 + $0x40] ss:$16 sps:$4 sm:$0xff]  }
  0x8d   : > { %s606_s7 = ssub.s32 1, %s5588_s15  ;;  %s3936_s18 = sshll.u32 %s5588_s15, 9  ;;  %v4689_v12 = vld [vmem:[#allocation7 + $0x48] ss:$16 sps:$4 sm:$0xff]   ;;  %v4690_v13 = vld [vmem:[#allocation7 + $0x64] ss:$16 sps:$4 sm:$0xff]  }
  0x8e   : > { %s1010_s11 = sshra.s32 %s3936_s18, 4  ;;  %v4692_v14 = vld [vmem:[#allocation7 + $0x6c] ss:$16 sps:$4 sm:$0xff]   ;;  %v4694_v15 = vld [vmem:[#allocation7 + $0x60] ss:$16 sps:$4 sm:$0xff]   ;;  %s4067_s19 = sshll.u32 (%p2456_p10), %s606_s7, 9 }
  0x8f   : > { %s3937_s9 = sshll.u32 %s1010_s11, 3  ;;  %v4695_v16 = vld [vmem:[#allocation7 + $0x68] ss:$16 sps:$4 sm:$0xff]   ;;  %v4696_v17 = vld [vmem:[#allocation7 + $0x84] ss:$16 sps:$4 sm:$0xff]   ;;  %s2559_s20 = sshra.s32 (%p2456_p10), %s4067_s19, 4 }
  0x90   : > { %s5284_s26 = scalar_lea.vmem [#allocation2], %s3937_s9  ;;  %v4698_v18 = vld [vmem:[#allocation7 + $0x8c] ss:$16 sps:$4 sm:$0xff]   ;;  %v4700_v19 = vld [vmem:[#allocation7 + $0x80] ss:$16 sps:$4 sm:$0xff]   ;;  %s4068_s24 = sshll.u32 (%p2456_p10), %s2559_s20, 3 }
  0x91   : > { %v1014_v35 = vld [vmem:[%s5284_s26] sm:$0xff]  ;;  %v1015_v37 = vld [vmem:[%s5284_s26 + $0x8] sm:$0xff]  ;;  %v1016_v39 = vld [vmem:[%s5284_s26 + $0x10] sm:$0xff]  ;;  %s5353_s10 = scalar_lea.vmem (%p2456_p10), [#allocation2], %s4068_s24 }
  0x92   : > { %v1030_v36 = vld [vmem:[%s5284_s26 + $0x80] sm:$0xff]  ;;  %1751 = vmatpush1.bf16.msra.mxu0 %v1014_v35  ;;  %v1031_v38 = vld [vmem:[%s5284_s26 + $0x88] sm:$0xff]  ;;  %v1032_v40 = vld [vmem:[%s5284_s26 + $0x90] sm:$0xff] }
  0x93   : > { %2040 = vmatpush1.bf16.msra.mxu1 %v1030_v36  ;;  %1752 = vmatprep.subr.bf16.mxu0 %v5082_v32  ;;  %v1017_v41 = vld [vmem:[%s5284_s26 + $0x18] sm:$0xff]  ;;  %v1018_v43 = vld [vmem:[%s5284_s26 + $0x20] sm:$0xff]  ;;  %v1019_v45 = vld [vmem:[%s5284_s26 + $0x28] sm:$0xff] }
  0x94   : > { %2041 = vmatprep.subr.bf16.mxu1 %v5082_v32  ;;  %v1033_v42 = vld [vmem:[%s5284_s26 + $0x98] sm:$0xff]  ;;  %v1034_v44 = vld [vmem:[%s5284_s26 + $0xa0] sm:$0xff]  ;;  %v1035_v46 = vld [vmem:[%s5284_s26 + $0xa8] sm:$0xff] }
  0x95   : > { %v1020_v47 = vld [vmem:[%s5284_s26 + $0x30] sm:$0xff]  ;;  %v1021_v49 = vld [vmem:[%s5284_s26 + $0x38] sm:$0xff]  ;;  %v1022_v51 = vld [vmem:[%s5284_s26 + $0x40] sm:$0xff] }
  0x96   : > { %1753 = vmatpush1.bf16.msra.mxu0 %v1015_v37  ;;  %v1036_v48 = vld [vmem:[%s5284_s26 + $0xb0] sm:$0xff]  ;;  %v1037_v50 = vld [vmem:[%s5284_s26 + $0xb8] sm:$0xff]  ;;  %v1038_v52 = vld [vmem:[%s5284_s26 + $0xc0] sm:$0xff] }
  0x97   : > { %2042 = vmatpush1.bf16.msra.mxu1 %v1031_v38  ;;  %1754 = vmatprep.subr.bf16.mxu0 %v5082_v32  ;;  %v1023_v53 = vld [vmem:[%s5284_s26 + $0x48] sm:$0xff]  ;;  %v1024_v55 = vld [vmem:[%s5284_s26 + $0x50] sm:$0xff]  ;;  %v1025_v57 = vld [vmem:[%s5284_s26 + $0x58] sm:$0xff] }
  0x98   : > { %2043 = vmatprep.subr.bf16.mxu1 %v5082_v32  ;;  %v1039_v54 = vld [vmem:[%s5284_s26 + $0xc8] sm:$0xff]  ;;  %v1040_v56 = vld [vmem:[%s5284_s26 + $0xd0] sm:$0xff]  ;;  %v1041_v58 = vld [vmem:[%s5284_s26 + $0xd8] sm:$0xff] }
  0x99   : > { %v1026_v59 = vld [vmem:[%s5284_s26 + $0x60] sm:$0xff]  ;;  %v1027_v61 = vld [vmem:[%s5284_s26 + $0x68] sm:$0xff]  ;;  %v1028_v63 = vld [vmem:[%s5284_s26 + $0x70] sm:$0xff] }
  0x9a   : > { %1755 = vmatpush1.bf16.msra.mxu0 %v1016_v39  ;;  %v1042_v60 = vld [vmem:[%s5284_s26 + $0xe0] sm:$0xff]  ;;  %v1043_v62 = vld [vmem:[%s5284_s26 + $0xe8] sm:$0xff]  ;;  %v1044_v0 = vld [vmem:[%s5284_s26 + $0xf0] sm:$0xff] }
  0x9b   : > { %2044 = vmatpush1.bf16.msra.mxu1 %v1032_v40  ;;  %1756 = vmatprep.subr.bf16.mxu0 %v5082_v32  ;;  %v1029_v1 = vld [vmem:[%s5284_s26 + $0x78] sm:$0xff]  ;;  %v4702_v21 = vld [vmem:[#allocation7 + $0xa4] ss:$16 sps:$4 sm:$0xff]   ;;  %v4706_v23 = vld [vmem:[#allocation7 + $0xa0] ss:$16 sps:$4 sm:$0xff]  }
  0x9c   : > { %2045 = vmatprep.subr.bf16.mxu1 %v5082_v32  ;;  %v1045_v2 = vld [vmem:[%s5284_s26 + $0xf8] sm:$0xff]  ;;  %v4708_v25 = vld [vmem:[#allocation7 + $0xc4] ss:$16 sps:$4 sm:$0xff]   ;;  %v4712_v27 = vld [vmem:[#allocation7 + $0xc0] ss:$16 sps:$4 sm:$0xff]  }
  0x9d   : > { %v4701_v20 = vld [vmem:[#allocation7 + $0x88] ss:$16 sps:$4 sm:$0xff]   ;;  %v4704_v22 = vld [vmem:[#allocation7 + $0xac] ss:$16 sps:$4 sm:$0xff]   ;;  %v4714_v29 = vld [vmem:[#allocation7 + $0xe4] ss:$16 sps:$4 sm:$0xff]  }
  0x9e   : > { %1757 = vmatpush1.bf16.msra.mxu0 %v1017_v41  ;;  %v4707_v24 = vld [vmem:[#allocation7 + $0xa8] ss:$16 sps:$4 sm:$0xff]   ;;  %v4710_v26 = vld [vmem:[#allocation7 + $0xcc] ss:$16 sps:$4 sm:$0xff]   ;;  %v4718_v31 = vld [vmem:[#allocation7 + $0xe0] ss:$16 sps:$4 sm:$0xff]  }
  0x9f   : > { %2046 = vmatpush1.bf16.msra.mxu1 %v1033_v42  ;;  %1758 = vmatprep.subr.bf16.mxu0 %v5082_v32  ;;  %v4713_v28 = vld [vmem:[#allocation7 + $0xc8] ss:$16 sps:$4 sm:$0xff]   ;;  %v4716_v30 = vld [vmem:[#allocation7 + $0xec] ss:$16 sps:$4 sm:$0xff]   ;;  %v4720_v33 = vld [vmem:[#allocation7 + $0x104] ss:$16 sps:$4 sm:$0xff]  }
  0xa0   : > { %2047 = vmatprep.subr.bf16.mxu1 %v5082_v32  ;;  %v4722_v34 = vld [vmem:[#allocation7 + $0x10c] ss:$16 sps:$4 sm:$0xff]   ;;  %v4724_v35 = vld [vmem:[#allocation7 + $0x100] ss:$16 sps:$4 sm:$0xff]   ;;  %v4725_v36 = vld [vmem:[#allocation7 + $0x108] ss:$16 sps:$4 sm:$0xff]  }
  0xa1   : > { %v4726_v37 = vld [vmem:[#allocation7 + $0x124] ss:$16 sps:$4 sm:$0xff]   ;;  %v4728_v38 = vld [vmem:[#allocation7 + $0x12c] ss:$16 sps:$4 sm:$0xff]   ;;  %v4730_v39 = vld [vmem:[#allocation7 + $0x120] ss:$16 sps:$4 sm:$0xff]  }
  0xa2   : > { %1759 = vmatpush1.bf16.msra.mxu0 %v1018_v43  ;;  %v4731_v40 = vld [vmem:[#allocation7 + $0x128] ss:$16 sps:$4 sm:$0xff]   ;;  %v4732_v41 = vld [vmem:[#allocation7 + $0x144] ss:$16 sps:$4 sm:$0xff]   ;;  %v4734_v42 = vld [vmem:[#allocation7 + $0x14c] ss:$16 sps:$4 sm:$0xff]  }
  0xa3   : > { %2048 = vmatpush1.bf16.msra.mxu1 %v1034_v44  ;;  %1760 = vmatprep.subr.bf16.mxu0 %v5082_v32  ;;  %v4736_v43 = vld [vmem:[#allocation7 + $0x140] ss:$16 sps:$4 sm:$0xff]   ;;  %v4737_v44 = vld [vmem:[#allocation7 + $0x148] ss:$16 sps:$4 sm:$0xff]  }
  0xa4   : > { %2049 = vmatprep.subr.bf16.mxu1 %v5082_v32 }
  0xa6   : > { %1761 = vmatpush1.bf16.msra.mxu0 %v1019_v45  ;;  %v4738_v45 = vld [vmem:[#allocation7 + $0x164] ss:$16 sps:$4 sm:$0xff]  }
  0xa7   : > { %2050 = vmatpush1.bf16.msra.mxu1 %v1035_v46  ;;  %1762 = vmatprep.subr.bf16.mxu0 %v5082_v32  ;;  %v4740_v46 = vld [vmem:[#allocation7 + $0x16c] ss:$16 sps:$4 sm:$0xff]  }
  0xa8   : > { %2051 = vmatprep.subr.bf16.mxu1 %v5082_v32 }
  0xaa   : > { %1763 = vmatpush1.bf16.msra.mxu0 %v1020_v47  ;;  %v4742_v47 = vld [vmem:[#allocation7 + $0x160] ss:$16 sps:$4 sm:$0xff]  }
  0xab   : > { %2052 = vmatpush1.bf16.msra.mxu1 %v1036_v48  ;;  %1764 = vmatprep.subr.bf16.mxu0 %v5082_v32  ;;  %v4743_v48 = vld [vmem:[#allocation7 + $0x168] ss:$16 sps:$4 sm:$0xff]  }
  0xac   : > { %2053 = vmatprep.subr.bf16.mxu1 %v5082_v32 }
  0xae   : > { %1765 = vmatpush1.bf16.msra.mxu0 %v1021_v49  ;;  %v4744_v49 = vld [vmem:[#allocation7 + $0x184] ss:$16 sps:$4 sm:$0xff]  }
  0xaf   : > { %2054 = vmatpush1.bf16.msra.mxu1 %v1037_v50  ;;  %1766 = vmatprep.subr.bf16.mxu0 %v5082_v32  ;;  %v4746_v50 = vld [vmem:[#allocation7 + $0x18c] ss:$16 sps:$4 sm:$0xff]  }
  0xb0   : > { %2055 = vmatprep.subr.bf16.mxu1 %v5082_v32 }
  0xb2   : > { %1767 = vmatpush1.bf16.msra.mxu0 %v1022_v51  ;;  %v4748_v51 = vld [vmem:[#allocation7 + $0x180] ss:$16 sps:$4 sm:$0xff]  }
  0xb3   : > { %2056 = vmatpush1.bf16.msra.mxu1 %v1038_v52  ;;  %1768 = vmatprep.subr.bf16.mxu0 %v5082_v32  ;;  %v4749_v52 = vld [vmem:[#allocation7 + $0x188] ss:$16 sps:$4 sm:$0xff]  }
  0xb4   : > { %2057 = vmatprep.subr.bf16.mxu1 %v5082_v32 }
  0xb6   : > { %1769 = vmatpush1.bf16.msra.mxu0 %v1023_v53  ;;  %v4750_v53 = vld [vmem:[#allocation7 + $0x1a4] ss:$16 sps:$4 sm:$0xff]  }
  0xb7   : > { %2058 = vmatpush1.bf16.msra.mxu1 %v1039_v54  ;;  %1770 = vmatprep.subr.bf16.mxu0 %v5082_v32  ;;  %v4752_v54 = vld [vmem:[#allocation7 + $0x1ac] ss:$16 sps:$4 sm:$0xff]  }
  0xb8   : > { %2059 = vmatprep.subr.bf16.mxu1 %v5082_v32 }
  0xba   : > { %1771 = vmatpush1.bf16.msra.mxu0 %v1024_v55  ;;  %v4754_v55 = vld [vmem:[#allocation7 + $0x1a0] ss:$16 sps:$4 sm:$0xff]  }
  0xbb   : > { %2060 = vmatpush1.bf16.msra.mxu1 %v1040_v56  ;;  %1772 = vmatprep.subr.bf16.mxu0 %v5082_v32  ;;  %v4755_v56 = vld [vmem:[#allocation7 + $0x1a8] ss:$16 sps:$4 sm:$0xff]  }
  0xbc   : > { %2061 = vmatprep.subr.bf16.mxu1 %v5082_v32 }
  0xbe   : > { %1773 = vmatpush1.bf16.msra.mxu0 %v1025_v57  ;;  %v4756_v57 = vld [vmem:[#allocation7 + $0x1c4] ss:$16 sps:$4 sm:$0xff]  }
  0xbf   : > { %2062 = vmatpush1.bf16.msra.mxu1 %v1041_v58  ;;  %1774 = vmatprep.subr.bf16.mxu0 %v5082_v32  ;;  %v4758_v58 = vld [vmem:[#allocation7 + $0x1cc] ss:$16 sps:$4 sm:$0xff]  }
  0xc0   : > { %2063 = vmatprep.subr.bf16.mxu1 %v5082_v32 }
  0xc2   : > { %1775 = vmatpush1.bf16.msra.mxu0 %v1026_v59  ;;  %v4760_v59 = vld [vmem:[#allocation7 + $0x1c0] ss:$16 sps:$4 sm:$0xff]  }
  0xc3   : > { %2064 = vmatpush1.bf16.msra.mxu1 %v1042_v60  ;;  %1776 = vmatprep.subr.bf16.mxu0 %v5082_v32  ;;  %v4761_v60 = vld [vmem:[#allocation7 + $0x1c8] ss:$16 sps:$4 sm:$0xff]  }
  0xc4   : > { %2065 = vmatprep.subr.bf16.mxu1 %v5082_v32 }
  0xc6   : > { %1777 = vmatpush1.bf16.msra.mxu0 %v1027_v61  ;;  %v4762_v61 = vld [vmem:[#allocation7 + $0x1e4] ss:$16 sps:$4 sm:$0xff]  }
  0xc7   : > { %2066 = vmatpush1.bf16.msra.mxu1 %v1043_v62  ;;  %1778 = vmatprep.subr.bf16.mxu0 %v5082_v32  ;;  %v4764_v62 = vld [vmem:[#allocation7 + $0x1ec] ss:$16 sps:$4 sm:$0xff]  }
  0xc8   : > { %2067 = vmatprep.subr.bf16.mxu1 %v5082_v32 }
  0xca   : > { %1779 = vmatpush1.bf16.msra.mxu0 %v1028_v63  ;;  %v4766_v63 = vld [vmem:[#allocation7 + $0x1e0] ss:$16 sps:$4 sm:$0xff]  }
  0xcb   : > { %2068 = vmatpush1.bf16.msra.mxu1 %v1044_v0  ;;  %1780 = vmatprep.subr.bf16.mxu0 %v5082_v32  ;;  %v4767_v0 = vld [vmem:[#allocation7 + $0x1e8] ss:$16 sps:$4 sm:$0xff]  }
  0xcc   : > { %2069 = vmatprep.subr.bf16.mxu1 %v5082_v32  ;;  %v4719_v32 = vld [vmem:[#allocation7 + $0xe8] ss:$16 sps:$4 sm:$0xff]  }
  0xce   : > { %1781 = vmatpush1.bf16.msra.mxu0 %v1029_v1  ;;  %v4768_v1 = vld [vmem:[#allocation7 + $0x204] ss:$16 sps:$4 sm:$0xff]  }
  0xcf   : > { %2070 = vmatpush1.bf16.msra.mxu1 %v1045_v2  ;;  %v4770_v2 = vld [vmem:[#allocation7 + $0x20c] ss:$16 sps:$4 sm:$0xff]  }
  0xd1   : > { %1783 = vmatmul.mubr.bf16.vlgmr.msra.gmra.mrb[0].mxu0 %v4672_v3  ;;  %v4772_v3 = vld [vmem:[#allocation7 + $0x200] ss:$16 sps:$4 sm:$0xff]  }
  0xd2   : > { %2072 = vmatmul.mubr.bf16.vlgmr.msra.gmra.mrb[0].mxu1 %v4675_v4  ;;  %1790 = vmatprep.mubr.bf16.mxu0 %v4678_v5  ;;  %v4773_v4 = vld [vmem:[#allocation7 + $0x208] ss:$16 sps:$4 sm:$0xff]   ;;  %v4774_v5 = vld [vmem:[#allocation7 + $0x224] ss:$16 sps:$4 sm:$0xff]  }
  0xd3   : > { %2079 = vmatprep.mubr.bf16.mxu1 %v4680_v6  ;;  %v4776_v6 = vld [vmem:[#allocation7 + $0x22c] ss:$16 sps:$4 sm:$0xff]  }
  0xd9   : > { %1791 = vmatmul.mubr.bf16.gmra.mrb[4].mxu0 %v4682_v7  ;;  %v4778_v7 = vld [vmem:[#allocation7 + $0x220] ss:$16 sps:$4 sm:$0xff]  }
  0xda   : > { %2080 = vmatmul.mubr.bf16.gmra.mrb[4].mxu1 %v4683_v8  ;;  %1798 = vmatprep.mubr.bf16.mxu0 %v4684_v9  ;;  %v4779_v8 = vld [vmem:[#allocation7 + $0x228] ss:$16 sps:$4 sm:$0xff]   ;;  %v4780_v9 = vld [vmem:[#allocation7 + $0x244] ss:$16 sps:$4 sm:$0xff]  }
  0xdb   : > { %2087 = vmatprep.mubr.bf16.mxu1 %v4686_v10  ;;  %v4782_v10 = vld [vmem:[#allocation7 + $0x24c] ss:$16 sps:$4 sm:$0xff]  }
  0xe1   : > { %1799 = vmatmul.mubr.bf16.gmra.mrb[8].mxu0 %v4688_v11  ;;  %v4784_v11 = vld [vmem:[#allocation7 + $0x240] ss:$16 sps:$4 sm:$0xff]  }
  0xe2   : > { %2088 = vmatmul.mubr.bf16.gmra.mrb[8].mxu1 %v4689_v12  ;;  %1806 = vmatprep.mubr.bf16.mxu0 %v4690_v13  ;;  %v4785_v12 = vld [vmem:[#allocation7 + $0x248] ss:$16 sps:$4 sm:$0xff]   ;;  %v4786_v13 = vld [vmem:[#allocation7 + $0x264] ss:$16 sps:$4 sm:$0xff]  }
  0xe3   : > { %2095 = vmatprep.mubr.bf16.mxu1 %v4692_v14  ;;  %v4788_v14 = vld [vmem:[#allocation7 + $0x26c] ss:$16 sps:$4 sm:$0xff]  }
  0xe9   : > { %1807 = vmatmul.mubr.bf16.gmra.mrb[12].mxu0 %v4694_v15  ;;  %v4790_v15 = vld [vmem:[#allocation7 + $0x260] ss:$16 sps:$4 sm:$0xff]  }
  0xea   : > { %2096 = vmatmul.mubr.bf16.gmra.mrb[12].mxu1 %v4695_v16  ;;  %1814 = vmatprep.mubr.bf16.mxu0 %v4696_v17  ;;  %v4791_v16 = vld [vmem:[#allocation7 + $0x268] ss:$16 sps:$4 sm:$0xff]   ;;  %v4792_v17 = vld [vmem:[#allocation7 + $0x284] ss:$16 sps:$4 sm:$0xff]  }
  0xeb   : > { %2103 = vmatprep.mubr.bf16.mxu1 %v4698_v18  ;;  %v4794_v18 = vld [vmem:[#allocation7 + $0x28c] ss:$16 sps:$4 sm:$0xff]  }
  0xf1   : > { %1815 = vmatmul.mubr.bf16.gmra.mrb[16].mxu0 %v4700_v19  ;;  %v4796_v19 = vld [vmem:[#allocation7 + $0x280] ss:$16 sps:$4 sm:$0xff]  }
  0xf2   : > { %2104 = vmatmul.mubr.bf16.gmra.mrb[16].mxu1 %v4701_v20  ;;  %1822 = vmatprep.mubr.bf16.mxu0 %v4702_v21  ;;  %v4797_v20 = vld [vmem:[#allocation7 + $0x288] ss:$16 sps:$4 sm:$0xff]   ;;  %v4798_v21 = vld [vmem:[#allocation7 + $0x2a4] ss:$16 sps:$4 sm:$0xff]  }
  0xf3   : > { %2111 = vmatprep.mubr.bf16.mxu1 %v4704_v22  ;;  %v4800_v22 = vld [vmem:[#allocation7 + $0x2ac] ss:$16 sps:$4 sm:$0xff]  }
  0xf9   : > { %1823 = vmatmul.mubr.bf16.gmra.mrb[20].mxu0 %v4706_v23  ;;  %v4802_v23 = vld [vmem:[#allocation7 + $0x2a0] ss:$16 sps:$4 sm:$0xff]  }
  0xfa   : > { %2112 = vmatmul.mubr.bf16.gmra.mrb[20].mxu1 %v4707_v24  ;;  %1830 = vmatprep.mubr.bf16.mxu0 %v4708_v25  ;;  %v4803_v24 = vld [vmem:[#allocation7 + $0x2a8] ss:$16 sps:$4 sm:$0xff]   ;;  %v4804_v25 = vld [vmem:[#allocation7 + $0x2c4] ss:$16 sps:$4 sm:$0xff]  }
  0xfb   : > { %2119 = vmatprep.mubr.bf16.mxu1 %v4710_v26  ;;  %v4806_v26 = vld [vmem:[#allocation7 + $0x2cc] ss:$16 sps:$4 sm:$0xff]  }
 0x101   : > { %1831 = vmatmul.mubr.bf16.gmra.mrb[24].mxu0 %v4712_v27  ;;  %v4808_v27 = vld [vmem:[#allocation7 + $0x2c0] ss:$16 sps:$4 sm:$0xff]  }
 0x102   : > { %2120 = vmatmul.mubr.bf16.gmra.mrb[24].mxu1 %v4713_v28  ;;  %1838 = vmatprep.mubr.bf16.mxu0 %v4714_v29  ;;  %v4809_v28 = vld [vmem:[#allocation7 + $0x2c8] ss:$16 sps:$4 sm:$0xff]   ;;  %v4810_v29 = vld [vmem:[#allocation7 + $0x2e4] ss:$16 sps:$4 sm:$0xff]  }
 0x103   : > { %2127 = vmatprep.mubr.bf16.mxu1 %v4716_v30  ;;  %v4812_v30 = vld [vmem:[#allocation7 + $0x2ec] ss:$16 sps:$4 sm:$0xff]  }
 0x109   : > { %1839 = vmatmul.mubr.bf16.gmra.mrb[28].mxu0 %v4718_v31  ;;  %v4814_v31 = vld [vmem:[#allocation7 + $0x2e0] ss:$16 sps:$4 sm:$0xff]  }
 0x10a   : > { %2128 = vmatmul.mubr.bf16.gmra.mrb[28].mxu1 %v4719_v32  ;;  %1846 = vmatprep.mubr.bf16.mxu0 %v4720_v33  ;;  %v4815_v32 = vld [vmem:[#allocation7 + $0x2e8] ss:$16 sps:$4 sm:$0xff]   ;;  %v4816_v33 = vld [vmem:[#allocation7 + $0x304] ss:$16 sps:$4 sm:$0xff]  }
 0x10b   : > { %2135 = vmatprep.mubr.bf16.mxu1 %v4722_v34  ;;  %v4818_v34 = vld [vmem:[#allocation7 + $0x30c] ss:$16 sps:$4 sm:$0xff]  }
 0x111   : > { %1847 = vmatmul.mubr.bf16.gmra.mrb[32].mxu0 %v4724_v35  ;;  %v4820_v35 = vld [vmem:[#allocation7 + $0x300] ss:$16 sps:$4 sm:$0xff]  }
 0x112   : > { %2136 = vmatmul.mubr.bf16.gmra.mrb[32].mxu1 %v4725_v36  ;;  %1854 = vmatprep.mubr.bf16.mxu0 %v4726_v37  ;;  %v4821_v36 = vld [vmem:[#allocation7 + $0x308] ss:$16 sps:$4 sm:$0xff]   ;;  %v4822_v37 = vld [vmem:[#allocation7 + $0x324] ss:$16 sps:$4 sm:$0xff]  }
 0x113   : > { %2143 = vmatprep.mubr.bf16.mxu1 %v4728_v38  ;;  %v4824_v38 = vld [vmem:[#allocation7 + $0x32c] ss:$16 sps:$4 sm:$0xff]  }
 0x119   : > { %1855 = vmatmul.mubr.bf16.gmra.mrb[36].mxu0 %v4730_v39  ;;  %v4826_v39 = vld [vmem:[#allocation7 + $0x320] ss:$16 sps:$4 sm:$0xff]  }
 0x11a   : > { %2144 = vmatmul.mubr.bf16.gmra.mrb[36].mxu1 %v4731_v40  ;;  %1862 = vmatprep.mubr.bf16.mxu0 %v4732_v41  ;;  %v4827_v40 = vld [vmem:[#allocation7 + $0x328] ss:$16 sps:$4 sm:$0xff]   ;;  %v4828_v41 = vld [vmem:[#allocation7 + $0x344] ss:$16 sps:$4 sm:$0xff]  }
 0x11b   : > { %2151 = vmatprep.mubr.bf16.mxu1 %v4734_v42  ;;  %v4830_v42 = vld [vmem:[#allocation7 + $0x34c] ss:$16 sps:$4 sm:$0xff]  }
 0x121   : > { %1863 = vmatmul.mubr.bf16.gmra.mrb[40].mxu0 %v4736_v43  ;;  %v4115_v43 = vld [vmem:[#allocation4] sm:$0xff]  }
 0x122   : > { %2152 = vmatmul.mubr.bf16.gmra.mrb[40].mxu1 %v4737_v44  ;;  %1870 = vmatprep.mubr.bf16.mxu0 %v4738_v45  ;;  %v4832_v44 = vld [vmem:[#allocation7 + $0x340] ss:$16 sps:$4 sm:$0xff]   ;;  %v4833_v45 = vld [vmem:[#allocation7 + $0x348] ss:$16 sps:$4 sm:$0xff]  }
 0x123   : > { %2159 = vmatprep.mubr.bf16.mxu1 %v4740_v46  ;;  %v4834_v46 = vld [vmem:[#allocation7 + $0x364] ss:$16 sps:$4 sm:$0xff]  }
 0x129   : > { %1871 = vmatmul.mubr.bf16.gmra.mrb[44].mxu0 %v4742_v47  ;;  %v4836_v47 = vld [vmem:[#allocation7 + $0x36c] ss:$16 sps:$4 sm:$0xff]  }
 0x12a   : > { %2160 = vmatmul.mubr.bf16.gmra.mrb[44].mxu1 %v4743_v48  ;;  %1878 = vmatprep.mubr.bf16.mxu0 %v4744_v49  ;;  %v4116_v48 = vunpack.c.l.bf16 %v4115_v43  ;;  %v4117_v49 = vunpack.c.h.bf16 %v4115_v43 }
 0x12b   : > { %2167 = vmatprep.mubr.bf16.mxu1 %v4746_v50 }
 0x12c   : > { %v743_v50 = vmul.f32 0.5, %v4116_v48 }
 0x131   : > { %1879 = vmatmul.mubr.bf16.gmra.mrb[48].mxu0 %v4748_v51 }
 0x132   : > { %2168 = vmatmul.mubr.bf16.gmra.mrb[48].mxu1 %v4749_v52  ;;  %1886 = vmatprep.mubr.bf16.mxu0 %v4750_v53  ;;  %v744_v53 = vmul.f32 0.5, %v4117_v49 }
 0x133   : > { %2175 = vmatprep.mubr.bf16.mxu1 %v4752_v54  ;;  %v4242_v54 = vld [vmem:[#allocation4 + $0x8] sm:$0xff]  }
 0x139   : > { %1887 = vmatmul.mubr.bf16.gmra.mrb[52].mxu0 %v4754_v55 }
 0x13a   : > { %2176 = vmatmul.mubr.bf16.gmra.mrb[52].mxu1 %v4755_v56  ;;  %1894 = vmatprep.mubr.bf16.mxu0 %v4756_v57 }
 0x13b   : > { %2183 = vmatprep.mubr.bf16.mxu1 %v4758_v58  ;;  %v4838_v58 = vld [vmem:[#allocation7 + $0x360] ss:$16 sps:$4 sm:$0xff]  }
 0x141   : > { %1895 = vmatmul.mubr.bf16.gmra.mrb[56].mxu0 %v4760_v59  ;;  %v4839_v59 = vld [vmem:[#allocation7 + $0x368] ss:$16 sps:$4 sm:$0xff]  }
 0x142   : > { %2184 = vmatmul.mubr.bf16.gmra.mrb[56].mxu1 %v4761_v60  ;;  %1902 = vmatprep.mubr.bf16.mxu0 %v4762_v61 }
 0x143   : > { %2191 = vmatprep.mubr.bf16.mxu1 %v4764_v62  ;;  %v4840_v62 = vld [vmem:[#allocation7 + $0x384] ss:$16 sps:$4 sm:$0xff]  }
 0x149   : > { %1903 = vmatmul.mubr.bf16.gmra.mrb[60].mxu0 %v4766_v63  ;;  %v4842_v63 = vld [vmem:[#allocation7 + $0x38c] ss:$16 sps:$4 sm:$0xff]  }
 0x14a   : > { %2192 = vmatmul.mubr.bf16.gmra.mrb[60].mxu1 %v4767_v0  ;;  %1910 = vmatprep.mubr.bf16.mxu0 %v4768_v1 }
 0x14b   : > { %2199 = vmatprep.mubr.bf16.mxu1 %v4770_v2 }
 0x151   : > { %1911 = vmatmul.mubr.bf16.gmra.mrb[64].mxu0 %v4772_v3 }
 0x152   : > { %2200 = vmatmul.mubr.bf16.gmra.mrb[64].mxu1 %v4773_v4  ;;  %1918 = vmatprep.mubr.bf16.mxu0 %v4774_v5  ;;  %v4120_v4 = vunpack.c.l.bf16 %v4242_v54  ;;  %v4121_v5 = vunpack.c.h.bf16 %v4242_v54 }
 0x153   : > { %2207 = vmatprep.mubr.bf16.mxu1 %v4776_v6 }
 0x159   : > { %1919 = vmatmul.mubr.bf16.gmra.mrb[68].mxu0 %v4778_v7  ;;  %v745_v7 = vmul.f32 0.5, %v4120_v4 }
 0x15a   : > { %2208 = vmatmul.mubr.bf16.gmra.mrb[68].mxu1 %v4779_v8  ;;  %1926 = vmatprep.mubr.bf16.mxu0 %v4780_v9 }
 0x15b   : > { %2215 = vmatprep.mubr.bf16.mxu1 %v4782_v10  ;;  %v746_v10 = vmul.f32 0.5, %v4121_v5 }
 0x161   : > { %1927 = vmatmul.mubr.bf16.gmra.mrb[72].mxu0 %v4784_v11  ;;  %v4243_v11 = vld [vmem:[#allocation4 + $0x10] sm:$0xff]  }
 0x162   : > { %2216 = vmatmul.mubr.bf16.gmra.mrb[72].mxu1 %v4785_v12  ;;  %1934 = vmatprep.mubr.bf16.mxu0 %v4786_v13 }
 0x163   : > { %2223 = vmatprep.mubr.bf16.mxu1 %v4788_v14 }
 0x169   : > { %1935 = vmatmul.mubr.bf16.gmra.mrb[76].mxu0 %v4790_v15  ;;  %v4844_v15 = vld [vmem:[#allocation7 + $0x380] ss:$16 sps:$4 sm:$0xff]  }
 0x16a   : > { %2224 = vmatmul.mubr.bf16.gmra.mrb[76].mxu1 %v4791_v16  ;;  %1942 = vmatprep.mubr.bf16.mxu0 %v4792_v17  ;;  %v4845_v16 = vld [vmem:[#allocation7 + $0x388] ss:$16 sps:$4 sm:$0xff]  }
 0x16b   : > { %2231 = vmatprep.mubr.bf16.mxu1 %v4794_v18 }
 0x171   : > { %1943 = vmatmul.mubr.bf16.gmra.mrb[80].mxu0 %v4796_v19  ;;  %v4846_v19 = vld [vmem:[#allocation7 + $0x3a4] ss:$16 sps:$4 sm:$0xff]  }
 0x172   : > { %2232 = vmatmul.mubr.bf16.gmra.mrb[80].mxu1 %v4797_v20  ;;  %1950 = vmatprep.mubr.bf16.mxu0 %v4798_v21  ;;  %v4848_v20 = vld [vmem:[#allocation7 + $0x3ac] ss:$16 sps:$4 sm:$0xff]  }
 0x173   : > { %2239 = vmatprep.mubr.bf16.mxu1 %v4800_v22 }
 0x179   : > { %1951 = vmatmul.mubr.bf16.gmra.mrb[84].mxu0 %v4802_v23 }
 0x17a   : > { %2240 = vmatmul.mubr.bf16.gmra.mrb[84].mxu1 %v4803_v24  ;;  %1958 = vmatprep.mubr.bf16.mxu0 %v4804_v25  ;;  %v4124_v25 = vunpack.c.l.bf16 %v4243_v11 }
 0x17b   : > { %2247 = vmatprep.mubr.bf16.mxu1 %v4806_v26  ;;  %v4125_v26 = vunpack.c.h.bf16 %v4243_v11 }
 0x181   : > { %1959 = vmatmul.mubr.bf16.gmra.mrb[88].mxu0 %v4808_v27 }
 0x182   : > { %2248 = vmatmul.mubr.bf16.gmra.mrb[88].mxu1 %v4809_v28  ;;  %1966 = vmatprep.mubr.bf16.mxu0 %v4810_v29  ;;  %v747_v28 = vmul.f32 0.5, %v4124_v25 }
 0x183   : > { %2255 = vmatprep.mubr.bf16.mxu1 %v4812_v30 }
 0x189   : > { %1967 = vmatmul.mubr.bf16.gmra.mrb[92].mxu0 %v4814_v31  ;;  %v748_v31 = vmul.f32 0.5, %v4125_v26 }
 0x18a   : > { %2256 = vmatmul.mubr.bf16.gmra.mrb[92].mxu1 %v4815_v32  ;;  %1974 = vmatprep.mubr.bf16.mxu0 %v4816_v33  ;;  %v4244_v32 = vld [vmem:[#allocation4 + $0x18] sm:$0xff]  }
 0x18b   : > { %2263 = vmatprep.mubr.bf16.mxu1 %v4818_v34 }
 0x191   : > { %1975 = vmatmul.mubr.bf16.gmra.mrb[96].mxu0 %v4820_v35 }
 0x192   : > { %2264 = vmatmul.mubr.bf16.gmra.mrb[96].mxu1 %v4821_v36  ;;  %1982 = vmatprep.mubr.bf16.mxu0 %v4822_v37  ;;  %v4850_v36 = vld [vmem:[#allocation7 + $0x3a0] ss:$16 sps:$4 sm:$0xff]   ;;  %v4851_v37 = vld [vmem:[#allocation7 + $0x3a8] ss:$16 sps:$4 sm:$0xff]  }
 0x193   : > { %2271 = vmatprep.mubr.bf16.mxu1 %v4824_v38 }
 0x199   : > { %1983 = vmatmul.mubr.bf16.gmra.mrb[100].mxu0 %v4826_v39 }
 0x19a   : > { %2272 = vmatmul.mubr.bf16.gmra.mrb[100].mxu1 %v4827_v40  ;;  %1990 = vmatprep.mubr.bf16.mxu0 %v4828_v41  ;;  %v4852_v40 = vld [vmem:[#allocation7 + $0x3c4] ss:$16 sps:$4 sm:$0xff]   ;;  %v4854_v41 = vld [vmem:[#allocation7 + $0x3cc] ss:$16 sps:$4 sm:$0xff]  }
 0x19b   : > { %2279 = vmatprep.mubr.bf16.mxu1 %v4830_v42 }
 0x1a1   : > { %1991 = vmatmul.mubr.bf16.gmra.mrb[104].mxu0 %v4832_v44 }
 0x1a2   : > { %2280 = vmatmul.mubr.bf16.gmra.mrb[104].mxu1 %v4833_v45  ;;  %1998 = vmatprep.mubr.bf16.mxu0 %v4834_v46  ;;  %v4128_v46 = vunpack.c.l.bf16 %v4244_v32 }
 0x1a3   : > { %2287 = vmatprep.mubr.bf16.mxu1 %v4836_v47  ;;  %v4129_v47 = vunpack.c.h.bf16 %v4244_v32 }
 0x1a4   : > { %v1784_v51 = vpop.f32.mrb[0].mxu0  ;;  %v749_v49 = vmul.f32 0.5, %v4128_v46 }
 0x1a5   : > { %v2073_v52 = vpop.f32.mrb[0].mxu1  ;;  %v1786_v56 = vpop.f32.mrb[1].mxu0 }
 0x1a6   : > { %v2074_v55 = vadd.f32 %v2073_v52, %v1784_v51  ;;  %v2075_v57 = vpop.f32.mrb[1].mxu1  ;;  %v1787_v60 = vpop.f32.mrb[2].mxu0  ;;  %v750_v52 = vmul.f32 0.5, %v4129_v47 }
 0x1a7   : > { %v2076_v61 = vpop.f32.mrb[2].mxu1  ;;  %v1789_v2 = vpop.f32.mrb[3].mxu0  ;;  %v4856_v57 = vld [vmem:[#allocation7 + $0x3c0] ss:$16 sps:$4 sm:$0xff]  }
 0x1a8   : > { %v2328_v0 = vadd.f32 %v2074_v55, %v743_v50  ;;  %v2077_v1 = vadd.f32 %v2076_v61, %v1787_v60  ;;  %v2078_v3 = vpop.f32.mrb[3].mxu1  ;;  %v4858_v61 = vld [vmem:[#allocation7 + $0x3e4] ss:$16 sps:$4 sm:$0xff]  }
 0x1a9   : > { %1999 = vmatmul.mubr.bf16.gmra.mrb[108].mxu0 %v4838_v58  ;;  %v4857_v58 = vld [vmem:[#allocation7 + $0x3c8] ss:$16 sps:$4 sm:$0xff]  }
 0x1aa   : > { %2392 = vst [vmem:[#allocation3] sm:$0xff] %v2328_v0  ;;  %v2329_v6 = vadd.f32 %v2077_v1, %v744_v53  ;;  %2288 = vmatmul.mubr.bf16.gmra.mrb[108].mxu1 %v4839_v59  ;;  %2006 = vmatprep.mubr.bf16.mxu0 %v4840_v62  ;;  %v4245_v53 = vld [vmem:[#allocation4 + $0x20] sm:$0xff]   ;;  %v4860_v62 = vld [vmem:[#allocation7 + $0x3ec] ss:$16 sps:$4 sm:$0xff]  }
 0x1ab   : > { %2295 = vmatprep.mubr.bf16.mxu1 %v4842_v63  ;;  %v4132_v3 = vunpack.c.l.bf16 %v4245_v53  ;;  %v4133_v4 = vunpack.c.h.bf16 %v4245_v53 }
 0x1ac   : > { %2393 = vst [vmem:[#allocation3 + $0x8] sm:$0xff] %v2329_v6  ;;  %v1792_v8 = vpop.f32.mrb[4].mxu0 }
 0x1ad   : > { %v2081_v9 = vpop.f32.mrb[4].mxu1  ;;  %v1794_v13 = vpop.f32.mrb[5].mxu0  ;;  %v751_v6 = vmul.f32 0.5, %v4132_v3 }
 0x1ae   : > { %v2082_v12 = vadd.f32 %v2081_v9, %v1792_v8  ;;  %v2083_v14 = vpop.f32.mrb[5].mxu1  ;;  %v1795_v17 = vpop.f32.mrb[6].mxu0  ;;  %v752_v9 = vmul.f32 0.5, %v4133_v4 }
 0x1af   : > { %v2084_v18 = vpop.f32.mrb[6].mxu1  ;;  %v1797_v23 = vpop.f32.mrb[7].mxu0  ;;  %v4862_v14 = vld [vmem:[#allocation7 + $0x3e0] ss:$16 sps:$4 sm:$0xff]  }
 0x1b0   : > { %v2330_v21 = vadd.f32 %v2082_v12, %v745_v7  ;;  %v2085_v22 = vadd.f32 %v2084_v18, %v1795_v17  ;;  %v2086_v24 = vpop.f32.mrb[7].mxu1 }
 0x1b1   : > { %2007 = vmatmul.mubr.bf16.gmra.mrb[112].mxu0 %v4844_v15  ;;  %v4863_v15 = vld [vmem:[#allocation7 + $0x3e8] ss:$16 sps:$4 sm:$0xff]  }
 0x1b2   : > { %2394 = vst [vmem:[#allocation3 + $0x10] sm:$0xff] %v2330_v21  ;;  %v2331_v27 = vadd.f32 %v2085_v22, %v746_v10  ;;  %2296 = vmatmul.mubr.bf16.gmra.mrb[112].mxu1 %v4845_v16  ;;  %2014 = vmatprep.mubr.bf16.mxu0 %v4846_v19  ;;  %v4246_v10 = vld [vmem:[#allocation4 + $0x28] sm:$0xff]  }
 0x1b3   : > { %2303 = vmatprep.mubr.bf16.mxu1 %v4848_v20  ;;  %v4136_v22 = vunpack.c.l.bf16 %v4246_v10  ;;  %v4137_v24 = vunpack.c.h.bf16 %v4246_v10 }
 0x1b4   : > { %2395 = vst [vmem:[#allocation3 + $0x18] sm:$0xff] %v2331_v27  ;;  %v1800_v29 = vpop.f32.mrb[8].mxu0 }
 0x1b5   : > { %v2089_v30 = vpop.f32.mrb[8].mxu1  ;;  %v1802_v34 = vpop.f32.mrb[9].mxu0  ;;  %v753_v25 = vmul.f32 0.5, %v4136_v22  ;;  %v754_v32 = vmul.f32 0.5, %v4137_v24 }
 0x1b6   : > { %v2090_v33 = vadd.f32 %v2089_v30, %v1800_v29  ;;  %v2091_v35 = vpop.f32.mrb[9].mxu1  ;;  %v1803_v38 = vpop.f32.mrb[10].mxu0 }
 0x1b7   : > { %v2092_v39 = vpop.f32.mrb[10].mxu1  ;;  %v1805_v44 = vpop.f32.mrb[11].mxu0 }
 0x1b8   : > { %v2332_v42 = vadd.f32 %v2090_v33, %v747_v28  ;;  %v2093_v43 = vadd.f32 %v2092_v39, %v1803_v38  ;;  %v2094_v45 = vpop.f32.mrb[11].mxu1  ;;  %v4247_v28 = vld [vmem:[#allocation4 + $0x30] sm:$0xff]  }
 0x1b9   : > { %2015 = vmatmul.mubr.bf16.gmra.mrb[116].mxu0 %v4850_v36  ;;  %v4140_v39 = vunpack.c.l.bf16 %v4247_v28  ;;  %v4248_v45 = vld [vmem:[#allocation4 + $0x38] sm:$0xff]  }
 0x1ba   : > { %2396 = vst [vmem:[#allocation3 + $0x20] sm:$0xff] %v2332_v42  ;;  %v2333_v48 = vadd.f32 %v2093_v43, %v748_v31  ;;  %2304 = vmatmul.mubr.bf16.gmra.mrb[116].mxu1 %v4851_v37  ;;  %2022 = vmatprep.mubr.bf16.mxu0 %v4852_v40 }
 0x1bb   : > { %2311 = vmatprep.mubr.bf16.mxu1 %v4854_v41  ;;  %v4141_v41 = vunpack.c.h.bf16 %v4247_v28  ;;  %v755_v42 = vmul.f32 0.5, %v4140_v39 }
 0x1bc   : > { %2397 = vst [vmem:[#allocation3 + $0x28] sm:$0xff] %v2333_v48  ;;  %v1808_v50 = vpop.f32.mrb[12].mxu0 }
 0x1bd   : > { %v2097_v51 = vpop.f32.mrb[12].mxu1  ;;  %v1810_v55 = vpop.f32.mrb[13].mxu0 }
 0x1be   : > { %v2098_v54 = vadd.f32 %v2097_v51, %v1808_v50  ;;  %v2099_v56 = vpop.f32.mrb[13].mxu1  ;;  %v1811_v59 = vpop.f32.mrb[14].mxu0 }
 0x1bf   : > { %v2100_v60 = vpop.f32.mrb[14].mxu1  ;;  %v1813_v1 = vpop.f32.mrb[15].mxu0  ;;  %v4144_v56 = vunpack.c.l.bf16 %v4248_v45 }
 0x1c0   : > { %v2334_v63 = vadd.f32 %v2098_v54, %v749_v49  ;;  %v2101_v0 = vadd.f32 %v2100_v60, %v1811_v59  ;;  %v2102_v2 = vpop.f32.mrb[15].mxu1  ;;  %v756_v49 = vmul.f32 0.5, %v4141_v41 }
 0x1c1   : > { %2023 = vmatmul.mubr.bf16.gmra.mrb[120].mxu0 %v4856_v57  ;;  %v757_v59 = vmul.f32 0.5, %v4144_v56 }
 0x1c2   : > { %2398 = vst [vmem:[#allocation3 + $0x30] sm:$0xff] %v2334_v63  ;;  %v2335_v5 = vadd.f32 %v2101_v0, %v750_v52  ;;  %2312 = vmatmul.mubr.bf16.gmra.mrb[120].mxu1 %v4857_v58  ;;  %2030 = vmatprep.mubr.bf16.mxu0 %v4858_v61  ;;  %v4145_v58 = vunpack.c.h.bf16 %v4248_v45 }
 0x1c3   : > { %2319 = vmatprep.mubr.bf16.mxu1 %v4860_v62  ;;  %v4249_v62 = vld [vmem:[#allocation4 + $0x40] sm:$0xff]  }
 0x1c4   : > { %2399 = vst [vmem:[#allocation3 + $0x38] sm:$0xff] %v2335_v5  ;;  %v1816_v7 = vpop.f32.mrb[16].mxu0  ;;  %v758_v2 = vmul.f32 0.5, %v4145_v58 }
 0x1c5   : > { %v2105_v8 = vpop.f32.mrb[16].mxu1  ;;  %v1818_v12 = vpop.f32.mrb[17].mxu0 }
 0x1c6   : > { %v2106_v11 = vadd.f32 %v2105_v8, %v1816_v7  ;;  %v2107_v13 = vpop.f32.mrb[17].mxu1  ;;  %v1819_v16 = vpop.f32.mrb[18].mxu0 }
 0x1c7   : > { %v2108_v17 = vpop.f32.mrb[18].mxu1  ;;  %v1821_v20 = vpop.f32.mrb[19].mxu0 }
 0x1c8   : > { %v2336_v18 = vadd.f32 %v2106_v11, %v751_v6  ;;  %v2109_v19 = vadd.f32 %v2108_v17, %v1819_v16  ;;  %v2110_v21 = vpop.f32.mrb[19].mxu1  ;;  %v4149_v11 = vunpack.c.h.bf16 %v4249_v62 }
 0x1c9   : > { %2031 = vmatmul.mubr.bf16.gmra.mrb[124].mxu0 %v4862_v14 }
 0x1ca   : > { %2400 = vst [vmem:[#allocation3 + $0x40] sm:$0xff] %v2336_v18  ;;  %v2337_v23 = vadd.f32 %v2109_v19, %v752_v9  ;;  %2320 = vmatmul.mubr.bf16.gmra.mrb[124].mxu1 %v4863_v15  ;;  %v4148_v9 = vunpack.c.l.bf16 %v4249_v62  ;;  %v4250_v15 = vld [vmem:[#allocation4 + $0x48] sm:$0xff]   ;;  %v760_v19 = vmul.f32 0.5, %v4149_v11 }
 0x1cb   : > { %v4153_v28 = vunpack.c.h.bf16 %v4250_v15 }
 0x1cc   : > { %2401 = vst [vmem:[#allocation3 + $0x48] sm:$0xff] %v2337_v23  ;;  %v1824_v26 = vpop.f32.mrb[20].mxu0  ;;  %v759_v12 = vmul.f32 0.5, %v4148_v9 }
 0x1cd   : > { %v2113_v27 = vpop.f32.mrb[20].mxu1  ;;  %v1826_v30 = vpop.f32.mrb[21].mxu0 }
 0x1ce   : > { %v2114_v29 = vadd.f32 %v2113_v27, %v1824_v26  ;;  %v2115_v31 = vpop.f32.mrb[21].mxu1  ;;  %v1827_v33 = vpop.f32.mrb[22].mxu0  ;;  %v4152_v26 = vunpack.c.l.bf16 %v4250_v15 }
 0x1cf   : > { %v2116_v34 = vpop.f32.mrb[22].mxu1  ;;  %v1829_v37 = vpop.f32.mrb[23].mxu0 }
 0x1d0   : > { %v2338_v35 = vadd.f32 %v2114_v29, %v753_v25  ;;  %v2117_v36 = vadd.f32 %v2116_v34, %v1827_v33  ;;  %v2118_v38 = vpop.f32.mrb[23].mxu1  ;;  %v761_v29 = vmul.f32 0.5, %v4152_v26 }
 0x1d2   : > { %2402 = vst [vmem:[#allocation3 + $0x50] sm:$0xff] %v2338_v35  ;;  %v2339_v40 = vadd.f32 %v2117_v36, %v754_v32  ;;  %v4251_v32 = vld [vmem:[#allocation4 + $0x50] sm:$0xff]   ;;  %v762_v36 = vmul.f32 0.5, %v4153_v28 }
 0x1d3   : > { %v4157_v45 = vunpack.c.h.bf16 %v4251_v32 }
 0x1d4   : > { %2403 = vst [vmem:[#allocation3 + $0x58] sm:$0xff] %v2339_v40  ;;  %v1832_v43 = vpop.f32.mrb[24].mxu0 }
 0x1d5   : > { %v2121_v44 = vpop.f32.mrb[24].mxu1  ;;  %v1834_v47 = vpop.f32.mrb[25].mxu0 }
 0x1d6   : > { %v2122_v46 = vadd.f32 %v2121_v44, %v1832_v43  ;;  %v2123_v48 = vpop.f32.mrb[25].mxu1  ;;  %v1835_v50 = vpop.f32.mrb[26].mxu0  ;;  %v4156_v43 = vunpack.c.l.bf16 %v4251_v32 }
 0x1d7   : > { %v2124_v51 = vpop.f32.mrb[26].mxu1  ;;  %v1837_v54 = vpop.f32.mrb[27].mxu0 }
 0x1d8   : > { %v2340_v52 = vadd.f32 %v2122_v46, %v755_v42  ;;  %v2125_v53 = vadd.f32 %v2124_v51, %v1835_v50  ;;  %v2126_v55 = vpop.f32.mrb[27].mxu1  ;;  %v763_v46 = vmul.f32 0.5, %v4156_v43 }
 0x1da   : > { %2404 = vst [vmem:[#allocation3 + $0x60] sm:$0xff] %v2340_v52  ;;  %v2341_v57 = vadd.f32 %v2125_v53, %v756_v49  ;;  %v4252_v49 = vld [vmem:[#allocation4 + $0x58] sm:$0xff]   ;;  %v764_v53 = vmul.f32 0.5, %v4157_v45 }
 0x1db   : > { %v4161_v62 = vunpack.c.h.bf16 %v4252_v49 }
 0x1dc   : > { %2405 = vst [vmem:[#allocation3 + $0x68] sm:$0xff] %v2341_v57  ;;  %v1840_v60 = vpop.f32.mrb[28].mxu0 }
 0x1dd   : > { %v2129_v61 = vpop.f32.mrb[28].mxu1  ;;  %v1842_v0 = vpop.f32.mrb[29].mxu0 }
 0x1de   : > { %v2130_v63 = vadd.f32 %v2129_v61, %v1840_v60  ;;  %v2131_v1 = vpop.f32.mrb[29].mxu1  ;;  %v1843_v3 = vpop.f32.mrb[30].mxu0  ;;  %v4160_v60 = vunpack.c.l.bf16 %v4252_v49 }
 0x1df   : > { %v2132_v4 = vpop.f32.mrb[30].mxu1  ;;  %v1845_v7 = vpop.f32.mrb[31].mxu0 }
 0x1e0   : > { %v2342_v5 = vadd.f32 %v2130_v63, %v757_v59  ;;  %v2133_v6 = vadd.f32 %v2132_v4, %v1843_v3  ;;  %v2134_v8 = vpop.f32.mrb[31].mxu1  ;;  %v765_v63 = vmul.f32 0.5, %v4160_v60 }
 0x1e2   : > { %2406 = vst [vmem:[#allocation3 + $0x70] sm:$0xff] %v2342_v5  ;;  %v2343_v10 = vadd.f32 %v2133_v6, %v758_v2  ;;  %v4253_v2 = vld [vmem:[#allocation4 + $0x60] sm:$0xff]   ;;  %v766_v6 = vmul.f32 0.5, %v4161_v62 }
 0x1e3   : > { %v4165_v15 = vunpack.c.h.bf16 %v4253_v2 }
 0x1e4   : > { %2407 = vst [vmem:[#allocation3 + $0x78] sm:$0xff] %v2343_v10  ;;  %v1848_v13 = vpop.f32.mrb[32].mxu0 }
 0x1e5   : > { %v2137_v14 = vpop.f32.mrb[32].mxu1  ;;  %v1850_v17 = vpop.f32.mrb[33].mxu0 }
 0x1e6   : > { %v2138_v16 = vadd.f32 %v2137_v14, %v1848_v13  ;;  %v2139_v18 = vpop.f32.mrb[33].mxu1  ;;  %v1851_v20 = vpop.f32.mrb[34].mxu0  ;;  %v4164_v13 = vunpack.c.l.bf16 %v4253_v2 }
 0x1e7   : > { %v2140_v21 = vpop.f32.mrb[34].mxu1  ;;  %v1853_v24 = vpop.f32.mrb[35].mxu0 }
 0x1e8   : > { %v2344_v22 = vadd.f32 %v2138_v16, %v759_v12  ;;  %v2141_v23 = vadd.f32 %v2140_v21, %v1851_v20  ;;  %v2142_v25 = vpop.f32.mrb[35].mxu1  ;;  %v767_v16 = vmul.f32 0.5, %v4164_v13 }
 0x1ea   : > { %2408 = vst [vmem:[#allocation3 + $0x80] sm:$0xff] %v2344_v22  ;;  %v2345_v27 = vadd.f32 %v2141_v23, %v760_v19  ;;  %v4254_v19 = vld [vmem:[#allocation4 + $0x68] sm:$0xff]   ;;  %v768_v23 = vmul.f32 0.5, %v4165_v15 }
 0x1eb   : > { %v4169_v32 = vunpack.c.h.bf16 %v4254_v19 }
 0x1ec   : > { %2409 = vst [vmem:[#allocation3 + $0x88] sm:$0xff] %v2345_v27  ;;  %v1856_v30 = vpop.f32.mrb[36].mxu0 }
 0x1ed   : > { %v2145_v31 = vpop.f32.mrb[36].mxu1  ;;  %v1858_v34 = vpop.f32.mrb[37].mxu0 }
 0x1ee   : > { %v2146_v33 = vadd.f32 %v2145_v31, %v1856_v30  ;;  %v2147_v35 = vpop.f32.mrb[37].mxu1  ;;  %v1859_v37 = vpop.f32.mrb[38].mxu0  ;;  %v4168_v30 = vunpack.c.l.bf16 %v4254_v19 }
 0x1ef   : > { %v2148_v38 = vpop.f32.mrb[38].mxu1  ;;  %v1861_v41 = vpop.f32.mrb[39].mxu0 }
 0x1f0   : > { %v2346_v39 = vadd.f32 %v2146_v33, %v761_v29  ;;  %v2149_v40 = vadd.f32 %v2148_v38, %v1859_v37  ;;  %v2150_v42 = vpop.f32.mrb[39].mxu1  ;;  %v769_v33 = vmul.f32 0.5, %v4168_v30 }
 0x1f2   : > { %2410 = vst [vmem:[#allocation3 + $0x90] sm:$0xff] %v2346_v39  ;;  %v2347_v44 = vadd.f32 %v2149_v40, %v762_v36  ;;  %v4255_v36 = vld [vmem:[#allocation4 + $0x70] sm:$0xff]   ;;  %v770_v40 = vmul.f32 0.5, %v4169_v32 }
 0x1f3   : > { %v4173_v49 = vunpack.c.h.bf16 %v4255_v36 }
 0x1f4   : > { %2411 = vst [vmem:[#allocation3 + $0x98] sm:$0xff] %v2347_v44  ;;  %v1864_v47 = vpop.f32.mrb[40].mxu0 }
 0x1f5   : > { %v2153_v48 = vpop.f32.mrb[40].mxu1  ;;  %v1866_v51 = vpop.f32.mrb[41].mxu0 }
 0x1f6   : > { %v2154_v50 = vadd.f32 %v2153_v48, %v1864_v47  ;;  %v2155_v52 = vpop.f32.mrb[41].mxu1  ;;  %v1867_v54 = vpop.f32.mrb[42].mxu0  ;;  %v4172_v47 = vunpack.c.l.bf16 %v4255_v36 }
 0x1f7   : > { %v2156_v55 = vpop.f32.mrb[42].mxu1  ;;  %v1869_v58 = vpop.f32.mrb[43].mxu0 }
 0x1f8   : > { %v2348_v56 = vadd.f32 %v2154_v50, %v763_v46  ;;  %v2157_v57 = vadd.f32 %v2156_v55, %v1867_v54  ;;  %v2158_v59 = vpop.f32.mrb[43].mxu1  ;;  %v771_v50 = vmul.f32 0.5, %v4172_v47 }
 0x1fa   : > { %2412 = vst [vmem:[#allocation3 + $0xa0] sm:$0xff] %v2348_v56  ;;  %v2349_v61 = vadd.f32 %v2157_v57, %v764_v53  ;;  %v4256_v53 = vld [vmem:[#allocation4 + $0x78] sm:$0xff]   ;;  %v772_v57 = vmul.f32 0.5, %v4173_v49 }
 0x1fb   : > { %v4177_v2 = vunpack.c.h.bf16 %v4256_v53 }
 0x1fc   : > { %2413 = vst [vmem:[#allocation3 + $0xa8] sm:$0xff] %v2349_v61  ;;  %v1872_v0 = vpop.f32.mrb[44].mxu0 }
 0x1fd   : > { %v2161_v1 = vpop.f32.mrb[44].mxu1  ;;  %v1874_v4 = vpop.f32.mrb[45].mxu0 }
 0x1fe   : > { %v2162_v3 = vadd.f32 %v2161_v1, %v1872_v0  ;;  %v2163_v5 = vpop.f32.mrb[45].mxu1  ;;  %v1875_v7 = vpop.f32.mrb[46].mxu0  ;;  %v4176_v0 = vunpack.c.l.bf16 %v4256_v53 }
 0x1ff   : > { %v2164_v8 = vpop.f32.mrb[46].mxu1  ;;  %v1877_v11 = vpop.f32.mrb[47].mxu0 }
 0x200   : > { %v2350_v9 = vadd.f32 %v2162_v3, %v765_v63  ;;  %v2165_v10 = vadd.f32 %v2164_v8, %v1875_v7  ;;  %v2166_v12 = vpop.f32.mrb[47].mxu1  ;;  %v773_v3 = vmul.f32 0.5, %v4176_v0 }
 0x202   : > { %2414 = vst [vmem:[#allocation3 + $0xb0] sm:$0xff] %v2350_v9  ;;  %v2351_v14 = vadd.f32 %v2165_v10, %v766_v6  ;;  %v4257_v6 = vld [vmem:[#allocation4 + $0x80] sm:$0xff]   ;;  %v774_v10 = vmul.f32 0.5, %v4177_v2 }
 0x203   : > { %v4181_v19 = vunpack.c.h.bf16 %v4257_v6 }
 0x204   : > { %2415 = vst [vmem:[#allocation3 + $0xb8] sm:$0xff] %v2351_v14  ;;  %v1880_v17 = vpop.f32.mrb[48].mxu0 }
 0x205   : > { %v2169_v18 = vpop.f32.mrb[48].mxu1  ;;  %v1882_v21 = vpop.f32.mrb[49].mxu0 }
 0x206   : > { %v2170_v20 = vadd.f32 %v2169_v18, %v1880_v17  ;;  %v2171_v22 = vpop.f32.mrb[49].mxu1  ;;  %v1883_v24 = vpop.f32.mrb[50].mxu0  ;;  %v4180_v17 = vunpack.c.l.bf16 %v4257_v6 }
 0x207   : > { %v2172_v25 = vpop.f32.mrb[50].mxu1  ;;  %v1885_v28 = vpop.f32.mrb[51].mxu0 }
 0x208   : > { %v2352_v26 = vadd.f32 %v2170_v20, %v767_v16  ;;  %v2173_v27 = vadd.f32 %v2172_v25, %v1883_v24  ;;  %v2174_v29 = vpop.f32.mrb[51].mxu1  ;;  %v775_v20 = vmul.f32 0.5, %v4180_v17 }
 0x20a   : > { %2416 = vst [vmem:[#allocation3 + $0xc0] sm:$0xff] %v2352_v26  ;;  %v2353_v31 = vadd.f32 %v2173_v27, %v768_v23  ;;  %v4258_v23 = vld [vmem:[#allocation4 + $0x88] sm:$0xff]   ;;  %v776_v27 = vmul.f32 0.5, %v4181_v19 }
 0x20b   : > { %v4185_v36 = vunpack.c.h.bf16 %v4258_v23 }
 0x20c   : > { %2417 = vst [vmem:[#allocation3 + $0xc8] sm:$0xff] %v2353_v31  ;;  %v1888_v34 = vpop.f32.mrb[52].mxu0 }
 0x20d   : > { %v2177_v35 = vpop.f32.mrb[52].mxu1  ;;  %v1890_v38 = vpop.f32.mrb[53].mxu0 }
 0x20e   : > { %v2178_v37 = vadd.f32 %v2177_v35, %v1888_v34  ;;  %v2179_v39 = vpop.f32.mrb[53].mxu1  ;;  %v1891_v41 = vpop.f32.mrb[54].mxu0  ;;  %v4184_v34 = vunpack.c.l.bf16 %v4258_v23 }
 0x20f   : > { %v2180_v42 = vpop.f32.mrb[54].mxu1  ;;  %v1893_v45 = vpop.f32.mrb[55].mxu0 }
 0x210   : > { %v2354_v43 = vadd.f32 %v2178_v37, %v769_v33  ;;  %v2181_v44 = vadd.f32 %v2180_v42, %v1891_v41  ;;  %v2182_v46 = vpop.f32.mrb[55].mxu1  ;;  %v777_v37 = vmul.f32 0.5, %v4184_v34 }
 0x212   : > { %2418 = vst [vmem:[#allocation3 + $0xd0] sm:$0xff] %v2354_v43  ;;  %v2355_v48 = vadd.f32 %v2181_v44, %v770_v40  ;;  %v4259_v40 = vld [vmem:[#allocation4 + $0x90] sm:$0xff]   ;;  %v778_v44 = vmul.f32 0.5, %v4185_v36 }
 0x213   : > { %v4189_v53 = vunpack.c.h.bf16 %v4259_v40 }
 0x214   : > { %2419 = vst [vmem:[#allocation3 + $0xd8] sm:$0xff] %v2355_v48  ;;  %v1896_v51 = vpop.f32.mrb[56].mxu0 }
 0x215   : > { %v2185_v52 = vpop.f32.mrb[56].mxu1  ;;  %v1898_v55 = vpop.f32.mrb[57].mxu0 }
 0x216   : > { %v2186_v54 = vadd.f32 %v2185_v52, %v1896_v51  ;;  %v2187_v56 = vpop.f32.mrb[57].mxu1  ;;  %v1899_v58 = vpop.f32.mrb[58].mxu0  ;;  %v4188_v51 = vunpack.c.l.bf16 %v4259_v40 }
 0x217   : > { %v2188_v59 = vpop.f32.mrb[58].mxu1  ;;  %v1901_v62 = vpop.f32.mrb[59].mxu0 }
 0x218   : > { %v2356_v60 = vadd.f32 %v2186_v54, %v771_v50  ;;  %v2189_v61 = vadd.f32 %v2188_v59, %v1899_v58  ;;  %v2190_v63 = vpop.f32.mrb[59].mxu1  ;;  %v779_v54 = vmul.f32 0.5, %v4188_v51 }
 0x21a   : > { %2420 = vst [vmem:[#allocation3 + $0xe0] sm:$0xff] %v2356_v60  ;;  %v2357_v1 = vadd.f32 %v2189_v61, %v772_v57  ;;  %v4260_v57 = vld [vmem:[#allocation4 + $0x98] sm:$0xff]   ;;  %v780_v61 = vmul.f32 0.5, %v4189_v53 }
 0x21b   : > { %v4193_v6 = vunpack.c.h.bf16 %v4260_v57 }
 0x21c   : > { %2421 = vst [vmem:[#allocation3 + $0xe8] sm:$0xff] %v2357_v1  ;;  %v1904_v4 = vpop.f32.mrb[60].mxu0 }
 0x21d   : > { %v2193_v5 = vpop.f32.mrb[60].mxu1  ;;  %v1906_v8 = vpop.f32.mrb[61].mxu0 }
 0x21e   : > { %v2194_v7 = vadd.f32 %v2193_v5, %v1904_v4  ;;  %v2195_v9 = vpop.f32.mrb[61].mxu1  ;;  %v1907_v11 = vpop.f32.mrb[62].mxu0  ;;  %v4192_v4 = vunpack.c.l.bf16 %v4260_v57 }
 0x21f   : > { %v2196_v12 = vpop.f32.mrb[62].mxu1  ;;  %v1909_v15 = vpop.f32.mrb[63].mxu0 }
 0x220   : > { %v2358_v13 = vadd.f32 %v2194_v7, %v773_v3  ;;  %v2197_v14 = vadd.f32 %v2196_v12, %v1907_v11  ;;  %v2198_v16 = vpop.f32.mrb[63].mxu1  ;;  %v781_v7 = vmul.f32 0.5, %v4192_v4 }
 0x222   : > { %2422 = vst [vmem:[#allocation3 + $0xf0] sm:$0xff] %v2358_v13  ;;  %v2359_v18 = vadd.f32 %v2197_v14, %v774_v10  ;;  %v4261_v10 = vld [vmem:[#allocation4 + $0xa0] sm:$0xff]   ;;  %v782_v14 = vmul.f32 0.5, %v4193_v6 }
 0x223   : > { %v4197_v23 = vunpack.c.h.bf16 %v4261_v10 }
 0x224   : > { %2423 = vst [vmem:[#allocation3 + $0xf8] sm:$0xff] %v2359_v18  ;;  %v1912_v21 = vpop.f32.mrb[64].mxu0 }
 0x225   : > { %v2201_v22 = vpop.f32.mrb[64].mxu1  ;;  %v1914_v25 = vpop.f32.mrb[65].mxu0 }
 0x226   : > { %v2202_v24 = vadd.f32 %v2201_v22, %v1912_v21  ;;  %v2203_v26 = vpop.f32.mrb[65].mxu1  ;;  %v1915_v28 = vpop.f32.mrb[66].mxu0  ;;  %v4196_v21 = vunpack.c.l.bf16 %v4261_v10 }
 0x227   : > { %v2204_v29 = vpop.f32.mrb[66].mxu1  ;;  %v1917_v32 = vpop.f32.mrb[67].mxu0 }
 0x228   : > { %v2360_v30 = vadd.f32 %v2202_v24, %v775_v20  ;;  %v2205_v31 = vadd.f32 %v2204_v29, %v1915_v28  ;;  %v2206_v33 = vpop.f32.mrb[67].mxu1  ;;  %v783_v24 = vmul.f32 0.5, %v4196_v21 }
 0x22a   : > { %2424 = vst [vmem:[#allocation3 + $0x100] sm:$0xff] %v2360_v30  ;;  %v2361_v35 = vadd.f32 %v2205_v31, %v776_v27  ;;  %v4262_v27 = vld [vmem:[#allocation4 + $0xa8] sm:$0xff]   ;;  %v784_v31 = vmul.f32 0.5, %v4197_v23 }
 0x22b   : > { %v4201_v40 = vunpack.c.h.bf16 %v4262_v27 }
 0x22c   : > { %2425 = vst [vmem:[#allocation3 + $0x108] sm:$0xff] %v2361_v35  ;;  %v1920_v38 = vpop.f32.mrb[68].mxu0 }
 0x22d   : > { %v2209_v39 = vpop.f32.mrb[68].mxu1  ;;  %v1922_v42 = vpop.f32.mrb[69].mxu0 }
 0x22e   : > { %v2210_v41 = vadd.f32 %v2209_v39, %v1920_v38  ;;  %v2211_v43 = vpop.f32.mrb[69].mxu1  ;;  %v1923_v45 = vpop.f32.mrb[70].mxu0  ;;  %v4200_v38 = vunpack.c.l.bf16 %v4262_v27 }
 0x22f   : > { %v2212_v46 = vpop.f32.mrb[70].mxu1  ;;  %v1925_v49 = vpop.f32.mrb[71].mxu0 }
 0x230   : > { %v2362_v47 = vadd.f32 %v2210_v41, %v777_v37  ;;  %v2213_v48 = vadd.f32 %v2212_v46, %v1923_v45  ;;  %v2214_v50 = vpop.f32.mrb[71].mxu1  ;;  %v785_v41 = vmul.f32 0.5, %v4200_v38 }
 0x232   : > { %2426 = vst [vmem:[#allocation3 + $0x110] sm:$0xff] %v2362_v47  ;;  %v2363_v52 = vadd.f32 %v2213_v48, %v778_v44  ;;  %v4263_v44 = vld [vmem:[#allocation4 + $0xb0] sm:$0xff]   ;;  %v786_v48 = vmul.f32 0.5, %v4201_v40 }
 0x233   : > { %v4205_v57 = vunpack.c.h.bf16 %v4263_v44 }
 0x234   : > { %2427 = vst [vmem:[#allocation3 + $0x118] sm:$0xff] %v2363_v52  ;;  %v1928_v55 = vpop.f32.mrb[72].mxu0 }
 0x235   : > { %v2217_v56 = vpop.f32.mrb[72].mxu1  ;;  %v1930_v59 = vpop.f32.mrb[73].mxu0 }
 0x236   : > { %v2218_v58 = vadd.f32 %v2217_v56, %v1928_v55  ;;  %v2219_v60 = vpop.f32.mrb[73].mxu1  ;;  %v1931_v62 = vpop.f32.mrb[74].mxu0  ;;  %v4204_v55 = vunpack.c.l.bf16 %v4263_v44 }
 0x237   : > { %v2220_v63 = vpop.f32.mrb[74].mxu1  ;;  %v1933_v2 = vpop.f32.mrb[75].mxu0 }
 0x238   : > { %v2364_v0 = vadd.f32 %v2218_v58, %v779_v54  ;;  %v2221_v1 = vadd.f32 %v2220_v63, %v1931_v62  ;;  %v2222_v3 = vpop.f32.mrb[75].mxu1  ;;  %v787_v58 = vmul.f32 0.5, %v4204_v55 }
 0x23a   : > { %2428 = vst [vmem:[#allocation3 + $0x120] sm:$0xff] %v2364_v0  ;;  %v2365_v5 = vadd.f32 %v2221_v1, %v780_v61  ;;  %v4264_v61 = vld [vmem:[#allocation4 + $0xb8] sm:$0xff]   ;;  %v788_v1 = vmul.f32 0.5, %v4205_v57 }
 0x23b   : > { %v4209_v10 = vunpack.c.h.bf16 %v4264_v61 }
 0x23c   : > { %2429 = vst [vmem:[#allocation3 + $0x128] sm:$0xff] %v2365_v5  ;;  %v1936_v8 = vpop.f32.mrb[76].mxu0 }
 0x23d   : > { %v2225_v9 = vpop.f32.mrb[76].mxu1  ;;  %v1938_v12 = vpop.f32.mrb[77].mxu0 }
 0x23e   : > { %v2226_v11 = vadd.f32 %v2225_v9, %v1936_v8  ;;  %v2227_v13 = vpop.f32.mrb[77].mxu1  ;;  %v1939_v15 = vpop.f32.mrb[78].mxu0  ;;  %v4208_v8 = vunpack.c.l.bf16 %v4264_v61 }
 0x23f   : > { %v2228_v16 = vpop.f32.mrb[78].mxu1  ;;  %v1941_v19 = vpop.f32.mrb[79].mxu0 }
 0x240   : > { %v2366_v17 = vadd.f32 %v2226_v11, %v781_v7  ;;  %v2229_v18 = vadd.f32 %v2228_v16, %v1939_v15  ;;  %v2230_v20 = vpop.f32.mrb[79].mxu1  ;;  %v789_v11 = vmul.f32 0.5, %v4208_v8 }
 0x242   : > { %2430 = vst [vmem:[#allocation3 + $0x130] sm:$0xff] %v2366_v17  ;;  %v2367_v22 = vadd.f32 %v2229_v18, %v782_v14  ;;  %v4265_v14 = vld [vmem:[#allocation4 + $0xc0] sm:$0xff]   ;;  %v790_v18 = vmul.f32 0.5, %v4209_v10 }
 0x243   : > { %v4213_v27 = vunpack.c.h.bf16 %v4265_v14 }
 0x244   : > { %2431 = vst [vmem:[#allocation3 + $0x138] sm:$0xff] %v2367_v22  ;;  %v1944_v25 = vpop.f32.mrb[80].mxu0 }
 0x245   : > { %v2233_v26 = vpop.f32.mrb[80].mxu1  ;;  %v1946_v29 = vpop.f32.mrb[81].mxu0 }
 0x246   : > { %v2234_v28 = vadd.f32 %v2233_v26, %v1944_v25  ;;  %v2235_v30 = vpop.f32.mrb[81].mxu1  ;;  %v1947_v32 = vpop.f32.mrb[82].mxu0  ;;  %v4212_v25 = vunpack.c.l.bf16 %v4265_v14 }
 0x247   : > { %v2236_v33 = vpop.f32.mrb[82].mxu1  ;;  %v1949_v36 = vpop.f32.mrb[83].mxu0 }
 0x248   : > { %v2368_v34 = vadd.f32 %v2234_v28, %v783_v24  ;;  %v2237_v35 = vadd.f32 %v2236_v33, %v1947_v32  ;;  %v2238_v37 = vpop.f32.mrb[83].mxu1  ;;  %v791_v28 = vmul.f32 0.5, %v4212_v25 }
 0x24a   : > { %2432 = vst [vmem:[#allocation3 + $0x140] sm:$0xff] %v2368_v34  ;;  %v2369_v39 = vadd.f32 %v2237_v35, %v784_v31  ;;  %v4266_v31 = vld [vmem:[#allocation4 + $0xc8] sm:$0xff]   ;;  %v792_v35 = vmul.f32 0.5, %v4213_v27 }
 0x24b   : > { %v4217_v44 = vunpack.c.h.bf16 %v4266_v31 }
 0x24c   : > { %2433 = vst [vmem:[#allocation3 + $0x148] sm:$0xff] %v2369_v39  ;;  %v1952_v42 = vpop.f32.mrb[84].mxu0 }
 0x24d   : > { %v2241_v43 = vpop.f32.mrb[84].mxu1  ;;  %v1954_v46 = vpop.f32.mrb[85].mxu0 }
 0x24e   : > { %v2242_v45 = vadd.f32 %v2241_v43, %v1952_v42  ;;  %v2243_v47 = vpop.f32.mrb[85].mxu1  ;;  %v1955_v49 = vpop.f32.mrb[86].mxu0  ;;  %v4216_v42 = vunpack.c.l.bf16 %v4266_v31 }
 0x24f   : > { %v2244_v50 = vpop.f32.mrb[86].mxu1  ;;  %v1957_v53 = vpop.f32.mrb[87].mxu0 }
 0x250   : > { %v2370_v51 = vadd.f32 %v2242_v45, %v785_v41  ;;  %v2245_v52 = vadd.f32 %v2244_v50, %v1955_v49  ;;  %v2246_v54 = vpop.f32.mrb[87].mxu1  ;;  %v793_v45 = vmul.f32 0.5, %v4216_v42 }
 0x252   : > { %2434 = vst [vmem:[#allocation3 + $0x150] sm:$0xff] %v2370_v51  ;;  %v2371_v56 = vadd.f32 %v2245_v52, %v786_v48  ;;  %v4267_v48 = vld [vmem:[#allocation4 + $0xd0] sm:$0xff]   ;;  %v794_v52 = vmul.f32 0.5, %v4217_v44 }
 0x253   : > { %v4221_v61 = vunpack.c.h.bf16 %v4267_v48 }
 0x254   : > { %2435 = vst [vmem:[#allocation3 + $0x158] sm:$0xff] %v2371_v56  ;;  %v1960_v59 = vpop.f32.mrb[88].mxu0 }
 0x255   : > { %v2249_v60 = vpop.f32.mrb[88].mxu1  ;;  %v1962_v63 = vpop.f32.mrb[89].mxu0 }
 0x256   : > { %v2250_v62 = vadd.f32 %v2249_v60, %v1960_v59  ;;  %v2251_v0 = vpop.f32.mrb[89].mxu1  ;;  %v1963_v2 = vpop.f32.mrb[90].mxu0  ;;  %v4220_v59 = vunpack.c.l.bf16 %v4267_v48 }
 0x257   : > { %v2252_v3 = vpop.f32.mrb[90].mxu1  ;;  %v1965_v6 = vpop.f32.mrb[91].mxu0 }
 0x258   : > { %v2372_v4 = vadd.f32 %v2250_v62, %v787_v58  ;;  %v2253_v5 = vadd.f32 %v2252_v3, %v1963_v2  ;;  %v2254_v7 = vpop.f32.mrb[91].mxu1  ;;  %v795_v62 = vmul.f32 0.5, %v4220_v59 }
 0x25a   : > { %2436 = vst [vmem:[#allocation3 + $0x160] sm:$0xff] %v2372_v4  ;;  %v2373_v9 = vadd.f32 %v2253_v5, %v788_v1  ;;  %v4268_v1 = vld [vmem:[#allocation4 + $0xd8] sm:$0xff]   ;;  %v796_v5 = vmul.f32 0.5, %v4221_v61 }
 0x25b   : > { %v4225_v14 = vunpack.c.h.bf16 %v4268_v1 }
 0x25c   : > { %2437 = vst [vmem:[#allocation3 + $0x168] sm:$0xff] %v2373_v9  ;;  %v1968_v12 = vpop.f32.mrb[92].mxu0 }
 0x25d   : > { %v2257_v13 = vpop.f32.mrb[92].mxu1  ;;  %v1970_v16 = vpop.f32.mrb[93].mxu0 }
 0x25e   : > { %v2258_v15 = vadd.f32 %v2257_v13, %v1968_v12  ;;  %v2259_v17 = vpop.f32.mrb[93].mxu1  ;;  %v1971_v19 = vpop.f32.mrb[94].mxu0  ;;  %v4224_v12 = vunpack.c.l.bf16 %v4268_v1 }
 0x25f   : > { %v2260_v20 = vpop.f32.mrb[94].mxu1  ;;  %v1973_v23 = vpop.f32.mrb[95].mxu0 }
 0x260   : > { %v2374_v21 = vadd.f32 %v2258_v15, %v789_v11  ;;  %v2261_v22 = vadd.f32 %v2260_v20, %v1971_v19  ;;  %v2262_v24 = vpop.f32.mrb[95].mxu1  ;;  %v797_v15 = vmul.f32 0.5, %v4224_v12 }
 0x262   : > { %2438 = vst [vmem:[#allocation3 + $0x170] sm:$0xff] %v2374_v21  ;;  %v2375_v26 = vadd.f32 %v2261_v22, %v790_v18  ;;  %v4269_v18 = vld [vmem:[#allocation4 + $0xe0] sm:$0xff]   ;;  %v798_v22 = vmul.f32 0.5, %v4225_v14 }
 0x263   : > { %v4229_v31 = vunpack.c.h.bf16 %v4269_v18 }
 0x264   : > { %2439 = vst [vmem:[#allocation3 + $0x178] sm:$0xff] %v2375_v26  ;;  %v1976_v29 = vpop.f32.mrb[96].mxu0 }
 0x265   : > { %v2265_v30 = vpop.f32.mrb[96].mxu1  ;;  %v1978_v33 = vpop.f32.mrb[97].mxu0 }
 0x266   : > { %v2266_v32 = vadd.f32 %v2265_v30, %v1976_v29  ;;  %v2267_v34 = vpop.f32.mrb[97].mxu1  ;;  %v1979_v36 = vpop.f32.mrb[98].mxu0  ;;  %v4228_v29 = vunpack.c.l.bf16 %v4269_v18 }
 0x267   : > { %v2268_v37 = vpop.f32.mrb[98].mxu1  ;;  %v1981_v40 = vpop.f32.mrb[99].mxu0 }
 0x268   : > { %v2376_v38 = vadd.f32 %v2266_v32, %v791_v28  ;;  %v2269_v39 = vadd.f32 %v2268_v37, %v1979_v36  ;;  %v2270_v41 = vpop.f32.mrb[99].mxu1  ;;  %v799_v32 = vmul.f32 0.5, %v4228_v29 }
 0x26a   : > { %2440 = vst [vmem:[#allocation3 + $0x180] sm:$0xff] %v2376_v38  ;;  %v2377_v43 = vadd.f32 %v2269_v39, %v792_v35  ;;  %v4270_v35 = vld [vmem:[#allocation4 + $0xe8] sm:$0xff]   ;;  %v800_v39 = vmul.f32 0.5, %v4229_v31 }
 0x26b   : > { %v4233_v48 = vunpack.c.h.bf16 %v4270_v35 }
 0x26c   : > { %2441 = vst [vmem:[#allocation3 + $0x188] sm:$0xff] %v2377_v43  ;;  %v1984_v46 = vpop.f32.mrb[100].mxu0 }
 0x26d   : > { %v2273_v47 = vpop.f32.mrb[100].mxu1  ;;  %v1986_v50 = vpop.f32.mrb[101].mxu0 }
 0x26e   : > { %v2274_v49 = vadd.f32 %v2273_v47, %v1984_v46  ;;  %v2275_v51 = vpop.f32.mrb[101].mxu1  ;;  %v1987_v53 = vpop.f32.mrb[102].mxu0  ;;  %v4232_v46 = vunpack.c.l.bf16 %v4270_v35  ;;  %v2465_v35 = vld [vmem:[#allocation3 + $0x10] sm:$0xff] (%p2456_p10) }
 0x26f   : > { %v2276_v54 = vpop.f32.mrb[102].mxu1  ;;  %v1989_v57 = vpop.f32.mrb[103].mxu0 }
 0x270   : > { %v2378_v55 = vadd.f32 %v2274_v49, %v793_v45  ;;  %v2277_v56 = vadd.f32 %v2276_v54, %v1987_v53  ;;  %v2278_v58 = vpop.f32.mrb[103].mxu1  ;;  %v801_v49 = vmul.f32 0.5, %v4232_v46  ;;  %v2472_v46 = vld [vmem:[#allocation3 + $0x48] sm:$0xff] (%p2456_p10) }
 0x272   : > { %2442 = vst [vmem:[#allocation3 + $0x190] sm:$0xff] %v2378_v55  ;;  %v2379_v60 = vadd.f32 %v2277_v56, %v794_v52  ;;  %v4271_v52 = vld [vmem:[#allocation4 + $0xf0] sm:$0xff]   ;;  %v802_v56 = vmul.f32 0.5, %v4233_v48  ;;  %v2474_v48 = vld [vmem:[#allocation3 + $0x58] sm:$0xff] (%p2456_p10) }
 0x273   : > { %v4237_v1 = vunpack.c.h.bf16 %v4271_v52 }
 0x274   : > { %2443 = vst [vmem:[#allocation3 + $0x198] sm:$0xff] %v2379_v60  ;;  %v1992_v63 = vpop.f32.mrb[104].mxu0 }
 0x275   : > { %v2281_v0 = vpop.f32.mrb[104].mxu1  ;;  %v1994_v3 = vpop.f32.mrb[105].mxu0 }
 0x276   : > { %v2282_v2 = vadd.f32 %v2281_v0, %v1992_v63  ;;  %v2283_v4 = vpop.f32.mrb[105].mxu1  ;;  %v1995_v6 = vpop.f32.mrb[106].mxu0  ;;  %v4236_v63 = vunpack.c.l.bf16 %v4271_v52  ;;  %v2476_v52 = vld [vmem:[#allocation3 + $0x68] sm:$0xff] (%p2456_p10) }
 0x277   : > { %v2284_v7 = vpop.f32.mrb[106].mxu1  ;;  %v1997_v10 = vpop.f32.mrb[107].mxu0 }
 0x278   : > { %v2380_v8 = vadd.f32 %v2282_v2, %v795_v62  ;;  %v2285_v9 = vadd.f32 %v2284_v7, %v1995_v6  ;;  %v2286_v11 = vpop.f32.mrb[107].mxu1  ;;  %v803_v2 = vmul.f32 0.5, %v4236_v63 }
 0x27a   : > { %2444 = vst [vmem:[#allocation3 + $0x1a0] sm:$0xff] %v2380_v8  ;;  %v2381_v13 = vadd.f32 %v2285_v9, %v796_v5  ;;  %v4272_v5 = vld [vmem:[#allocation4 + $0xf8] sm:$0xff]   ;;  %v804_v9 = vmul.f32 0.5, %v4237_v1  ;;  %v2485_v1 = vld [vmem:[#allocation3 + $0xb0] sm:$0xff] (%p2456_p10) }
 0x27b   : > { %v4241_v18 = vunpack.c.h.bf16 %v4272_v5 }
 0x27c   : > { %2445 = vst [vmem:[#allocation3 + $0x1a8] sm:$0xff] %v2381_v13  ;;  %v2000_v16 = vpop.f32.mrb[108].mxu0 }
 0x27d   : > { %v2289_v17 = vpop.f32.mrb[108].mxu1  ;;  %v2002_v20 = vpop.f32.mrb[109].mxu0 }
 0x27e   : > { %v2290_v19 = vadd.f32 %v2289_v17, %v2000_v16  ;;  %v2291_v21 = vpop.f32.mrb[109].mxu1  ;;  %v2003_v23 = vpop.f32.mrb[110].mxu0  ;;  %v4240_v16 = vunpack.c.l.bf16 %v4272_v5  ;;  %v2487_v5 = vld [vmem:[#allocation3 + $0xc0] sm:$0xff] (%p2456_p10) }
 0x27f   : > { %v2292_v24 = vpop.f32.mrb[110].mxu1  ;;  %v2005_v27 = vpop.f32.mrb[111].mxu0 }
 0x280   : > { %v2382_v25 = vadd.f32 %v2290_v19, %v797_v15  ;;  %v2293_v26 = vadd.f32 %v2292_v24, %v2003_v23  ;;  %v2294_v28 = vpop.f32.mrb[111].mxu1  ;;  %v805_v19 = vmul.f32 0.5, %v4240_v16  ;;  %v2495_v16 = vld [vmem:[#allocation3 + $0x100] sm:$0xff] (%p2456_p10) }
 0x282   : > { %2446 = vst [vmem:[#allocation3 + $0x1b0] sm:$0xff] %v2382_v25  ;;  %v2383_v30 = vadd.f32 %v2293_v26, %v798_v22  ;;  %v806_v25 = vmul.f32 0.5, %v4241_v18  ;;  %v2496_v18 = vld [vmem:[#allocation3 + $0x108] sm:$0xff] (%p2456_p10) }
 0x284   : > { %2447 = vst [vmem:[#allocation3 + $0x1b8] sm:$0xff] %v2383_v30  ;;  %v2008_v33 = vpop.f32.mrb[112].mxu0 }
 0x285   : > { %v2297_v34 = vpop.f32.mrb[112].mxu1  ;;  %v2010_v37 = vpop.f32.mrb[113].mxu0 }
 0x286   : > { %v2298_v36 = vadd.f32 %v2297_v34, %v2008_v33  ;;  %v2299_v38 = vpop.f32.mrb[113].mxu1  ;;  %v2011_v40 = vpop.f32.mrb[114].mxu0  ;;  %v2463_v33 = vld [vmem:[#allocation3] sm:$0xff] (%p2456_p10)  ;;  %v2464_v34 = vld [vmem:[#allocation3 + $0x8] sm:$0xff] (%p2456_p10)  ;;  %v2466_v37 = vld [vmem:[#allocation3 + $0x18] sm:$0xff] (%p2456_p10) }
 0x287   : > { %v2300_v41 = vpop.f32.mrb[114].mxu1  ;;  %v2013_v44 = vpop.f32.mrb[115].mxu0  ;;  %v2467_v38 = vld [vmem:[#allocation3 + $0x20] sm:$0xff] (%p2456_p10) }
 0x288   : > { %v2384_v42 = vadd.f32 %v2298_v36, %v799_v32  ;;  %v2301_v43 = vadd.f32 %v2300_v41, %v2011_v40  ;;  %v2302_v45 = vpop.f32.mrb[115].mxu1  ;;  %v2527_v36 = vpack.c.bf16 (%p2456_p10), %v2464_v34, %v2463_v33  ;;  %v2528_v40 = vpack.c.bf16 (%p2456_p10), %v2466_v37, %v2465_v35  ;;  %v2471_v44 = vld [vmem:[#allocation3 + $0x40] sm:$0xff] (%p2456_p10)  ;;  %v2506_v33 = vld [vmem:[#allocation3 + $0x158] sm:$0xff] (%p2456_p10)  ;;  %v2509_v37 = vld [vmem:[#allocation3 + $0x170] sm:$0xff] (%p2456_p10) }
 0x289   : > { %v2507_v34 = vld [vmem:[#allocation3 + $0x160] sm:$0xff] (%p2456_p10) }
 0x28a   : > { %2448 = vst [vmem:[#allocation3 + $0x1c0] sm:$0xff] %v2384_v42  ;;  %v2385_v47 = vadd.f32 %v2301_v43, %v800_v39  ;;  %v2468_v39 = vld [vmem:[#allocation3 + $0x28] sm:$0xff] (%p2456_p10)  ;;  %v2469_v42 = vld [vmem:[#allocation3 + $0x30] sm:$0xff] (%p2456_p10)  ;;  %v2470_v43 = vld [vmem:[#allocation3 + $0x38] sm:$0xff] (%p2456_p10) }
 0x28b   : > { %v2529_v41 = vpack.c.bf16 (%p2456_p10), %v2468_v39, %v2467_v38  ;;  %v2530_v45 = vpack.c.bf16 (%p2456_p10), %v2470_v43, %v2469_v42  ;;  %2563 = vst [vmem:[%s5353_s10] sm:$0xff] (%p2456_p10), %v2527_v36  ;;  %2564 = vst [vmem:[%s5353_s10 + $0x8] sm:$0xff] (%p2456_p10), %v2528_v40  ;;  %v2508_v36 = vld [vmem:[#allocation3 + $0x168] sm:$0xff] (%p2456_p10)  ;;  %v2510_v38 = vld [vmem:[#allocation3 + $0x178] sm:$0xff] (%p2456_p10) }
 0x28c   : > { %2449 = vst [vmem:[#allocation3 + $0x1c8] sm:$0xff] %v2385_v47  ;;  %v2016_v50 = vpop.f32.mrb[116].mxu0  ;;  %v2473_v47 = vld [vmem:[#allocation3 + $0x50] sm:$0xff] (%p2456_p10)  ;;  %v2549_v39 = vpack.c.bf16 (%p2456_p10), %v2508_v36, %v2507_v34  ;;  %v2550_v40 = vpack.c.bf16 (%p2456_p10), %v2510_v38, %v2509_v37  ;;  %v2512_v42 = vld [vmem:[#allocation3 + $0x188] sm:$0xff] (%p2456_p10) }
 0x28d   : > { %v2305_v51 = vpop.f32.mrb[116].mxu1  ;;  %v2018_v54 = vpop.f32.mrb[117].mxu0  ;;  %2565 = vst [vmem:[%s5353_s10 + $0x10] sm:$0xff] (%p2456_p10), %v2529_v41  ;;  %2566 = vst [vmem:[%s5353_s10 + $0x18] sm:$0xff] (%p2456_p10), %v2530_v45  ;;  %v2511_v41 = vld [vmem:[#allocation3 + $0x180] sm:$0xff] (%p2456_p10)  ;;  %v2513_v43 = vld [vmem:[#allocation3 + $0x190] sm:$0xff] (%p2456_p10) }
 0x28e   : > { %v2306_v53 = vadd.f32 %v2305_v51, %v2016_v50  ;;  %v2307_v55 = vpop.f32.mrb[117].mxu1  ;;  %v2019_v57 = vpop.f32.mrb[118].mxu0  ;;  %v2532_v50 = vpack.c.bf16 (%p2456_p10), %v2474_v48, %v2473_v47  ;;  %v2475_v51 = vld [vmem:[#allocation3 + $0x60] sm:$0xff] (%p2456_p10)  ;;  %v2514_v45 = vld [vmem:[#allocation3 + $0x198] sm:$0xff] (%p2456_p10)  ;;  %v2516_v47 = vld [vmem:[#allocation3 + $0x1a8] sm:$0xff] (%p2456_p10)  ;;  %2585 = vst [vmem:[%s5353_s10 + $0xb0] sm:$0xff] (%p2456_p10), %v2549_v39 }
 0x28f   : > { %v2308_v58 = vpop.f32.mrb[118].mxu1  ;;  %v2021_v61 = vpop.f32.mrb[119].mxu0  ;;  %v2533_v54 = vpack.c.bf16 (%p2456_p10), %v2476_v52, %v2475_v51  ;;  %v2478_v55 = vld [vmem:[#allocation3 + $0x78] sm:$0xff] (%p2456_p10)  ;;  %2586 = vst [vmem:[%s5353_s10 + $0xb8] sm:$0xff] (%p2456_p10), %v2550_v40  ;;  %v2552_v48 = vpack.c.bf16 (%p2456_p10), %v2514_v45, %v2513_v43 }
 0x290   : > { %v2386_v59 = vadd.f32 %v2306_v53, %v801_v49  ;;  %v2309_v60 = vadd.f32 %v2308_v58, %v2019_v57  ;;  %v2310_v62 = vpop.f32.mrb[119].mxu1  ;;  %v2531_v49 = vpack.c.bf16 (%p2456_p10), %v2472_v46, %v2471_v44  ;;  %v2477_v53 = vld [vmem:[#allocation3 + $0x70] sm:$0xff] (%p2456_p10)  ;;  %v2480_v57 = vld [vmem:[#allocation3 + $0x88] sm:$0xff] (%p2456_p10)  ;;  %2568 = vst [vmem:[%s5353_s10 + $0x28] sm:$0xff] (%p2456_p10), %v2532_v50  ;;  %v2482_v61 = vld [vmem:[#allocation3 + $0x98] sm:$0xff] (%p2456_p10)  ;;  %v2551_v44 = vpack.c.bf16 (%p2456_p10), %v2512_v42, %v2511_v41 }
 0x291   : > { %v2534_v58 = vpack.c.bf16 (%p2456_p10), %v2478_v55, %v2477_v53  ;;  %v2483_v62 = vld [vmem:[#allocation3 + $0xa0] sm:$0xff] (%p2456_p10)  ;;  %2569 = vst [vmem:[%s5353_s10 + $0x30] sm:$0xff] (%p2456_p10), %v2533_v54  ;;  %v2517_v50 = vld [vmem:[#allocation3 + $0x1b0] sm:$0xff] (%p2456_p10)  ;;  %v2518_v51 = vld [vmem:[#allocation3 + $0x1b8] sm:$0xff] (%p2456_p10) }
 0x292   : > { %2450 = vst [vmem:[#allocation3 + $0x1d0] sm:$0xff] %v2386_v59  ;;  %v2387_v0 = vadd.f32 %v2309_v60, %v802_v56  ;;  %v2479_v56 = vld [vmem:[#allocation3 + $0x80] sm:$0xff] (%p2456_p10)  ;;  %2567 = vst [vmem:[%s5353_s10 + $0x20] sm:$0xff] (%p2456_p10), %v2531_v49  ;;  %v2481_v60 = vld [vmem:[#allocation3 + $0x90] sm:$0xff] (%p2456_p10)  ;;  %v2554_v53 = vpack.c.bf16 (%p2456_p10), %v2518_v51, %v2517_v50 }
 0x293   : > { %v2535_v59 = vpack.c.bf16 (%p2456_p10), %v2480_v57, %v2479_v56  ;;  %v2536_v63 = vpack.c.bf16 (%p2456_p10), %v2482_v61, %v2481_v60  ;;  %2570 = vst [vmem:[%s5353_s10 + $0x38] sm:$0xff] (%p2456_p10), %v2534_v58  ;;  %v2515_v46 = vld [vmem:[#allocation3 + $0x1a0] sm:$0xff] (%p2456_p10)  ;;  %2587 = vst [vmem:[%s5353_s10 + $0xc0] sm:$0xff] (%p2456_p10), %v2551_v44  ;;  %v2520_v54 = vld [vmem:[#allocation3 + $0x1c8] sm:$0xff] (%p2456_p10) }
 0x294   : > { %2451 = vst [vmem:[#allocation3 + $0x1d8] sm:$0xff] %v2387_v0  ;;  %v2024_v3 = vpop.f32.mrb[120].mxu0  ;;  %v2484_v0 = vld [vmem:[#allocation3 + $0xa8] sm:$0xff] (%p2456_p10)  ;;  %v2553_v49 = vpack.c.bf16 (%p2456_p10), %v2516_v47, %v2515_v46  ;;  %v2519_v52 = vld [vmem:[#allocation3 + $0x1c0] sm:$0xff] (%p2456_p10)  ;;  %2588 = vst [vmem:[%s5353_s10 + $0xc8] sm:$0xff] (%p2456_p10), %v2552_v48 }
 0x295   : > { %v2313_v4 = vpop.f32.mrb[120].mxu1  ;;  %v2026_v7 = vpop.f32.mrb[121].mxu0  ;;  %2571 = vst [vmem:[%s5353_s10 + $0x40] sm:$0xff] (%p2456_p10), %v2535_v59  ;;  %2572 = vst [vmem:[%s5353_s10 + $0x48] sm:$0xff] (%p2456_p10), %v2536_v63  ;;  %v2555_v57 = vpack.c.bf16 (%p2456_p10), %v2520_v54, %v2519_v52 }
 0x296   : > { %v2314_v6 = vadd.f32 %v2313_v4, %v2024_v3  ;;  %v2315_v8 = vpop.f32.mrb[121].mxu1  ;;  %v2027_v10 = vpop.f32.mrb[122].mxu0  ;;  %v2537_v3 = vpack.c.bf16 (%p2456_p10), %v2484_v0, %v2483_v62  ;;  %v2489_v7 = vld [vmem:[#allocation3 + $0xd0] sm:$0xff] (%p2456_p10)  ;;  %2589 = vst [vmem:[%s5353_s10 + $0xd0] sm:$0xff] (%p2456_p10), %v2553_v49  ;;  %2590 = vst [vmem:[%s5353_s10 + $0xd8] sm:$0xff] (%p2456_p10), %v2554_v53 }
 0x297   : > { %v2316_v11 = vpop.f32.mrb[122].mxu1  ;;  %v2029_v14 = vpop.f32.mrb[123].mxu0  ;;  %2591 = vst [vmem:[%s5353_s10 + $0xe0] sm:$0xff] (%p2456_p10), %v2555_v57 }
 0x298   : > { %v2388_v12 = vadd.f32 %v2314_v6, %v803_v2  ;;  %v2317_v13 = vadd.f32 %v2316_v11, %v2027_v10  ;;  %v2318_v15 = vpop.f32.mrb[123].mxu1  ;;  %v2486_v2 = vld [vmem:[#allocation3 + $0xb8] sm:$0xff] (%p2456_p10)  ;;  %v2488_v6 = vld [vmem:[#allocation3 + $0xc8] sm:$0xff] (%p2456_p10)  ;;  %v2491_v10 = vld [vmem:[#allocation3 + $0xe0] sm:$0xff] (%p2456_p10)  ;;  %2573 = vst [vmem:[%s5353_s10 + $0x50] sm:$0xff] (%p2456_p10), %v2537_v3 }
 0x299   : > { %v2538_v4 = vpack.c.bf16 (%p2456_p10), %v2486_v2, %v2485_v1  ;;  %v2539_v8 = vpack.c.bf16 (%p2456_p10), %v2488_v6, %v2487_v5  ;;  %v2492_v11 = vld [vmem:[#allocation3 + $0xe8] sm:$0xff] (%p2456_p10)  ;;  %v2493_v14 = vld [vmem:[#allocation3 + $0xf0] sm:$0xff] (%p2456_p10)  ;;  %v2494_v15 = vld [vmem:[#allocation3 + $0xf8] sm:$0xff] (%p2456_p10) }
 0x29a   : > { %2452 = vst [vmem:[#allocation3 + $0x1e0] sm:$0xff] %v2388_v12  ;;  %v2389_v17 = vadd.f32 %v2317_v13, %v804_v9  ;;  %v2490_v9 = vld [vmem:[#allocation3 + $0xd8] sm:$0xff] (%p2456_p10)  ;;  %v2541_v13 = vpack.c.bf16 (%p2456_p10), %v2492_v11, %v2491_v10  ;;  %v2521_v55 = vld [vmem:[#allocation3 + $0x1d0] sm:$0xff] (%p2456_p10) }
 0x29b   : > { %2574 = vst [vmem:[%s5353_s10 + $0x58] sm:$0xff] (%p2456_p10), %v2538_v4  ;;  %v2540_v12 = vpack.c.bf16 (%p2456_p10), %v2490_v9, %v2489_v7  ;;  %2575 = vst [vmem:[%s5353_s10 + $0x60] sm:$0xff] (%p2456_p10), %v2539_v8  ;;  %v2522_v56 = vld [vmem:[#allocation3 + $0x1d8] sm:$0xff] (%p2456_p10) }
 0x29c   : > { %2453 = vst [vmem:[#allocation3 + $0x1e8] sm:$0xff] %v2389_v17  ;;  %v2032_v20 = vpop.f32.mrb[124].mxu0  ;;  %v2542_v17 = vpack.c.bf16 (%p2456_p10), %v2494_v15, %v2493_v14  ;;  %2577 = vst [vmem:[%s5353_s10 + $0x70] sm:$0xff] (%p2456_p10), %v2541_v13  ;;  %v2556_v58 = vpack.c.bf16 (%p2456_p10), %v2522_v56, %v2521_v55 }
 0x29d   : > { %v2321_v21 = vpop.f32.mrb[124].mxu1  ;;  %v2034_v23 = vpop.f32.mrb[125].mxu0  ;;  %2576 = vst [vmem:[%s5353_s10 + $0x68] sm:$0xff] (%p2456_p10), %v2540_v12 }
 0x29e   : > { %v2322_v22 = vadd.f32 %v2321_v21, %v2032_v20  ;;  %v2323_v24 = vpop.f32.mrb[125].mxu1  ;;  %v2035_v26 = vpop.f32.mrb[126].mxu0  ;;  %2460 = sbr.rel (!%p2456_p10) target bundleno = 687 (0x2af), region = 72  ;;  %v2498_v20 = vld [vmem:[#allocation3 + $0x118] sm:$0xff] (%p2456_p10)  ;;  %v2543_v21 = vpack.c.bf16 (%p2456_p10), %v2496_v18, %v2495_v16  ;;  %v2499_v23 = vld [vmem:[#allocation3 + $0x120] sm:$0xff] (%p2456_p10)  ;;  %2578 = vst [vmem:[%s5353_s10 + $0x78] sm:$0xff] (%p2456_p10), %v2542_v17 }
 0x29f   : > { %v2324_v27 = vpop.f32.mrb[126].mxu1  ;;  %v2037_v30 = vpop.f32.mrb[127].mxu0  ;;  %v2500_v24 = vld [vmem:[#allocation3 + $0x128] sm:$0xff] (%p2456_p10)  ;;  %2592 = vst [vmem:[%s5353_s10 + $0xe8] sm:$0xff] (%p2456_p10), %v2556_v58 }
 0x2a0   : > { %v2390_v28 = vadd.f32 %v2322_v22, %v805_v19  ;;  %v2325_v29 = vadd.f32 %v2324_v27, %v2035_v26  ;;  %v2326_v31 = vpop.f32.mrb[127].mxu1  ;;  %v2497_v19 = vld [vmem:[#allocation3 + $0x110] sm:$0xff] (%p2456_p10)  ;;  %v2545_v26 = vpack.c.bf16 (%p2456_p10), %v2500_v24, %v2499_v23  ;;  %v2502_v27 = vld [vmem:[#allocation3 + $0x138] sm:$0xff] (%p2456_p10)  ;;  %2579 = vst [vmem:[%s5353_s10 + $0x80] sm:$0xff] (%p2456_p10), %v2543_v21 }
 0x2a1   : > { %v2544_v22 = vpack.c.bf16 (%p2456_p10), %v2498_v20, %v2497_v19  ;;  %v2523_v59 = vld [vmem:[#allocation3 + $0x1e0] sm:$0xff] (%p2456_p10) }
 0x2a2   : > { %2454 = vst [vmem:[#allocation3 + $0x1f0] sm:$0xff] %v2390_v28  ;;  %v2391_v32 = vadd.f32 %v2325_v29, %v806_v25  ;;  %v2501_v25 = vld [vmem:[#allocation3 + $0x130] sm:$0xff] (%p2456_p10)  ;;  %v2503_v28 = vld [vmem:[#allocation3 + $0x140] sm:$0xff] (%p2456_p10)  ;;  %v2504_v29 = vld [vmem:[#allocation3 + $0x148] sm:$0xff] (%p2456_p10) }
 0x2a3   : > { %2580 = vst [vmem:[%s5353_s10 + $0x88] sm:$0xff] (%p2456_p10), %v2544_v22  ;;  %v2546_v30 = vpack.c.bf16 (%p2456_p10), %v2502_v27, %v2501_v25  ;;  %v2547_v31 = vpack.c.bf16 (%p2456_p10), %v2504_v29, %v2503_v28  ;;  %2581 = vst [vmem:[%s5353_s10 + $0x90] sm:$0xff] (%p2456_p10), %v2545_v26  ;;  %v2524_v60 = vld [vmem:[#allocation3 + $0x1e8] sm:$0xff] (%p2456_p10) }
 0x2a4   : > { %2455 = vst [vmem:[#allocation3 + $0x1f8] sm:$0xff] %v2391_v32  ;;  %v2505_v32 = vld [vmem:[#allocation3 + $0x150] sm:$0xff] (%p2456_p10)  ;;  %v2557_v62 = vpack.c.bf16 (%p2456_p10), %v2524_v60, %v2523_v59 }
 0x2a5   : > { %v2548_v35 = vpack.c.bf16 %v2506_v33, %v2505_v32  ;;  %2582 = vst [vmem:[%s5353_s10 + $0x98] sm:$0xff] %v2546_v30  ;;  %2583 = vst [vmem:[%s5353_s10 + $0xa0] sm:$0xff] %v2547_v31 }
 0x2a6   : > { %2593 = vst [vmem:[%s5353_s10 + $0xf0] sm:$0xff] %v2557_v62 }
 0x2a7   : > { %2584 = vst [vmem:[%s5353_s10 + $0xa8] sm:$0xff] %v2548_v35 }
 0x2a9   : > { %v2525_v61 = vld [vmem:[#allocation3 + $0x1f0] sm:$0xff] }
 0x2ab   : > { %v2526_v63 = vld [vmem:[#allocation3 + $0x1f8] sm:$0xff] }
 0x2ac   : > { %v2558_v0 = vpack.c.bf16 %v2526_v63, %v2525_v61 }
 0x2ae   : > { %2594 = vst [vmem:[%s5353_s10 + $0xf8] sm:$0xff] %v2558_v0 }
 0x2af PF: > { %p2595_p11 = scmp.eq.s32.totalorder %s5064_s21, 1 }
 0x2b0   : > { %v4864_v1 = vld [vmem:[#allocation9] sm:$0xff] (%p2595_p11)   ;;  %v4865_v2 = vld [vmem:[#allocation9 + $0x8] sm:$0xff] (%p2595_p11)   ;;  %v4866_v3 = vld [vmem:[#allocation9 + $0x10] sm:$0xff] (%p2595_p11)  }
 0x2b1   : > { %2599 = sbr.rel (!%p2595_p11) target bundleno = 1279 (0x4ff), region = 76  ;;  %4369 = vmatprep.subr.bf16.mxu0 (%p2595_p11), %v4864_v1  ;;  %v4867_v4 = vld [vmem:[#allocation9 + $0x18] sm:$0xff] (%p2595_p11)   ;;  %v2600_v5 = vld [vmem:[#allocation3] sm:$0xff] (%p2595_p11)  ;;  %v2601_v6 = vld [vmem:[#allocation3 + $0x8] sm:$0xff] (%p2595_p11) }
 0x2b2   : > { %4370 = vmatpush3.bf16.msra.mxu0 (%p2595_p11), %v4864_v1  ;;  %v2632_v7 = vmax.f32 (%p2595_p11), %v2600_v5, 0.0  ;;  %v2633_v8 = vmax.f32 (%p2595_p11), %v2601_v6, 0.0  ;;  %v4868_v10 = vld [vmem:[#allocation9 + $0x20] sm:$0xff] (%p2595_p11)   ;;  %v4869_v11 = vld [vmem:[#allocation9 + $0x28] sm:$0xff] (%p2595_p11)   ;;  %v4870_v12 = vld [vmem:[#allocation9 + $0x30] sm:$0xff] (%p2595_p11)  }
 0x2b3   : > { %4371 = vmatprep.subr.bf16.mxu0 (%p2595_p11), %v4865_v2  ;;  %v4871_v13 = vld [vmem:[#allocation9 + $0x38] sm:$0xff] (%p2595_p11)   ;;  %v2602_v14 = vld [vmem:[#allocation3 + $0x10] sm:$0xff] (%p2595_p11)  ;;  %v2604_v16 = vld [vmem:[#allocation3 + $0x20] sm:$0xff] (%p2595_p11) }
 0x2b4   : > { %v2664_v9 = vpack.c.bf16 (%p2595_p11), %v2633_v8, %v2632_v7  ;;  %v2603_v15 = vld [vmem:[#allocation3 + $0x18] sm:$0xff] (%p2595_p11)  ;;  %v2605_v17 = vld [vmem:[#allocation3 + $0x28] sm:$0xff] (%p2595_p11)  ;;  %v2634_v18 = vmax.f32 (%p2595_p11), %v2602_v14, 0.0  ;;  %v2636_v20 = vmax.f32 (%p2595_p11), %v2604_v16, 0.0  ;;  %v4872_v22 = vld [vmem:[#allocation9] sm:$0xff] (%p2595_p11)  }
 0x2b5   : > { %v2635_v19 = vmax.f32 (%p2595_p11), %v2603_v15, 0.0  ;;  %v2637_v21 = vmax.f32 (%p2595_p11), %v2605_v17, 0.0  ;;  %v2606_v25 = vld [vmem:[#allocation3 + $0x30] sm:$0xff] (%p2595_p11)  ;;  %v2607_v26 = vld [vmem:[#allocation3 + $0x38] sm:$0xff] (%p2595_p11)  ;;  %v4873_v27 = vld [vmem:[#allocation9 + $0x8] sm:$0xff] (%p2595_p11)  }
 0x2b6   : > { %4372 = vmatpush3.bf16.msra.mxu0 (%p2595_p11), %v4865_v2  ;;  %4385 = vmatprep.mubr.bf16.mxu0 (%p2595_p11), %v2664_v9  ;;  %v2608_v28 = vld [vmem:[#allocation3 + $0x40] sm:$0xff] (%p2595_p11)  ;;  %v2609_v29 = vld [vmem:[#allocation3 + $0x48] sm:$0xff] (%p2595_p11)  ;;  %v2638_v30 = vmax.f32 (%p2595_p11), %v2606_v25, 0.0  ;;  %v2639_v31 = vmax.f32 (%p2595_p11), %v2607_v26, 0.0  ;;  %v4874_v34 = vld [vmem:[#allocation9 + $0x10] sm:$0xff] (%p2595_p11)  }
 0x2b7   : > { %4373 = vmatprep.subr.bf16.mxu0 (%p2595_p11), %v4866_v3  ;;  %v2665_v23 = vpack.c.bf16 (%p2595_p11), %v2635_v19, %v2634_v18  ;;  %v2666_v24 = vpack.c.bf16 (%p2595_p11), %v2637_v21, %v2636_v20  ;;  %v2640_v32 = vmax.f32 (%p2595_p11), %v2608_v28, 0.0  ;;  %v2641_v33 = vmax.f32 (%p2595_p11), %v2609_v29, 0.0  ;;  %v2610_v35 = vld [vmem:[#allocation3 + $0x50] sm:$0xff] (%p2595_p11)  ;;  %v2611_v36 = vld [vmem:[#allocation3 + $0x58] sm:$0xff] (%p2595_p11)  ;;  %v2612_v37 = vld [vmem:[#allocation3 + $0x60] sm:$0xff] (%p2595_p11) }
 0x2b8   : > { %v2667_v38 = vpack.c.bf16 %v2639_v31, %v2638_v30  ;;  %v2613_v39 = vld [vmem:[#allocation3 + $0x68] sm:$0xff]  ;;  %v2614_v40 = vld [vmem:[#allocation3 + $0x70] sm:$0xff]  ;;  %v2615_v41 = vld [vmem:[#allocation3 + $0x78] sm:$0xff]  ;;  %v2642_v44 = vmax.f32 %v2610_v35, 0.0  ;;  %v2643_v45 = vmax.f32 %v2611_v36, 0.0  ;;  %v2644_v48 = vmax.f32 %v2612_v37, 0.0 }
 0x2b9   : > { %v2668_v42 = vpack.c.bf16 %v2641_v33, %v2640_v32  ;;  %v4875_v43 = vld [vmem:[#allocation9 + $0x18] sm:$0xff]   ;;  %v2616_v46 = vld [vmem:[#allocation3 + $0x80] sm:$0xff]  ;;  %v4881_v49 = vld [vmem:[#allocation10 + $0x8] sm:$0xff]   ;;  %v2645_v50 = vmax.f32 %v2613_v39, 0.0  ;;  %v2646_v52 = vmax.f32 %v2614_v40, 0.0  ;;  %v2647_v53 = vmax.f32 %v2615_v41, 0.0 }
 0x2ba   : > { %4374 = vmatpush3.bf16.msra.mxu0 %v4866_v3  ;;  %v4880_v47 = vld [vmem:[#allocation10] sm:$0xff]   ;;  %v2617_v51 = vld [vmem:[#allocation3 + $0x88] sm:$0xff]  ;;  %v2648_v54 = vmax.f32 %v2616_v46, 0.0  ;;  %v4882_v57 = vld [vmem:[#allocation10 + $0x10] sm:$0xff]   ;;  %v2669_v58 = vpack.c.bf16 %v2643_v45, %v2642_v44 }
 0x2bb   : > { %4375 = vmatprep.subr.bf16.mxu0 %v4867_v4  ;;  %4417 = vmatprep.subr.bf16.mxu1 %v4880_v47  ;;  %v4876_v55 = vld [vmem:[#allocation9 + $0x20] sm:$0xff]   ;;  %v2649_v56 = vmax.f32 %v2617_v51, 0.0  ;;  %v4877_v59 = vld [vmem:[#allocation9 + $0x28] sm:$0xff]   ;;  %v2670_v60 = vpack.c.bf16 %v2645_v50, %v2644_v48  ;;  %v4883_v61 = vld [vmem:[#allocation10 + $0x18] sm:$0xff]   ;;  %v2671_v0 = vpack.c.bf16 %v2647_v53, %v2646_v52 }
 0x2bc   : > { %4418 = vmatpush3.bf16.msra.mxu1 %v4880_v47  ;;  %v4878_v62 = vld [vmem:[#allocation9 + $0x30] sm:$0xff]   ;;  %v4884_v63 = vld [vmem:[#allocation10 + $0x20] sm:$0xff]   ;;  %v2619_v3 = vld [vmem:[#allocation3 + $0x98] sm:$0xff] }
 0x2bd   : > { %4419 = vmatprep.subr.bf16.mxu1 %v4881_v49  ;;  %v2672_v1 = vpack.c.bf16 %v2649_v56, %v2648_v54  ;;  %v2618_v2 = vld [vmem:[#allocation3 + $0x90] sm:$0xff]  ;;  %v2621_v5 = vld [vmem:[#allocation3 + $0xa8] sm:$0xff]  ;;  %v4879_v6 = vld [vmem:[#allocation9 + $0x38] sm:$0xff]   ;;  %v2651_v9 = vmax.f32 %v2619_v3, 0.0 }
 0x2be   : > { %4376 = vmatpush3.bf16.msra.mxu0 %v4867_v4  ;;  %v2620_v4 = vld [vmem:[#allocation3 + $0xa0] sm:$0xff]  ;;  %v4885_v7 = vld [vmem:[#allocation10 + $0x28] sm:$0xff]   ;;  %v2650_v8 = vmax.f32 %v2618_v2, 0.0  ;;  %v2622_v14 = vld [vmem:[#allocation3 + $0xb0] sm:$0xff] }
 0x2bf   : > { %4377 = vmatprep.subr.bf16.mxu0 %v4868_v10  ;;  %v2623_v15 = vld [vmem:[#allocation3 + $0xb8] sm:$0xff]  ;;  %v2624_v16 = vld [vmem:[#allocation3 + $0xc0] sm:$0xff]  ;;  %v2625_v17 = vld [vmem:[#allocation3 + $0xc8] sm:$0xff]  ;;  %v2654_v18 = vmax.f32 %v2622_v14, 0.0 }
 0x2c0   : > { %4420 = vmatpush3.bf16.msra.mxu1 %v4881_v49  ;;  %v2655_v19 = vmax.f32 %v2623_v15, 0.0  ;;  %v2656_v20 = vmax.f32 %v2624_v16, 0.0  ;;  %v2657_v21 = vmax.f32 %v2625_v17, 0.0  ;;  %v2627_v25 = vld [vmem:[#allocation3 + $0xd8] sm:$0xff]  ;;  %v2628_v26 = vld [vmem:[#allocation3 + $0xe0] sm:$0xff]  ;;  %v3194_v37 = vld [vmem:[#allocation3 + $0x108] sm:$0xff] }
 0x2c1   : > { %4421 = vmatprep.subr.bf16.mxu1 %v4882_v57  ;;  %v2659_v29 = vmax.f32 %v2627_v25, 0.0  ;;  %v2660_v30 = vmax.f32 %v2628_v26, 0.0  ;;  %v2631_v35 = vld [vmem:[#allocation3 + $0xf8] sm:$0xff]  ;;  %v3193_v36 = vld [vmem:[#allocation3 + $0x100] sm:$0xff]  ;;  %v3226_v41 = vmax.f32 %v3194_v37, 0.0  ;;  %v3195_v44 = vld [vmem:[#allocation3 + $0x110] sm:$0xff] }
 0x2c2   : > { %4378 = vmatpush3.bf16.msra.mxu0 %v4868_v10  ;;  %v2652_v10 = vmax.f32 %v2620_v4, 0.0  ;;  %v2663_v39 = vmax.f32 %v2631_v35, 0.0  ;;  %v3225_v40 = vmax.f32 %v3193_v36, 0.0  ;;  %v3196_v45 = vld [vmem:[#allocation3 + $0x118] sm:$0xff]  ;;  %v3197_v46 = vld [vmem:[#allocation3 + $0x120] sm:$0xff]  ;;  %v3198_v47 = vld [vmem:[#allocation3 + $0x128] sm:$0xff] }
 0x2c3   : > { %4379 = vmatprep.subr.bf16.mxu0 %v4869_v11  ;;  %v3227_v48 = vmax.f32 %v3195_v44, 0.0  ;;  %v3228_v49 = vmax.f32 %v3196_v45, 0.0  ;;  %v3229_v50 = vmax.f32 %v3197_v46, 0.0  ;;  %v3230_v51 = vmax.f32 %v3198_v47, 0.0  ;;  %v3199_v54 = vld [vmem:[#allocation3 + $0x130] sm:$0xff]  ;;  %v3201_v56 = vld [vmem:[#allocation3 + $0x140] sm:$0xff] }
 0x2c4   : > { %4422 = vmatpush3.bf16.msra.mxu1 %v4882_v57  ;;  %v3202_v57 = vld [vmem:[#allocation3 + $0x148] sm:$0xff]  ;;  %v3205_v2 = vld [vmem:[#allocation3 + $0x160] sm:$0xff]  ;;  %v4887_v25 = vld [vmem:[#allocation10 + $0x38] sm:$0xff]  }
 0x2c5   : > { %4423 = vmatprep.subr.bf16.mxu1 %v4883_v61  ;;  %v3258_v52 = vpack.c.bf16 %v3228_v49, %v3227_v48  ;;  %v3259_v53 = vpack.c.bf16 %v3230_v51, %v3229_v50  ;;  %v3206_v3 = vld [vmem:[#allocation3 + $0x168] sm:$0xff]  ;;  %v3217_v35 = vld [vmem:[#allocation3 + $0x1c0] sm:$0xff]  ;;  %v3220_v44 = vld [vmem:[#allocation3 + $0x1d8] sm:$0xff] }
 0x2c6   : > { %4380 = vmatpush3.bf16.msra.mxu0 %v4869_v11  ;;  %v2653_v11 = vmax.f32 %v2621_v5, 0.0  ;;  %v3218_v36 = vld [vmem:[#allocation3 + $0x1c8] sm:$0xff]  ;;  %v3221_v45 = vld [vmem:[#allocation3 + $0x1e0] sm:$0xff]  ;;  %v3252_v48 = vmax.f32 %v3220_v44, 0.0 }
 0x2c7   : > { %4381 = vmatprep.subr.bf16.mxu0 %v4870_v12  ;;  %v3222_v46 = vld [vmem:[#allocation3 + $0x1e8] sm:$0xff]  ;;  %v3253_v49 = vmax.f32 %v3221_v45, 0.0 }
 0x2c8   : > { %4424 = vmatpush3.bf16.msra.mxu1 %v4883_v61  ;;  %v3234_v61 = vmax.f32 %v3202_v57, 0.0  ;;  %v3254_v50 = vmax.f32 %v3222_v46, 0.0 }
 0x2c9   : > { %4425 = vmatprep.subr.bf16.mxu1 %v4884_v63 }
 0x2ca   : > { %4382 = vmatpush3.bf16.msra.mxu0 %v4870_v12  ;;  %v2673_v12 = vpack.c.bf16 %v2651_v9, %v2650_v8 }
 0x2cb   : > { %4383 = vmatprep.subr.bf16.mxu0 %v4871_v13 }
 0x2cc   : > { %4426 = vmatpush3.bf16.msra.mxu1 %v4884_v63 }
 0x2cd   : > { %4427 = vmatprep.subr.bf16.mxu1 %v4885_v7 }
 0x2ce   : > { %4384 = vmatpush3.bf16.msra.mxu0 %v4871_v13  ;;  %v2674_v13 = vpack.c.bf16 %v2653_v11, %v2652_v10  ;;  %v3207_v10 = vld [vmem:[#allocation3 + $0x170] sm:$0xff]  ;;  %v3208_v11 = vld [vmem:[#allocation3 + $0x178] sm:$0xff] }
 0x2cf   : > { %4465 = vmatprep.subr.bf16.mxu0 %v4872_v22  ;;  %v3239_v14 = vmax.f32 %v3207_v10, 0.0  ;;  %v3240_v15 = vmax.f32 %v3208_v11, 0.0 }
 0x2d0   : > { %4428 = vmatpush3.bf16.msra.mxu1 %v4885_v7  ;;  %v3238_v7 = vmax.f32 %v3206_v3, 0.0 }
 0x2d1   : > { %4386 = vmatmul.mubr.bf16.vlgmr.msra.gmra.mrb[0].mxu0 %v2665_v23  ;;  %v2676_v23 = vpack.c.bf16 %v2657_v21, %v2656_v20  ;;  %v3211_v21 = vld [vmem:[#allocation3 + $0x190] sm:$0xff] }
 0x2d2   : > { %4466 = vmatpush3.bf16.msra.mxu0 %v4872_v22  ;;  %4389 = vmatprep.mubr.bf16.mxu0 %v2666_v24  ;;  %v2675_v22 = vpack.c.bf16 %v2655_v19, %v2654_v18  ;;  %v2626_v24 = vld [vmem:[#allocation3 + $0xd0] sm:$0xff]  ;;  %v3264_v19 = vpack.c.bf16 %v3240_v15, %v3239_v14  ;;  %v3243_v26 = vmax.f32 %v3211_v21, 0.0 }
 0x2d3   : > { %4467 = vmatprep.subr.bf16.mxu0 %v4873_v27  ;;  %v2658_v28 = vmax.f32 %v2626_v24, 0.0  ;;  %v4886_v18 = vld [vmem:[#allocation10 + $0x30] sm:$0xff]   ;;  %v3214_v24 = vld [vmem:[#allocation3 + $0x1a8] sm:$0xff] }
 0x2d4   : > { %4429 = vmatprep.subr.bf16.mxu1 %v4886_v18 }
 0x2d5   : > { %v2677_v32 = vpack.c.bf16 %v2659_v29, %v2658_v28  ;;  %4430 = vmatpush3.bf16.msra.mxu1 %v4886_v18  ;;  %v3246_v29 = vmax.f32 %v3214_v24, 0.0  ;;  %v4892_v24 = vld [vmem:[#allocation10 + $0x20] sm:$0xff]  }
 0x2d6   : > { %4468 = vmatpush3.bf16.msra.mxu0 %v4873_v27  ;;  %v2629_v27 = vld [vmem:[#allocation3 + $0xe8] sm:$0xff]  ;;  %4431 = vmatprep.subr.bf16.mxu1 %v4887_v25 }
 0x2d7   : > { %4469 = vmatprep.subr.bf16.mxu0 %v4874_v34  ;;  %v2661_v31 = vmax.f32 %v2629_v27, 0.0 }
 0x2d9   : > { %4390 = vmatmul.mubr.bf16.gmra.mrb[4].mxu0 %v2667_v38  ;;  %v2678_v33 = vpack.c.bf16 %v2661_v31, %v2660_v30  ;;  %4432 = vmatpush3.bf16.msra.mxu1 %v4887_v25 }
 0x2da   : > { %4393 = vmatprep.mubr.bf16.mxu0 %v2668_v42  ;;  %4470 = vmatpush3.bf16.msra.mxu0 %v4874_v34  ;;  %v2630_v34 = vld [vmem:[#allocation3 + $0xf0] sm:$0xff] }
 0x2db   : > { %4471 = vmatprep.subr.bf16.mxu0 %v4875_v43  ;;  %v2662_v38 = vmax.f32 %v2630_v34, 0.0  ;;  %v4888_v34 = vld [vmem:[#allocation10] sm:$0xff]  }
 0x2dc   : > { %4513 = vmatprep.subr.bf16.mxu1 %v4888_v34 }
 0x2dd   : > { %v2679_v42 = vpack.c.bf16 %v2663_v39, %v2662_v38  ;;  %v3249_v39 = vmax.f32 %v3217_v35, 0.0 }
 0x2de   : > { %4472 = vmatpush3.bf16.msra.mxu0 %v4875_v43  ;;  %v3257_v43 = vpack.c.bf16 %v3226_v41, %v3225_v40  ;;  %v3250_v40 = vmax.f32 %v3218_v36, 0.0  ;;  %v4894_v36 = vld [vmem:[#allocation10 + $0x30] sm:$0xff]  }
 0x2df   : > { %4473 = vmatprep.subr.bf16.mxu0 %v4876_v55 }
 0x2e1   : > { %4394 = vmatmul.mubr.bf16.gmra.mrb[8].mxu0 %v2669_v58  ;;  %v3231_v58 = vmax.f32 %v3199_v54, 0.0  ;;  %v3224_v54 = vld [vmem:[#allocation3 + $0x1f8] sm:$0xff] }
 0x2e2   : > { %4397 = vmatprep.mubr.bf16.mxu0 %v2670_v60  ;;  %4474 = vmatpush3.bf16.msra.mxu0 %v4876_v55  ;;  %v3200_v55 = vld [vmem:[#allocation3 + $0x138] sm:$0xff]  ;;  %v3233_v60 = vmax.f32 %v3201_v56, 0.0  ;;  %v3256_v56 = vmax.f32 %v3224_v54, 0.0 }
 0x2e3   : > { %4475 = vmatprep.subr.bf16.mxu0 %v4877_v59 }
 0x2e4   : > { %v3261_v63 = vpack.c.bf16 %v3234_v61, %v3233_v60 }
 0x2e6   : > { %4476 = vmatpush3.bf16.msra.mxu0 %v4877_v59  ;;  %v3232_v59 = vmax.f32 %v3200_v55, 0.0 }
 0x2e7   : > { %4477 = vmatprep.subr.bf16.mxu0 %v4878_v62 }
 0x2e9   : > { %4398 = vmatmul.mubr.bf16.gmra.mrb[12].mxu0 %v2671_v0  ;;  %v3203_v0 = vld [vmem:[#allocation3 + $0x150] sm:$0xff] }
 0x2ea   : > { %4401 = vmatprep.mubr.bf16.mxu0 %v2672_v1  ;;  %4478 = vmatpush3.bf16.msra.mxu0 %v4878_v62  ;;  %v3260_v62 = vpack.c.bf16 %v3232_v59, %v3231_v58  ;;  %v3204_v1 = vld [vmem:[#allocation3 + $0x158] sm:$0xff]  ;;  %v3235_v4 = vmax.f32 %v3203_v0, 0.0  ;;  %v5391_v59 = vld [vmem:[%s5566_s3] ss:$0 sm:$0xff] }
 0x2eb   : > { %4479 = vmatprep.subr.bf16.mxu0 %v4879_v6  ;;  %v3236_v5 = vmax.f32 %v3204_v1, 0.0 }
 0x2ed   : > { %v3262_v8 = vpack.c.bf16 %v3236_v5, %v3235_v4  ;;  %v4889_v5 = vld [vmem:[#allocation10 + $0x8] sm:$0xff]  }
 0x2ee   : > { %4480 = vmatpush3.bf16.msra.mxu0 %v4879_v6  ;;  %v3237_v6 = vmax.f32 %v3205_v2, 0.0 }
 0x2f0   : > { %v3263_v9 = vpack.c.bf16 %v3238_v7, %v3237_v6 }
 0x2f1   : > { %4402 = vmatmul.mubr.bf16.gmra.mrb[16].mxu0 %v2673_v12  ;;  %v3209_v12 = vld [vmem:[#allocation3 + $0x180] sm:$0xff] }
 0x2f2   : > { %4405 = vmatprep.mubr.bf16.mxu0 %v2674_v13  ;;  %v3210_v13 = vld [vmem:[#allocation3 + $0x188] sm:$0xff]  ;;  %v3241_v16 = vmax.f32 %v3209_v12, 0.0  ;;  %v4890_v12 = vld [vmem:[#allocation10 + $0x10] sm:$0xff]  }
 0x2f3   : > { %v3242_v17 = vmax.f32 %v3210_v13, 0.0 }
 0x2f5   : > { %v3265_v20 = vpack.c.bf16 %v3242_v17, %v3241_v16  ;;  %v4891_v17 = vld [vmem:[#allocation10 + $0x18] sm:$0xff]  }
 0x2f9   : > { %4406 = vmatmul.mubr.bf16.gmra.mrb[20].mxu0 %v2675_v22  ;;  %v3212_v22 = vld [vmem:[#allocation3 + $0x198] sm:$0xff] }
 0x2fa   : > { %4409 = vmatprep.mubr.bf16.mxu0 %v2676_v23  ;;  %v3213_v23 = vld [vmem:[#allocation3 + $0x1a0] sm:$0xff]  ;;  %v3244_v27 = vmax.f32 %v3212_v22, 0.0 }
 0x2fb   : > { %v3245_v28 = vmax.f32 %v3213_v23, 0.0 }
 0x2fc   : > { %v3266_v30 = vpack.c.bf16 %v3244_v27, %v3243_v26 }
 0x2fd   : > { %v3267_v31 = vpack.c.bf16 %v3246_v29, %v3245_v28  ;;  %v4893_v29 = vld [vmem:[#allocation10 + $0x28] sm:$0xff]  }
 0x301   : > { %4410 = vmatmul.mubr.bf16.gmra.mrb[24].mxu0 %v2677_v32  ;;  %v3215_v32 = vld [vmem:[#allocation3 + $0x1b0] sm:$0xff] }
 0x302   : > { %4413 = vmatprep.mubr.bf16.mxu0 %v2678_v33  ;;  %v3216_v33 = vld [vmem:[#allocation3 + $0x1b8] sm:$0xff]  ;;  %v3247_v37 = vmax.f32 %v3215_v32, 0.0 }
 0x303   : > { %v3248_v38 = vmax.f32 %v3216_v33, 0.0 }
 0x305   : > { %v3268_v41 = vpack.c.bf16 %v3248_v38, %v3247_v37 }
 0x309   : > { %4414 = vmatmul.mubr.bf16.gmra.mrb[28].mxu0 %v2679_v42  ;;  %v3269_v42 = vpack.c.bf16 %v3250_v40, %v3249_v39 }
 0x30a   : > { %4481 = vmatprep.mubr.bf16.mxu0 %v3257_v43  ;;  %v3219_v43 = vld [vmem:[#allocation3 + $0x1d0] sm:$0xff] }
 0x30b   : > { %v3251_v47 = vmax.f32 %v3219_v43, 0.0 }
 0x30d   : > { %v3270_v51 = vpack.c.bf16 %v3252_v48, %v3251_v47 }
 0x311   : > { %4482 = vmatmul.mubr.bf16.vlgmr.msra.gmra.mrb[32].mxu0 %v3258_v52  ;;  %v3271_v52 = vpack.c.bf16 %v3254_v50, %v3253_v49 }
 0x312   : > { %4485 = vmatprep.mubr.bf16.mxu0 %v3259_v53  ;;  %v3223_v53 = vld [vmem:[#allocation3 + $0x1f0] sm:$0xff] }
 0x313   : > { %v3255_v55 = vmax.f32 %v3223_v53, 0.0 }
 0x315   : > { %v3272_v57 = vpack.c.bf16 %v3256_v56, %v3255_v55 }
 0x319   : > { %4486 = vmatmul.mubr.bf16.gmra.mrb[36].mxu0 %v3260_v62 }
 0x31a   : > { %4489 = vmatprep.mubr.bf16.mxu0 %v3261_v63 }
 0x321   : > { %4490 = vmatmul.mubr.bf16.gmra.mrb[40].mxu0 %v3262_v8 }
 0x322   : > { %4493 = vmatprep.mubr.bf16.mxu0 %v3263_v9 }
 0x329   : > { %4494 = vmatmul.mubr.bf16.gmra.mrb[44].mxu0 %v3264_v19 }
 0x32a   : > { %4497 = vmatprep.mubr.bf16.mxu0 %v3265_v20 }
 0x331   : > { %4498 = vmatmul.mubr.bf16.gmra.mrb[48].mxu0 %v3266_v30 }
 0x332   : > { %4501 = vmatprep.mubr.bf16.mxu0 %v3267_v31 }
 0x339   : > { %4502 = vmatmul.mubr.bf16.gmra.mrb[52].mxu0 %v3268_v41  ;;  %v4895_v41 = vld [vmem:[#allocation10 + $0x38] sm:$0xff]  }
 0x33a   : > { %4505 = vmatprep.mubr.bf16.mxu0 %v3269_v42 }
 0x341   : > { %4506 = vmatmul.mubr.bf16.gmra.mrb[56].mxu0 %v3270_v51 }
 0x342   : > { %4509 = vmatprep.mubr.bf16.mxu0 %v3271_v52 }
 0x349   : > { %4510 = vmatmul.mubr.bf16.gmra.mrb[60].mxu0 %v3272_v57 }
 0x3a4   : > { %v4387_v58 = vpop.f32.mrb[0].mxu0 }
 0x3a5   : > { %v2785_v60 = vpop.f32.mrb[1].mxu0  ;;  %v2794_v62 = vadd.f32 %v4387_v58, %v5391_v59 }
 0x3a6   : > { %v4388_v61 = vpop.f32.mrb[2].mxu0  ;;  %v2786_v1 = vadd.f32 %v5391_v59, %v2785_v60 }
 0x3a7   : > { %v2797_v63 = vadd.f32 %v4388_v61, %v5391_v59  ;;  %v2788_v0 = vpop.f32.mrb[3].mxu0 }
 0x3a8   : > { %v2789_v2 = vadd.f32 %v5391_v59, %v2788_v0 }
 0x3a9   : > { %v2913_v3 = vpack.c.bf16 %v2797_v63, %v2794_v62 }
 0x3aa   : > { %v2912_v4 = vpack.c.bf16 %v2789_v2, %v2786_v1 }
 0x3ac   : > { %v4391_v6 = vpop.f32.mrb[4].mxu0  ;;  %4433 = vmatprep.mubr.bf16.mxu1 %v2912_v4 }
 0x3ad   : > { %v2801_v7 = vpop.f32.mrb[5].mxu0  ;;  %4434 = vmatmul.mubr.bf16.vlgmr.msra.gmra.mrb[0].mxu1 %v2913_v3  ;;  %v2810_v9 = vadd.f32 %v4391_v6, %v5391_v59 }
 0x3ae   : > { %v4392_v8 = vpop.f32.mrb[6].mxu0  ;;  %4514 = vmatpush3.bf16.msra.mxu1 %v4888_v34  ;;  %v2802_v13 = vadd.f32 %v5391_v59, %v2801_v7 }
 0x3af   : > { %v2813_v10 = vadd.f32 %v4392_v8, %v5391_v59  ;;  %v2804_v11 = vpop.f32.mrb[7].mxu0  ;;  %4515 = vmatprep.subr.bf16.mxu1 %v4889_v5 }
 0x3b0   : > { %v2805_v14 = vadd.f32 %v5391_v59, %v2804_v11 }
 0x3b1   : > { %v2915_v15 = vpack.c.bf16 %v2813_v10, %v2810_v9 }
 0x3b2   : > { %v2914_v16 = vpack.c.bf16 %v2805_v14, %v2802_v13  ;;  %4516 = vmatpush3.bf16.msra.mxu1 %v4889_v5 }
 0x3b3   : > { %4517 = vmatprep.subr.bf16.mxu1 %v4890_v12 }
 0x3b4   : > { %v4395_v18 = vpop.f32.mrb[8].mxu0  ;;  %4437 = vmatprep.mubr.bf16.mxu1 %v2914_v16 }
 0x3b5   : > { %v2817_v19 = vpop.f32.mrb[9].mxu0  ;;  %4438 = vmatmul.mubr.bf16.gmra.mrb[4].mxu1 %v2915_v15  ;;  %v2826_v21 = vadd.f32 %v4395_v18, %v5391_v59 }
 0x3b6   : > { %v4396_v20 = vpop.f32.mrb[10].mxu0  ;;  %4518 = vmatpush3.bf16.msra.mxu1 %v4890_v12  ;;  %v2818_v25 = vadd.f32 %v5391_v59, %v2817_v19 }
 0x3b7   : > { %v2829_v22 = vadd.f32 %v4396_v20, %v5391_v59  ;;  %v2820_v23 = vpop.f32.mrb[11].mxu0  ;;  %4519 = vmatprep.subr.bf16.mxu1 %v4891_v17 }
 0x3b8   : > { %v2821_v26 = vadd.f32 %v5391_v59, %v2820_v23 }
 0x3b9   : > { %v2917_v27 = vpack.c.bf16 %v2829_v22, %v2826_v21 }
 0x3ba   : > { %v2916_v28 = vpack.c.bf16 %v2821_v26, %v2818_v25  ;;  %4520 = vmatpush3.bf16.msra.mxu1 %v4891_v17 }
 0x3bb   : > { %4521 = vmatprep.subr.bf16.mxu1 %v4892_v24 }
 0x3bc   : > { %v4399_v30 = vpop.f32.mrb[12].mxu0  ;;  %4441 = vmatprep.mubr.bf16.mxu1 %v2916_v28 }
 0x3bd   : > { %v2833_v31 = vpop.f32.mrb[13].mxu0  ;;  %4442 = vmatmul.mubr.bf16.gmra.mrb[8].mxu1 %v2917_v27  ;;  %v2842_v33 = vadd.f32 %v4399_v30, %v5391_v59 }
 0x3be   : > { %v4400_v32 = vpop.f32.mrb[14].mxu0  ;;  %4522 = vmatpush3.bf16.msra.mxu1 %v4892_v24  ;;  %v2834_v37 = vadd.f32 %v5391_v59, %v2833_v31 }
 0x3bf   : > { %v2845_v34 = vadd.f32 %v4400_v32, %v5391_v59  ;;  %v2836_v35 = vpop.f32.mrb[15].mxu0  ;;  %4523 = vmatprep.subr.bf16.mxu1 %v4893_v29 }
 0x3c0   : > { %v2837_v38 = vadd.f32 %v5391_v59, %v2836_v35 }
 0x3c1   : > { %v2919_v39 = vpack.c.bf16 %v2845_v34, %v2842_v33 }
 0x3c2   : > { %v2918_v40 = vpack.c.bf16 %v2837_v38, %v2834_v37  ;;  %4524 = vmatpush3.bf16.msra.mxu1 %v4893_v29 }
 0x3c3   : > { %4525 = vmatprep.subr.bf16.mxu1 %v4894_v36 }
 0x3c4   : > { %v4403_v42 = vpop.f32.mrb[16].mxu0  ;;  %4445 = vmatprep.mubr.bf16.mxu1 %v2918_v40 }
 0x3c5   : > { %v2849_v43 = vpop.f32.mrb[17].mxu0  ;;  %4446 = vmatmul.mubr.bf16.gmra.mrb[12].mxu1 %v2919_v39  ;;  %v2858_v45 = vadd.f32 %v4403_v42, %v5391_v59 }
 0x3c6   : > { %v4404_v44 = vpop.f32.mrb[18].mxu0  ;;  %4526 = vmatpush3.bf16.msra.mxu1 %v4894_v36  ;;  %v2850_v48 = vadd.f32 %v5391_v59, %v2849_v43 }
 0x3c7   : > { %v2861_v46 = vadd.f32 %v4404_v44, %v5391_v59  ;;  %v2852_v47 = vpop.f32.mrb[19].mxu0  ;;  %4527 = vmatprep.subr.bf16.mxu1 %v4895_v41 }
 0x3c8   : > { %v2853_v49 = vadd.f32 %v5391_v59, %v2852_v47 }
 0x3c9   : > { %v2921_v50 = vpack.c.bf16 %v2861_v46, %v2858_v45 }
 0x3ca   : > { %v2920_v51 = vpack.c.bf16 %v2853_v49, %v2850_v48  ;;  %4528 = vmatpush3.bf16.msra.mxu1 %v4895_v41 }
 0x3cc   : > { %v4407_v52 = vpop.f32.mrb[20].mxu0  ;;  %4449 = vmatprep.mubr.bf16.mxu1 %v2920_v51 }
 0x3cd   : > { %v2865_v53 = vpop.f32.mrb[21].mxu0  ;;  %4450 = vmatmul.mubr.bf16.gmra.mrb[16].mxu1 %v2921_v50  ;;  %v2874_v55 = vadd.f32 %v4407_v52, %v5391_v59 }
 0x3ce   : > { %v4408_v54 = vpop.f32.mrb[22].mxu0  ;;  %v2866_v58 = vadd.f32 %v5391_v59, %v2865_v53 }
 0x3cf   : > { %v2877_v56 = vadd.f32 %v4408_v54, %v5391_v59  ;;  %v2868_v57 = vpop.f32.mrb[23].mxu0 }
 0x3d0   : > { %v2869_v60 = vadd.f32 %v5391_v59, %v2868_v57 }
 0x3d1   : > { %v2923_v61 = vpack.c.bf16 %v2877_v56, %v2874_v55 }
 0x3d2   : > { %v2922_v62 = vpack.c.bf16 %v2869_v60, %v2866_v58 }
 0x3d4   : > { %v4411_v63 = vpop.f32.mrb[24].mxu0  ;;  %4453 = vmatprep.mubr.bf16.mxu1 %v2922_v62 }
 0x3d5   : > { %v2881_v0 = vpop.f32.mrb[25].mxu0  ;;  %4454 = vmatmul.mubr.bf16.gmra.mrb[20].mxu1 %v2923_v61  ;;  %v2890_v2 = vadd.f32 %v4411_v63, %v5391_v59 }
 0x3d6   : > { %v4412_v1 = vpop.f32.mrb[26].mxu0  ;;  %v2882_v5 = vadd.f32 %v5391_v59, %v2881_v0 }
 0x3d7   : > { %v2893_v3 = vadd.f32 %v4412_v1, %v5391_v59  ;;  %v2884_v4 = vpop.f32.mrb[27].mxu0 }
 0x3d8   : > { %v2885_v6 = vadd.f32 %v5391_v59, %v2884_v4 }
 0x3d9   : > { %v2925_v7 = vpack.c.bf16 %v2893_v3, %v2890_v2 }
 0x3da   : > { %v2924_v8 = vpack.c.bf16 %v2885_v6, %v2882_v5 }
 0x3dc   : > { %v4415_v9 = vpop.f32.mrb[28].mxu0  ;;  %4457 = vmatprep.mubr.bf16.mxu1 %v2924_v8 }
 0x3dd   : > { %v2897_v10 = vpop.f32.mrb[29].mxu0  ;;  %4458 = vmatmul.mubr.bf16.gmra.mrb[24].mxu1 %v2925_v7  ;;  %v2906_v12 = vadd.f32 %v4415_v9, %v5391_v59 }
 0x3de   : > { %v4416_v11 = vpop.f32.mrb[30].mxu0  ;;  %v2898_v15 = vadd.f32 %v5391_v59, %v2897_v10 }
 0x3df   : > { %v2909_v13 = vadd.f32 %v4416_v11, %v5391_v59  ;;  %v2900_v14 = vpop.f32.mrb[31].mxu0 }
 0x3e0   : > { %v2901_v16 = vadd.f32 %v5391_v59, %v2900_v14 }
 0x3e1   : > { %v2927_v17 = vpack.c.bf16 %v2909_v13, %v2906_v12 }
 0x3e2   : > { %v2926_v18 = vpack.c.bf16 %v2901_v16, %v2898_v15 }
 0x3e4   : > { %4461 = vmatprep.mubr.bf16.mxu1 %v2926_v18  ;;  %v4483_v19 = vpop.f32.mrb[32].mxu0 }
 0x3e5   : > { %4462 = vmatmul.mubr.bf16.gmra.mrb[28].mxu1 %v2927_v17  ;;  %v3378_v20 = vpop.f32.mrb[33].mxu0  ;;  %v3387_v22 = vadd.f32 %v4483_v19, %v5391_v59 }
 0x3e6   : > { %v4484_v21 = vpop.f32.mrb[34].mxu0  ;;  %v3379_v25 = vadd.f32 %v5391_v59, %v3378_v20 }
 0x3e7   : > { %v3390_v23 = vadd.f32 %v4484_v21, %v5391_v59  ;;  %v3381_v24 = vpop.f32.mrb[35].mxu0 }
 0x3e8   : > { %v3382_v26 = vadd.f32 %v5391_v59, %v3381_v24 }
 0x3e9   : > { %v3506_v27 = vpack.c.bf16 %v3390_v23, %v3387_v22 }
 0x3ea   : > { %v3505_v28 = vpack.c.bf16 %v3382_v26, %v3379_v25 }
 0x3ec   : > { %v4487_v29 = vpop.f32.mrb[36].mxu0  ;;  %4529 = vmatprep.mubr.bf16.mxu1 %v3505_v28 }
 0x3ed   : > { %v3394_v30 = vpop.f32.mrb[37].mxu0  ;;  %4530 = vmatmul.mubr.bf16.vlgmr.msra.gmra.mrb[32].mxu1 %v3506_v27  ;;  %v3403_v32 = vadd.f32 %v4487_v29, %v5391_v59 }
 0x3ee   : > { %v4488_v31 = vpop.f32.mrb[38].mxu0  ;;  %v3395_v35 = vadd.f32 %v5391_v59, %v3394_v30 }
 0x3ef   : > { %v3406_v33 = vadd.f32 %v4488_v31, %v5391_v59  ;;  %v3397_v34 = vpop.f32.mrb[39].mxu0 }
 0x3f0   : > { %v3398_v36 = vadd.f32 %v5391_v59, %v3397_v34 }
 0x3f1   : > { %v3508_v37 = vpack.c.bf16 %v3406_v33, %v3403_v32 }
 0x3f2   : > { %v3507_v38 = vpack.c.bf16 %v3398_v36, %v3395_v35  ;;  %v5460_v36 = vld [vmem:[%s5568_s5] ss:$0 sm:$0xff] }
 0x3f4   : > { %v4491_v39 = vpop.f32.mrb[40].mxu0  ;;  %4533 = vmatprep.mubr.bf16.mxu1 %v3507_v38 }
 0x3f5   : > { %v3410_v40 = vpop.f32.mrb[41].mxu0  ;;  %4534 = vmatmul.mubr.bf16.gmra.mrb[36].mxu1 %v3508_v37  ;;  %v3419_v42 = vadd.f32 %v4491_v39, %v5391_v59 }
 0x3f6   : > { %v4492_v41 = vpop.f32.mrb[42].mxu0  ;;  %v3411_v45 = vadd.f32 %v5391_v59, %v3410_v40 }
 0x3f7   : > { %v3422_v43 = vadd.f32 %v4492_v41, %v5391_v59  ;;  %v3413_v44 = vpop.f32.mrb[43].mxu0 }
 0x3f8   : > { %v3414_v46 = vadd.f32 %v5391_v59, %v3413_v44 }
 0x3f9   : > { %v3510_v47 = vpack.c.bf16 %v3422_v43, %v3419_v42 }
 0x3fa   : > { %v3509_v48 = vpack.c.bf16 %v3414_v46, %v3411_v45 }
 0x3fc   : > { %v4495_v49 = vpop.f32.mrb[44].mxu0  ;;  %4537 = vmatprep.mubr.bf16.mxu1 %v3509_v48 }
 0x3fd   : > { %v3426_v50 = vpop.f32.mrb[45].mxu0  ;;  %4538 = vmatmul.mubr.bf16.gmra.mrb[40].mxu1 %v3510_v47  ;;  %v3435_v52 = vadd.f32 %v4495_v49, %v5391_v59 }
 0x3fe   : > { %v4496_v51 = vpop.f32.mrb[46].mxu0  ;;  %v3427_v55 = vadd.f32 %v5391_v59, %v3426_v50 }
 0x3ff   : > { %v3438_v53 = vadd.f32 %v4496_v51, %v5391_v59  ;;  %v3429_v54 = vpop.f32.mrb[47].mxu0 }
 0x400   : > { %v3430_v56 = vadd.f32 %v5391_v59, %v3429_v54 }
 0x401   : > { %v3512_v57 = vpack.c.bf16 %v3438_v53, %v3435_v52 }
 0x402   : > { %v3511_v58 = vpack.c.bf16 %v3430_v56, %v3427_v55 }
 0x404   : > { %v4499_v60 = vpop.f32.mrb[48].mxu0  ;;  %4541 = vmatprep.mubr.bf16.mxu1 %v3511_v58 }
 0x405   : > { %v3442_v61 = vpop.f32.mrb[49].mxu0  ;;  %4542 = vmatmul.mubr.bf16.gmra.mrb[44].mxu1 %v3512_v57  ;;  %v3451_v63 = vadd.f32 %v4499_v60, %v5391_v59 }
 0x406   : > { %v4500_v62 = vpop.f32.mrb[50].mxu0  ;;  %v3443_v2 = vadd.f32 %v5391_v59, %v3442_v61 }
 0x407   : > { %v3454_v0 = vadd.f32 %v4500_v62, %v5391_v59  ;;  %v3445_v1 = vpop.f32.mrb[51].mxu0 }
 0x408   : > { %v3446_v3 = vadd.f32 %v5391_v59, %v3445_v1 }
 0x409   : > { %v3514_v4 = vpack.c.bf16 %v3454_v0, %v3451_v63 }
 0x40a   : > { %v3513_v5 = vpack.c.bf16 %v3446_v3, %v3443_v2 }
 0x40c   : > { %v4503_v6 = vpop.f32.mrb[52].mxu0  ;;  %4545 = vmatprep.mubr.bf16.mxu1 %v3513_v5 }
 0x40d   : > { %v3458_v7 = vpop.f32.mrb[53].mxu0  ;;  %4546 = vmatmul.mubr.bf16.gmra.mrb[48].mxu1 %v3514_v4  ;;  %v3467_v9 = vadd.f32 %v4503_v6, %v5391_v59 }
 0x40e   : > { %v4504_v8 = vpop.f32.mrb[54].mxu0  ;;  %v3459_v12 = vadd.f32 %v5391_v59, %v3458_v7 }
 0x40f   : > { %v3470_v10 = vadd.f32 %v4504_v8, %v5391_v59  ;;  %v3461_v11 = vpop.f32.mrb[55].mxu0 }
 0x410   : > { %v3462_v13 = vadd.f32 %v5391_v59, %v3461_v11 }
 0x411   : > { %v3516_v14 = vpack.c.bf16 %v3470_v10, %v3467_v9 }
 0x412   : > { %v3515_v15 = vpack.c.bf16 %v3462_v13, %v3459_v12 }
 0x414   : > { %v4507_v16 = vpop.f32.mrb[56].mxu0  ;;  %4549 = vmatprep.mubr.bf16.mxu1 %v3515_v15 }
 0x415   : > { %v3474_v17 = vpop.f32.mrb[57].mxu0  ;;  %4550 = vmatmul.mubr.bf16.gmra.mrb[52].mxu1 %v3516_v14  ;;  %v3483_v19 = vadd.f32 %v4507_v16, %v5391_v59 }
 0x416   : > { %v4508_v18 = vpop.f32.mrb[58].mxu0  ;;  %v3475_v22 = vadd.f32 %v5391_v59, %v3474_v17 }
 0x417   : > { %v3486_v20 = vadd.f32 %v4508_v18, %v5391_v59  ;;  %v3477_v21 = vpop.f32.mrb[59].mxu0 }
 0x418   : > { %v3478_v23 = vadd.f32 %v5391_v59, %v3477_v21 }
 0x419   : > { %v3518_v24 = vpack.c.bf16 %v3486_v20, %v3483_v19 }
 0x41a   : > { %v3517_v25 = vpack.c.bf16 %v3478_v23, %v3475_v22 }
 0x41c   : > { %v4511_v26 = vpop.f32.mrb[60].mxu0  ;;  %4553 = vmatprep.mubr.bf16.mxu1 %v3517_v25 }
 0x41d   : > { %v3490_v27 = vpop.f32.mrb[61].mxu0  ;;  %4554 = vmatmul.mubr.bf16.gmra.mrb[56].mxu1 %v3518_v24  ;;  %v3499_v29 = vadd.f32 %v4511_v26, %v5391_v59 }
 0x41e   : > { %v4512_v28 = vpop.f32.mrb[62].mxu0  ;;  %v3491_v32 = vadd.f32 %v5391_v59, %v3490_v27 }
 0x41f   : > { %v3502_v30 = vadd.f32 %v4512_v28, %v5391_v59  ;;  %v3493_v31 = vpop.f32.mrb[63].mxu0 }
 0x420   : > { %v3494_v33 = vadd.f32 %v5391_v59, %v3493_v31 }
 0x421   : > { %v3520_v34 = vpack.c.bf16 %v3502_v30, %v3499_v29 }
 0x422   : > { %v3519_v35 = vpack.c.bf16 %v3494_v33, %v3491_v32 }
 0x424   : > { %4557 = vmatprep.mubr.bf16.mxu1 %v3519_v35 }
 0x425   : > { %4558 = vmatmul.mubr.bf16.gmra.mrb[60].mxu1 %v3520_v34 }
 0x480   : > { %v4435_v37 = vpop.f32.mrb[0].mxu1 }
 0x481   : > { %v3042_v38 = vadd.f32 %v4435_v37, %v5460_v36  ;;  %v3033_v39 = vpop.f32.mrb[1].mxu1 }
 0x482   : > { %v3034_v40 = vadd.f32 %v5460_v36, %v3033_v39  ;;  %v4436_v41 = vpop.f32.mrb[2].mxu1 }
 0x483   : > { %3162 = vst [vmem:[#allocation12 + $0x10] sm:$0xff] %v3042_v38  ;;  %v3045_v42 = vadd.f32 %v4436_v41, %v5460_v36  ;;  %v3036_v59 = vpop.f32.mrb[3].mxu1 }
 0x484   : > { %3160 = vst [vmem:[#allocation12] sm:$0xff] %v3034_v40  ;;  %v3037_v43 = vadd.f32 %v5460_v36, %v3036_v59 }
 0x485   : > { %3163 = vst [vmem:[#allocation12 + $0x18] sm:$0xff] %v3045_v42 }
 0x486   : > { %3161 = vst [vmem:[#allocation12 + $0x8] sm:$0xff] %v3037_v43 }
 0x488   : > { %v4439_v44 = vpop.f32.mrb[4].mxu1 }
 0x489   : > { %v3058_v45 = vadd.f32 %v4439_v44, %v5460_v36  ;;  %v3049_v46 = vpop.f32.mrb[5].mxu1 }
 0x48a   : > { %v3050_v47 = vadd.f32 %v5460_v36, %v3049_v46  ;;  %v4440_v48 = vpop.f32.mrb[6].mxu1 }
 0x48b   : > { %3166 = vst [vmem:[#allocation12 + $0x30] sm:$0xff] %v3058_v45  ;;  %v3061_v49 = vadd.f32 %v4440_v48, %v5460_v36  ;;  %v3052_v50 = vpop.f32.mrb[7].mxu1 }
 0x48c   : > { %3164 = vst [vmem:[#allocation12 + $0x20] sm:$0xff] %v3050_v47  ;;  %v3053_v51 = vadd.f32 %v5460_v36, %v3052_v50 }
 0x48d   : > { %3167 = vst [vmem:[#allocation12 + $0x38] sm:$0xff] %v3061_v49 }
 0x48e   : > { %3165 = vst [vmem:[#allocation12 + $0x28] sm:$0xff] %v3053_v51 }
 0x490   : > { %v4443_v52 = vpop.f32.mrb[8].mxu1 }
 0x491   : > { %v3074_v53 = vadd.f32 %v4443_v52, %v5460_v36  ;;  %v3065_v54 = vpop.f32.mrb[9].mxu1 }
 0x492   : > { %v3066_v55 = vadd.f32 %v5460_v36, %v3065_v54  ;;  %v4444_v56 = vpop.f32.mrb[10].mxu1 }
 0x493   : > { %3170 = vst [vmem:[#allocation12 + $0x50] sm:$0xff] %v3074_v53  ;;  %v3077_v57 = vadd.f32 %v4444_v56, %v5460_v36  ;;  %v3068_v58 = vpop.f32.mrb[11].mxu1 }
 0x494   : > { %3168 = vst [vmem:[#allocation12 + $0x40] sm:$0xff] %v3066_v55  ;;  %v3069_v60 = vadd.f32 %v5460_v36, %v3068_v58 }
 0x495   : > { %3171 = vst [vmem:[#allocation12 + $0x58] sm:$0xff] %v3077_v57 }
 0x496   : > { %3169 = vst [vmem:[#allocation12 + $0x48] sm:$0xff] %v3069_v60 }
 0x498   : > { %v4447_v61 = vpop.f32.mrb[12].mxu1 }
 0x499   : > { %v3090_v62 = vadd.f32 %v4447_v61, %v5460_v36  ;;  %v3081_v63 = vpop.f32.mrb[13].mxu1 }
 0x49a   : > { %v3082_v0 = vadd.f32 %v5460_v36, %v3081_v63  ;;  %v4448_v1 = vpop.f32.mrb[14].mxu1 }
 0x49b   : > { %3174 = vst [vmem:[#allocation12 + $0x70] sm:$0xff] %v3090_v62  ;;  %v3093_v2 = vadd.f32 %v4448_v1, %v5460_v36  ;;  %v3084_v3 = vpop.f32.mrb[15].mxu1 }
 0x49c   : > { %3172 = vst [vmem:[#allocation12 + $0x60] sm:$0xff] %v3082_v0  ;;  %v3085_v4 = vadd.f32 %v5460_v36, %v3084_v3 }
 0x49d   : > { %3175 = vst [vmem:[#allocation12 + $0x78] sm:$0xff] %v3093_v2 }
 0x49e   : > { %3173 = vst [vmem:[#allocation12 + $0x68] sm:$0xff] %v3085_v4 }
 0x4a0   : > { %v4451_v5 = vpop.f32.mrb[16].mxu1 }
 0x4a1   : > { %v3106_v6 = vadd.f32 %v4451_v5, %v5460_v36  ;;  %v3097_v7 = vpop.f32.mrb[17].mxu1 }
 0x4a2   : > { %v3098_v8 = vadd.f32 %v5460_v36, %v3097_v7  ;;  %v4452_v9 = vpop.f32.mrb[18].mxu1 }
 0x4a3   : > { %3178 = vst [vmem:[#allocation12 + $0x90] sm:$0xff] %v3106_v6  ;;  %v3109_v10 = vadd.f32 %v4452_v9, %v5460_v36  ;;  %v3100_v11 = vpop.f32.mrb[19].mxu1 }
 0x4a4   : > { %3176 = vst [vmem:[#allocation12 + $0x80] sm:$0xff] %v3098_v8  ;;  %v3101_v12 = vadd.f32 %v5460_v36, %v3100_v11 }
 0x4a5   : > { %3179 = vst [vmem:[#allocation12 + $0x98] sm:$0xff] %v3109_v10 }
 0x4a6   : > { %3177 = vst [vmem:[#allocation12 + $0x88] sm:$0xff] %v3101_v12 }
 0x4a8   : > { %v4455_v13 = vpop.f32.mrb[20].mxu1 }
 0x4a9   : > { %v3122_v14 = vadd.f32 %v4455_v13, %v5460_v36  ;;  %v3113_v15 = vpop.f32.mrb[21].mxu1 }
 0x4aa   : > { %v3114_v16 = vadd.f32 %v5460_v36, %v3113_v15  ;;  %v4456_v17 = vpop.f32.mrb[22].mxu1 }
 0x4ab   : > { %3182 = vst [vmem:[#allocation12 + $0xb0] sm:$0xff] %v3122_v14  ;;  %v3125_v18 = vadd.f32 %v4456_v17, %v5460_v36  ;;  %v3116_v19 = vpop.f32.mrb[23].mxu1 }
 0x4ac   : > { %3180 = vst [vmem:[#allocation12 + $0xa0] sm:$0xff] %v3114_v16  ;;  %v3117_v20 = vadd.f32 %v5460_v36, %v3116_v19 }
 0x4ad   : > { %3183 = vst [vmem:[#allocation12 + $0xb8] sm:$0xff] %v3125_v18 }
 0x4ae   : > { %3181 = vst [vmem:[#allocation12 + $0xa8] sm:$0xff] %v3117_v20 }
 0x4b0   : > { %v4459_v21 = vpop.f32.mrb[24].mxu1 }
 0x4b1   : > { %v3138_v22 = vadd.f32 %v4459_v21, %v5460_v36  ;;  %v3129_v23 = vpop.f32.mrb[25].mxu1 }
 0x4b2   : > { %v3130_v24 = vadd.f32 %v5460_v36, %v3129_v23  ;;  %v4460_v25 = vpop.f32.mrb[26].mxu1 }
 0x4b3   : > { %3186 = vst [vmem:[#allocation12 + $0xd0] sm:$0xff] %v3138_v22  ;;  %v3141_v26 = vadd.f32 %v4460_v25, %v5460_v36  ;;  %v3132_v27 = vpop.f32.mrb[27].mxu1 }
 0x4b4   : > { %3184 = vst [vmem:[#allocation12 + $0xc0] sm:$0xff] %v3130_v24  ;;  %v3133_v28 = vadd.f32 %v5460_v36, %v3132_v27 }
 0x4b5   : > { %3187 = vst [vmem:[#allocation12 + $0xd8] sm:$0xff] %v3141_v26 }
 0x4b6   : > { %3185 = vst [vmem:[#allocation12 + $0xc8] sm:$0xff] %v3133_v28 }
 0x4b8   : > { %v4463_v29 = vpop.f32.mrb[28].mxu1 }
 0x4b9   : > { %v3154_v30 = vadd.f32 %v4463_v29, %v5460_v36  ;;  %v3145_v31 = vpop.f32.mrb[29].mxu1 }
 0x4ba   : > { %v3146_v32 = vadd.f32 %v5460_v36, %v3145_v31  ;;  %v4464_v33 = vpop.f32.mrb[30].mxu1 }
 0x4bb   : > { %3190 = vst [vmem:[#allocation12 + $0xf0] sm:$0xff] %v3154_v30  ;;  %v3157_v34 = vadd.f32 %v4464_v33, %v5460_v36  ;;  %v3148_v35 = vpop.f32.mrb[31].mxu1 }
 0x4bc   : > { %3188 = vst [vmem:[#allocation12 + $0xe0] sm:$0xff] %v3146_v32  ;;  %v3149_v37 = vadd.f32 %v5460_v36, %v3148_v35 }
 0x4bd   : > { %3191 = vst [vmem:[#allocation12 + $0xf8] sm:$0xff] %v3157_v34 }
 0x4be   : > { %3189 = vst [vmem:[#allocation12 + $0xe8] sm:$0xff] %v3149_v37 }
 0x4c0   : > { %v4531_v38 = vpop.f32.mrb[32].mxu1 }
 0x4c1   : > { %v3635_v39 = vadd.f32 %v4531_v38, %v5460_v36  ;;  %v3626_v40 = vpop.f32.mrb[33].mxu1 }
 0x4c2   : > { %v3627_v41 = vadd.f32 %v5460_v36, %v3626_v40  ;;  %v4532_v42 = vpop.f32.mrb[34].mxu1 }
 0x4c3   : > { %3756 = vst [vmem:[#allocation12 + $0x110] sm:$0xff] %v3635_v39  ;;  %v3638_v59 = vadd.f32 %v4532_v42, %v5460_v36  ;;  %v3629_v43 = vpop.f32.mrb[35].mxu1 }
 0x4c4   : > { %3754 = vst [vmem:[#allocation12 + $0x100] sm:$0xff] %v3627_v41  ;;  %v3630_v44 = vadd.f32 %v5460_v36, %v3629_v43 }
 0x4c5   : > { %3757 = vst [vmem:[#allocation12 + $0x118] sm:$0xff] %v3638_v59 }
 0x4c6   : > { %3755 = vst [vmem:[#allocation12 + $0x108] sm:$0xff] %v3630_v44 }
 0x4c8   : > { %v4535_v45 = vpop.f32.mrb[36].mxu1 }
 0x4c9   : > { %v3651_v46 = vadd.f32 %v4535_v45, %v5460_v36  ;;  %v3642_v47 = vpop.f32.mrb[37].mxu1 }
 0x4ca   : > { %v3643_v48 = vadd.f32 %v5460_v36, %v3642_v47  ;;  %v4536_v49 = vpop.f32.mrb[38].mxu1 }
 0x4cb   : > { %3760 = vst [vmem:[#allocation12 + $0x130] sm:$0xff] %v3651_v46  ;;  %v3654_v50 = vadd.f32 %v4536_v49, %v5460_v36  ;;  %v3645_v51 = vpop.f32.mrb[39].mxu1 }
 0x4cc   : > { %3758 = vst [vmem:[#allocation12 + $0x120] sm:$0xff] %v3643_v48  ;;  %v3646_v52 = vadd.f32 %v5460_v36, %v3645_v51 }
 0x4cd   : > { %3761 = vst [vmem:[#allocation12 + $0x138] sm:$0xff] %v3654_v50 }
 0x4ce   : > { %3759 = vst [vmem:[#allocation12 + $0x128] sm:$0xff] %v3646_v52 }
 0x4d0   : > { %v4539_v53 = vpop.f32.mrb[40].mxu1 }
 0x4d1   : > { %v3667_v54 = vadd.f32 %v4539_v53, %v5460_v36  ;;  %v3658_v55 = vpop.f32.mrb[41].mxu1 }
 0x4d2   : > { %v3659_v56 = vadd.f32 %v5460_v36, %v3658_v55  ;;  %v4540_v57 = vpop.f32.mrb[42].mxu1 }
 0x4d3   : > { %3764 = vst [vmem:[#allocation12 + $0x150] sm:$0xff] %v3667_v54  ;;  %v3670_v58 = vadd.f32 %v4540_v57, %v5460_v36  ;;  %v3661_v60 = vpop.f32.mrb[43].mxu1 }
 0x4d4   : > { %3762 = vst [vmem:[#allocation12 + $0x140] sm:$0xff] %v3659_v56  ;;  %v3662_v61 = vadd.f32 %v5460_v36, %v3661_v60 }
 0x4d5   : > { %3765 = vst [vmem:[#allocation12 + $0x158] sm:$0xff] %v3670_v58 }
 0x4d6   : > { %3763 = vst [vmem:[#allocation12 + $0x148] sm:$0xff] %v3662_v61 }
 0x4d8   : > { %v4543_v62 = vpop.f32.mrb[44].mxu1 }
 0x4d9   : > { %v3683_v63 = vadd.f32 %v4543_v62, %v5460_v36  ;;  %v3674_v0 = vpop.f32.mrb[45].mxu1 }
 0x4da   : > { %v3675_v1 = vadd.f32 %v5460_v36, %v3674_v0  ;;  %v4544_v2 = vpop.f32.mrb[46].mxu1 }
 0x4db   : > { %3768 = vst [vmem:[#allocation12 + $0x170] sm:$0xff] %v3683_v63  ;;  %v3686_v3 = vadd.f32 %v4544_v2, %v5460_v36  ;;  %v3677_v4 = vpop.f32.mrb[47].mxu1 }
 0x4dc   : > { %3766 = vst [vmem:[#allocation12 + $0x160] sm:$0xff] %v3675_v1  ;;  %v3678_v5 = vadd.f32 %v5460_v36, %v3677_v4 }
 0x4dd   : > { %3769 = vst [vmem:[#allocation12 + $0x178] sm:$0xff] %v3686_v3 }
 0x4de   : > { %3767 = vst [vmem:[#allocation12 + $0x168] sm:$0xff] %v3678_v5 }
 0x4e0   : > { %v4547_v6 = vpop.f32.mrb[48].mxu1 }
 0x4e1   : > { %v3699_v7 = vadd.f32 %v4547_v6, %v5460_v36  ;;  %v3690_v8 = vpop.f32.mrb[49].mxu1 }
 0x4e2   : > { %v3691_v9 = vadd.f32 %v5460_v36, %v3690_v8  ;;  %v4548_v10 = vpop.f32.mrb[50].mxu1 }
 0x4e3   : > { %3772 = vst [vmem:[#allocation12 + $0x190] sm:$0xff] %v3699_v7  ;;  %v3702_v11 = vadd.f32 %v4548_v10, %v5460_v36  ;;  %v3693_v12 = vpop.f32.mrb[51].mxu1 }
 0x4e4   : > { %3770 = vst [vmem:[#allocation12 + $0x180] sm:$0xff] %v3691_v9  ;;  %v3694_v13 = vadd.f32 %v5460_v36, %v3693_v12 }
 0x4e5   : > { %3773 = vst [vmem:[#allocation12 + $0x198] sm:$0xff] %v3702_v11 }
 0x4e6   : > { %3771 = vst [vmem:[#allocation12 + $0x188] sm:$0xff] %v3694_v13 }
 0x4e8   : > { %v4551_v14 = vpop.f32.mrb[52].mxu1 }
 0x4e9   : > { %v3715_v15 = vadd.f32 %v4551_v14, %v5460_v36  ;;  %v3706_v16 = vpop.f32.mrb[53].mxu1 }
 0x4ea   : > { %v3707_v17 = vadd.f32 %v5460_v36, %v3706_v16  ;;  %v4552_v18 = vpop.f32.mrb[54].mxu1 }
 0x4eb   : > { %3776 = vst [vmem:[#allocation12 + $0x1b0] sm:$0xff] %v3715_v15  ;;  %v3718_v19 = vadd.f32 %v4552_v18, %v5460_v36  ;;  %v3709_v20 = vpop.f32.mrb[55].mxu1 }
 0x4ec   : > { %3774 = vst [vmem:[#allocation12 + $0x1a0] sm:$0xff] %v3707_v17  ;;  %v3710_v21 = vadd.f32 %v5460_v36, %v3709_v20 }
 0x4ed   : > { %3777 = vst [vmem:[#allocation12 + $0x1b8] sm:$0xff] %v3718_v19 }
 0x4ee   : > { %3775 = vst [vmem:[#allocation12 + $0x1a8] sm:$0xff] %v3710_v21 }
 0x4f0   : > { %v4555_v22 = vpop.f32.mrb[56].mxu1 }
 0x4f1   : > { %v3731_v23 = vadd.f32 %v4555_v22, %v5460_v36  ;;  %v3722_v24 = vpop.f32.mrb[57].mxu1 }
 0x4f2   : > { %v3723_v25 = vadd.f32 %v5460_v36, %v3722_v24  ;;  %v4556_v26 = vpop.f32.mrb[58].mxu1 }
 0x4f3   : > { %3780 = vst [vmem:[#allocation12 + $0x1d0] sm:$0xff] %v3731_v23  ;;  %v3734_v27 = vadd.f32 %v4556_v26, %v5460_v36  ;;  %v3725_v28 = vpop.f32.mrb[59].mxu1 }
 0x4f4   : > { %3778 = vst [vmem:[#allocation12 + $0x1c0] sm:$0xff] %v3723_v25  ;;  %v3726_v29 = vadd.f32 %v5460_v36, %v3725_v28 }
 0x4f5   : > { %3781 = vst [vmem:[#allocation12 + $0x1d8] sm:$0xff] %v3734_v27 }
 0x4f6   : > { %3779 = vst [vmem:[#allocation12 + $0x1c8] sm:$0xff] %v3726_v29 }
 0x4f8   : > { %v4559_v30 = vpop.f32.mrb[60].mxu1 }
 0x4f9   : > { %v3747_v31 = vadd.f32 %v4559_v30, %v5460_v36  ;;  %v3738_v32 = vpop.f32.mrb[61].mxu1 }
 0x4fa   : > { %v3739_v33 = vadd.f32 %v5460_v36, %v3738_v32  ;;  %v4560_v34 = vpop.f32.mrb[62].mxu1 }
 0x4fb   : > { %3784 = vst [vmem:[#allocation12 + $0x1f0] sm:$0xff] %v3747_v31  ;;  %v3750_v35 = vadd.f32 %v4560_v34, %v5460_v36  ;;  %v3741_v37 = vpop.f32.mrb[63].mxu1 }
 0x4fc   : > { %3782 = vst [vmem:[#allocation12 + $0x1e0] sm:$0xff] %v3739_v33  ;;  %v3742_v38 = vadd.f32 %v5460_v36, %v3741_v37 }
 0x4fd   : > { %3785 = vst [vmem:[#allocation12 + $0x1f8] sm:$0xff] %v3750_v35 }
 0x4fe   : > { %3783 = vst [vmem:[#allocation12 + $0x1e8] sm:$0xff] %v3742_v38 }
 0x4ff PF: > { %s5581_s16 = sadd.s32 4294967295, %s5072_s23   ;;  %s5083_s8 = smov [#allocation12]  }
 0x500   : > { %p5528_p12 = scmp.eq.s32.totalorder %s5581_s16, 1  ;;  %s3795_s25 = sshll.u32 %s5083_s8, 4  ;;  %s3796_s25 = int_to_ptr.vmem [resolvable:$true] %s3795_s25 }
 0x501   : > { %s5008_s27 = scalar_lea.vmem %s3796_s25, 8192  ;;  %p5015_p1 = scmp.lt.s32.totalorder %s3796_s25, %s3796_s25 }
 0x502   : > { %p5009_p13 = scmp.ne.s32.totalorder %s3796_s25, %s5008_s27  ;;  %p5016_p4 = scmp.lt.s32.totalorder %s5008_s27, %s5008_s27 }
 0x504   : > { %p5010_p6 = pnand %p5009_p13, %p5528_p12  ;;  %p5017_p7 = por %p5016_p4, %p5015_p1 }
 0x506   : > { %p5011_p0 = pneg %p5010_p6 }
 0x508   : > { %p5018_p9 = pnand %p5017_p7, %p5011_p0 }
 0x50a   : > { %5021 = shalt.err (!%p5018_p9)
}
 0x50b   : > { %s5022_s15 = scalar_lea.hbm %s5569_s6, 8192 }
 0x50c   : > { %p5023_p3 = scmp.ne.s32.totalorder %s5569_s6, %s5022_s15  ;;  %p5028_p2 = scmp.lt.u32.totalorder %s5022_s15, %s5569_s6 }
 0x50e   : > { %p5024_p8 = pnand %p5023_p3, %p5528_p12 }
 0x510   : > { %p5025_p5 = pneg %p5024_p8 }
 0x512   : > { %p5030_p10 = pnand %p5028_p2, %p5025_p5 }
 0x514   : > { %5033 = shalt.err (!%p5030_p10)
}
 0x515   : > { %s5084_s26 = smov 128   ;;  %s5085_s19 = smov 8  }
 0x516   : > { %4578 = dma.vmem_to_hbm [thread:$0]  (%p5528_p12), %s3796_s25, 8192, %s5569_s6, [#allocation6], %s5084_s26, %s5084_s26, %s5085_s19  }
 0x517   : > { %5059 = dma.done.wait (%p5528_p12), [#allocation6], 8192  }
 0x518   : > { %5061 = vsyncadd (%p5528_p12), [#allocation6], 4294959104 }
 0x519 PF: > { %s20_s23 = sadd.s32 1, %s5072_s23   ;;  %s5583_s21 = smov %s5068_s22 }
 0x51a   : > { %p17_p11 = scmp.ge.s32.totalorder %s20_s23, 4   ;;  %s5584_s22 = smov %s5586_s30 }
 0x51c   :  { %19 = sbr.rel (!%p17_p11) target bundleno = 5 (0x5), region = 108 }
 0x523   :  { %3811 = vsyncpa [#allocation5], 1 }
 0x524   :  { %3813 = vsyncpa [#allocation5 + $0x1], 1 }
 0x525   :  { %3814 = vsyncpa [#allocation8], 1 }
 0x526   :  { %3815 = vsyncpa [#allocation11], 1 }
 0x527   :  { %3816 = vsyncpa [#allocation6], 1 }
 0x528   :  { %3818 = vsyncpa [#allocation6 + $0x1], 1 }

</bundles_post_ra>
